<compile_context>
chip_gen: v7x
topology: tpu7x:2x2x1
jax: 0.10.0
libtpu: 0.0.40
codegen_flags: <defaults>
</compile_context>

<pallas_src>
import numpy as np
import jax
import jax.numpy as jnp
from jax import lax
from jax.experimental import pallas as pl
from jax.experimental.pallas import tpu as pltpu  # noqa: F401  (TPU backend)

EPS = 1e-5


# ----------------------------------------------------------------------------
# Host-side constant matrices: padding + stride + tap-shift folded into small
# lane-axis selection matrices.  They are block-diagonal over samples, so
# samples never mix and zero padding falls out of the matrix structure.
# ----------------------------------------------------------------------------
def shift_mats(n, l_in, l_out, k, stride, pad):
    """T[k]: (n*l_in, n*l_out); (x @ T[k])[:, n*l_out+t] = x[:, n*l_in + stride*t + k - pad]
    (or 0 when that index lands in the implicit zero padding)."""
    t = np.zeros((k, n * l_in, n * l_out), np.float32)
    for kk in range(k):
        for nn in range(n):
            for tt in range(l_out):
                li = stride * tt + kk - pad
                if 0 <= li < l_in:
                    t[kk, nn * l_in + li, nn * l_out + tt] = 1.0
    return jnp.asarray(t)


def pool_mat(n, l):
    """(n*l, n) averaging matrix: x(C, n*l) @ P -> per-sample mean over l => (C, n)."""
    p = np.zeros((n * l, n), np.float32)
    for nn in range(n):
        p[nn * l:(nn + 1) * l, nn] = 1.0 / l
    return jnp.asarray(p)


def build_consts(n, length, k=3):
    assert k == 3, "fused kernel is specialized to kernel_size=3 (stem padding=1 == 'same')"
    pad = k // 2
    l1 = length + 2 * 1 - k + 1          # stem conv uses padding=1 (as in the PyTorch model)
    l2 = (l1 + 2 * pad - k) // 2 + 1     # after block_1 stride-2 downsample
    l3 = (l2 + 2 * pad - k) // 2 + 1     # after block_2 stride-2 downsample
    return [
        shift_mats(n, l1, l1, k, 1, pad),   # tA: stride-1 convs at length l1 (stem + block_0)
        shift_mats(n, l1, l2, k, 2, pad),   # tB: block_1 strided conv_0
        shift_mats(n, l2, l2, k, 1, pad),   # tC: stride-1 convs at length l2
        shift_mats(n, l2, l3, k, 2, pad),   # tD: block_2 strided conv_0
        shift_mats(n, l3, l3, k, 1, pad),   # tE: stride-1 convs at length l3
        shift_mats(n, l1, l2, 1, 2, 0),     # tds1: block_1 1x1 stride-2 downsample conv
        shift_mats(n, l2, l3, 1, 2, 0),     # tds2: block_2 1x1 stride-2 downsample conv
        pool_mat(n, l3),                    # AdaptiveAvgPool1d(1)
    ]


# ----------------------------------------------------------------------------
# The fused whole-network kernel
# ----------------------------------------------------------------------------
def make_kernel(block_depth):
    """Inputs (in order): x2d, the 8 constant matrices, then the parameter
    arrays in forward order.  Output: (num_classes, N)."""

    def kernel(*refs):
        out_ref = refs[-1]
        it = iter(refs[:-1])
        x_ref = next(it)
        t_a, t_b, t_c, t_d, t_e = next(it), next(it), next(it), next(it), next(it)
        t_ds1, t_ds2, pool = next(it), next(it), next(it)

        def conv(x, w_ref, t_ref, ident_tap=-1):
            # x: (C_in, M_in); w_ref: (K, C_out, C_in); t_ref: (K, M_in, M_out)
            acc = None
            for k in range(w_ref.shape[0]):
                u = x if k == ident_tap else jnp.dot(
                    x, t_ref[k], preferred_element_type=jnp.float32)
                term = jnp.dot(w_ref[k], u, preferred_element_type=jnp.float32)
                acc = term if acc is None else acc + term
            return acc

        def bn_relu(x, g_ref, b_ref):
            # training-mode BatchNorm1d: batch stats over the (N*L) lane axis, biased var
            m = jnp.mean(x, axis=1, keepdims=True)
            v = jnp.mean(jnp.square(x - m), axis=1, keepdims=True)
            y = (x - m) * lax.rsqrt(v + EPS) * g_ref[...] + b_ref[...]
            return jnp.maximum(y, 0.0)

        # ---- stem conv_0 (stride 1, padding=1) ----
        x = conv(x_ref[...], next(it), t_a, ident_tap=1)

        # (conv_0 T, conv_0 identity tap, stride-1 T at output length, its identity tap, 1x1-ds T)
        stages = [(t_a, 1, t_a, 1, None),
                  (t_b, -1, t_c, 1, t_ds1),
                  (t_d, -1, t_e, 1, t_ds2)]

        for t0, id0, t1, id1, tds in stages:
            # ---- DownsampleUnit ----
            g_na, b_na = next(it), next(it)
            w_c0 = next(it)
            g0, b0 = next(it), next(it)
            w_c1 = next(it)
            w_dn = next(it)
            xa = bn_relu(x, g_na, b_na)
            r = conv(xa, w_c0, t0, id0)
            r = bn_relu(r, g0, b0)            # dropout(p=0.0) == identity
            r = conv(r, w_c1, t1, id1)
            if tds is None:                   # 1x1 stride-1 downsample conv
                d = jnp.dot(w_dn[0], xa, preferred_element_type=jnp.float32)
            else:                             # 1x1 stride-2 downsample conv
                d = jnp.dot(w_dn[0],
                            jnp.dot(xa, tds[0], preferred_element_type=jnp.float32),
                            preferred_element_type=jnp.float32)
            x = d + r                         # fused residual add

            # ---- BasicUnits ----
            for _ in range(block_depth):
                ga, ba = next(it), next(it)
                wa = next(it)
                gb, bb = next(it), next(it)
                wb = next(it)
                r = bn_relu(x, ga, ba)
                r = conv(r, wa, t1, id1)
                r = bn_relu(r, gb, bb)        # dropout(p=0.0) == identity
                r = conv(r, wb, t1, id1)
                x = x + r                     # fused residual add

        # ---- tail: norm_0 + ReLU + AdaptiveAvgPool1d(1) + Flatten + Linear ----
        g, b = next(it), next(it)
        x = bn_relu(x, g, b)
        w_fc, b_fc = next(it), next(it)
        pooled = jnp.dot(x, pool[...], preferred_element_type=jnp.float32)     # (C, N)
        out_ref[...] = jnp.dot(w_fc[...], pooled,
                               preferred_element_type=jnp.float32) + b_fc[...]  # (F, N)

    return kernel


def wide_resnet_forward(x, flat_params, consts, cfg):
    """x: (N, C_in, L) -> logits (N, num_classes).  One fused pallas_call."""
    n, c_in, length = x.shape
    x2d = jnp.transpose(x, (1, 0, 2)).reshape(c_in, n * length)   # channels -> sublanes
    out = pl.pallas_call(
        make_kernel(cfg['block_depth']),
        out_shape=jax.ShapeDtypeStruct((cfg['num_classes'], n), jnp.float32),
    )(x2d, *consts, *flat_params)
    return out.T


# ----------------------------------------------------------------------------
# Parameter init (deterministic, mirrors WideResNet._initialize), kernel layout
# ----------------------------------------------------------------------------
def init_params(key, c_in, num_classes=256, kernel_size=3, depth=16, width_factor=1):
    assert kernel_size == 3
    filters = [16, 16 * width_factor, 32 * width_factor, 64 * width_factor]
    block_depth = (depth - 4) // 6
    n_convs = 1 + 3 * (3 + 2 * block_depth)
    keys = iter(jax.random.split(key, n_convs + 4))

    def conv_w(c_out, c_inn, k):
        fan_in = c_inn * k
        w = jax.random.normal(next(keys), (c_out, c_inn, k), jnp.float32) * np.sqrt(2.0 / fan_in)
        return jnp.transpose(w, (2, 0, 1))            # kernel layout: (K, C_out, C_in)

    def bn(c):
        return [jnp.ones((c, 1), jnp.float32), jnp.zeros((c, 1), jnp.float32)]

    flat = [conv_w(filters[0], c_in, kernel_size)]    # conv_0
    ins = [filters[0], filters[1], filters[2]]
    outs = [filters[1], filters[2], filters[3]]
    for bi in range(3):
        ci, co = ins[bi], outs[bi]
        flat += bn(ci)                                # norm_act
        flat += [conv_w(co, ci, kernel_size)]         # conv_0
        flat += bn(co)                                # bn_0
        flat += [conv_w(co, co, kernel_size)]         # conv_1
        flat += [conv_w(co, ci, 1)]                   # 1x1 downsample conv
        for _ in range(block_depth):                  # BasicUnits
            flat += bn(co) + [conv_w(co, co, kernel_size)]
            flat += bn(co) + [conv_w(co, co, kernel_size)]
    flat += bn(filters[3])                            # norm_0
    # nn.Linear weight/bias zero-initialized by WideResNet._initialize
    flat += [jnp.zeros((num_classes, filters[3]), jnp.float32),
             jnp.zeros((num_classes, 1), jnp.float32)]
    cfg = dict(block_depth=block_depth, filters=filters,
               num_classes=num_classes, kernel_size=kernel_size)
    return flat, cfg


# ----------------------------------------------------------------------------
# Pure-JAX reference (mirrors the PyTorch ops) for a numeric sanity check
# ----------------------------------------------------------------------------
def _conv1d_ref(x, w_koc, stride, pad):
    w = jnp.transpose(w_koc, (1, 2, 0))               # back to (C_out, C_in, K)
    return lax.conv_general_dilated(
        x, w, window_strides=(stride,), padding=[(pad, pad)],
        dimension_numbers=('NCH', 'OIH', 'NCH'), precision=lax.Precision.HIGHEST)


def _bn_relu_ref(x, g, b):
    m = jnp.mean(x, axis=(0, 2), keepdims=True)
    v = jnp.mean(jnp.square(x - m), axis=(0, 2), keepdims=True)
    y = (x - m) * lax.rsqrt(v + EPS) * g.reshape(1, -1, 1) + b.reshape(1, -1, 1)
    return jnp.maximum(y, 0.0)


def forward_ref(x, flat, cfg):
    it = iter(flat)
    k = cfg['kernel_size']
    pad = k // 2
    x = _conv1d_ref(x, next(it), 1, 1)                # stem uses padding=1
    for stride in (1, 2, 2):
        g_na, b_na = next(it), next(it)
        w_c0 = next(it)
        g0, b0 = next(it), next(it)
        w_c1 = next(it)
        w_dn = next(it)
        xa = _bn_relu_ref(x, g_na, b_na)
        r = _conv1d_ref(xa, w_c0, stride, pad)
        r = _bn_relu_ref(r, g0, b0)
        r = _conv1d_ref(r, w_c1, 1, pad)
        x = _conv1d_ref(xa, w_dn, stride, 0) + r
        for _ in range(cfg['block_depth']):
            ga, ba, wa = next(it), next(it), next(it)
            gb, bb, wb = next(it), next(it), next(it)
            r = _bn_relu_ref(x, ga, ba)
            r = _conv1d_ref(r, wa, 1, pad)
            r = _bn_relu_ref(r, gb, bb)
            r = _conv1d_ref(r, wb, 1, pad)
            x = x + r
    g, b = next(it), next(it)
    x = _bn_relu_ref(x, g, b)
    w_fc, b_fc = next(it), next(it)
    pooled = jnp.mean(x, axis=2)                      # (N, C)
    return jnp.dot(pooled, w_fc.T, precision=lax.Precision.HIGHEST) + b_fc.reshape(1, -1)


if __name__ == "__main__":
    key = jax.random.PRNGKey(0)
    kx, kp, kf, kb = jax.random.split(key, 4)
    N, C_in, L = 2, 4, 16
    x = jax.random.normal(kx, (N, C_in, L), jnp.float32)

    flat, cfg = init_params(kp, C_in, kernel_size=3, depth=16, width_factor=1)
    consts = build_consts(N, L, k=cfg['kernel_size'])

    fwd = jax.jit(lambda xx, fp: wide_resnet_forward(xx, fp, consts, cfg))

    out = fwd(x, flat)
    jax.block_until_ready(out)
    assert out.shape == (N, cfg['num_classes']), out.shape

    # Sanity check vs. pure-JAX reference (use random fc so the check is non-trivial;
    # the faithful init zero-fills the Linear, which would make the outputs all-zero).
    flat_chk = list(flat)
    flat_chk[-2] = jax.random.normal(kf, flat[-2].shape, jnp.float32) * 0.1
    flat_chk[-1] = jax.random.normal(kb, flat[-1].shape, jnp.float32) * 0.1
    got = fwd(x, flat_chk)
    want = forward_ref(x, flat_chk, cfg)
    np.testing.assert_allclose(np.asarray(got), np.asarray(want), rtol=2e-2, atol=2e-2)

    print("KERNEL_OK")
</pallas_src>

<mosaic_0001>
module attributes {stable_mosaic.version = 11 : i64} {
  func.func @kernel(%arg0: memref<4x32xf32, #tpu.memory_space<vmem>>, %arg1: memref<3x32x32xf32, #tpu.memory_space<vmem>>, %arg2: memref<3x32x16xf32, #tpu.memory_space<vmem>>, %arg3: memref<3x16x16xf32, #tpu.memory_space<vmem>>, %arg4: memref<3x16x8xf32, #tpu.memory_space<vmem>>, %arg5: memref<3x8x8xf32, #tpu.memory_space<vmem>>, %arg6: memref<1x32x16xf32, #tpu.memory_space<vmem>>, %arg7: memref<1x16x8xf32, #tpu.memory_space<vmem>>, %arg8: memref<8x2xf32, #tpu.memory_space<vmem>>, %arg9: memref<3x16x4xf32, #tpu.memory_space<vmem>>, %arg10: memref<16x1xf32, #tpu.memory_space<vmem>>, %arg11: memref<16x1xf32, #tpu.memory_space<vmem>>, %arg12: memref<3x16x16xf32, #tpu.memory_space<vmem>>, %arg13: memref<16x1xf32, #tpu.memory_space<vmem>>, %arg14: memref<16x1xf32, #tpu.memory_space<vmem>>, %arg15: memref<3x16x16xf32, #tpu.memory_space<vmem>>, %arg16: memref<1x16x16xf32, #tpu.memory_space<vmem>>, %arg17: memref<16x1xf32, #tpu.memory_space<vmem>>, %arg18: memref<16x1xf32, #tpu.memory_space<vmem>>, %arg19: memref<3x16x16xf32, #tpu.memory_space<vmem>>, %arg20: memref<16x1xf32, #tpu.memory_space<vmem>>, %arg21: memref<16x1xf32, #tpu.memory_space<vmem>>, %arg22: memref<3x16x16xf32, #tpu.memory_space<vmem>>, %arg23: memref<16x1xf32, #tpu.memory_space<vmem>>, %arg24: memref<16x1xf32, #tpu.memory_space<vmem>>, %arg25: memref<3x16x16xf32, #tpu.memory_space<vmem>>, %arg26: memref<16x1xf32, #tpu.memory_space<vmem>>, %arg27: memref<16x1xf32, #tpu.memory_space<vmem>>, %arg28: memref<3x16x16xf32, #tpu.memory_space<vmem>>, %arg29: memref<16x1xf32, #tpu.memory_space<vmem>>, %arg30: memref<16x1xf32, #tpu.memory_space<vmem>>, %arg31: memref<3x32x16xf32, #tpu.memory_space<vmem>>, %arg32: memref<32x1xf32, #tpu.memory_space<vmem>>, %arg33: memref<32x1xf32, #tpu.memory_space<vmem>>, %arg34: memref<3x32x32xf32, #tpu.memory_space<vmem>>, %arg35: memref<1x32x16xf32, #tpu.memory_space<vmem>>, %arg36: memref<32x1xf32, #tpu.memory_space<vmem>>, %arg37: memref<32x1xf32, #tpu.memory_space<vmem>>, %arg38: memref<3x32x32xf32, #tpu.memory_space<vmem>>, %arg39: memref<32x1xf32, #tpu.memory_space<vmem>>, %arg40: memref<32x1xf32, #tpu.memory_space<vmem>>, %arg41: memref<3x32x32xf32, #tpu.memory_space<vmem>>, %arg42: memref<32x1xf32, #tpu.memory_space<vmem>>, %arg43: memref<32x1xf32, #tpu.memory_space<vmem>>, %arg44: memref<3x32x32xf32, #tpu.memory_space<vmem>>, %arg45: memref<32x1xf32, #tpu.memory_space<vmem>>, %arg46: memref<32x1xf32, #tpu.memory_space<vmem>>, %arg47: memref<3x32x32xf32, #tpu.memory_space<vmem>>, %arg48: memref<32x1xf32, #tpu.memory_space<vmem>>, %arg49: memref<32x1xf32, #tpu.memory_space<vmem>>, %arg50: memref<3x64x32xf32, #tpu.memory_space<vmem>>, %arg51: memref<64x1xf32, #tpu.memory_space<vmem>>, %arg52: memref<64x1xf32, #tpu.memory_space<vmem>>, %arg53: memref<3x64x64xf32, #tpu.memory_space<vmem>>, %arg54: memref<1x64x32xf32, #tpu.memory_space<vmem>>, %arg55: memref<64x1xf32, #tpu.memory_space<vmem>>, %arg56: memref<64x1xf32, #tpu.memory_space<vmem>>, %arg57: memref<3x64x64xf32, #tpu.memory_space<vmem>>, %arg58: memref<64x1xf32, #tpu.memory_space<vmem>>, %arg59: memref<64x1xf32, #tpu.memory_space<vmem>>, %arg60: memref<3x64x64xf32, #tpu.memory_space<vmem>>, %arg61: memref<64x1xf32, #tpu.memory_space<vmem>>, %arg62: memref<64x1xf32, #tpu.memory_space<vmem>>, %arg63: memref<3x64x64xf32, #tpu.memory_space<vmem>>, %arg64: memref<64x1xf32, #tpu.memory_space<vmem>>, %arg65: memref<64x1xf32, #tpu.memory_space<vmem>>, %arg66: memref<3x64x64xf32, #tpu.memory_space<vmem>>, %arg67: memref<64x1xf32, #tpu.memory_space<vmem>>, %arg68: memref<64x1xf32, #tpu.memory_space<vmem>>, %arg69: memref<256x64xf32, #tpu.memory_space<vmem>>, %arg70: memref<256x1xf32, #tpu.memory_space<vmem>>, %arg71: memref<256x2xf32, #tpu.memory_space<vmem>>) attributes {dimension_semantics = [], scalar_prefetch = 0 : i64, scratch_operands = 0 : i64, tpu.core_type = #tpu.core_type<tc>} {
    %c0 = arith.constant 0 : index
    %c0_0 = arith.constant 0 : index
    %0 = vector.load %arg0[%c0, %c0_0] : memref<4x32xf32, #tpu.memory_space<vmem>>, vector<4x32xf32>
    %c0_1 = arith.constant 0 : index
    %c0_2 = arith.constant 0 : index
    %c0_3 = arith.constant 0 : index
    %1 = vector.load %arg1[%c0_1, %c0_2, %c0_3] : memref<3x32x32xf32, #tpu.memory_space<vmem>>, vector<1x32x32xf32>
    %2 = vector.shape_cast %1 : vector<1x32x32xf32> to vector<32x32xf32>
    %cst = arith.constant dense<0.000000e+00> : vector<4x32xf32>
    %3 = tpu.matmul %0, %2, %cst {dimension_numbers = #tpu.dot_dimension_numbers<[1], [0], [0], [1], [0, 0, 1, 1], [], []>} : vector<4x32xf32>, vector<32x32xf32>, vector<4x32xf32> -> vector<4x32xf32>
    %c0_4 = arith.constant 0 : index
    %c0_5 = arith.constant 0 : index
    %c0_6 = arith.constant 0 : index
    %4 = vector.load %arg9[%c0_4, %c0_5, %c0_6] : memref<3x16x4xf32, #tpu.memory_space<vmem>>, vector<1x16x4xf32>
    %5 = vector.shape_cast %4 : vector<1x16x4xf32> to vector<16x4xf32>
    %cst_7 = arith.constant dense<0.000000e+00> : vector<16x32xf32>
    %6 = tpu.matmul %5, %3, %cst_7 {dimension_numbers = #tpu.dot_dimension_numbers<[1], [0], [0], [1], [0, 0, 1, 1], [], []>} : vector<16x4xf32>, vector<4x32xf32>, vector<16x32xf32> -> vector<16x32xf32>
    %c1 = arith.constant 1 : index
    %c0_8 = arith.constant 0 : index
    %c0_9 = arith.constant 0 : index
    %7 = vector.load %arg9[%c1, %c0_8, %c0_9] : memref<3x16x4xf32, #tpu.memory_space<vmem>>, vector<1x16x4xf32>
    %8 = vector.shape_cast %7 : vector<1x16x4xf32> to vector<16x4xf32>
    %cst_10 = arith.constant dense<0.000000e+00> : vector<16x32xf32>
    %9 = tpu.matmul %8, %0, %cst_10 {dimension_numbers = #tpu.dot_dimension_numbers<[1], [0], [0], [1], [0, 0, 1, 1], [], []>} : vector<16x4xf32>, vector<4x32xf32>, vector<16x32xf32> -> vector<16x32xf32>
    %10 = arith.addf %6, %9 : vector<16x32xf32>
    %c2 = arith.constant 2 : index
    %c0_11 = arith.constant 0 : index
    %c0_12 = arith.constant 0 : index
    %11 = vector.load %arg1[%c2, %c0_11, %c0_12] : memref<3x32x32xf32, #tpu.memory_space<vmem>>, vector<1x32x32xf32>
    %12 = vector.shape_cast %11 : vector<1x32x32xf32> to vector<32x32xf32>
    %cst_13 = arith.constant dense<0.000000e+00> : vector<4x32xf32>
    %13 = tpu.matmul %0, %12, %cst_13 {dimension_numbers = #tpu.dot_dimension_numbers<[1], [0], [0], [1], [0, 0, 1, 1], [], []>} : vector<4x32xf32>, vector<32x32xf32>, vector<4x32xf32> -> vector<4x32xf32>
    %c2_14 = arith.constant 2 : index
    %c0_15 = arith.constant 0 : index
    %c0_16 = arith.constant 0 : index
    %14 = vector.load %arg9[%c2_14, %c0_15, %c0_16] : memref<3x16x4xf32, #tpu.memory_space<vmem>>, vector<1x16x4xf32>
    %15 = vector.shape_cast %14 : vector<1x16x4xf32> to vector<16x4xf32>
    %cst_17 = arith.constant dense<0.000000e+00> : vector<16x32xf32>
    %16 = tpu.matmul %15, %13, %cst_17 {dimension_numbers = #tpu.dot_dimension_numbers<[1], [0], [0], [1], [0, 0, 1, 1], [], []>} : vector<16x4xf32>, vector<4x32xf32>, vector<16x32xf32> -> vector<16x32xf32>
    %17 = arith.addf %10, %16 : vector<16x32xf32>
    %cst_18 = arith.constant dense<0.000000e+00> : vector<16xf32>
    %18 = vector.multi_reduction <add>, %17, %cst_18 [1] : vector<16x32xf32> to vector<16xf32>
    %19 = vector.shape_cast %18 : vector<16xf32> to vector<16x1xf32>
    %cst_19 = arith.constant 3.200000e+01 : f32
    %20 = vector.broadcast %cst_19 : f32 to vector<16x1xf32>
    %21 = arith.divf %19, %20 : vector<16x1xf32>
    %22 = vector.broadcast %21 : vector<16x1xf32> to vector<16x32xf32>
    %23 = arith.subf %17, %22 : vector<16x32xf32>
    %24 = arith.mulf %23, %23 : vector<16x32xf32>
    %cst_20 = arith.constant dense<0.000000e+00> : vector<16xf32>
    %25 = vector.multi_reduction <add>, %24, %cst_20 [1] : vector<16x32xf32> to vector<16xf32>
    %26 = vector.shape_cast %25 : vector<16xf32> to vector<16x1xf32>
    %cst_21 = arith.constant 3.200000e+01 : f32
    %27 = vector.broadcast %cst_21 : f32 to vector<16x1xf32>
    %28 = arith.divf %26, %27 : vector<16x1xf32>
    %29 = vector.broadcast %21 : vector<16x1xf32> to vector<16x32xf32>
    %30 = arith.subf %17, %29 : vector<16x32xf32>
    %cst_22 = arith.constant 9.99999974E-6 : f32
    %31 = vector.broadcast %cst_22 : f32 to vector<16x1xf32>
    %32 = arith.addf %28, %31 : vector<16x1xf32>
    %33 = math.rsqrt %32 : vector<16x1xf32>
    %34 = vector.broadcast %33 : vector<16x1xf32> to vector<16x32xf32>
    %35 = arith.mulf %30, %34 : vector<16x32xf32>
    %c0_23 = arith.constant 0 : index
    %c0_24 = arith.constant 0 : index
    %36 = vector.load %arg10[%c0_23, %c0_24] : memref<16x1xf32, #tpu.memory_space<vmem>>, vector<16x1xf32>
    %37 = vector.broadcast %36 : vector<16x1xf32> to vector<16x32xf32>
    %38 = arith.mulf %35, %37 : vector<16x32xf32>
    %c0_25 = arith.constant 0 : index
    %c0_26 = arith.constant 0 : index
    %39 = vector.load %arg11[%c0_25, %c0_26] : memref<16x1xf32, #tpu.memory_space<vmem>>, vector<16x1xf32>
    %40 = vector.broadcast %39 : vector<16x1xf32> to vector<16x32xf32>
    %41 = arith.addf %38, %40 : vector<16x32xf32>
    %cst_27 = arith.constant 0.000000e+00 : f32
    %42 = vector.broadcast %cst_27 : f32 to vector<16x32xf32>
    %43 = arith.maximumf %41, %42 : vector<16x32xf32>
    %c0_28 = arith.constant 0 : index
    %c0_29 = arith.constant 0 : index
    %c0_30 = arith.constant 0 : index
    %44 = vector.load %arg1[%c0_28, %c0_29, %c0_30] : memref<3x32x32xf32, #tpu.memory_space<vmem>>, vector<1x32x32xf32>
    %45 = vector.shape_cast %44 : vector<1x32x32xf32> to vector<32x32xf32>
    %cst_31 = arith.constant dense<0.000000e+00> : vector<16x32xf32>
    %46 = tpu.matmul %43, %45, %cst_31 {dimension_numbers = #tpu.dot_dimension_numbers<[1], [0], [0], [1], [0, 0, 1, 1], [], []>} : vector<16x32xf32>, vector<32x32xf32>, vector<16x32xf32> -> vector<16x32xf32>
    %c0_32 = arith.constant 0 : index
    %c0_33 = arith.constant 0 : index
    %c0_34 = arith.constant 0 : index
    %47 = vector.load %arg12[%c0_32, %c0_33, %c0_34] : memref<3x16x16xf32, #tpu.memory_space<vmem>>, vector<1x16x16xf32>
    %48 = vector.shape_cast %47 : vector<1x16x16xf32> to vector<16x16xf32>
    %cst_35 = arith.constant dense<0.000000e+00> : vector<16x32xf32>
    %49 = tpu.matmul %48, %46, %cst_35 {dimension_numbers = #tpu.dot_dimension_numbers<[1], [0], [0], [1], [0, 0, 1, 1], [], []>} : vector<16x16xf32>, vector<16x32xf32>, vector<16x32xf32> -> vector<16x32xf32>
    %c1_36 = arith.constant 1 : index
    %c0_37 = arith.constant 0 : index
    %c0_38 = arith.constant 0 : index
    %50 = vector.load %arg12[%c1_36, %c0_37, %c0_38] : memref<3x16x16xf32, #tpu.memory_space<vmem>>, vector<1x16x16xf32>
    %51 = vector.shape_cast %50 : vector<1x16x16xf32> to vector<16x16xf32>
    %cst_39 = arith.constant dense<0.000000e+00> : vector<16x32xf32>
    %52 = tpu.matmul %51, %43, %cst_39 {dimension_numbers = #tpu.dot_dimension_numbers<[1], [0], [0], [1], [0, 0, 1, 1], [], []>} : vector<16x16xf32>, vector<16x32xf32>, vector<16x32xf32> -> vector<16x32xf32>
    %53 = arith.addf %49, %52 : vector<16x32xf32>
    %c2_40 = arith.constant 2 : index
    %c0_41 = arith.constant 0 : index
    %c0_42 = arith.constant 0 : index
    %54 = vector.load %arg1[%c2_40, %c0_41, %c0_42] : memref<3x32x32xf32, #tpu.memory_space<vmem>>, vector<1x32x32xf32>
    %55 = vector.shape_cast %54 : vector<1x32x32xf32> to vector<32x32xf32>
    %cst_43 = arith.constant dense<0.000000e+00> : vector<16x32xf32>
    %56 = tpu.matmul %43, %55, %cst_43 {dimension_numbers = #tpu.dot_dimension_numbers<[1], [0], [0], [1], [0, 0, 1, 1], [], []>} : vector<16x32xf32>, vector<32x32xf32>, vector<16x32xf32> -> vector<16x32xf32>
    %c2_44 = arith.constant 2 : index
    %c0_45 = arith.constant 0 : index
    %c0_46 = arith.constant 0 : index
    %57 = vector.load %arg12[%c2_44, %c0_45, %c0_46] : memref<3x16x16xf32, #tpu.memory_space<vmem>>, vector<1x16x16xf32>
    %58 = vector.shape_cast %57 : vector<1x16x16xf32> to vector<16x16xf32>
    %cst_47 = arith.constant dense<0.000000e+00> : vector<16x32xf32>
    %59 = tpu.matmul %58, %56, %cst_47 {dimension_numbers = #tpu.dot_dimension_numbers<[1], [0], [0], [1], [0, 0, 1, 1], [], []>} : vector<16x16xf32>, vector<16x32xf32>, vector<16x32xf32> -> vector<16x32xf32>
    %60 = arith.addf %53, %59 : vector<16x32xf32>
    %cst_48 = arith.constant dense<0.000000e+00> : vector<16xf32>
    %61 = vector.multi_reduction <add>, %60, %cst_48 [1] : vector<16x32xf32> to vector<16xf32>
    %62 = vector.shape_cast %61 : vector<16xf32> to vector<16x1xf32>
    %cst_49 = arith.constant 3.200000e+01 : f32
    %63 = vector.broadcast %cst_49 : f32 to vector<16x1xf32>
    %64 = arith.divf %62, %63 : vector<16x1xf32>
    %65 = vector.broadcast %64 : vector<16x1xf32> to vector<16x32xf32>
    %66 = arith.subf %60, %65 : vector<16x32xf32>
    %67 = arith.mulf %66, %66 : vector<16x32xf32>
    %cst_50 = arith.constant dense<0.000000e+00> : vector<16xf32>
    %68 = vector.multi_reduction <add>, %67, %cst_50 [1] : vector<16x32xf32> to vector<16xf32>
    %69 = vector.shape_cast %68 : vector<16xf32> to vector<16x1xf32>
    %cst_51 = arith.constant 3.200000e+01 : f32
    %70 = vector.broadcast %cst_51 : f32 to vector<16x1xf32>
    %71 = arith.divf %69, %70 : vector<16x1xf32>
    %72 = vector.broadcast %64 : vector<16x1xf32> to vector<16x32xf32>
    %73 = arith.subf %60, %72 : vector<16x32xf32>
    %cst_52 = arith.constant 9.99999974E-6 : f32
    %74 = vector.broadcast %cst_52 : f32 to vector<16x1xf32>
    %75 = arith.addf %71, %74 : vector<16x1xf32>
    %76 = math.rsqrt %75 : vector<16x1xf32>
    %77 = vector.broadcast %76 : vector<16x1xf32> to vector<16x32xf32>
    %78 = arith.mulf %73, %77 : vector<16x32xf32>
    %c0_53 = arith.constant 0 : index
    %c0_54 = arith.constant 0 : index
    %79 = vector.load %arg13[%c0_53, %c0_54] : memref<16x1xf32, #tpu.memory_space<vmem>>, vector<16x1xf32>
    %80 = vector.broadcast %79 : vector<16x1xf32> to vector<16x32xf32>
    %81 = arith.mulf %78, %80 : vector<16x32xf32>
    %c0_55 = arith.constant 0 : index
    %c0_56 = arith.constant 0 : index
    %82 = vector.load %arg14[%c0_55, %c0_56] : memref<16x1xf32, #tpu.memory_space<vmem>>, vector<16x1xf32>
    %83 = vector.broadcast %82 : vector<16x1xf32> to vector<16x32xf32>
    %84 = arith.addf %81, %83 : vector<16x32xf32>
    %cst_57 = arith.constant 0.000000e+00 : f32
    %85 = vector.broadcast %cst_57 : f32 to vector<16x32xf32>
    %86 = arith.maximumf %84, %85 : vector<16x32xf32>
    %c0_58 = arith.constant 0 : index
    %c0_59 = arith.constant 0 : index
    %c0_60 = arith.constant 0 : index
    %87 = vector.load %arg1[%c0_58, %c0_59, %c0_60] : memref<3x32x32xf32, #tpu.memory_space<vmem>>, vector<1x32x32xf32>
    %88 = vector.shape_cast %87 : vector<1x32x32xf32> to vector<32x32xf32>
    %cst_61 = arith.constant dense<0.000000e+00> : vector<16x32xf32>
    %89 = tpu.matmul %86, %88, %cst_61 {dimension_numbers = #tpu.dot_dimension_numbers<[1], [0], [0], [1], [0, 0, 1, 1], [], []>} : vector<16x32xf32>, vector<32x32xf32>, vector<16x32xf32> -> vector<16x32xf32>
    %c0_62 = arith.constant 0 : index
    %c0_63 = arith.constant 0 : index
    %c0_64 = arith.constant 0 : index
    %90 = vector.load %arg15[%c0_62, %c0_63, %c0_64] : memref<3x16x16xf32, #tpu.memory_space<vmem>>, vector<1x16x16xf32>
    %91 = vector.shape_cast %90 : vector<1x16x16xf32> to vector<16x16xf32>
    %cst_65 = arith.constant dense<0.000000e+00> : vector<16x32xf32>
    %92 = tpu.matmul %91, %89, %cst_65 {dimension_numbers = #tpu.dot_dimension_numbers<[1], [0], [0], [1], [0, 0, 1, 1], [], []>} : vector<16x16xf32>, vector<16x32xf32>, vector<16x32xf32> -> vector<16x32xf32>
    %c1_66 = arith.constant 1 : index
    %c0_67 = arith.constant 0 : index
    %c0_68 = arith.constant 0 : index
    %93 = vector.load %arg15[%c1_66, %c0_67, %c0_68] : memref<3x16x16xf32, #tpu.memory_space<vmem>>, vector<1x16x16xf32>
    %94 = vector.shape_cast %93 : vector<1x16x16xf32> to vector<16x16xf32>
    %cst_69 = arith.constant dense<0.000000e+00> : vector<16x32xf32>
    %95 = tpu.matmul %94, %86, %cst_69 {dimension_numbers = #tpu.dot_dimension_numbers<[1], [0], [0], [1], [0, 0, 1, 1], [], []>} : vector<16x16xf32>, vector<16x32xf32>, vector<16x32xf32> -> vector<16x32xf32>
    %96 = arith.addf %92, %95 : vector<16x32xf32>
    %c2_70 = arith.constant 2 : index
    %c0_71 = arith.constant 0 : index
    %c0_72 = arith.constant 0 : index
    %97 = vector.load %arg1[%c2_70, %c0_71, %c0_72] : memref<3x32x32xf32, #tpu.memory_space<vmem>>, vector<1x32x32xf32>
    %98 = vector.shape_cast %97 : vector<1x32x32xf32> to vector<32x32xf32>
    %cst_73 = arith.constant dense<0.000000e+00> : vector<16x32xf32>
    %99 = tpu.matmul %86, %98, %cst_73 {dimension_numbers = #tpu.dot_dimension_numbers<[1], [0], [0], [1], [0, 0, 1, 1], [], []>} : vector<16x32xf32>, vector<32x32xf32>, vector<16x32xf32> -> vector<16x32xf32>
    %c2_74 = arith.constant 2 : index
    %c0_75 = arith.constant 0 : index
    %c0_76 = arith.constant 0 : index
    %100 = vector.load %arg15[%c2_74, %c0_75, %c0_76] : memref<3x16x16xf32, #tpu.memory_space<vmem>>, vector<1x16x16xf32>
    %101 = vector.shape_cast %100 : vector<1x16x16xf32> to vector<16x16xf32>
    %cst_77 = arith.constant dense<0.000000e+00> : vector<16x32xf32>
    %102 = tpu.matmul %101, %99, %cst_77 {dimension_numbers = #tpu.dot_dimension_numbers<[1], [0], [0], [1], [0, 0, 1, 1], [], []>} : vector<16x16xf32>, vector<16x32xf32>, vector<16x32xf32> -> vector<16x32xf32>
    %103 = arith.addf %96, %102 : vector<16x32xf32>
    %c0_78 = arith.constant 0 : index
    %c0_79 = arith.constant 0 : index
    %c0_80 = arith.constant 0 : index
    %104 = vector.load %arg16[%c0_78, %c0_79, %c0_80] : memref<1x16x16xf32, #tpu.memory_space<vmem>>, vector<1x16x16xf32>
    %105 = vector.shape_cast %104 : vector<1x16x16xf32> to vector<16x16xf32>
    %cst_81 = arith.constant dense<0.000000e+00> : vector<16x32xf32>
    %106 = tpu.matmul %105, %43, %cst_81 {dimension_numbers = #tpu.dot_dimension_numbers<[1], [0], [0], [1], [0, 0, 1, 1], [], []>} : vector<16x16xf32>, vector<16x32xf32>, vector<16x32xf32> -> vector<16x32xf32>
    %107 = arith.addf %106, %103 : vector<16x32xf32>
    %cst_82 = arith.constant dense<0.000000e+00> : vector<16xf32>
    %108 = vector.multi_reduction <add>, %107, %cst_82 [1] : vector<16x32xf32> to vector<16xf32>
    %109 = vector.shape_cast %108 : vector<16xf32> to vector<16x1xf32>
    %cst_83 = arith.constant 3.200000e+01 : f32
    %110 = vector.broadcast %cst_83 : f32 to vector<16x1xf32>
    %111 = arith.divf %109, %110 : vector<16x1xf32>
    %112 = vector.broadcast %111 : vector<16x1xf32> to vector<16x32xf32>
    %113 = arith.subf %107, %112 : vector<16x32xf32>
    %114 = arith.mulf %113, %113 : vector<16x32xf32>
    %cst_84 = arith.constant dense<0.000000e+00> : vector<16xf32>
    %115 = vector.multi_reduction <add>, %114, %cst_84 [1] : vector<16x32xf32> to vector<16xf32>
    %116 = vector.shape_cast %115 : vector<16xf32> to vector<16x1xf32>
    %cst_85 = arith.constant 3.200000e+01 : f32
    %117 = vector.broadcast %cst_85 : f32 to vector<16x1xf32>
    %118 = arith.divf %116, %117 : vector<16x1xf32>
    %119 = vector.broadcast %111 : vector<16x1xf32> to vector<16x32xf32>
    %120 = arith.subf %107, %119 : vector<16x32xf32>
    %cst_86 = arith.constant 9.99999974E-6 : f32
    %121 = vector.broadcast %cst_86 : f32 to vector<16x1xf32>
    %122 = arith.addf %118, %121 : vector<16x1xf32>
    %123 = math.rsqrt %122 : vector<16x1xf32>
    %124 = vector.broadcast %123 : vector<16x1xf32> to vector<16x32xf32>
    %125 = arith.mulf %120, %124 : vector<16x32xf32>
    %c0_87 = arith.constant 0 : index
    %c0_88 = arith.constant 0 : index
    %126 = vector.load %arg17[%c0_87, %c0_88] : memref<16x1xf32, #tpu.memory_space<vmem>>, vector<16x1xf32>
    %127 = vector.broadcast %126 : vector<16x1xf32> to vector<16x32xf32>
    %128 = arith.mulf %125, %127 : vector<16x32xf32>
    %c0_89 = arith.constant 0 : index
    %c0_90 = arith.constant 0 : index
    %129 = vector.load %arg18[%c0_89, %c0_90] : memref<16x1xf32, #tpu.memory_space<vmem>>, vector<16x1xf32>
    %130 = vector.broadcast %129 : vector<16x1xf32> to vector<16x32xf32>
    %131 = arith.addf %128, %130 : vector<16x32xf32>
    %cst_91 = arith.constant 0.000000e+00 : f32
    %132 = vector.broadcast %cst_91 : f32 to vector<16x32xf32>
    %133 = arith.maximumf %131, %132 : vector<16x32xf32>
    %c0_92 = arith.constant 0 : index
    %c0_93 = arith.constant 0 : index
    %c0_94 = arith.constant 0 : index
    %134 = vector.load %arg1[%c0_92, %c0_93, %c0_94] : memref<3x32x32xf32, #tpu.memory_space<vmem>>, vector<1x32x32xf32>
    %135 = vector.shape_cast %134 : vector<1x32x32xf32> to vector<32x32xf32>
    %cst_95 = arith.constant dense<0.000000e+00> : vector<16x32xf32>
    %136 = tpu.matmul %133, %135, %cst_95 {dimension_numbers = #tpu.dot_dimension_numbers<[1], [0], [0], [1], [0, 0, 1, 1], [], []>} : vector<16x32xf32>, vector<32x32xf32>, vector<16x32xf32> -> vector<16x32xf32>
    %c0_96 = arith.constant 0 : index
    %c0_97 = arith.constant 0 : index
    %c0_98 = arith.constant 0 : index
    %137 = vector.load %arg19[%c0_96, %c0_97, %c0_98] : memref<3x16x16xf32, #tpu.memory_space<vmem>>, vector<1x16x16xf32>
    %138 = vector.shape_cast %137 : vector<1x16x16xf32> to vector<16x16xf32>
    %cst_99 = arith.constant dense<0.000000e+00> : vector<16x32xf32>
    %139 = tpu.matmul %138, %136, %cst_99 {dimension_numbers = #tpu.dot_dimension_numbers<[1], [0], [0], [1], [0, 0, 1, 1], [], []>} : vector<16x16xf32>, vector<16x32xf32>, vector<16x32xf32> -> vector<16x32xf32>
    %c1_100 = arith.constant 1 : index
    %c0_101 = arith.constant 0 : index
    %c0_102 = arith.constant 0 : index
    %140 = vector.load %arg19[%c1_100, %c0_101, %c0_102] : memref<3x16x16xf32, #tpu.memory_space<vmem>>, vector<1x16x16xf32>
    %141 = vector.shape_cast %140 : vector<1x16x16xf32> to vector<16x16xf32>
    %cst_103 = arith.constant dense<0.000000e+00> : vector<16x32xf32>
    %142 = tpu.matmul %141, %133, %cst_103 {dimension_numbers = #tpu.dot_dimension_numbers<[1], [0], [0], [1], [0, 0, 1, 1], [], []>} : vector<16x16xf32>, vector<16x32xf32>, vector<16x32xf32> -> vector<16x32xf32>
    %143 = arith.addf %139, %142 : vector<16x32xf32>
    %c2_104 = arith.constant 2 : index
    %c0_105 = arith.constant 0 : index
    %c0_106 = arith.constant 0 : index
    %144 = vector.load %arg1[%c2_104, %c0_105, %c0_106] : memref<3x32x32xf32, #tpu.memory_space<vmem>>, vector<1x32x32xf32>
    %145 = vector.shape_cast %144 : vector<1x32x32xf32> to vector<32x32xf32>
    %cst_107 = arith.constant dense<0.000000e+00> : vector<16x32xf32>
    %146 = tpu.matmul %133, %145, %cst_107 {dimension_numbers = #tpu.dot_dimension_numbers<[1], [0], [0], [1], [0, 0, 1, 1], [], []>} : vector<16x32xf32>, vector<32x32xf32>, vector<16x32xf32> -> vector<16x32xf32>
    %c2_108 = arith.constant 2 : index
    %c0_109 = arith.constant 0 : index
    %c0_110 = arith.constant 0 : index
    %147 = vector.load %arg19[%c2_108, %c0_109, %c0_110] : memref<3x16x16xf32, #tpu.memory_space<vmem>>, vector<1x16x16xf32>
    %148 = vector.shape_cast %147 : vector<1x16x16xf32> to vector<16x16xf32>
    %cst_111 = arith.constant dense<0.000000e+00> : vector<16x32xf32>
    %149 = tpu.matmul %148, %146, %cst_111 {dimension_numbers = #tpu.dot_dimension_numbers<[1], [0], [0], [1], [0, 0, 1, 1], [], []>} : vector<16x16xf32>, vector<16x32xf32>, vector<16x32xf32> -> vector<16x32xf32>
    %150 = arith.addf %143, %149 : vector<16x32xf32>
    %cst_112 = arith.constant dense<0.000000e+00> : vector<16xf32>
    %151 = vector.multi_reduction <add>, %150, %cst_112 [1] : vector<16x32xf32> to vector<16xf32>
    %152 = vector.shape_cast %151 : vector<16xf32> to vector<16x1xf32>
    %cst_113 = arith.constant 3.200000e+01 : f32
    %153 = vector.broadcast %cst_113 : f32 to vector<16x1xf32>
    %154 = arith.divf %152, %153 : vector<16x1xf32>
    %155 = vector.broadcast %154 : vector<16x1xf32> to vector<16x32xf32>
    %156 = arith.subf %150, %155 : vector<16x32xf32>
    %157 = arith.mulf %156, %156 : vector<16x32xf32>
    %cst_114 = arith.constant dense<0.000000e+00> : vector<16xf32>
    %158 = vector.multi_reduction <add>, %157, %cst_114 [1] : vector<16x32xf32> to vector<16xf32>
    %159 = vector.shape_cast %158 : vector<16xf32> to vector<16x1xf32>
    %cst_115 = arith.constant 3.200000e+01 : f32
    %160 = vector.broadcast %cst_115 : f32 to vector<16x1xf32>
    %161 = arith.divf %159, %160 : vector<16x1xf32>
    %162 = vector.broadcast %154 : vector<16x1xf32> to vector<16x32xf32>
    %163 = arith.subf %150, %162 : vector<16x32xf32>
    %cst_116 = arith.constant 9.99999974E-6 : f32
    %164 = vector.broadcast %cst_116 : f32 to vector<16x1xf32>
    %165 = arith.addf %161, %164 : vector<16x1xf32>
    %166 = math.rsqrt %165 : vector<16x1xf32>
    %167 = vector.broadcast %166 : vector<16x1xf32> to vector<16x32xf32>
    %168 = arith.mulf %163, %167 : vector<16x32xf32>
    %c0_117 = arith.constant 0 : index
    %c0_118 = arith.constant 0 : index
    %169 = vector.load %arg20[%c0_117, %c0_118] : memref<16x1xf32, #tpu.memory_space<vmem>>, vector<16x1xf32>
    %170 = vector.broadcast %169 : vector<16x1xf32> to vector<16x32xf32>
    %171 = arith.mulf %168, %170 : vector<16x32xf32>
    %c0_119 = arith.constant 0 : index
    %c0_120 = arith.constant 0 : index
    %172 = vector.load %arg21[%c0_119, %c0_120] : memref<16x1xf32, #tpu.memory_space<vmem>>, vector<16x1xf32>
    %173 = vector.broadcast %172 : vector<16x1xf32> to vector<16x32xf32>
    %174 = arith.addf %171, %173 : vector<16x32xf32>
    %cst_121 = arith.constant 0.000000e+00 : f32
    %175 = vector.broadcast %cst_121 : f32 to vector<16x32xf32>
    %176 = arith.maximumf %174, %175 : vector<16x32xf32>
    %c0_122 = arith.constant 0 : index
    %c0_123 = arith.constant 0 : index
    %c0_124 = arith.constant 0 : index
    %177 = vector.load %arg1[%c0_122, %c0_123, %c0_124] : memref<3x32x32xf32, #tpu.memory_space<vmem>>, vector<1x32x32xf32>
    %178 = vector.shape_cast %177 : vector<1x32x32xf32> to vector<32x32xf32>
    %cst_125 = arith.constant dense<0.000000e+00> : vector<16x32xf32>
    %179 = tpu.matmul %176, %178, %cst_125 {dimension_numbers = #tpu.dot_dimension_numbers<[1], [0], [0], [1], [0, 0, 1, 1], [], []>} : vector<16x32xf32>, vector<32x32xf32>, vector<16x32xf32> -> vector<16x32xf32>
    %c0_126 = arith.constant 0 : index
    %c0_127 = arith.constant 0 : index
    %c0_128 = arith.constant 0 : index
    %180 = vector.load %arg22[%c0_126, %c0_127, %c0_128] : memref<3x16x16xf32, #tpu.memory_space<vmem>>, vector<1x16x16xf32>
    %181 = vector.shape_cast %180 : vector<1x16x16xf32> to vector<16x16xf32>
    %cst_129 = arith.constant dense<0.000000e+00> : vector<16x32xf32>
    %182 = tpu.matmul %181, %179, %cst_129 {dimension_numbers = #tpu.dot_dimension_numbers<[1], [0], [0], [1], [0, 0, 1, 1], [], []>} : vector<16x16xf32>, vector<16x32xf32>, vector<16x32xf32> -> vector<16x32xf32>
    %c1_130 = arith.constant 1 : index
    %c0_131 = arith.constant 0 : index
    %c0_132 = arith.constant 0 : index
    %183 = vector.load %arg22[%c1_130, %c0_131, %c0_132] : memref<3x16x16xf32, #tpu.memory_space<vmem>>, vector<1x16x16xf32>
    %184 = vector.shape_cast %183 : vector<1x16x16xf32> to vector<16x16xf32>
    %cst_133 = arith.constant dense<0.000000e+00> : vector<16x32xf32>
    %185 = tpu.matmul %184, %176, %cst_133 {dimension_numbers = #tpu.dot_dimension_numbers<[1], [0], [0], [1], [0, 0, 1, 1], [], []>} : vector<16x16xf32>, vector<16x32xf32>, vector<16x32xf32> -> vector<16x32xf32>
    %186 = arith.addf %182, %185 : vector<16x32xf32>
    %c2_134 = arith.constant 2 : index
    %c0_135 = arith.constant 0 : index
    %c0_136 = arith.constant 0 : index
    %187 = vector.load %arg1[%c2_134, %c0_135, %c0_136] : memref<3x32x32xf32, #tpu.memory_space<vmem>>, vector<1x32x32xf32>
    %188 = vector.shape_cast %187 : vector<1x32x32xf32> to vector<32x32xf32>
    %cst_137 = arith.constant dense<0.000000e+00> : vector<16x32xf32>
    %189 = tpu.matmul %176, %188, %cst_137 {dimension_numbers = #tpu.dot_dimension_numbers<[1], [0], [0], [1], [0, 0, 1, 1], [], []>} : vector<16x32xf32>, vector<32x32xf32>, vector<16x32xf32> -> vector<16x32xf32>
    %c2_138 = arith.constant 2 : index
    %c0_139 = arith.constant 0 : index
    %c0_140 = arith.constant 0 : index
    %190 = vector.load %arg22[%c2_138, %c0_139, %c0_140] : memref<3x16x16xf32, #tpu.memory_space<vmem>>, vector<1x16x16xf32>
    %191 = vector.shape_cast %190 : vector<1x16x16xf32> to vector<16x16xf32>
    %cst_141 = arith.constant dense<0.000000e+00> : vector<16x32xf32>
    %192 = tpu.matmul %191, %189, %cst_141 {dimension_numbers = #tpu.dot_dimension_numbers<[1], [0], [0], [1], [0, 0, 1, 1], [], []>} : vector<16x16xf32>, vector<16x32xf32>, vector<16x32xf32> -> vector<16x32xf32>
    %193 = arith.addf %186, %192 : vector<16x32xf32>
    %194 = arith.addf %107, %193 : vector<16x32xf32>
    %cst_142 = arith.constant dense<0.000000e+00> : vector<16xf32>
    %195 = vector.multi_reduction <add>, %194, %cst_142 [1] : vector<16x32xf32> to vector<16xf32>
    %196 = vector.shape_cast %195 : vector<16xf32> to vector<16x1xf32>
    %cst_143 = arith.constant 3.200000e+01 : f32
    %197 = vector.broadcast %cst_143 : f32 to vector<16x1xf32>
    %198 = arith.divf %196, %197 : vector<16x1xf32>
    %199 = vector.broadcast %198 : vector<16x1xf32> to vector<16x32xf32>
    %200 = arith.subf %194, %199 : vector<16x32xf32>
    %201 = arith.mulf %200, %200 : vector<16x32xf32>
    %cst_144 = arith.constant dense<0.000000e+00> : vector<16xf32>
    %202 = vector.multi_reduction <add>, %201, %cst_144 [1] : vector<16x32xf32> to vector<16xf32>
    %203 = vector.shape_cast %202 : vector<16xf32> to vector<16x1xf32>
    %cst_145 = arith.constant 3.200000e+01 : f32
    %204 = vector.broadcast %cst_145 : f32 to vector<16x1xf32>
    %205 = arith.divf %203, %204 : vector<16x1xf32>
    %206 = vector.broadcast %198 : vector<16x1xf32> to vector<16x32xf32>
    %207 = arith.subf %194, %206 : vector<16x32xf32>
    %cst_146 = arith.constant 9.99999974E-6 : f32
    %208 = vector.broadcast %cst_146 : f32 to vector<16x1xf32>
    %209 = arith.addf %205, %208 : vector<16x1xf32>
    %210 = math.rsqrt %209 : vector<16x1xf32>
    %211 = vector.broadcast %210 : vector<16x1xf32> to vector<16x32xf32>
    %212 = arith.mulf %207, %211 : vector<16x32xf32>
    %c0_147 = arith.constant 0 : index
    %c0_148 = arith.constant 0 : index
    %213 = vector.load %arg23[%c0_147, %c0_148] : memref<16x1xf32, #tpu.memory_space<vmem>>, vector<16x1xf32>
    %214 = vector.broadcast %213 : vector<16x1xf32> to vector<16x32xf32>
    %215 = arith.mulf %212, %214 : vector<16x32xf32>
    %c0_149 = arith.constant 0 : index
    %c0_150 = arith.constant 0 : index
    %216 = vector.load %arg24[%c0_149, %c0_150] : memref<16x1xf32, #tpu.memory_space<vmem>>, vector<16x1xf32>
    %217 = vector.broadcast %216 : vector<16x1xf32> to vector<16x32xf32>
    %218 = arith.addf %215, %217 : vector<16x32xf32>
    %cst_151 = arith.constant 0.000000e+00 : f32
    %219 = vector.broadcast %cst_151 : f32 to vector<16x32xf32>
    %220 = arith.maximumf %218, %219 : vector<16x32xf32>
    %c0_152 = arith.constant 0 : index
    %c0_153 = arith.constant 0 : index
    %c0_154 = arith.constant 0 : index
    %221 = vector.load %arg1[%c0_152, %c0_153, %c0_154] : memref<3x32x32xf32, #tpu.memory_space<vmem>>, vector<1x32x32xf32>
    %222 = vector.shape_cast %221 : vector<1x32x32xf32> to vector<32x32xf32>
    %cst_155 = arith.constant dense<0.000000e+00> : vector<16x32xf32>
    %223 = tpu.matmul %220, %222, %cst_155 {dimension_numbers = #tpu.dot_dimension_numbers<[1], [0], [0], [1], [0, 0, 1, 1], [], []>} : vector<16x32xf32>, vector<32x32xf32>, vector<16x32xf32> -> vector<16x32xf32>
    %c0_156 = arith.constant 0 : index
    %c0_157 = arith.constant 0 : index
    %c0_158 = arith.constant 0 : index
    %224 = vector.load %arg25[%c0_156, %c0_157, %c0_158] : memref<3x16x16xf32, #tpu.memory_space<vmem>>, vector<1x16x16xf32>
    %225 = vector.shape_cast %224 : vector<1x16x16xf32> to vector<16x16xf32>
    %cst_159 = arith.constant dense<0.000000e+00> : vector<16x32xf32>
    %226 = tpu.matmul %225, %223, %cst_159 {dimension_numbers = #tpu.dot_dimension_numbers<[1], [0], [0], [1], [0, 0, 1, 1], [], []>} : vector<16x16xf32>, vector<16x32xf32>, vector<16x32xf32> -> vector<16x32xf32>
    %c1_160 = arith.constant 1 : index
    %c0_161 = arith.constant 0 : index
    %c0_162 = arith.constant 0 : index
    %227 = vector.load %arg25[%c1_160, %c0_161, %c0_162] : memref<3x16x16xf32, #tpu.memory_space<vmem>>, vector<1x16x16xf32>
    %228 = vector.shape_cast %227 : vector<1x16x16xf32> to vector<16x16xf32>
    %cst_163 = arith.constant dense<0.000000e+00> : vector<16x32xf32>
    %229 = tpu.matmul %228, %220, %cst_163 {dimension_numbers = #tpu.dot_dimension_numbers<[1], [0], [0], [1], [0, 0, 1, 1], [], []>} : vector<16x16xf32>, vector<16x32xf32>, vector<16x32xf32> -> vector<16x32xf32>
    %230 = arith.addf %226, %229 : vector<16x32xf32>
    %c2_164 = arith.constant 2 : index
    %c0_165 = arith.constant 0 : index
    %c0_166 = arith.constant 0 : index
    %231 = vector.load %arg1[%c2_164, %c0_165, %c0_166] : memref<3x32x32xf32, #tpu.memory_space<vmem>>, vector<1x32x32xf32>
    %232 = vector.shape_cast %231 : vector<1x32x32xf32> to vector<32x32xf32>
    %cst_167 = arith.constant dense<0.000000e+00> : vector<16x32xf32>
    %233 = tpu.matmul %220, %232, %cst_167 {dimension_numbers = #tpu.dot_dimension_numbers<[1], [0], [0], [1], [0, 0, 1, 1], [], []>} : vector<16x32xf32>, vector<32x32xf32>, vector<16x32xf32> -> vector<16x32xf32>
    %c2_168 = arith.constant 2 : index
    %c0_169 = arith.constant 0 : index
    %c0_170 = arith.constant 0 : index
    %234 = vector.load %arg25[%c2_168, %c0_169, %c0_170] : memref<3x16x16xf32, #tpu.memory_space<vmem>>, vector<1x16x16xf32>
    %235 = vector.shape_cast %234 : vector<1x16x16xf32> to vector<16x16xf32>
    %cst_171 = arith.constant dense<0.000000e+00> : vector<16x32xf32>
    %236 = tpu.matmul %235, %233, %cst_171 {dimension_numbers = #tpu.dot_dimension_numbers<[1], [0], [0], [1], [0, 0, 1, 1], [], []>} : vector<16x16xf32>, vector<16x32xf32>, vector<16x32xf32> -> vector<16x32xf32>
    %237 = arith.addf %230, %236 : vector<16x32xf32>
    %cst_172 = arith.constant dense<0.000000e+00> : vector<16xf32>
    %238 = vector.multi_reduction <add>, %237, %cst_172 [1] : vector<16x32xf32> to vector<16xf32>
    %239 = vector.shape_cast %238 : vector<16xf32> to vector<16x1xf32>
    %cst_173 = arith.constant 3.200000e+01 : f32
    %240 = vector.broadcast %cst_173 : f32 to vector<16x1xf32>
    %241 = arith.divf %239, %240 : vector<16x1xf32>
    %242 = vector.broadcast %241 : vector<16x1xf32> to vector<16x32xf32>
    %243 = arith.subf %237, %242 : vector<16x32xf32>
    %244 = arith.mulf %243, %243 : vector<16x32xf32>
    %cst_174 = arith.constant dense<0.000000e+00> : vector<16xf32>
    %245 = vector.multi_reduction <add>, %244, %cst_174 [1] : vector<16x32xf32> to vector<16xf32>
    %246 = vector.shape_cast %245 : vector<16xf32> to vector<16x1xf32>
    %cst_175 = arith.constant 3.200000e+01 : f32
    %247 = vector.broadcast %cst_175 : f32 to vector<16x1xf32>
    %248 = arith.divf %246, %247 : vector<16x1xf32>
    %249 = vector.broadcast %241 : vector<16x1xf32> to vector<16x32xf32>
    %250 = arith.subf %237, %249 : vector<16x32xf32>
    %cst_176 = arith.constant 9.99999974E-6 : f32
    %251 = vector.broadcast %cst_176 : f32 to vector<16x1xf32>
    %252 = arith.addf %248, %251 : vector<16x1xf32>
    %253 = math.rsqrt %252 : vector<16x1xf32>
    %254 = vector.broadcast %253 : vector<16x1xf32> to vector<16x32xf32>
    %255 = arith.mulf %250, %254 : vector<16x32xf32>
    %c0_177 = arith.constant 0 : index
    %c0_178 = arith.constant 0 : index
    %256 = vector.load %arg26[%c0_177, %c0_178] : memref<16x1xf32, #tpu.memory_space<vmem>>, vector<16x1xf32>
    %257 = vector.broadcast %256 : vector<16x1xf32> to vector<16x32xf32>
    %258 = arith.mulf %255, %257 : vector<16x32xf32>
    %c0_179 = arith.constant 0 : index
    %c0_180 = arith.constant 0 : index
    %259 = vector.load %arg27[%c0_179, %c0_180] : memref<16x1xf32, #tpu.memory_space<vmem>>, vector<16x1xf32>
    %260 = vector.broadcast %259 : vector<16x1xf32> to vector<16x32xf32>
    %261 = arith.addf %258, %260 : vector<16x32xf32>
    %cst_181 = arith.constant 0.000000e+00 : f32
    %262 = vector.broadcast %cst_181 : f32 to vector<16x32xf32>
    %263 = arith.maximumf %261, %262 : vector<16x32xf32>
    %c0_182 = arith.constant 0 : index
    %c0_183 = arith.constant 0 : index
    %c0_184 = arith.constant 0 : index
    %264 = vector.load %arg1[%c0_182, %c0_183, %c0_184] : memref<3x32x32xf32, #tpu.memory_space<vmem>>, vector<1x32x32xf32>
    %265 = vector.shape_cast %264 : vector<1x32x32xf32> to vector<32x32xf32>
    %cst_185 = arith.constant dense<0.000000e+00> : vector<16x32xf32>
    %266 = tpu.matmul %263, %265, %cst_185 {dimension_numbers = #tpu.dot_dimension_numbers<[1], [0], [0], [1], [0, 0, 1, 1], [], []>} : vector<16x32xf32>, vector<32x32xf32>, vector<16x32xf32> -> vector<16x32xf32>
    %c0_186 = arith.constant 0 : index
    %c0_187 = arith.constant 0 : index
    %c0_188 = arith.constant 0 : index
    %267 = vector.load %arg28[%c0_186, %c0_187, %c0_188] : memref<3x16x16xf32, #tpu.memory_space<vmem>>, vector<1x16x16xf32>
    %268 = vector.shape_cast %267 : vector<1x16x16xf32> to vector<16x16xf32>
    %cst_189 = arith.constant dense<0.000000e+00> : vector<16x32xf32>
    %269 = tpu.matmul %268, %266, %cst_189 {dimension_numbers = #tpu.dot_dimension_numbers<[1], [0], [0], [1], [0, 0, 1, 1], [], []>} : vector<16x16xf32>, vector<16x32xf32>, vector<16x32xf32> -> vector<16x32xf32>
    %c1_190 = arith.constant 1 : index
    %c0_191 = arith.constant 0 : index
    %c0_192 = arith.constant 0 : index
    %270 = vector.load %arg28[%c1_190, %c0_191, %c0_192] : memref<3x16x16xf32, #tpu.memory_space<vmem>>, vector<1x16x16xf32>
    %271 = vector.shape_cast %270 : vector<1x16x16xf32> to vector<16x16xf32>
    %cst_193 = arith.constant dense<0.000000e+00> : vector<16x32xf32>
    %272 = tpu.matmul %271, %263, %cst_193 {dimension_numbers = #tpu.dot_dimension_numbers<[1], [0], [0], [1], [0, 0, 1, 1], [], []>} : vector<16x16xf32>, vector<16x32xf32>, vector<16x32xf32> -> vector<16x32xf32>
    %273 = arith.addf %269, %272 : vector<16x32xf32>
    %c2_194 = arith.constant 2 : index
    %c0_195 = arith.constant 0 : index
    %c0_196 = arith.constant 0 : index
    %274 = vector.load %arg1[%c2_194, %c0_195, %c0_196] : memref<3x32x32xf32, #tpu.memory_space<vmem>>, vector<1x32x32xf32>
    %275 = vector.shape_cast %274 : vector<1x32x32xf32> to vector<32x32xf32>
    %cst_197 = arith.constant dense<0.000000e+00> : vector<16x32xf32>
    %276 = tpu.matmul %263, %275, %cst_197 {dimension_numbers = #tpu.dot_dimension_numbers<[1], [0], [0], [1], [0, 0, 1, 1], [], []>} : vector<16x32xf32>, vector<32x32xf32>, vector<16x32xf32> -> vector<16x32xf32>
    %c2_198 = arith.constant 2 : index
    %c0_199 = arith.constant 0 : index
    %c0_200 = arith.constant 0 : index
    %277 = vector.load %arg28[%c2_198, %c0_199, %c0_200] : memref<3x16x16xf32, #tpu.memory_space<vmem>>, vector<1x16x16xf32>
    %278 = vector.shape_cast %277 : vector<1x16x16xf32> to vector<16x16xf32>
    %cst_201 = arith.constant dense<0.000000e+00> : vector<16x32xf32>
    %279 = tpu.matmul %278, %276, %cst_201 {dimension_numbers = #tpu.dot_dimension_numbers<[1], [0], [0], [1], [0, 0, 1, 1], [], []>} : vector<16x16xf32>, vector<16x32xf32>, vector<16x32xf32> -> vector<16x32xf32>
    %280 = arith.addf %273, %279 : vector<16x32xf32>
    %281 = arith.addf %194, %280 : vector<16x32xf32>
    %cst_202 = arith.constant dense<0.000000e+00> : vector<16xf32>
    %282 = vector.multi_reduction <add>, %281, %cst_202 [1] : vector<16x32xf32> to vector<16xf32>
    %283 = vector.shape_cast %282 : vector<16xf32> to vector<16x1xf32>
    %cst_203 = arith.constant 3.200000e+01 : f32
    %284 = vector.broadcast %cst_203 : f32 to vector<16x1xf32>
    %285 = arith.divf %283, %284 : vector<16x1xf32>
    %286 = vector.broadcast %285 : vector<16x1xf32> to vector<16x32xf32>
    %287 = arith.subf %281, %286 : vector<16x32xf32>
    %288 = arith.mulf %287, %287 : vector<16x32xf32>
    %cst_204 = arith.constant dense<0.000000e+00> : vector<16xf32>
    %289 = vector.multi_reduction <add>, %288, %cst_204 [1] : vector<16x32xf32> to vector<16xf32>
    %290 = vector.shape_cast %289 : vector<16xf32> to vector<16x1xf32>
    %cst_205 = arith.constant 3.200000e+01 : f32
    %291 = vector.broadcast %cst_205 : f32 to vector<16x1xf32>
    %292 = arith.divf %290, %291 : vector<16x1xf32>
    %293 = vector.broadcast %285 : vector<16x1xf32> to vector<16x32xf32>
    %294 = arith.subf %281, %293 : vector<16x32xf32>
    %cst_206 = arith.constant 9.99999974E-6 : f32
    %295 = vector.broadcast %cst_206 : f32 to vector<16x1xf32>
    %296 = arith.addf %292, %295 : vector<16x1xf32>
    %297 = math.rsqrt %296 : vector<16x1xf32>
    %298 = vector.broadcast %297 : vector<16x1xf32> to vector<16x32xf32>
    %299 = arith.mulf %294, %298 : vector<16x32xf32>
    %c0_207 = arith.constant 0 : index
    %c0_208 = arith.constant 0 : index
    %300 = vector.load %arg29[%c0_207, %c0_208] : memref<16x1xf32, #tpu.memory_space<vmem>>, vector<16x1xf32>
    %301 = vector.broadcast %300 : vector<16x1xf32> to vector<16x32xf32>
    %302 = arith.mulf %299, %301 : vector<16x32xf32>
    %c0_209 = arith.constant 0 : index
    %c0_210 = arith.constant 0 : index
    %303 = vector.load %arg30[%c0_209, %c0_210] : memref<16x1xf32, #tpu.memory_space<vmem>>, vector<16x1xf32>
    %304 = vector.broadcast %303 : vector<16x1xf32> to vector<16x32xf32>
    %305 = arith.addf %302, %304 : vector<16x32xf32>
    %cst_211 = arith.constant 0.000000e+00 : f32
    %306 = vector.broadcast %cst_211 : f32 to vector<16x32xf32>
    %307 = arith.maximumf %305, %306 : vector<16x32xf32>
    %c0_212 = arith.constant 0 : index
    %c0_213 = arith.constant 0 : index
    %c0_214 = arith.constant 0 : index
    %308 = vector.load %arg2[%c0_212, %c0_213, %c0_214] : memref<3x32x16xf32, #tpu.memory_space<vmem>>, vector<1x32x16xf32>
    %309 = vector.shape_cast %308 : vector<1x32x16xf32> to vector<32x16xf32>
    %cst_215 = arith.constant dense<0.000000e+00> : vector<16x16xf32>
    %310 = tpu.matmul %307, %309, %cst_215 {dimension_numbers = #tpu.dot_dimension_numbers<[1], [0], [0], [1], [0, 0, 1, 1], [], []>} : vector<16x32xf32>, vector<32x16xf32>, vector<16x16xf32> -> vector<16x16xf32>
    %c0_216 = arith.constant 0 : index
    %c0_217 = arith.constant 0 : index
    %c0_218 = arith.constant 0 : index
    %311 = vector.load %arg31[%c0_216, %c0_217, %c0_218] : memref<3x32x16xf32, #tpu.memory_space<vmem>>, vector<1x32x16xf32>
    %312 = vector.shape_cast %311 : vector<1x32x16xf32> to vector<32x16xf32>
    %cst_219 = arith.constant dense<0.000000e+00> : vector<32x16xf32>
    %313 = tpu.matmul %312, %310, %cst_219 {dimension_numbers = #tpu.dot_dimension_numbers<[1], [0], [0], [1], [0, 0, 1, 1], [], []>} : vector<32x16xf32>, vector<16x16xf32>, vector<32x16xf32> -> vector<32x16xf32>
    %c1_220 = arith.constant 1 : index
    %c0_221 = arith.constant 0 : index
    %c0_222 = arith.constant 0 : index
    %314 = vector.load %arg2[%c1_220, %c0_221, %c0_222] : memref<3x32x16xf32, #tpu.memory_space<vmem>>, vector<1x32x16xf32>
    %315 = vector.shape_cast %314 : vector<1x32x16xf32> to vector<32x16xf32>
    %cst_223 = arith.constant dense<0.000000e+00> : vector<16x16xf32>
    %316 = tpu.matmul %307, %315, %cst_223 {dimension_numbers = #tpu.dot_dimension_numbers<[1], [0], [0], [1], [0, 0, 1, 1], [], []>} : vector<16x32xf32>, vector<32x16xf32>, vector<16x16xf32> -> vector<16x16xf32>
    %c1_224 = arith.constant 1 : index
    %c0_225 = arith.constant 0 : index
    %c0_226 = arith.constant 0 : index
    %317 = vector.load %arg31[%c1_224, %c0_225, %c0_226] : memref<3x32x16xf32, #tpu.memory_space<vmem>>, vector<1x32x16xf32>
    %318 = vector.shape_cast %317 : vector<1x32x16xf32> to vector<32x16xf32>
    %cst_227 = arith.constant dense<0.000000e+00> : vector<32x16xf32>
    %319 = tpu.matmul %318, %316, %cst_227 {dimension_numbers = #tpu.dot_dimension_numbers<[1], [0], [0], [1], [0, 0, 1, 1], [], []>} : vector<32x16xf32>, vector<16x16xf32>, vector<32x16xf32> -> vector<32x16xf32>
    %320 = arith.addf %313, %319 : vector<32x16xf32>
    %c2_228 = arith.constant 2 : index
    %c0_229 = arith.constant 0 : index
    %c0_230 = arith.constant 0 : index
    %321 = vector.load %arg2[%c2_228, %c0_229, %c0_230] : memref<3x32x16xf32, #tpu.memory_space<vmem>>, vector<1x32x16xf32>
    %322 = vector.shape_cast %321 : vector<1x32x16xf32> to vector<32x16xf32>
    %cst_231 = arith.constant dense<0.000000e+00> : vector<16x16xf32>
    %323 = tpu.matmul %307, %322, %cst_231 {dimension_numbers = #tpu.dot_dimension_numbers<[1], [0], [0], [1], [0, 0, 1, 1], [], []>} : vector<16x32xf32>, vector<32x16xf32>, vector<16x16xf32> -> vector<16x16xf32>
    %c2_232 = arith.constant 2 : index
    %c0_233 = arith.constant 0 : index
    %c0_234 = arith.constant 0 : index
    %324 = vector.load %arg31[%c2_232, %c0_233, %c0_234] : memref<3x32x16xf32, #tpu.memory_space<vmem>>, vector<1x32x16xf32>
    %325 = vector.shape_cast %324 : vector<1x32x16xf32> to vector<32x16xf32>
    %cst_235 = arith.constant dense<0.000000e+00> : vector<32x16xf32>
    %326 = tpu.matmul %325, %323, %cst_235 {dimension_numbers = #tpu.dot_dimension_numbers<[1], [0], [0], [1], [0, 0, 1, 1], [], []>} : vector<32x16xf32>, vector<16x16xf32>, vector<32x16xf32> -> vector<32x16xf32>
    %327 = arith.addf %320, %326 : vector<32x16xf32>
    %cst_236 = arith.constant dense<0.000000e+00> : vector<32xf32>
    %328 = vector.multi_reduction <add>, %327, %cst_236 [1] : vector<32x16xf32> to vector<32xf32>
    %329 = vector.shape_cast %328 : vector<32xf32> to vector<32x1xf32>
    %cst_237 = arith.constant 1.600000e+01 : f32
    %330 = vector.broadcast %cst_237 : f32 to vector<32x1xf32>
    %331 = arith.divf %329, %330 : vector<32x1xf32>
    %332 = vector.broadcast %331 : vector<32x1xf32> to vector<32x16xf32>
    %333 = arith.subf %327, %332 : vector<32x16xf32>
    %334 = arith.mulf %333, %333 : vector<32x16xf32>
    %cst_238 = arith.constant dense<0.000000e+00> : vector<32xf32>
    %335 = vector.multi_reduction <add>, %334, %cst_238 [1] : vector<32x16xf32> to vector<32xf32>
    %336 = vector.shape_cast %335 : vector<32xf32> to vector<32x1xf32>
    %cst_239 = arith.constant 1.600000e+01 : f32
    %337 = vector.broadcast %cst_239 : f32 to vector<32x1xf32>
    %338 = arith.divf %336, %337 : vector<32x1xf32>
    %339 = vector.broadcast %331 : vector<32x1xf32> to vector<32x16xf32>
    %340 = arith.subf %327, %339 : vector<32x16xf32>
    %cst_240 = arith.constant 9.99999974E-6 : f32
    %341 = vector.broadcast %cst_240 : f32 to vector<32x1xf32>
    %342 = arith.addf %338, %341 : vector<32x1xf32>
    %343 = math.rsqrt %342 : vector<32x1xf32>
    %344 = vector.broadcast %343 : vector<32x1xf32> to vector<32x16xf32>
    %345 = arith.mulf %340, %344 : vector<32x16xf32>
    %c0_241 = arith.constant 0 : index
    %c0_242 = arith.constant 0 : index
    %346 = vector.load %arg32[%c0_241, %c0_242] : memref<32x1xf32, #tpu.memory_space<vmem>>, vector<32x1xf32>
    %347 = vector.broadcast %346 : vector<32x1xf32> to vector<32x16xf32>
    %348 = arith.mulf %345, %347 : vector<32x16xf32>
    %c0_243 = arith.constant 0 : index
    %c0_244 = arith.constant 0 : index
    %349 = vector.load %arg33[%c0_243, %c0_244] : memref<32x1xf32, #tpu.memory_space<vmem>>, vector<32x1xf32>
    %350 = vector.broadcast %349 : vector<32x1xf32> to vector<32x16xf32>
    %351 = arith.addf %348, %350 : vector<32x16xf32>
    %cst_245 = arith.constant 0.000000e+00 : f32
    %352 = vector.broadcast %cst_245 : f32 to vector<32x16xf32>
    %353 = arith.maximumf %351, %352 : vector<32x16xf32>
    %c0_246 = arith.constant 0 : index
    %c0_247 = arith.constant 0 : index
    %c0_248 = arith.constant 0 : index
    %354 = vector.load %arg3[%c0_246, %c0_247, %c0_248] : memref<3x16x16xf32, #tpu.memory_space<vmem>>, vector<1x16x16xf32>
    %355 = vector.shape_cast %354 : vector<1x16x16xf32> to vector<16x16xf32>
    %cst_249 = arith.constant dense<0.000000e+00> : vector<32x16xf32>
    %356 = tpu.matmul %353, %355, %cst_249 {dimension_numbers = #tpu.dot_dimension_numbers<[1], [0], [0], [1], [0, 0, 1, 1], [], []>} : vector<32x16xf32>, vector<16x16xf32>, vector<32x16xf32> -> vector<32x16xf32>
    %c0_250 = arith.constant 0 : index
    %c0_251 = arith.constant 0 : index
    %c0_252 = arith.constant 0 : index
    %357 = vector.load %arg34[%c0_250, %c0_251, %c0_252] : memref<3x32x32xf32, #tpu.memory_space<vmem>>, vector<1x32x32xf32>
    %358 = vector.shape_cast %357 : vector<1x32x32xf32> to vector<32x32xf32>
    %cst_253 = arith.constant dense<0.000000e+00> : vector<32x16xf32>
    %359 = tpu.matmul %358, %356, %cst_253 {dimension_numbers = #tpu.dot_dimension_numbers<[1], [0], [0], [1], [0, 0, 1, 1], [], []>} : vector<32x32xf32>, vector<32x16xf32>, vector<32x16xf32> -> vector<32x16xf32>
    %c1_254 = arith.constant 1 : index
    %c0_255 = arith.constant 0 : index
    %c0_256 = arith.constant 0 : index
    %360 = vector.load %arg34[%c1_254, %c0_255, %c0_256] : memref<3x32x32xf32, #tpu.memory_space<vmem>>, vector<1x32x32xf32>
    %361 = vector.shape_cast %360 : vector<1x32x32xf32> to vector<32x32xf32>
    %cst_257 = arith.constant dense<0.000000e+00> : vector<32x16xf32>
    %362 = tpu.matmul %361, %353, %cst_257 {dimension_numbers = #tpu.dot_dimension_numbers<[1], [0], [0], [1], [0, 0, 1, 1], [], []>} : vector<32x32xf32>, vector<32x16xf32>, vector<32x16xf32> -> vector<32x16xf32>
    %363 = arith.addf %359, %362 : vector<32x16xf32>
    %c2_258 = arith.constant 2 : index
    %c0_259 = arith.constant 0 : index
    %c0_260 = arith.constant 0 : index
    %364 = vector.load %arg3[%c2_258, %c0_259, %c0_260] : memref<3x16x16xf32, #tpu.memory_space<vmem>>, vector<1x16x16xf32>
    %365 = vector.shape_cast %364 : vector<1x16x16xf32> to vector<16x16xf32>
    %cst_261 = arith.constant dense<0.000000e+00> : vector<32x16xf32>
    %366 = tpu.matmul %353, %365, %cst_261 {dimension_numbers = #tpu.dot_dimension_numbers<[1], [0], [0], [1], [0, 0, 1, 1], [], []>} : vector<32x16xf32>, vector<16x16xf32>, vector<32x16xf32> -> vector<32x16xf32>
    %c2_262 = arith.constant 2 : index
    %c0_263 = arith.constant 0 : index
    %c0_264 = arith.constant 0 : index
    %367 = vector.load %arg34[%c2_262, %c0_263, %c0_264] : memref<3x32x32xf32, #tpu.memory_space<vmem>>, vector<1x32x32xf32>
    %368 = vector.shape_cast %367 : vector<1x32x32xf32> to vector<32x32xf32>
    %cst_265 = arith.constant dense<0.000000e+00> : vector<32x16xf32>
    %369 = tpu.matmul %368, %366, %cst_265 {dimension_numbers = #tpu.dot_dimension_numbers<[1], [0], [0], [1], [0, 0, 1, 1], [], []>} : vector<32x32xf32>, vector<32x16xf32>, vector<32x16xf32> -> vector<32x16xf32>
    %370 = arith.addf %363, %369 : vector<32x16xf32>
    %c0_266 = arith.constant 0 : index
    %c0_267 = arith.constant 0 : index
    %c0_268 = arith.constant 0 : index
    %371 = vector.load %arg35[%c0_266, %c0_267, %c0_268] : memref<1x32x16xf32, #tpu.memory_space<vmem>>, vector<1x32x16xf32>
    %372 = vector.shape_cast %371 : vector<1x32x16xf32> to vector<32x16xf32>
    %c0_269 = arith.constant 0 : index
    %c0_270 = arith.constant 0 : index
    %c0_271 = arith.constant 0 : index
    %373 = vector.load %arg6[%c0_269, %c0_270, %c0_271] : memref<1x32x16xf32, #tpu.memory_space<vmem>>, vector<1x32x16xf32>
    %374 = vector.shape_cast %373 : vector<1x32x16xf32> to vector<32x16xf32>
    %cst_272 = arith.constant dense<0.000000e+00> : vector<16x16xf32>
    %375 = tpu.matmul %307, %374, %cst_272 {dimension_numbers = #tpu.dot_dimension_numbers<[1], [0], [0], [1], [0, 0, 1, 1], [], []>} : vector<16x32xf32>, vector<32x16xf32>, vector<16x16xf32> -> vector<16x16xf32>
    %cst_273 = arith.constant dense<0.000000e+00> : vector<32x16xf32>
    %376 = tpu.matmul %372, %375, %cst_273 {dimension_numbers = #tpu.dot_dimension_numbers<[1], [0], [0], [1], [0, 0, 1, 1], [], []>} : vector<32x16xf32>, vector<16x16xf32>, vector<32x16xf32> -> vector<32x16xf32>
    %377 = arith.addf %376, %370 : vector<32x16xf32>
    %cst_274 = arith.constant dense<0.000000e+00> : vector<32xf32>
    %378 = vector.multi_reduction <add>, %377, %cst_274 [1] : vector<32x16xf32> to vector<32xf32>
    %379 = vector.shape_cast %378 : vector<32xf32> to vector<32x1xf32>
    %cst_275 = arith.constant 1.600000e+01 : f32
    %380 = vector.broadcast %cst_275 : f32 to vector<32x1xf32>
    %381 = arith.divf %379, %380 : vector<32x1xf32>
    %382 = vector.broadcast %381 : vector<32x1xf32> to vector<32x16xf32>
    %383 = arith.subf %377, %382 : vector<32x16xf32>
    %384 = arith.mulf %383, %383 : vector<32x16xf32>
    %cst_276 = arith.constant dense<0.000000e+00> : vector<32xf32>
    %385 = vector.multi_reduction <add>, %384, %cst_276 [1] : vector<32x16xf32> to vector<32xf32>
    %386 = vector.shape_cast %385 : vector<32xf32> to vector<32x1xf32>
    %cst_277 = arith.constant 1.600000e+01 : f32
    %387 = vector.broadcast %cst_277 : f32 to vector<32x1xf32>
    %388 = arith.divf %386, %387 : vector<32x1xf32>
    %389 = vector.broadcast %381 : vector<32x1xf32> to vector<32x16xf32>
    %390 = arith.subf %377, %389 : vector<32x16xf32>
    %cst_278 = arith.constant 9.99999974E-6 : f32
    %391 = vector.broadcast %cst_278 : f32 to vector<32x1xf32>
    %392 = arith.addf %388, %391 : vector<32x1xf32>
    %393 = math.rsqrt %392 : vector<32x1xf32>
    %394 = vector.broadcast %393 : vector<32x1xf32> to vector<32x16xf32>
    %395 = arith.mulf %390, %394 : vector<32x16xf32>
    %c0_279 = arith.constant 0 : index
    %c0_280 = arith.constant 0 : index
    %396 = vector.load %arg36[%c0_279, %c0_280] : memref<32x1xf32, #tpu.memory_space<vmem>>, vector<32x1xf32>
    %397 = vector.broadcast %396 : vector<32x1xf32> to vector<32x16xf32>
    %398 = arith.mulf %395, %397 : vector<32x16xf32>
    %c0_281 = arith.constant 0 : index
    %c0_282 = arith.constant 0 : index
    %399 = vector.load %arg37[%c0_281, %c0_282] : memref<32x1xf32, #tpu.memory_space<vmem>>, vector<32x1xf32>
    %400 = vector.broadcast %399 : vector<32x1xf32> to vector<32x16xf32>
    %401 = arith.addf %398, %400 : vector<32x16xf32>
    %cst_283 = arith.constant 0.000000e+00 : f32
    %402 = vector.broadcast %cst_283 : f32 to vector<32x16xf32>
    %403 = arith.maximumf %401, %402 : vector<32x16xf32>
    %c0_284 = arith.constant 0 : index
    %c0_285 = arith.constant 0 : index
    %c0_286 = arith.constant 0 : index
    %404 = vector.load %arg3[%c0_284, %c0_285, %c0_286] : memref<3x16x16xf32, #tpu.memory_space<vmem>>, vector<1x16x16xf32>
    %405 = vector.shape_cast %404 : vector<1x16x16xf32> to vector<16x16xf32>
    %cst_287 = arith.constant dense<0.000000e+00> : vector<32x16xf32>
    %406 = tpu.matmul %403, %405, %cst_287 {dimension_numbers = #tpu.dot_dimension_numbers<[1], [0], [0], [1], [0, 0, 1, 1], [], []>} : vector<32x16xf32>, vector<16x16xf32>, vector<32x16xf32> -> vector<32x16xf32>
    %c0_288 = arith.constant 0 : index
    %c0_289 = arith.constant 0 : index
    %c0_290 = arith.constant 0 : index
    %407 = vector.load %arg38[%c0_288, %c0_289, %c0_290] : memref<3x32x32xf32, #tpu.memory_space<vmem>>, vector<1x32x32xf32>
    %408 = vector.shape_cast %407 : vector<1x32x32xf32> to vector<32x32xf32>
    %cst_291 = arith.constant dense<0.000000e+00> : vector<32x16xf32>
    %409 = tpu.matmul %408, %406, %cst_291 {dimension_numbers = #tpu.dot_dimension_numbers<[1], [0], [0], [1], [0, 0, 1, 1], [], []>} : vector<32x32xf32>, vector<32x16xf32>, vector<32x16xf32> -> vector<32x16xf32>
    %c1_292 = arith.constant 1 : index
    %c0_293 = arith.constant 0 : index
    %c0_294 = arith.constant 0 : index
    %410 = vector.load %arg38[%c1_292, %c0_293, %c0_294] : memref<3x32x32xf32, #tpu.memory_space<vmem>>, vector<1x32x32xf32>
    %411 = vector.shape_cast %410 : vector<1x32x32xf32> to vector<32x32xf32>
    %cst_295 = arith.constant dense<0.000000e+00> : vector<32x16xf32>
    %412 = tpu.matmul %411, %403, %cst_295 {dimension_numbers = #tpu.dot_dimension_numbers<[1], [0], [0], [1], [0, 0, 1, 1], [], []>} : vector<32x32xf32>, vector<32x16xf32>, vector<32x16xf32> -> vector<32x16xf32>
    %413 = arith.addf %409, %412 : vector<32x16xf32>
    %c2_296 = arith.constant 2 : index
    %c0_297 = arith.constant 0 : index
    %c0_298 = arith.constant 0 : index
    %414 = vector.load %arg3[%c2_296, %c0_297, %c0_298] : memref<3x16x16xf32, #tpu.memory_space<vmem>>, vector<1x16x16xf32>
    %415 = vector.shape_cast %414 : vector<1x16x16xf32> to vector<16x16xf32>
    %cst_299 = arith.constant dense<0.000000e+00> : vector<32x16xf32>
    %416 = tpu.matmul %403, %415, %cst_299 {dimension_numbers = #tpu.dot_dimension_numbers<[1], [0], [0], [1], [0, 0, 1, 1], [], []>} : vector<32x16xf32>, vector<16x16xf32>, vector<32x16xf32> -> vector<32x16xf32>
    %c2_300 = arith.constant 2 : index
    %c0_301 = arith.constant 0 : index
    %c0_302 = arith.constant 0 : index
    %417 = vector.load %arg38[%c2_300, %c0_301, %c0_302] : memref<3x32x32xf32, #tpu.memory_space<vmem>>, vector<1x32x32xf32>
    %418 = vector.shape_cast %417 : vector<1x32x32xf32> to vector<32x32xf32>
    %cst_303 = arith.constant dense<0.000000e+00> : vector<32x16xf32>
    %419 = tpu.matmul %418, %416, %cst_303 {dimension_numbers = #tpu.dot_dimension_numbers<[1], [0], [0], [1], [0, 0, 1, 1], [], []>} : vector<32x32xf32>, vector<32x16xf32>, vector<32x16xf32> -> vector<32x16xf32>
    %420 = arith.addf %413, %419 : vector<32x16xf32>
    %cst_304 = arith.constant dense<0.000000e+00> : vector<32xf32>
    %421 = vector.multi_reduction <add>, %420, %cst_304 [1] : vector<32x16xf32> to vector<32xf32>
    %422 = vector.shape_cast %421 : vector<32xf32> to vector<32x1xf32>
    %cst_305 = arith.constant 1.600000e+01 : f32
    %423 = vector.broadcast %cst_305 : f32 to vector<32x1xf32>
    %424 = arith.divf %422, %423 : vector<32x1xf32>
    %425 = vector.broadcast %424 : vector<32x1xf32> to vector<32x16xf32>
    %426 = arith.subf %420, %425 : vector<32x16xf32>
    %427 = arith.mulf %426, %426 : vector<32x16xf32>
    %cst_306 = arith.constant dense<0.000000e+00> : vector<32xf32>
    %428 = vector.multi_reduction <add>, %427, %cst_306 [1] : vector<32x16xf32> to vector<32xf32>
    %429 = vector.shape_cast %428 : vector<32xf32> to vector<32x1xf32>
    %cst_307 = arith.constant 1.600000e+01 : f32
    %430 = vector.broadcast %cst_307 : f32 to vector<32x1xf32>
    %431 = arith.divf %429, %430 : vector<32x1xf32>
    %432 = vector.broadcast %424 : vector<32x1xf32> to vector<32x16xf32>
    %433 = arith.subf %420, %432 : vector<32x16xf32>
    %cst_308 = arith.constant 9.99999974E-6 : f32
    %434 = vector.broadcast %cst_308 : f32 to vector<32x1xf32>
    %435 = arith.addf %431, %434 : vector<32x1xf32>
    %436 = math.rsqrt %435 : vector<32x1xf32>
    %437 = vector.broadcast %436 : vector<32x1xf32> to vector<32x16xf32>
    %438 = arith.mulf %433, %437 : vector<32x16xf32>
    %c0_309 = arith.constant 0 : index
    %c0_310 = arith.constant 0 : index
    %439 = vector.load %arg39[%c0_309, %c0_310] : memref<32x1xf32, #tpu.memory_space<vmem>>, vector<32x1xf32>
    %440 = vector.broadcast %439 : vector<32x1xf32> to vector<32x16xf32>
    %441 = arith.mulf %438, %440 : vector<32x16xf32>
    %c0_311 = arith.constant 0 : index
    %c0_312 = arith.constant 0 : index
    %442 = vector.load %arg40[%c0_311, %c0_312] : memref<32x1xf32, #tpu.memory_space<vmem>>, vector<32x1xf32>
    %443 = vector.broadcast %442 : vector<32x1xf32> to vector<32x16xf32>
    %444 = arith.addf %441, %443 : vector<32x16xf32>
    %cst_313 = arith.constant 0.000000e+00 : f32
    %445 = vector.broadcast %cst_313 : f32 to vector<32x16xf32>
    %446 = arith.maximumf %444, %445 : vector<32x16xf32>
    %c0_314 = arith.constant 0 : index
    %c0_315 = arith.constant 0 : index
    %c0_316 = arith.constant 0 : index
    %447 = vector.load %arg3[%c0_314, %c0_315, %c0_316] : memref<3x16x16xf32, #tpu.memory_space<vmem>>, vector<1x16x16xf32>
    %448 = vector.shape_cast %447 : vector<1x16x16xf32> to vector<16x16xf32>
    %cst_317 = arith.constant dense<0.000000e+00> : vector<32x16xf32>
    %449 = tpu.matmul %446, %448, %cst_317 {dimension_numbers = #tpu.dot_dimension_numbers<[1], [0], [0], [1], [0, 0, 1, 1], [], []>} : vector<32x16xf32>, vector<16x16xf32>, vector<32x16xf32> -> vector<32x16xf32>
    %c0_318 = arith.constant 0 : index
    %c0_319 = arith.constant 0 : index
    %c0_320 = arith.constant 0 : index
    %450 = vector.load %arg41[%c0_318, %c0_319, %c0_320] : memref<3x32x32xf32, #tpu.memory_space<vmem>>, vector<1x32x32xf32>
    %451 = vector.shape_cast %450 : vector<1x32x32xf32> to vector<32x32xf32>
    %cst_321 = arith.constant dense<0.000000e+00> : vector<32x16xf32>
    %452 = tpu.matmul %451, %449, %cst_321 {dimension_numbers = #tpu.dot_dimension_numbers<[1], [0], [0], [1], [0, 0, 1, 1], [], []>} : vector<32x32xf32>, vector<32x16xf32>, vector<32x16xf32> -> vector<32x16xf32>
    %c1_322 = arith.constant 1 : index
    %c0_323 = arith.constant 0 : index
    %c0_324 = arith.constant 0 : index
    %453 = vector.load %arg41[%c1_322, %c0_323, %c0_324] : memref<3x32x32xf32, #tpu.memory_space<vmem>>, vector<1x32x32xf32>
    %454 = vector.shape_cast %453 : vector<1x32x32xf32> to vector<32x32xf32>
    %cst_325 = arith.constant dense<0.000000e+00> : vector<32x16xf32>
    %455 = tpu.matmul %454, %446, %cst_325 {dimension_numbers = #tpu.dot_dimension_numbers<[1], [0], [0], [1], [0, 0, 1, 1], [], []>} : vector<32x32xf32>, vector<32x16xf32>, vector<32x16xf32> -> vector<32x16xf32>
    %456 = arith.addf %452, %455 : vector<32x16xf32>
    %c2_326 = arith.constant 2 : index
    %c0_327 = arith.constant 0 : index
    %c0_328 = arith.constant 0 : index
    %457 = vector.load %arg3[%c2_326, %c0_327, %c0_328] : memref<3x16x16xf32, #tpu.memory_space<vmem>>, vector<1x16x16xf32>
    %458 = vector.shape_cast %457 : vector<1x16x16xf32> to vector<16x16xf32>
    %cst_329 = arith.constant dense<0.000000e+00> : vector<32x16xf32>
    %459 = tpu.matmul %446, %458, %cst_329 {dimension_numbers = #tpu.dot_dimension_numbers<[1], [0], [0], [1], [0, 0, 1, 1], [], []>} : vector<32x16xf32>, vector<16x16xf32>, vector<32x16xf32> -> vector<32x16xf32>
    %c2_330 = arith.constant 2 : index
    %c0_331 = arith.constant 0 : index
    %c0_332 = arith.constant 0 : index
    %460 = vector.load %arg41[%c2_330, %c0_331, %c0_332] : memref<3x32x32xf32, #tpu.memory_space<vmem>>, vector<1x32x32xf32>
    %461 = vector.shape_cast %460 : vector<1x32x32xf32> to vector<32x32xf32>
    %cst_333 = arith.constant dense<0.000000e+00> : vector<32x16xf32>
    %462 = tpu.matmul %461, %459, %cst_333 {dimension_numbers = #tpu.dot_dimension_numbers<[1], [0], [0], [1], [0, 0, 1, 1], [], []>} : vector<32x32xf32>, vector<32x16xf32>, vector<32x16xf32> -> vector<32x16xf32>
    %463 = arith.addf %456, %462 : vector<32x16xf32>
    %464 = arith.addf %377, %463 : vector<32x16xf32>
    %cst_334 = arith.constant dense<0.000000e+00> : vector<32xf32>
    %465 = vector.multi_reduction <add>, %464, %cst_334 [1] : vector<32x16xf32> to vector<32xf32>
    %466 = vector.shape_cast %465 : vector<32xf32> to vector<32x1xf32>
    %cst_335 = arith.constant 1.600000e+01 : f32
    %467 = vector.broadcast %cst_335 : f32 to vector<32x1xf32>
    %468 = arith.divf %466, %467 : vector<32x1xf32>
    %469 = vector.broadcast %468 : vector<32x1xf32> to vector<32x16xf32>
    %470 = arith.subf %464, %469 : vector<32x16xf32>
    %471 = arith.mulf %470, %470 : vector<32x16xf32>
    %cst_336 = arith.constant dense<0.000000e+00> : vector<32xf32>
    %472 = vector.multi_reduction <add>, %471, %cst_336 [1] : vector<32x16xf32> to vector<32xf32>
    %473 = vector.shape_cast %472 : vector<32xf32> to vector<32x1xf32>
    %cst_337 = arith.constant 1.600000e+01 : f32
    %474 = vector.broadcast %cst_337 : f32 to vector<32x1xf32>
    %475 = arith.divf %473, %474 : vector<32x1xf32>
    %476 = vector.broadcast %468 : vector<32x1xf32> to vector<32x16xf32>
    %477 = arith.subf %464, %476 : vector<32x16xf32>
    %cst_338 = arith.constant 9.99999974E-6 : f32
    %478 = vector.broadcast %cst_338 : f32 to vector<32x1xf32>
    %479 = arith.addf %475, %478 : vector<32x1xf32>
    %480 = math.rsqrt %479 : vector<32x1xf32>
    %481 = vector.broadcast %480 : vector<32x1xf32> to vector<32x16xf32>
    %482 = arith.mulf %477, %481 : vector<32x16xf32>
    %c0_339 = arith.constant 0 : index
    %c0_340 = arith.constant 0 : index
    %483 = vector.load %arg42[%c0_339, %c0_340] : memref<32x1xf32, #tpu.memory_space<vmem>>, vector<32x1xf32>
    %484 = vector.broadcast %483 : vector<32x1xf32> to vector<32x16xf32>
    %485 = arith.mulf %482, %484 : vector<32x16xf32>
    %c0_341 = arith.constant 0 : index
    %c0_342 = arith.constant 0 : index
    %486 = vector.load %arg43[%c0_341, %c0_342] : memref<32x1xf32, #tpu.memory_space<vmem>>, vector<32x1xf32>
    %487 = vector.broadcast %486 : vector<32x1xf32> to vector<32x16xf32>
    %488 = arith.addf %485, %487 : vector<32x16xf32>
    %cst_343 = arith.constant 0.000000e+00 : f32
    %489 = vector.broadcast %cst_343 : f32 to vector<32x16xf32>
    %490 = arith.maximumf %488, %489 : vector<32x16xf32>
    %c0_344 = arith.constant 0 : index
    %c0_345 = arith.constant 0 : index
    %c0_346 = arith.constant 0 : index
    %491 = vector.load %arg3[%c0_344, %c0_345, %c0_346] : memref<3x16x16xf32, #tpu.memory_space<vmem>>, vector<1x16x16xf32>
    %492 = vector.shape_cast %491 : vector<1x16x16xf32> to vector<16x16xf32>
    %cst_347 = arith.constant dense<0.000000e+00> : vector<32x16xf32>
    %493 = tpu.matmul %490, %492, %cst_347 {dimension_numbers = #tpu.dot_dimension_numbers<[1], [0], [0], [1], [0, 0, 1, 1], [], []>} : vector<32x16xf32>, vector<16x16xf32>, vector<32x16xf32> -> vector<32x16xf32>
    %c0_348 = arith.constant 0 : index
    %c0_349 = arith.constant 0 : index
    %c0_350 = arith.constant 0 : index
    %494 = vector.load %arg44[%c0_348, %c0_349, %c0_350] : memref<3x32x32xf32, #tpu.memory_space<vmem>>, vector<1x32x32xf32>
    %495 = vector.shape_cast %494 : vector<1x32x32xf32> to vector<32x32xf32>
    %cst_351 = arith.constant dense<0.000000e+00> : vector<32x16xf32>
    %496 = tpu.matmul %495, %493, %cst_351 {dimension_numbers = #tpu.dot_dimension_numbers<[1], [0], [0], [1], [0, 0, 1, 1], [], []>} : vector<32x32xf32>, vector<32x16xf32>, vector<32x16xf32> -> vector<32x16xf32>
    %c1_352 = arith.constant 1 : index
    %c0_353 = arith.constant 0 : index
    %c0_354 = arith.constant 0 : index
    %497 = vector.load %arg44[%c1_352, %c0_353, %c0_354] : memref<3x32x32xf32, #tpu.memory_space<vmem>>, vector<1x32x32xf32>
    %498 = vector.shape_cast %497 : vector<1x32x32xf32> to vector<32x32xf32>
    %cst_355 = arith.constant dense<0.000000e+00> : vector<32x16xf32>
    %499 = tpu.matmul %498, %490, %cst_355 {dimension_numbers = #tpu.dot_dimension_numbers<[1], [0], [0], [1], [0, 0, 1, 1], [], []>} : vector<32x32xf32>, vector<32x16xf32>, vector<32x16xf32> -> vector<32x16xf32>
    %500 = arith.addf %496, %499 : vector<32x16xf32>
    %c2_356 = arith.constant 2 : index
    %c0_357 = arith.constant 0 : index
    %c0_358 = arith.constant 0 : index
    %501 = vector.load %arg3[%c2_356, %c0_357, %c0_358] : memref<3x16x16xf32, #tpu.memory_space<vmem>>, vector<1x16x16xf32>
    %502 = vector.shape_cast %501 : vector<1x16x16xf32> to vector<16x16xf32>
    %cst_359 = arith.constant dense<0.000000e+00> : vector<32x16xf32>
    %503 = tpu.matmul %490, %502, %cst_359 {dimension_numbers = #tpu.dot_dimension_numbers<[1], [0], [0], [1], [0, 0, 1, 1], [], []>} : vector<32x16xf32>, vector<16x16xf32>, vector<32x16xf32> -> vector<32x16xf32>
    %c2_360 = arith.constant 2 : index
    %c0_361 = arith.constant 0 : index
    %c0_362 = arith.constant 0 : index
    %504 = vector.load %arg44[%c2_360, %c0_361, %c0_362] : memref<3x32x32xf32, #tpu.memory_space<vmem>>, vector<1x32x32xf32>
    %505 = vector.shape_cast %504 : vector<1x32x32xf32> to vector<32x32xf32>
    %cst_363 = arith.constant dense<0.000000e+00> : vector<32x16xf32>
    %506 = tpu.matmul %505, %503, %cst_363 {dimension_numbers = #tpu.dot_dimension_numbers<[1], [0], [0], [1], [0, 0, 1, 1], [], []>} : vector<32x32xf32>, vector<32x16xf32>, vector<32x16xf32> -> vector<32x16xf32>
    %507 = arith.addf %500, %506 : vector<32x16xf32>
    %cst_364 = arith.constant dense<0.000000e+00> : vector<32xf32>
    %508 = vector.multi_reduction <add>, %507, %cst_364 [1] : vector<32x16xf32> to vector<32xf32>
    %509 = vector.shape_cast %508 : vector<32xf32> to vector<32x1xf32>
    %cst_365 = arith.constant 1.600000e+01 : f32
    %510 = vector.broadcast %cst_365 : f32 to vector<32x1xf32>
    %511 = arith.divf %509, %510 : vector<32x1xf32>
    %512 = vector.broadcast %511 : vector<32x1xf32> to vector<32x16xf32>
    %513 = arith.subf %507, %512 : vector<32x16xf32>
    %514 = arith.mulf %513, %513 : vector<32x16xf32>
    %cst_366 = arith.constant dense<0.000000e+00> : vector<32xf32>
    %515 = vector.multi_reduction <add>, %514, %cst_366 [1] : vector<32x16xf32> to vector<32xf32>
    %516 = vector.shape_cast %515 : vector<32xf32> to vector<32x1xf32>
    %cst_367 = arith.constant 1.600000e+01 : f32
    %517 = vector.broadcast %cst_367 : f32 to vector<32x1xf32>
    %518 = arith.divf %516, %517 : vector<32x1xf32>
    %519 = vector.broadcast %511 : vector<32x1xf32> to vector<32x16xf32>
    %520 = arith.subf %507, %519 : vector<32x16xf32>
    %cst_368 = arith.constant 9.99999974E-6 : f32
    %521 = vector.broadcast %cst_368 : f32 to vector<32x1xf32>
    %522 = arith.addf %518, %521 : vector<32x1xf32>
    %523 = math.rsqrt %522 : vector<32x1xf32>
    %524 = vector.broadcast %523 : vector<32x1xf32> to vector<32x16xf32>
    %525 = arith.mulf %520, %524 : vector<32x16xf32>
    %c0_369 = arith.constant 0 : index
    %c0_370 = arith.constant 0 : index
    %526 = vector.load %arg45[%c0_369, %c0_370] : memref<32x1xf32, #tpu.memory_space<vmem>>, vector<32x1xf32>
    %527 = vector.broadcast %526 : vector<32x1xf32> to vector<32x16xf32>
    %528 = arith.mulf %525, %527 : vector<32x16xf32>
    %c0_371 = arith.constant 0 : index
    %c0_372 = arith.constant 0 : index
    %529 = vector.load %arg46[%c0_371, %c0_372] : memref<32x1xf32, #tpu.memory_space<vmem>>, vector<32x1xf32>
    %530 = vector.broadcast %529 : vector<32x1xf32> to vector<32x16xf32>
    %531 = arith.addf %528, %530 : vector<32x16xf32>
    %cst_373 = arith.constant 0.000000e+00 : f32
    %532 = vector.broadcast %cst_373 : f32 to vector<32x16xf32>
    %533 = arith.maximumf %531, %532 : vector<32x16xf32>
    %c0_374 = arith.constant 0 : index
    %c0_375 = arith.constant 0 : index
    %c0_376 = arith.constant 0 : index
    %534 = vector.load %arg3[%c0_374, %c0_375, %c0_376] : memref<3x16x16xf32, #tpu.memory_space<vmem>>, vector<1x16x16xf32>
    %535 = vector.shape_cast %534 : vector<1x16x16xf32> to vector<16x16xf32>
    %cst_377 = arith.constant dense<0.000000e+00> : vector<32x16xf32>
    %536 = tpu.matmul %533, %535, %cst_377 {dimension_numbers = #tpu.dot_dimension_numbers<[1], [0], [0], [1], [0, 0, 1, 1], [], []>} : vector<32x16xf32>, vector<16x16xf32>, vector<32x16xf32> -> vector<32x16xf32>
    %c0_378 = arith.constant 0 : index
    %c0_379 = arith.constant 0 : index
    %c0_380 = arith.constant 0 : index
    %537 = vector.load %arg47[%c0_378, %c0_379, %c0_380] : memref<3x32x32xf32, #tpu.memory_space<vmem>>, vector<1x32x32xf32>
    %538 = vector.shape_cast %537 : vector<1x32x32xf32> to vector<32x32xf32>
    %cst_381 = arith.constant dense<0.000000e+00> : vector<32x16xf32>
    %539 = tpu.matmul %538, %536, %cst_381 {dimension_numbers = #tpu.dot_dimension_numbers<[1], [0], [0], [1], [0, 0, 1, 1], [], []>} : vector<32x32xf32>, vector<32x16xf32>, vector<32x16xf32> -> vector<32x16xf32>
    %c1_382 = arith.constant 1 : index
    %c0_383 = arith.constant 0 : index
    %c0_384 = arith.constant 0 : index
    %540 = vector.load %arg47[%c1_382, %c0_383, %c0_384] : memref<3x32x32xf32, #tpu.memory_space<vmem>>, vector<1x32x32xf32>
    %541 = vector.shape_cast %540 : vector<1x32x32xf32> to vector<32x32xf32>
    %cst_385 = arith.constant dense<0.000000e+00> : vector<32x16xf32>
    %542 = tpu.matmul %541, %533, %cst_385 {dimension_numbers = #tpu.dot_dimension_numbers<[1], [0], [0], [1], [0, 0, 1, 1], [], []>} : vector<32x32xf32>, vector<32x16xf32>, vector<32x16xf32> -> vector<32x16xf32>
    %543 = arith.addf %539, %542 : vector<32x16xf32>
    %c2_386 = arith.constant 2 : index
    %c0_387 = arith.constant 0 : index
    %c0_388 = arith.constant 0 : index
    %544 = vector.load %arg3[%c2_386, %c0_387, %c0_388] : memref<3x16x16xf32, #tpu.memory_space<vmem>>, vector<1x16x16xf32>
    %545 = vector.shape_cast %544 : vector<1x16x16xf32> to vector<16x16xf32>
    %cst_389 = arith.constant dense<0.000000e+00> : vector<32x16xf32>
    %546 = tpu.matmul %533, %545, %cst_389 {dimension_numbers = #tpu.dot_dimension_numbers<[1], [0], [0], [1], [0, 0, 1, 1], [], []>} : vector<32x16xf32>, vector<16x16xf32>, vector<32x16xf32> -> vector<32x16xf32>
    %c2_390 = arith.constant 2 : index
    %c0_391 = arith.constant 0 : index
    %c0_392 = arith.constant 0 : index
    %547 = vector.load %arg47[%c2_390, %c0_391, %c0_392] : memref<3x32x32xf32, #tpu.memory_space<vmem>>, vector<1x32x32xf32>
    %548 = vector.shape_cast %547 : vector<1x32x32xf32> to vector<32x32xf32>
    %cst_393 = arith.constant dense<0.000000e+00> : vector<32x16xf32>
    %549 = tpu.matmul %548, %546, %cst_393 {dimension_numbers = #tpu.dot_dimension_numbers<[1], [0], [0], [1], [0, 0, 1, 1], [], []>} : vector<32x32xf32>, vector<32x16xf32>, vector<32x16xf32> -> vector<32x16xf32>
    %550 = arith.addf %543, %549 : vector<32x16xf32>
    %551 = arith.addf %464, %550 : vector<32x16xf32>
    %cst_394 = arith.constant dense<0.000000e+00> : vector<32xf32>
    %552 = vector.multi_reduction <add>, %551, %cst_394 [1] : vector<32x16xf32> to vector<32xf32>
    %553 = vector.shape_cast %552 : vector<32xf32> to vector<32x1xf32>
    %cst_395 = arith.constant 1.600000e+01 : f32
    %554 = vector.broadcast %cst_395 : f32 to vector<32x1xf32>
    %555 = arith.divf %553, %554 : vector<32x1xf32>
    %556 = vector.broadcast %555 : vector<32x1xf32> to vector<32x16xf32>
    %557 = arith.subf %551, %556 : vector<32x16xf32>
    %558 = arith.mulf %557, %557 : vector<32x16xf32>
    %cst_396 = arith.constant dense<0.000000e+00> : vector<32xf32>
    %559 = vector.multi_reduction <add>, %558, %cst_396 [1] : vector<32x16xf32> to vector<32xf32>
    %560 = vector.shape_cast %559 : vector<32xf32> to vector<32x1xf32>
    %cst_397 = arith.constant 1.600000e+01 : f32
    %561 = vector.broadcast %cst_397 : f32 to vector<32x1xf32>
    %562 = arith.divf %560, %561 : vector<32x1xf32>
    %563 = vector.broadcast %555 : vector<32x1xf32> to vector<32x16xf32>
    %564 = arith.subf %551, %563 : vector<32x16xf32>
    %cst_398 = arith.constant 9.99999974E-6 : f32
    %565 = vector.broadcast %cst_398 : f32 to vector<32x1xf32>
    %566 = arith.addf %562, %565 : vector<32x1xf32>
    %567 = math.rsqrt %566 : vector<32x1xf32>
    %568 = vector.broadcast %567 : vector<32x1xf32> to vector<32x16xf32>
    %569 = arith.mulf %564, %568 : vector<32x16xf32>
    %c0_399 = arith.constant 0 : index
    %c0_400 = arith.constant 0 : index
    %570 = vector.load %arg48[%c0_399, %c0_400] : memref<32x1xf32, #tpu.memory_space<vmem>>, vector<32x1xf32>
    %571 = vector.broadcast %570 : vector<32x1xf32> to vector<32x16xf32>
    %572 = arith.mulf %569, %571 : vector<32x16xf32>
    %c0_401 = arith.constant 0 : index
    %c0_402 = arith.constant 0 : index
    %573 = vector.load %arg49[%c0_401, %c0_402] : memref<32x1xf32, #tpu.memory_space<vmem>>, vector<32x1xf32>
    %574 = vector.broadcast %573 : vector<32x1xf32> to vector<32x16xf32>
    %575 = arith.addf %572, %574 : vector<32x16xf32>
    %cst_403 = arith.constant 0.000000e+00 : f32
    %576 = vector.broadcast %cst_403 : f32 to vector<32x16xf32>
    %577 = arith.maximumf %575, %576 : vector<32x16xf32>
    %c0_404 = arith.constant 0 : index
    %c0_405 = arith.constant 0 : index
    %c0_406 = arith.constant 0 : index
    %578 = vector.load %arg4[%c0_404, %c0_405, %c0_406] : memref<3x16x8xf32, #tpu.memory_space<vmem>>, vector<1x16x8xf32>
    %579 = vector.shape_cast %578 : vector<1x16x8xf32> to vector<16x8xf32>
    %cst_407 = arith.constant dense<0.000000e+00> : vector<32x8xf32>
    %580 = tpu.matmul %577, %579, %cst_407 {dimension_numbers = #tpu.dot_dimension_numbers<[1], [0], [0], [1], [0, 0, 1, 1], [], []>} : vector<32x16xf32>, vector<16x8xf32>, vector<32x8xf32> -> vector<32x8xf32>
    %c0_408 = arith.constant 0 : index
    %c0_409 = arith.constant 0 : index
    %c0_410 = arith.constant 0 : index
    %581 = vector.load %arg50[%c0_408, %c0_409, %c0_410] : memref<3x64x32xf32, #tpu.memory_space<vmem>>, vector<1x64x32xf32>
    %582 = vector.shape_cast %581 : vector<1x64x32xf32> to vector<64x32xf32>
    %cst_411 = arith.constant dense<0.000000e+00> : vector<64x8xf32>
    %583 = tpu.matmul %582, %580, %cst_411 {dimension_numbers = #tpu.dot_dimension_numbers<[1], [0], [0], [1], [0, 0, 1, 1], [], []>} : vector<64x32xf32>, vector<32x8xf32>, vector<64x8xf32> -> vector<64x8xf32>
    %c1_412 = arith.constant 1 : index
    %c0_413 = arith.constant 0 : index
    %c0_414 = arith.constant 0 : index
    %584 = vector.load %arg4[%c1_412, %c0_413, %c0_414] : memref<3x16x8xf32, #tpu.memory_space<vmem>>, vector<1x16x8xf32>
    %585 = vector.shape_cast %584 : vector<1x16x8xf32> to vector<16x8xf32>
    %cst_415 = arith.constant dense<0.000000e+00> : vector<32x8xf32>
    %586 = tpu.matmul %577, %585, %cst_415 {dimension_numbers = #tpu.dot_dimension_numbers<[1], [0], [0], [1], [0, 0, 1, 1], [], []>} : vector<32x16xf32>, vector<16x8xf32>, vector<32x8xf32> -> vector<32x8xf32>
    %c1_416 = arith.constant 1 : index
    %c0_417 = arith.constant 0 : index
    %c0_418 = arith.constant 0 : index
    %587 = vector.load %arg50[%c1_416, %c0_417, %c0_418] : memref<3x64x32xf32, #tpu.memory_space<vmem>>, vector<1x64x32xf32>
    %588 = vector.shape_cast %587 : vector<1x64x32xf32> to vector<64x32xf32>
    %cst_419 = arith.constant dense<0.000000e+00> : vector<64x8xf32>
    %589 = tpu.matmul %588, %586, %cst_419 {dimension_numbers = #tpu.dot_dimension_numbers<[1], [0], [0], [1], [0, 0, 1, 1], [], []>} : vector<64x32xf32>, vector<32x8xf32>, vector<64x8xf32> -> vector<64x8xf32>
    %590 = arith.addf %583, %589 : vector<64x8xf32>
    %c2_420 = arith.constant 2 : index
    %c0_421 = arith.constant 0 : index
    %c0_422 = arith.constant 0 : index
    %591 = vector.load %arg4[%c2_420, %c0_421, %c0_422] : memref<3x16x8xf32, #tpu.memory_space<vmem>>, vector<1x16x8xf32>
    %592 = vector.shape_cast %591 : vector<1x16x8xf32> to vector<16x8xf32>
    %cst_423 = arith.constant dense<0.000000e+00> : vector<32x8xf32>
    %593 = tpu.matmul %577, %592, %cst_423 {dimension_numbers = #tpu.dot_dimension_numbers<[1], [0], [0], [1], [0, 0, 1, 1], [], []>} : vector<32x16xf32>, vector<16x8xf32>, vector<32x8xf32> -> vector<32x8xf32>
    %c2_424 = arith.constant 2 : index
    %c0_425 = arith.constant 0 : index
    %c0_426 = arith.constant 0 : index
    %594 = vector.load %arg50[%c2_424, %c0_425, %c0_426] : memref<3x64x32xf32, #tpu.memory_space<vmem>>, vector<1x64x32xf32>
    %595 = vector.shape_cast %594 : vector<1x64x32xf32> to vector<64x32xf32>
    %cst_427 = arith.constant dense<0.000000e+00> : vector<64x8xf32>
    %596 = tpu.matmul %595, %593, %cst_427 {dimension_numbers = #tpu.dot_dimension_numbers<[1], [0], [0], [1], [0, 0, 1, 1], [], []>} : vector<64x32xf32>, vector<32x8xf32>, vector<64x8xf32> -> vector<64x8xf32>
    %597 = arith.addf %590, %596 : vector<64x8xf32>
    %cst_428 = arith.constant dense<0.000000e+00> : vector<64xf32>
    %598 = vector.multi_reduction <add>, %597, %cst_428 [1] : vector<64x8xf32> to vector<64xf32>
    %599 = vector.shape_cast %598 : vector<64xf32> to vector<64x1xf32>
    %cst_429 = arith.constant 8.000000e+00 : f32
    %600 = vector.broadcast %cst_429 : f32 to vector<64x1xf32>
    %601 = arith.divf %599, %600 : vector<64x1xf32>
    %602 = vector.broadcast %601 : vector<64x1xf32> to vector<64x8xf32>
    %603 = arith.subf %597, %602 : vector<64x8xf32>
    %604 = arith.mulf %603, %603 : vector<64x8xf32>
    %cst_430 = arith.constant dense<0.000000e+00> : vector<64xf32>
    %605 = vector.multi_reduction <add>, %604, %cst_430 [1] : vector<64x8xf32> to vector<64xf32>
    %606 = vector.shape_cast %605 : vector<64xf32> to vector<64x1xf32>
    %cst_431 = arith.constant 8.000000e+00 : f32
    %607 = vector.broadcast %cst_431 : f32 to vector<64x1xf32>
    %608 = arith.divf %606, %607 : vector<64x1xf32>
    %609 = vector.broadcast %601 : vector<64x1xf32> to vector<64x8xf32>
    %610 = arith.subf %597, %609 : vector<64x8xf32>
    %cst_432 = arith.constant 9.99999974E-6 : f32
    %611 = vector.broadcast %cst_432 : f32 to vector<64x1xf32>
    %612 = arith.addf %608, %611 : vector<64x1xf32>
    %613 = math.rsqrt %612 : vector<64x1xf32>
    %614 = vector.broadcast %613 : vector<64x1xf32> to vector<64x8xf32>
    %615 = arith.mulf %610, %614 : vector<64x8xf32>
    %c0_433 = arith.constant 0 : index
    %c0_434 = arith.constant 0 : index
    %616 = vector.load %arg51[%c0_433, %c0_434] : memref<64x1xf32, #tpu.memory_space<vmem>>, vector<64x1xf32>
    %617 = vector.broadcast %616 : vector<64x1xf32> to vector<64x8xf32>
    %618 = arith.mulf %615, %617 : vector<64x8xf32>
    %c0_435 = arith.constant 0 : index
    %c0_436 = arith.constant 0 : index
    %619 = vector.load %arg52[%c0_435, %c0_436] : memref<64x1xf32, #tpu.memory_space<vmem>>, vector<64x1xf32>
    %620 = vector.broadcast %619 : vector<64x1xf32> to vector<64x8xf32>
    %621 = arith.addf %618, %620 : vector<64x8xf32>
    %cst_437 = arith.constant 0.000000e+00 : f32
    %622 = vector.broadcast %cst_437 : f32 to vector<64x8xf32>
    %623 = arith.maximumf %621, %622 : vector<64x8xf32>
    %c0_438 = arith.constant 0 : index
    %c0_439 = arith.constant 0 : index
    %c0_440 = arith.constant 0 : index
    %624 = vector.load %arg5[%c0_438, %c0_439, %c0_440] : memref<3x8x8xf32, #tpu.memory_space<vmem>>, vector<1x8x8xf32>
    %625 = vector.shape_cast %624 : vector<1x8x8xf32> to vector<8x8xf32>
    %cst_441 = arith.constant dense<0.000000e+00> : vector<64x8xf32>
    %626 = tpu.matmul %623, %625, %cst_441 {dimension_numbers = #tpu.dot_dimension_numbers<[1], [0], [0], [1], [0, 0, 1, 1], [], []>} : vector<64x8xf32>, vector<8x8xf32>, vector<64x8xf32> -> vector<64x8xf32>
    %c0_442 = arith.constant 0 : index
    %c0_443 = arith.constant 0 : index
    %c0_444 = arith.constant 0 : index
    %627 = vector.load %arg53[%c0_442, %c0_443, %c0_444] : memref<3x64x64xf32, #tpu.memory_space<vmem>>, vector<1x64x64xf32>
    %628 = vector.shape_cast %627 : vector<1x64x64xf32> to vector<64x64xf32>
    %cst_445 = arith.constant dense<0.000000e+00> : vector<64x8xf32>
    %629 = tpu.matmul %628, %626, %cst_445 {dimension_numbers = #tpu.dot_dimension_numbers<[1], [0], [0], [1], [0, 0, 1, 1], [], []>} : vector<64x64xf32>, vector<64x8xf32>, vector<64x8xf32> -> vector<64x8xf32>
    %c1_446 = arith.constant 1 : index
    %c0_447 = arith.constant 0 : index
    %c0_448 = arith.constant 0 : index
    %630 = vector.load %arg53[%c1_446, %c0_447, %c0_448] : memref<3x64x64xf32, #tpu.memory_space<vmem>>, vector<1x64x64xf32>
    %631 = vector.shape_cast %630 : vector<1x64x64xf32> to vector<64x64xf32>
    %cst_449 = arith.constant dense<0.000000e+00> : vector<64x8xf32>
    %632 = tpu.matmul %631, %623, %cst_449 {dimension_numbers = #tpu.dot_dimension_numbers<[1], [0], [0], [1], [0, 0, 1, 1], [], []>} : vector<64x64xf32>, vector<64x8xf32>, vector<64x8xf32> -> vector<64x8xf32>
    %633 = arith.addf %629, %632 : vector<64x8xf32>
    %c2_450 = arith.constant 2 : index
    %c0_451 = arith.constant 0 : index
    %c0_452 = arith.constant 0 : index
    %634 = vector.load %arg5[%c2_450, %c0_451, %c0_452] : memref<3x8x8xf32, #tpu.memory_space<vmem>>, vector<1x8x8xf32>
    %635 = vector.shape_cast %634 : vector<1x8x8xf32> to vector<8x8xf32>
    %cst_453 = arith.constant dense<0.000000e+00> : vector<64x8xf32>
    %636 = tpu.matmul %623, %635, %cst_453 {dimension_numbers = #tpu.dot_dimension_numbers<[1], [0], [0], [1], [0, 0, 1, 1], [], []>} : vector<64x8xf32>, vector<8x8xf32>, vector<64x8xf32> -> vector<64x8xf32>
    %c2_454 = arith.constant 2 : index
    %c0_455 = arith.constant 0 : index
    %c0_456 = arith.constant 0 : index
    %637 = vector.load %arg53[%c2_454, %c0_455, %c0_456] : memref<3x64x64xf32, #tpu.memory_space<vmem>>, vector<1x64x64xf32>
    %638 = vector.shape_cast %637 : vector<1x64x64xf32> to vector<64x64xf32>
    %cst_457 = arith.constant dense<0.000000e+00> : vector<64x8xf32>
    %639 = tpu.matmul %638, %636, %cst_457 {dimension_numbers = #tpu.dot_dimension_numbers<[1], [0], [0], [1], [0, 0, 1, 1], [], []>} : vector<64x64xf32>, vector<64x8xf32>, vector<64x8xf32> -> vector<64x8xf32>
    %640 = arith.addf %633, %639 : vector<64x8xf32>
    %c0_458 = arith.constant 0 : index
    %c0_459 = arith.constant 0 : index
    %c0_460 = arith.constant 0 : index
    %641 = vector.load %arg54[%c0_458, %c0_459, %c0_460] : memref<1x64x32xf32, #tpu.memory_space<vmem>>, vector<1x64x32xf32>
    %642 = vector.shape_cast %641 : vector<1x64x32xf32> to vector<64x32xf32>
    %c0_461 = arith.constant 0 : index
    %c0_462 = arith.constant 0 : index
    %c0_463 = arith.constant 0 : index
    %643 = vector.load %arg7[%c0_461, %c0_462, %c0_463] : memref<1x16x8xf32, #tpu.memory_space<vmem>>, vector<1x16x8xf32>
    %644 = vector.shape_cast %643 : vector<1x16x8xf32> to vector<16x8xf32>
    %cst_464 = arith.constant dense<0.000000e+00> : vector<32x8xf32>
    %645 = tpu.matmul %577, %644, %cst_464 {dimension_numbers = #tpu.dot_dimension_numbers<[1], [0], [0], [1], [0, 0, 1, 1], [], []>} : vector<32x16xf32>, vector<16x8xf32>, vector<32x8xf32> -> vector<32x8xf32>
    %cst_465 = arith.constant dense<0.000000e+00> : vector<64x8xf32>
    %646 = tpu.matmul %642, %645, %cst_465 {dimension_numbers = #tpu.dot_dimension_numbers<[1], [0], [0], [1], [0, 0, 1, 1], [], []>} : vector<64x32xf32>, vector<32x8xf32>, vector<64x8xf32> -> vector<64x8xf32>
    %647 = arith.addf %646, %640 : vector<64x8xf32>
    %cst_466 = arith.constant dense<0.000000e+00> : vector<64xf32>
    %648 = vector.multi_reduction <add>, %647, %cst_466 [1] : vector<64x8xf32> to vector<64xf32>
    %649 = vector.shape_cast %648 : vector<64xf32> to vector<64x1xf32>
    %cst_467 = arith.constant 8.000000e+00 : f32
    %650 = vector.broadcast %cst_467 : f32 to vector<64x1xf32>
    %651 = arith.divf %649, %650 : vector<64x1xf32>
    %652 = vector.broadcast %651 : vector<64x1xf32> to vector<64x8xf32>
    %653 = arith.subf %647, %652 : vector<64x8xf32>
    %654 = arith.mulf %653, %653 : vector<64x8xf32>
    %cst_468 = arith.constant dense<0.000000e+00> : vector<64xf32>
    %655 = vector.multi_reduction <add>, %654, %cst_468 [1] : vector<64x8xf32> to vector<64xf32>
    %656 = vector.shape_cast %655 : vector<64xf32> to vector<64x1xf32>
    %cst_469 = arith.constant 8.000000e+00 : f32
    %657 = vector.broadcast %cst_469 : f32 to vector<64x1xf32>
    %658 = arith.divf %656, %657 : vector<64x1xf32>
    %659 = vector.broadcast %651 : vector<64x1xf32> to vector<64x8xf32>
    %660 = arith.subf %647, %659 : vector<64x8xf32>
    %cst_470 = arith.constant 9.99999974E-6 : f32
    %661 = vector.broadcast %cst_470 : f32 to vector<64x1xf32>
    %662 = arith.addf %658, %661 : vector<64x1xf32>
    %663 = math.rsqrt %662 : vector<64x1xf32>
    %664 = vector.broadcast %663 : vector<64x1xf32> to vector<64x8xf32>
    %665 = arith.mulf %660, %664 : vector<64x8xf32>
    %c0_471 = arith.constant 0 : index
    %c0_472 = arith.constant 0 : index
    %666 = vector.load %arg55[%c0_471, %c0_472] : memref<64x1xf32, #tpu.memory_space<vmem>>, vector<64x1xf32>
    %667 = vector.broadcast %666 : vector<64x1xf32> to vector<64x8xf32>
    %668 = arith.mulf %665, %667 : vector<64x8xf32>
    %c0_473 = arith.constant 0 : index
    %c0_474 = arith.constant 0 : index
    %669 = vector.load %arg56[%c0_473, %c0_474] : memref<64x1xf32, #tpu.memory_space<vmem>>, vector<64x1xf32>
    %670 = vector.broadcast %669 : vector<64x1xf32> to vector<64x8xf32>
    %671 = arith.addf %668, %670 : vector<64x8xf32>
    %cst_475 = arith.constant 0.000000e+00 : f32
    %672 = vector.broadcast %cst_475 : f32 to vector<64x8xf32>
    %673 = arith.maximumf %671, %672 : vector<64x8xf32>
    %c0_476 = arith.constant 0 : index
    %c0_477 = arith.constant 0 : index
    %c0_478 = arith.constant 0 : index
    %674 = vector.load %arg5[%c0_476, %c0_477, %c0_478] : memref<3x8x8xf32, #tpu.memory_space<vmem>>, vector<1x8x8xf32>
    %675 = vector.shape_cast %674 : vector<1x8x8xf32> to vector<8x8xf32>
    %cst_479 = arith.constant dense<0.000000e+00> : vector<64x8xf32>
    %676 = tpu.matmul %673, %675, %cst_479 {dimension_numbers = #tpu.dot_dimension_numbers<[1], [0], [0], [1], [0, 0, 1, 1], [], []>} : vector<64x8xf32>, vector<8x8xf32>, vector<64x8xf32> -> vector<64x8xf32>
    %c0_480 = arith.constant 0 : index
    %c0_481 = arith.constant 0 : index
    %c0_482 = arith.constant 0 : index
    %677 = vector.load %arg57[%c0_480, %c0_481, %c0_482] : memref<3x64x64xf32, #tpu.memory_space<vmem>>, vector<1x64x64xf32>
    %678 = vector.shape_cast %677 : vector<1x64x64xf32> to vector<64x64xf32>
    %cst_483 = arith.constant dense<0.000000e+00> : vector<64x8xf32>
    %679 = tpu.matmul %678, %676, %cst_483 {dimension_numbers = #tpu.dot_dimension_numbers<[1], [0], [0], [1], [0, 0, 1, 1], [], []>} : vector<64x64xf32>, vector<64x8xf32>, vector<64x8xf32> -> vector<64x8xf32>
    %c1_484 = arith.constant 1 : index
    %c0_485 = arith.constant 0 : index
    %c0_486 = arith.constant 0 : index
    %680 = vector.load %arg57[%c1_484, %c0_485, %c0_486] : memref<3x64x64xf32, #tpu.memory_space<vmem>>, vector<1x64x64xf32>
    %681 = vector.shape_cast %680 : vector<1x64x64xf32> to vector<64x64xf32>
    %cst_487 = arith.constant dense<0.000000e+00> : vector<64x8xf32>
    %682 = tpu.matmul %681, %673, %cst_487 {dimension_numbers = #tpu.dot_dimension_numbers<[1], [0], [0], [1], [0, 0, 1, 1], [], []>} : vector<64x64xf32>, vector<64x8xf32>, vector<64x8xf32> -> vector<64x8xf32>
    %683 = arith.addf %679, %682 : vector<64x8xf32>
    %c2_488 = arith.constant 2 : index
    %c0_489 = arith.constant 0 : index
    %c0_490 = arith.constant 0 : index
    %684 = vector.load %arg5[%c2_488, %c0_489, %c0_490] : memref<3x8x8xf32, #tpu.memory_space<vmem>>, vector<1x8x8xf32>
    %685 = vector.shape_cast %684 : vector<1x8x8xf32> to vector<8x8xf32>
    %cst_491 = arith.constant dense<0.000000e+00> : vector<64x8xf32>
    %686 = tpu.matmul %673, %685, %cst_491 {dimension_numbers = #tpu.dot_dimension_numbers<[1], [0], [0], [1], [0, 0, 1, 1], [], []>} : vector<64x8xf32>, vector<8x8xf32>, vector<64x8xf32> -> vector<64x8xf32>
    %c2_492 = arith.constant 2 : index
    %c0_493 = arith.constant 0 : index
    %c0_494 = arith.constant 0 : index
    %687 = vector.load %arg57[%c2_492, %c0_493, %c0_494] : memref<3x64x64xf32, #tpu.memory_space<vmem>>, vector<1x64x64xf32>
    %688 = vector.shape_cast %687 : vector<1x64x64xf32> to vector<64x64xf32>
    %cst_495 = arith.constant dense<0.000000e+00> : vector<64x8xf32>
    %689 = tpu.matmul %688, %686, %cst_495 {dimension_numbers = #tpu.dot_dimension_numbers<[1], [0], [0], [1], [0, 0, 1, 1], [], []>} : vector<64x64xf32>, vector<64x8xf32>, vector<64x8xf32> -> vector<64x8xf32>
    %690 = arith.addf %683, %689 : vector<64x8xf32>
    %cst_496 = arith.constant dense<0.000000e+00> : vector<64xf32>
    %691 = vector.multi_reduction <add>, %690, %cst_496 [1] : vector<64x8xf32> to vector<64xf32>
    %692 = vector.shape_cast %691 : vector<64xf32> to vector<64x1xf32>
    %cst_497 = arith.constant 8.000000e+00 : f32
    %693 = vector.broadcast %cst_497 : f32 to vector<64x1xf32>
    %694 = arith.divf %692, %693 : vector<64x1xf32>
    %695 = vector.broadcast %694 : vector<64x1xf32> to vector<64x8xf32>
    %696 = arith.subf %690, %695 : vector<64x8xf32>
    %697 = arith.mulf %696, %696 : vector<64x8xf32>
    %cst_498 = arith.constant dense<0.000000e+00> : vector<64xf32>
    %698 = vector.multi_reduction <add>, %697, %cst_498 [1] : vector<64x8xf32> to vector<64xf32>
    %699 = vector.shape_cast %698 : vector<64xf32> to vector<64x1xf32>
    %cst_499 = arith.constant 8.000000e+00 : f32
    %700 = vector.broadcast %cst_499 : f32 to vector<64x1xf32>
    %701 = arith.divf %699, %700 : vector<64x1xf32>
    %702 = vector.broadcast %694 : vector<64x1xf32> to vector<64x8xf32>
    %703 = arith.subf %690, %702 : vector<64x8xf32>
    %cst_500 = arith.constant 9.99999974E-6 : f32
    %704 = vector.broadcast %cst_500 : f32 to vector<64x1xf32>
    %705 = arith.addf %701, %704 : vector<64x1xf32>
    %706 = math.rsqrt %705 : vector<64x1xf32>
    %707 = vector.broadcast %706 : vector<64x1xf32> to vector<64x8xf32>
    %708 = arith.mulf %703, %707 : vector<64x8xf32>
    %c0_501 = arith.constant 0 : index
    %c0_502 = arith.constant 0 : index
    %709 = vector.load %arg58[%c0_501, %c0_502] : memref<64x1xf32, #tpu.memory_space<vmem>>, vector<64x1xf32>
    %710 = vector.broadcast %709 : vector<64x1xf32> to vector<64x8xf32>
    %711 = arith.mulf %708, %710 : vector<64x8xf32>
    %c0_503 = arith.constant 0 : index
    %c0_504 = arith.constant 0 : index
    %712 = vector.load %arg59[%c0_503, %c0_504] : memref<64x1xf32, #tpu.memory_space<vmem>>, vector<64x1xf32>
    %713 = vector.broadcast %712 : vector<64x1xf32> to vector<64x8xf32>
    %714 = arith.addf %711, %713 : vector<64x8xf32>
    %cst_505 = arith.constant 0.000000e+00 : f32
    %715 = vector.broadcast %cst_505 : f32 to vector<64x8xf32>
    %716 = arith.maximumf %714, %715 : vector<64x8xf32>
    %c0_506 = arith.constant 0 : index
    %c0_507 = arith.constant 0 : index
    %c0_508 = arith.constant 0 : index
    %717 = vector.load %arg5[%c0_506, %c0_507, %c0_508] : memref<3x8x8xf32, #tpu.memory_space<vmem>>, vector<1x8x8xf32>
    %718 = vector.shape_cast %717 : vector<1x8x8xf32> to vector<8x8xf32>
    %cst_509 = arith.constant dense<0.000000e+00> : vector<64x8xf32>
    %719 = tpu.matmul %716, %718, %cst_509 {dimension_numbers = #tpu.dot_dimension_numbers<[1], [0], [0], [1], [0, 0, 1, 1], [], []>} : vector<64x8xf32>, vector<8x8xf32>, vector<64x8xf32> -> vector<64x8xf32>
    %c0_510 = arith.constant 0 : index
    %c0_511 = arith.constant 0 : index
    %c0_512 = arith.constant 0 : index
    %720 = vector.load %arg60[%c0_510, %c0_511, %c0_512] : memref<3x64x64xf32, #tpu.memory_space<vmem>>, vector<1x64x64xf32>
    %721 = vector.shape_cast %720 : vector<1x64x64xf32> to vector<64x64xf32>
    %cst_513 = arith.constant dense<0.000000e+00> : vector<64x8xf32>
    %722 = tpu.matmul %721, %719, %cst_513 {dimension_numbers = #tpu.dot_dimension_numbers<[1], [0], [0], [1], [0, 0, 1, 1], [], []>} : vector<64x64xf32>, vector<64x8xf32>, vector<64x8xf32> -> vector<64x8xf32>
    %c1_514 = arith.constant 1 : index
    %c0_515 = arith.constant 0 : index
    %c0_516 = arith.constant 0 : index
    %723 = vector.load %arg60[%c1_514, %c0_515, %c0_516] : memref<3x64x64xf32, #tpu.memory_space<vmem>>, vector<1x64x64xf32>
    %724 = vector.shape_cast %723 : vector<1x64x64xf32> to vector<64x64xf32>
    %cst_517 = arith.constant dense<0.000000e+00> : vector<64x8xf32>
    %725 = tpu.matmul %724, %716, %cst_517 {dimension_numbers = #tpu.dot_dimension_numbers<[1], [0], [0], [1], [0, 0, 1, 1], [], []>} : vector<64x64xf32>, vector<64x8xf32>, vector<64x8xf32> -> vector<64x8xf32>
    %726 = arith.addf %722, %725 : vector<64x8xf32>
    %c2_518 = arith.constant 2 : index
    %c0_519 = arith.constant 0 : index
    %c0_520 = arith.constant 0 : index
    %727 = vector.load %arg5[%c2_518, %c0_519, %c0_520] : memref<3x8x8xf32, #tpu.memory_space<vmem>>, vector<1x8x8xf32>
    %728 = vector.shape_cast %727 : vector<1x8x8xf32> to vector<8x8xf32>
    %cst_521 = arith.constant dense<0.000000e+00> : vector<64x8xf32>
    %729 = tpu.matmul %716, %728, %cst_521 {dimension_numbers = #tpu.dot_dimension_numbers<[1], [0], [0], [1], [0, 0, 1, 1], [], []>} : vector<64x8xf32>, vector<8x8xf32>, vector<64x8xf32> -> vector<64x8xf32>
    %c2_522 = arith.constant 2 : index
    %c0_523 = arith.constant 0 : index
    %c0_524 = arith.constant 0 : index
    %730 = vector.load %arg60[%c2_522, %c0_523, %c0_524] : memref<3x64x64xf32, #tpu.memory_space<vmem>>, vector<1x64x64xf32>
    %731 = vector.shape_cast %730 : vector<1x64x64xf32> to vector<64x64xf32>
    %cst_525 = arith.constant dense<0.000000e+00> : vector<64x8xf32>
    %732 = tpu.matmul %731, %729, %cst_525 {dimension_numbers = #tpu.dot_dimension_numbers<[1], [0], [0], [1], [0, 0, 1, 1], [], []>} : vector<64x64xf32>, vector<64x8xf32>, vector<64x8xf32> -> vector<64x8xf32>
    %733 = arith.addf %726, %732 : vector<64x8xf32>
    %734 = arith.addf %647, %733 : vector<64x8xf32>
    %cst_526 = arith.constant dense<0.000000e+00> : vector<64xf32>
    %735 = vector.multi_reduction <add>, %734, %cst_526 [1] : vector<64x8xf32> to vector<64xf32>
    %736 = vector.shape_cast %735 : vector<64xf32> to vector<64x1xf32>
    %cst_527 = arith.constant 8.000000e+00 : f32
    %737 = vector.broadcast %cst_527 : f32 to vector<64x1xf32>
    %738 = arith.divf %736, %737 : vector<64x1xf32>
    %739 = vector.broadcast %738 : vector<64x1xf32> to vector<64x8xf32>
    %740 = arith.subf %734, %739 : vector<64x8xf32>
    %741 = arith.mulf %740, %740 : vector<64x8xf32>
    %cst_528 = arith.constant dense<0.000000e+00> : vector<64xf32>
    %742 = vector.multi_reduction <add>, %741, %cst_528 [1] : vector<64x8xf32> to vector<64xf32>
    %743 = vector.shape_cast %742 : vector<64xf32> to vector<64x1xf32>
    %cst_529 = arith.constant 8.000000e+00 : f32
    %744 = vector.broadcast %cst_529 : f32 to vector<64x1xf32>
    %745 = arith.divf %743, %744 : vector<64x1xf32>
    %746 = vector.broadcast %738 : vector<64x1xf32> to vector<64x8xf32>
    %747 = arith.subf %734, %746 : vector<64x8xf32>
    %cst_530 = arith.constant 9.99999974E-6 : f32
    %748 = vector.broadcast %cst_530 : f32 to vector<64x1xf32>
    %749 = arith.addf %745, %748 : vector<64x1xf32>
    %750 = math.rsqrt %749 : vector<64x1xf32>
    %751 = vector.broadcast %750 : vector<64x1xf32> to vector<64x8xf32>
    %752 = arith.mulf %747, %751 : vector<64x8xf32>
    %c0_531 = arith.constant 0 : index
    %c0_532 = arith.constant 0 : index
    %753 = vector.load %arg61[%c0_531, %c0_532] : memref<64x1xf32, #tpu.memory_space<vmem>>, vector<64x1xf32>
    %754 = vector.broadcast %753 : vector<64x1xf32> to vector<64x8xf32>
    %755 = arith.mulf %752, %754 : vector<64x8xf32>
    %c0_533 = arith.constant 0 : index
    %c0_534 = arith.constant 0 : index
    %756 = vector.load %arg62[%c0_533, %c0_534] : memref<64x1xf32, #tpu.memory_space<vmem>>, vector<64x1xf32>
    %757 = vector.broadcast %756 : vector<64x1xf32> to vector<64x8xf32>
    %758 = arith.addf %755, %757 : vector<64x8xf32>
    %cst_535 = arith.constant 0.000000e+00 : f32
    %759 = vector.broadcast %cst_535 : f32 to vector<64x8xf32>
    %760 = arith.maximumf %758, %759 : vector<64x8xf32>
    %c0_536 = arith.constant 0 : index
    %c0_537 = arith.constant 0 : index
    %c0_538 = arith.constant 0 : index
    %761 = vector.load %arg5[%c0_536, %c0_537, %c0_538] : memref<3x8x8xf32, #tpu.memory_space<vmem>>, vector<1x8x8xf32>
    %762 = vector.shape_cast %761 : vector<1x8x8xf32> to vector<8x8xf32>
    %cst_539 = arith.constant dense<0.000000e+00> : vector<64x8xf32>
    %763 = tpu.matmul %760, %762, %cst_539 {dimension_numbers = #tpu.dot_dimension_numbers<[1], [0], [0], [1], [0, 0, 1, 1], [], []>} : vector<64x8xf32>, vector<8x8xf32>, vector<64x8xf32> -> vector<64x8xf32>
    %c0_540 = arith.constant 0 : index
    %c0_541 = arith.constant 0 : index
    %c0_542 = arith.constant 0 : index
    %764 = vector.load %arg63[%c0_540, %c0_541, %c0_542] : memref<3x64x64xf32, #tpu.memory_space<vmem>>, vector<1x64x64xf32>
    %765 = vector.shape_cast %764 : vector<1x64x64xf32> to vector<64x64xf32>
    %cst_543 = arith.constant dense<0.000000e+00> : vector<64x8xf32>
    %766 = tpu.matmul %765, %763, %cst_543 {dimension_numbers = #tpu.dot_dimension_numbers<[1], [0], [0], [1], [0, 0, 1, 1], [], []>} : vector<64x64xf32>, vector<64x8xf32>, vector<64x8xf32> -> vector<64x8xf32>
    %c1_544 = arith.constant 1 : index
    %c0_545 = arith.constant 0 : index
    %c0_546 = arith.constant 0 : index
    %767 = vector.load %arg63[%c1_544, %c0_545, %c0_546] : memref<3x64x64xf32, #tpu.memory_space<vmem>>, vector<1x64x64xf32>
    %768 = vector.shape_cast %767 : vector<1x64x64xf32> to vector<64x64xf32>
    %cst_547 = arith.constant dense<0.000000e+00> : vector<64x8xf32>
    %769 = tpu.matmul %768, %760, %cst_547 {dimension_numbers = #tpu.dot_dimension_numbers<[1], [0], [0], [1], [0, 0, 1, 1], [], []>} : vector<64x64xf32>, vector<64x8xf32>, vector<64x8xf32> -> vector<64x8xf32>
    %770 = arith.addf %766, %769 : vector<64x8xf32>
    %c2_548 = arith.constant 2 : index
    %c0_549 = arith.constant 0 : index
    %c0_550 = arith.constant 0 : index
    %771 = vector.load %arg5[%c2_548, %c0_549, %c0_550] : memref<3x8x8xf32, #tpu.memory_space<vmem>>, vector<1x8x8xf32>
    %772 = vector.shape_cast %771 : vector<1x8x8xf32> to vector<8x8xf32>
    %cst_551 = arith.constant dense<0.000000e+00> : vector<64x8xf32>
    %773 = tpu.matmul %760, %772, %cst_551 {dimension_numbers = #tpu.dot_dimension_numbers<[1], [0], [0], [1], [0, 0, 1, 1], [], []>} : vector<64x8xf32>, vector<8x8xf32>, vector<64x8xf32> -> vector<64x8xf32>
    %c2_552 = arith.constant 2 : index
    %c0_553 = arith.constant 0 : index
    %c0_554 = arith.constant 0 : index
    %774 = vector.load %arg63[%c2_552, %c0_553, %c0_554] : memref<3x64x64xf32, #tpu.memory_space<vmem>>, vector<1x64x64xf32>
    %775 = vector.shape_cast %774 : vector<1x64x64xf32> to vector<64x64xf32>
    %cst_555 = arith.constant dense<0.000000e+00> : vector<64x8xf32>
    %776 = tpu.matmul %775, %773, %cst_555 {dimension_numbers = #tpu.dot_dimension_numbers<[1], [0], [0], [1], [0, 0, 1, 1], [], []>} : vector<64x64xf32>, vector<64x8xf32>, vector<64x8xf32> -> vector<64x8xf32>
    %777 = arith.addf %770, %776 : vector<64x8xf32>
    %cst_556 = arith.constant dense<0.000000e+00> : vector<64xf32>
    %778 = vector.multi_reduction <add>, %777, %cst_556 [1] : vector<64x8xf32> to vector<64xf32>
    %779 = vector.shape_cast %778 : vector<64xf32> to vector<64x1xf32>
    %cst_557 = arith.constant 8.000000e+00 : f32
    %780 = vector.broadcast %cst_557 : f32 to vector<64x1xf32>
    %781 = arith.divf %779, %780 : vector<64x1xf32>
    %782 = vector.broadcast %781 : vector<64x1xf32> to vector<64x8xf32>
    %783 = arith.subf %777, %782 : vector<64x8xf32>
    %784 = arith.mulf %783, %783 : vector<64x8xf32>
    %cst_558 = arith.constant dense<0.000000e+00> : vector<64xf32>
    %785 = vector.multi_reduction <add>, %784, %cst_558 [1] : vector<64x8xf32> to vector<64xf32>
    %786 = vector.shape_cast %785 : vector<64xf32> to vector<64x1xf32>
    %cst_559 = arith.constant 8.000000e+00 : f32
    %787 = vector.broadcast %cst_559 : f32 to vector<64x1xf32>
    %788 = arith.divf %786, %787 : vector<64x1xf32>
    %789 = vector.broadcast %781 : vector<64x1xf32> to vector<64x8xf32>
    %790 = arith.subf %777, %789 : vector<64x8xf32>
    %cst_560 = arith.constant 9.99999974E-6 : f32
    %791 = vector.broadcast %cst_560 : f32 to vector<64x1xf32>
    %792 = arith.addf %788, %791 : vector<64x1xf32>
    %793 = math.rsqrt %792 : vector<64x1xf32>
    %794 = vector.broadcast %793 : vector<64x1xf32> to vector<64x8xf32>
    %795 = arith.mulf %790, %794 : vector<64x8xf32>
    %c0_561 = arith.constant 0 : index
    %c0_562 = arith.constant 0 : index
    %796 = vector.load %arg64[%c0_561, %c0_562] : memref<64x1xf32, #tpu.memory_space<vmem>>, vector<64x1xf32>
    %797 = vector.broadcast %796 : vector<64x1xf32> to vector<64x8xf32>
    %798 = arith.mulf %795, %797 : vector<64x8xf32>
    %c0_563 = arith.constant 0 : index
    %c0_564 = arith.constant 0 : index
    %799 = vector.load %arg65[%c0_563, %c0_564] : memref<64x1xf32, #tpu.memory_space<vmem>>, vector<64x1xf32>
    %800 = vector.broadcast %799 : vector<64x1xf32> to vector<64x8xf32>
    %801 = arith.addf %798, %800 : vector<64x8xf32>
    %cst_565 = arith.constant 0.000000e+00 : f32
    %802 = vector.broadcast %cst_565 : f32 to vector<64x8xf32>
    %803 = arith.maximumf %801, %802 : vector<64x8xf32>
    %c0_566 = arith.constant 0 : index
    %c0_567 = arith.constant 0 : index
    %c0_568 = arith.constant 0 : index
    %804 = vector.load %arg5[%c0_566, %c0_567, %c0_568] : memref<3x8x8xf32, #tpu.memory_space<vmem>>, vector<1x8x8xf32>
    %805 = vector.shape_cast %804 : vector<1x8x8xf32> to vector<8x8xf32>
    %cst_569 = arith.constant dense<0.000000e+00> : vector<64x8xf32>
    %806 = tpu.matmul %803, %805, %cst_569 {dimension_numbers = #tpu.dot_dimension_numbers<[1], [0], [0], [1], [0, 0, 1, 1], [], []>} : vector<64x8xf32>, vector<8x8xf32>, vector<64x8xf32> -> vector<64x8xf32>
    %c0_570 = arith.constant 0 : index
    %c0_571 = arith.constant 0 : index
    %c0_572 = arith.constant 0 : index
    %807 = vector.load %arg66[%c0_570, %c0_571, %c0_572] : memref<3x64x64xf32, #tpu.memory_space<vmem>>, vector<1x64x64xf32>
    %808 = vector.shape_cast %807 : vector<1x64x64xf32> to vector<64x64xf32>
    %cst_573 = arith.constant dense<0.000000e+00> : vector<64x8xf32>
    %809 = tpu.matmul %808, %806, %cst_573 {dimension_numbers = #tpu.dot_dimension_numbers<[1], [0], [0], [1], [0, 0, 1, 1], [], []>} : vector<64x64xf32>, vector<64x8xf32>, vector<64x8xf32> -> vector<64x8xf32>
    %c1_574 = arith.constant 1 : index
    %c0_575 = arith.constant 0 : index
    %c0_576 = arith.constant 0 : index
    %810 = vector.load %arg66[%c1_574, %c0_575, %c0_576] : memref<3x64x64xf32, #tpu.memory_space<vmem>>, vector<1x64x64xf32>
    %811 = vector.shape_cast %810 : vector<1x64x64xf32> to vector<64x64xf32>
    %cst_577 = arith.constant dense<0.000000e+00> : vector<64x8xf32>
    %812 = tpu.matmul %811, %803, %cst_577 {dimension_numbers = #tpu.dot_dimension_numbers<[1], [0], [0], [1], [0, 0, 1, 1], [], []>} : vector<64x64xf32>, vector<64x8xf32>, vector<64x8xf32> -> vector<64x8xf32>
    %813 = arith.addf %809, %812 : vector<64x8xf32>
    %c2_578 = arith.constant 2 : index
    %c0_579 = arith.constant 0 : index
    %c0_580 = arith.constant 0 : index
    %814 = vector.load %arg5[%c2_578, %c0_579, %c0_580] : memref<3x8x8xf32, #tpu.memory_space<vmem>>, vector<1x8x8xf32>
    %815 = vector.shape_cast %814 : vector<1x8x8xf32> to vector<8x8xf32>
    %cst_581 = arith.constant dense<0.000000e+00> : vector<64x8xf32>
    %816 = tpu.matmul %803, %815, %cst_581 {dimension_numbers = #tpu.dot_dimension_numbers<[1], [0], [0], [1], [0, 0, 1, 1], [], []>} : vector<64x8xf32>, vector<8x8xf32>, vector<64x8xf32> -> vector<64x8xf32>
    %c2_582 = arith.constant 2 : index
    %c0_583 = arith.constant 0 : index
    %c0_584 = arith.constant 0 : index
    %817 = vector.load %arg66[%c2_582, %c0_583, %c0_584] : memref<3x64x64xf32, #tpu.memory_space<vmem>>, vector<1x64x64xf32>
    %818 = vector.shape_cast %817 : vector<1x64x64xf32> to vector<64x64xf32>
    %cst_585 = arith.constant dense<0.000000e+00> : vector<64x8xf32>
    %819 = tpu.matmul %818, %816, %cst_585 {dimension_numbers = #tpu.dot_dimension_numbers<[1], [0], [0], [1], [0, 0, 1, 1], [], []>} : vector<64x64xf32>, vector<64x8xf32>, vector<64x8xf32> -> vector<64x8xf32>
    %820 = arith.addf %813, %819 : vector<64x8xf32>
    %821 = arith.addf %734, %820 : vector<64x8xf32>
    %cst_586 = arith.constant dense<0.000000e+00> : vector<64xf32>
    %822 = vector.multi_reduction <add>, %821, %cst_586 [1] : vector<64x8xf32> to vector<64xf32>
    %823 = vector.shape_cast %822 : vector<64xf32> to vector<64x1xf32>
    %cst_587 = arith.constant 8.000000e+00 : f32
    %824 = vector.broadcast %cst_587 : f32 to vector<64x1xf32>
    %825 = arith.divf %823, %824 : vector<64x1xf32>
    %826 = vector.broadcast %825 : vector<64x1xf32> to vector<64x8xf32>
    %827 = arith.subf %821, %826 : vector<64x8xf32>
    %828 = arith.mulf %827, %827 : vector<64x8xf32>
    %cst_588 = arith.constant dense<0.000000e+00> : vector<64xf32>
    %829 = vector.multi_reduction <add>, %828, %cst_588 [1] : vector<64x8xf32> to vector<64xf32>
    %830 = vector.shape_cast %829 : vector<64xf32> to vector<64x1xf32>
    %cst_589 = arith.constant 8.000000e+00 : f32
    %831 = vector.broadcast %cst_589 : f32 to vector<64x1xf32>
    %832 = arith.divf %830, %831 : vector<64x1xf32>
    %833 = vector.broadcast %825 : vector<64x1xf32> to vector<64x8xf32>
    %834 = arith.subf %821, %833 : vector<64x8xf32>
    %cst_590 = arith.constant 9.99999974E-6 : f32
    %835 = vector.broadcast %cst_590 : f32 to vector<64x1xf32>
    %836 = arith.addf %832, %835 : vector<64x1xf32>
    %837 = math.rsqrt %836 : vector<64x1xf32>
    %838 = vector.broadcast %837 : vector<64x1xf32> to vector<64x8xf32>
    %839 = arith.mulf %834, %838 : vector<64x8xf32>
    %c0_591 = arith.constant 0 : index
    %c0_592 = arith.constant 0 : index
    %840 = vector.load %arg67[%c0_591, %c0_592] : memref<64x1xf32, #tpu.memory_space<vmem>>, vector<64x1xf32>
    %841 = vector.broadcast %840 : vector<64x1xf32> to vector<64x8xf32>
    %842 = arith.mulf %839, %841 : vector<64x8xf32>
    %c0_593 = arith.constant 0 : index
    %c0_594 = arith.constant 0 : index
    %843 = vector.load %arg68[%c0_593, %c0_594] : memref<64x1xf32, #tpu.memory_space<vmem>>, vector<64x1xf32>
    %844 = vector.broadcast %843 : vector<64x1xf32> to vector<64x8xf32>
    %845 = arith.addf %842, %844 : vector<64x8xf32>
    %cst_595 = arith.constant 0.000000e+00 : f32
    %846 = vector.broadcast %cst_595 : f32 to vector<64x8xf32>
    %847 = arith.maximumf %845, %846 : vector<64x8xf32>
    %c0_596 = arith.constant 0 : index
    %c0_597 = arith.constant 0 : index
    %848 = vector.load %arg8[%c0_596, %c0_597] : memref<8x2xf32, #tpu.memory_space<vmem>>, vector<8x2xf32>
    %cst_598 = arith.constant dense<0.000000e+00> : vector<64x2xf32>
    %849 = tpu.matmul %847, %848, %cst_598 {dimension_numbers = #tpu.dot_dimension_numbers<[1], [0], [0], [1], [0, 0, 1, 1], [], []>} : vector<64x8xf32>, vector<8x2xf32>, vector<64x2xf32> -> vector<64x2xf32>
    %c0_599 = arith.constant 0 : index
    %c0_600 = arith.constant 0 : index
    %850 = vector.load %arg69[%c0_599, %c0_600] : memref<256x64xf32, #tpu.memory_space<vmem>>, vector<256x64xf32>
    %cst_601 = arith.constant dense<0.000000e+00> : vector<256x2xf32>
    %851 = tpu.matmul %850, %849, %cst_601 {dimension_numbers = #tpu.dot_dimension_numbers<[1], [0], [0], [1], [0, 0, 1, 1], [], []>} : vector<256x64xf32>, vector<64x2xf32>, vector<256x2xf32> -> vector<256x2xf32>
    %c0_602 = arith.constant 0 : index
    %c0_603 = arith.constant 0 : index
    %852 = vector.load %arg70[%c0_602, %c0_603] : memref<256x1xf32, #tpu.memory_space<vmem>>, vector<256x1xf32>
    %853 = vector.broadcast %852 : vector<256x1xf32> to vector<256x2xf32>
    %854 = arith.addf %851, %853 : vector<256x2xf32>
    %c0_604 = arith.constant 0 : index
    %c0_605 = arith.constant 0 : index
    %855 = vector.load %arg71[%c0_604, %c0_605] : memref<256x2xf32, #tpu.memory_space<vmem>>, vector<256x2xf32>
    tpu.vector_store %arg71[%c0_604, %c0_605], %854 {strides = array<i32>} : memref<256x2xf32, #tpu.memory_space<vmem>>, vector<256x2xf32>,
    return
  }
}

</mosaic_0001>

<bundles_post_ra>
// kernel: _lambda_.1
= control target key start
LH: loop header
LB: loop body
LE: loop exit
PB: predicated region body
PF: predicated region fallthrough
CT: control target
= control target key end

     0   :  { %v17980_v0 = vmov 0.0|0.0   ;;  %s17981_s3 = smov 1   ;;  %vm17982_vm0 = vmmov 0   ;;  %v17983_v1 = vmov 0.0   ;;  %s17984_s10 = smov 9   ;;  %vm381_vm1 = vcmask 1043456   ;;  %s20441_s0 = inlined_call_operand.smem [shape: u32[72], index: -1, kind: input, shape index: {}] }
   0x1   :  { %16837 = vmatprep.subr.bf16.mxu0 %v17980_v0  ;;  %s18063_s6 = sld [smem:[%s20441_s0 + %s17981_s3]]   ;;  %15391 = vmatprep.mubr.msk.f32.mxu0 %vm17982_vm0, %v17983_v1  ;;  %vm374_vm2 = vcmask 31744   ;;  %vm295_vm3 = vcmask 261120   ;;  %v17985_v25 = vmov 0   ;;  %s17986_s14 = smov 10   ;;  %vm850_vm4 = vcmask 130048  }
   0x2   :  { %s1_s9 = sld [smem:[%s20441_s0]]   ;;  %17803 = vset.pattern.permute.xlu1 %v17985_v25  ;;  %s17987_s18 = smov 11   ;;  %17802 = vset.pattern.permute.xlu0 %v17985_v25  ;;  %vm8213_vm5 = vcmask 64512   ;;  %vm8586_vm6 = vcmask 523264   ;;  %vm13753_vm7 = vcmask 15360  }
   0x3   :  { %s18072_s13 = sld [smem:[%s20441_s0 + %s17984_s10]]   ;;  %s17988_s22 = smov 12  }
   0x4   :  { %s13799_s17 = sld [smem:[%s20441_s0 + %s17986_s14]]   ;;  %s17989_s26 = smov 13  }
   0x5   :  { %s13800_s21 = sld [smem:[%s20441_s0 + %s17987_s18]]   ;;  %s17990_s30 = smov 14  }
   0x6   :  { %s18132_s25 = sld [smem:[%s20441_s0 + %s17988_s22]]   ;;  %s17991_s4 = smov 15  }
   0x7   :  { %v291_v2 = vld [vmem:[%s18063_s6] sm:$0xff]  ;;  %v292_v3 = vld [vmem:[%s18063_s6 + $0x8] sm:$0xff]  ;;  %v293_v4 = vld [vmem:[%s18063_s6 + $0x10] sm:$0xff]  ;;  %s13802_s29 = sld [smem:[%s20441_s0 + %s17989_s26]]   ;;  %s17992_s8 = smov 16  }
   0x8   :  { %v18077_v5 = vpack.c.bf16 %v292_v3, %v291_v2  ;;  %v294_v6 = vld [vmem:[%s18063_s6 + $0x18] sm:$0xff]  ;;  %v290_v7 = vld [vmem:[%s1_s9] sm:$0xf]  ;;  %v13871_v13 = vld [vmem:[%s18063_s6 + $0x48] sm:$0xff]  ;;  %s13803_s3 = sld [smem:[%s20441_s0 + %s17990_s30]]   ;;  %s17993_s12 = smov 17  }
   0x9   :  { %v13862_v8 = vld [vmem:[%s18072_s13 + $0x10] sm:$0xff]  ;;  %15394 = vmatprep.subr.msk.mxu1 %vm381_vm1, %v290_v7  ;;  %v13863_v9 = vld [vmem:[%s18072_s13 + $0x18] sm:$0xff]  ;;  %v18085_v10 = vpack.c.bf16 %v294_v6, %v293_v4  ;;  %v369_v11 = vld [vmem:[%s18072_s13] sm:$0xff]  ;;  %s18176_s7 = sld [smem:[%s20441_s0 + %s17991_s4]]   ;;  %s17994_s16 = smov 18  }
   0xa   :  { %15396 = vmatprep.mubr.msk.f32.mxu1 %vm374_vm2, %v13862_v8  ;;  %16839 = vmatpush3.bf16.msra.mxu0 %v18077_v5  ;;  %v13870_v12 = vld [vmem:[%s18063_s6 + $0x40] sm:$0xff]  ;;  %v370_v15 = vld [vmem:[%s18072_s13 + $0x8] sm:$0xff]  ;;  %v13872_v18 = vld [vmem:[%s18063_s6 + $0x50] sm:$0xff]  ;;  %s13805_s11 = sld [smem:[%s20441_s0 + %s17992_s8]]   ;;  %s17995_s20 = smov 19  }
   0xb   :  { %15395 = vmatpush3.msk.msra.mxu1 %vm381_vm1, %v290_v7  ;;  %16840 = vmatprep.subr.bf16.mxu0 %v17980_v0  ;;  %v18100_v16 = vpack.c.bf16 %v13871_v13, %v13870_v12  ;;  %v13873_v19 = vld [vmem:[%s18063_s6 + $0x58] sm:$0xff]  ;;  %v13875_v21 = vld [vmem:[%s18072_s13 + $0x20] sm:$0xff]  ;;  %v13876_v23 = vld [vmem:[%s18072_s13 + $0x28] sm:$0xff]  ;;  %s13806_s15 = sld [smem:[%s20441_s0 + %s17993_s12]]   ;;  %s17996_s24 = smov 20  }
   0xc   :  { %15397 = vmatmul.mubr.msk.f32.vlgmr.msra.gmra.mrb[0].mxu1 %vm374_vm2, %v13863_v9  ;;  %v18108_v20 = vpack.c.bf16 %v13873_v19, %v13872_v18  ;;  %v735_v26 = vld [vmem:[%s13799_s17 + $0x8] sm:$0xff]  ;;  %v748_v27 = vld [vmem:[%s13800_s21] sm:$0xff]  ;;  %v13882_v44 = vld [vmem:[%s18132_s25 + $0x10] sm:$0xff]  ;;  %s13807_s19 = sld [smem:[%s20441_s0 + %s17994_s16]]   ;;  %s17997_s28 = smov 21  }
   0xd   :  { %15401 = vmatprep.mubr.msk.f32.mxu1 %vm374_vm2, %v369_v11  ;;  %743 = vperm.xlu1 %17803, %v735_v26   ;;  %v734_v32 = vld [vmem:[%s13799_s17] sm:$0xff]  ;;  %v749_v43 = vld [vmem:[%s13800_s21 + $0x8] sm:$0xff]  ;;  %v13883_v2 = vld [vmem:[%s18132_s25 + $0x18] sm:$0xff]  ;;  %s18230_s23 = sld [smem:[%s20441_s0 + %s17995_s20]]   ;;  %s17998_s2 = smov 22  }
   0xe   :  { %16842 = vmatpush3.bf16.msra.mxu0 %v18085_v10  ;;  %v845_v3 = vld [vmem:[%s18132_s25] sm:$0xff]  ;;  %v846_v9 = vld [vmem:[%s18132_s25 + $0x8] sm:$0xff]  ;;  %s13809_s27 = sld [smem:[%s20441_s0 + %s17996_s24]]   ;;  %s17999_s6 = smov 23  }
   0xf   :  { %16850 = vmatprep.subr.bf16.mxu0 %v18077_v5  ;;  %v13890_v12 = vld [vmem:[%s18132_s25 + $0x20] sm:$0xff]  ;;  %v1201_v26 = vld [vmem:[%s13802_s29 + $0x8] sm:$0xff]  ;;  %s13810_s1 = sld [smem:[%s20441_s0 + %s17997_s28]]   ;;  %s18000_s10 = smov 24  }
  0x10   :  { %v1200_v25 = vld [vmem:[%s13802_s29] sm:$0xff]  ;;  %s18269_s5 = sld [smem:[%s20441_s0 + %s17998_s2]]   ;;  %s18001_s14 = smov 25  }
  0x11   :  { %15392 = vmatmul.mubr.msk.f32.vlgmr.msra.gmra.mrb[0].mxu0 %vm295_vm3, %v290_v7  ;;  %752 = vperm.xlu1 %17803, %v748_v27   ;;  %v1214_v27 = vld [vmem:[%s13803_s3] sm:$0xff]  ;;  %s13812_s9 = sld [smem:[%s20441_s0 + %s17999_s6]]   ;;  %s18002_s18 = smov 26  }
  0x12   :  { %16852 = vmatpush3.bf16.msra.mxu0 %v18077_v5  ;;  %s13813_s13 = sld [smem:[%s20441_s0 + %s18000_s10]]   ;;  %s18003_s22 = smov 27  }
  0x13   :  { %16854 = vmatprep.subr.bf16.mxu0 %v18085_v10  ;;  %s18318_s17 = sld [smem:[%s20441_s0 + %s18001_s14]]   ;;  %s18004_s26 = smov 28  }
  0x14   :  { %s13815_s21 = sld [smem:[%s20441_s0 + %s18002_s18]]   ;;  %s18005_s30 = smov 29  }
  0x15   :  { %s18357_s29 = sld [smem:[%s20441_s0 + %s18004_s26]]   ;;  %s18006_s4 = smov 30  }
  0x16   :  { %16856 = vmatpush3.bf16.msra.mxu0 %v18085_v10  ;;  %s18007_s8 = smov 2   ;;  %s18008_s12 = smov 31  }
  0x17   :  { %s18009_s16 = smov 32   ;;  %s18010_s20 = smov 33  }
  0x18   :  { %s18011_s24 = smov 3   ;;  %s18012_s28 = smov 6  }
  0x19   :  { %s18013_s2 = smov 34   ;;  %s18014_s6 = smov 35  }
  0x1a   :  { %s18015_s10 = smov 36   ;;  %s18016_s14 = smov 37  }
  0x1b   :  { %s18017_s18 = smov 38   ;;  %s18019_s26 = smov 40  }
  0x8c   :  { %v744_v45 = vpop.permute.xlu1 %743 }
  0x90   :  { %v753_v46 = vpop.permute.xlu1 %752 }
  0xe4   :  { %v365_v14 = vpop.f32.mrb[0].mxu0 }
  0xe5   :  { %v15393_v17 = vpop.f32.mrb[1].mxu0  ;;  %15399 = vmatprep.subr.msk.mxu1 %vm381_vm1, %v365_v14 }
  0xe6   :  { %15400 = vmatpush3.msk.msra.mxu1 %vm381_vm1, %v365_v14  ;;  %v13891_v17 = vld [vmem:[%s18132_s25 + $0x28] sm:$0xff]  ;;  %s13816_s25 = sld [smem:[%s20441_s0 + %s18003_s22]]   ;;  %s18018_s22 = smov 39  }
  0xe7   :  { %16843 = vmatprep.subr.bf16.mxu1 %v17980_v0  ;;  %15402 = vmatmul.mubr.msk.f32.vlgmr.msra.gmra.mrb[0].mxu1 %vm374_vm2, %v370_v15 }
  0xe8   :  { %16845 = vmatpush3.bf16.msra.mxu1 %v18100_v16  ;;  %15412 = vmatprep.mubr.msk.f32.mxu1 %vm17982_vm0, %v17983_v1 }
  0xe9   :  { %16846 = vmatprep.subr.bf16.mxu1 %v17980_v0 }
  0xec   :  { %16848 = vmatpush3.bf16.msra.mxu1 %v18108_v20 }
  0xef   :  { %15413 = vmatmul.mubr.msk.f32.vlgmr.msra.gmra.mrb[2].mxu1 %vm295_vm3, %v290_v7 }
  0xf0   :  { %15417 = vmatprep.mubr.msk.f32.mxu1 %vm374_vm2, %v13875_v21 }
 0x1c2   :  { %v614_v22 = vpop.f32.mrb[2].mxu1 }
 0x1c3   :  { %v15414_v24 = vpop.f32.mrb[3].mxu1  ;;  %15415 = vmatprep.subr.msk.mxu1 %vm381_vm1, %v614_v22 }
 0x1c4   :  { %15416 = vmatpush3.msk.msra.mxu1 %vm381_vm1, %v614_v22 }
 0x1c5   :  { %15418 = vmatmul.mubr.msk.f32.vlgmr.msra.gmra.mrb[0].mxu1 %vm374_vm2, %v13876_v23 }
 0x1c6   :  { %15435 = vmatprep.mubr.msk.f32.mxu1 %vm850_vm4, %v13882_v44 }
 0x298   :  { %v15419_v28 = vpop.f32.mrb[0].mxu1 }
 0x299   :  { %v696_v29 = vpop.f32.mrb[1].mxu1  ;;  %v710_v31 = vsel %vm295_vm3, %v15419_v28, 0.0 }
 0x29a   :  { %v707_v30 = vsel %vm295_vm3, %v696_v29, 0.0 }
 0x29b   :  { %708 = vadd.xlane.f32.xlu0 %v707_v30 }
 0x29f   :  { %711 = vadd.xlane.f32.xlu0 %v710_v31 }
 0x2b5   :  { %738 = vperm.xlu0 %17802, %v734_v32  }
 0x328   :  { %v709_v33 = vpop.xlane.xlu0 %708 }
 0x329   :  { %v714_v34 = vmul.f32 0.03125, %v709_v33 }
 0x32b   :  { %v716_v37 = vsub.f32 %v696_v29, %v714_v34 }
 0x32c   :  { %v712_v35 = vpop.xlane.xlu0 %711 }
 0x32d   :  { %v715_v36 = vmul.f32 0.03125, %v712_v35  ;;  %v718_v41 = vmul.f32 %v716_v37, %v716_v37 }
 0x32f   :  { %v717_v38 = vsub.f32 %v15419_v28, %v715_v36  ;;  %v720_v42 = vsel %vm295_vm3, %v718_v41, 0.0 }
 0x331   :  { %v719_v39 = vmul.f32 %v717_v38, %v717_v38 }
 0x333   :  { %v723_v40 = vsel %vm295_vm3, %v719_v39, 0.0  ;;  %v13896_v39 = vld [vmem:[%s18176_s7 + $0x10] sm:$0xff] }
 0x334   :  { %724 = vadd.xlane.f32.xlu1 %v723_v40  ;;  %v739_v57 = vpop.permute.xlu0 %738 }
 0x338   :  { %721 = vadd.xlane.f32.xlu1 %v720_v42 }
 0x349   :  { %757 = vperm.xlu1 %17803, %v749_v43  }
 0x3c1   :  { %v725_v47 = vpop.xlane.xlu1 %724 }
 0x3c2   :  { %v727_v48 = vmul.f32 0.03125, %v725_v47 }
 0x3c4   :  { %v729_v49 = vadd.f32 1e-05, %v727_v48 }
 0x3c5   :  { %v722_v50 = vpop.xlane.xlu1 %721 }
 0x3c6   :  { %17804 = vrsqrt.f32 %v729_v49  ;;  %v726_v51 = vmul.f32 0.03125, %v722_v50 }
 0x3c8   :  { %v728_v52 = vadd.f32 1e-05, %v726_v51 }
 0x3c9   :  { %v758_v59 = vpop.permute.xlu1 %757 }
 0x3ca   :  { %17806 = vrsqrt.f32 %v728_v52 }
 0x3d0   :  { %v17805_v53 = vpop.eup %17804 }
 0x3d1   :  { %v733_v54 = vmul.f32 %v17805_v53, %v717_v38  ;;  %v1215_v38 = vld [vmem:[%s13803_s3 + $0x8] sm:$0xff]  ;;  %s13818_s3 = sld [smem:[%s20441_s0 + %s18005_s30]]   ;;  %s18020_s30 = smov 41  }
 0x3d3   :  { %v747_v55 = vmul.f32 %v744_v45, %v733_v54 }
 0x3d4   :  { %v17807_v56 = vpop.eup %17806 }
 0x3d5   :  { %v732_v58 = vmul.f32 %v17807_v56, %v716_v37  ;;  %v761_v60 = vadd.f32 %v758_v59, %v747_v55 }
 0x3d7   :  { %v746_v61 = vmul.f32 %v739_v57, %v732_v58  ;;  %v763_v63 = vmax.f32 %v761_v60, 0.0 }
 0x3d9   :  { %v760_v62 = vadd.f32 %v753_v46, %v746_v61  ;;  %v13897_v61 = vld [vmem:[%s18176_s7 + $0x18] sm:$0xff] }
 0x3db   :  { %v762_v0 = vmax.f32 %v760_v62, 0.0  ;;  %v1311_v62 = vld [vmem:[%s18176_s7] sm:$0xff] }
 0x3dd   :  { %15428 = vmatprep.mubr.msk.f32.mxu0 %vm295_vm3, %v762_v0  ;;  %v18137_v1 = vpack.c.bf16 %v763_v63, %v762_v0 }
 0x3de   :  { %15429 = vmatmul.mubr.msk.f32.vlgmr.msra.gmra.mrb[2].mxu0 %vm295_vm3, %v763_v63 }
 0x3df   :  { %16858 = vmatprep.subr.bf16.mxu1 %v18137_v1  ;;  %15442 = vmatprep.mubr.msk.f32.mxu0 %vm850_vm4, %v845_v3  ;;  %v1312_v3 = vld [vmem:[%s18176_s7 + $0x8] sm:$0xff] }
 0x3e0   :  { %16860 = vmatpush3.bf16.msra.mxu1 %v18137_v1 }
 0x3e1   :  { %16866 = vmatprep.subr.bf16.mxu1 %v18100_v16 }
 0x3e3   :  { %15436 = vmatmul.mubr.msk.f32.vlgmr.msra.gmra.mrb[4].mxu1 %vm850_vm4, %v13883_v2 }
 0x3e4   :  { %16868 = vmatpush3.bf16.msra.mxu1 %v18100_v16  ;;  %15453 = vmatprep.mubr.msk.f32.mxu1 %vm295_vm3, %v762_v0 }
 0x3e5   :  { %16870 = vmatprep.subr.bf16.mxu1 %v18108_v20 }
 0x3e8   :  { %16872 = vmatpush3.bf16.msra.mxu1 %v18108_v20 }
 0x3e9   :  { %16878 = vmatprep.subr.bf16.mxu1 %v18077_v5 }
 0x3eb   :  { %15454 = vmatmul.mubr.msk.f32.vlgmr.msra.gmra.mrb[6].mxu1 %vm295_vm3, %v763_v63 }
 0x3ec   :  { %16880 = vmatpush3.bf16.msra.mxu1 %v18077_v5 }
 0x3ed   :  { %16882 = vmatprep.subr.bf16.mxu1 %v18085_v10 }
 0x3f0   :  { %16884 = vmatpush3.bf16.msra.mxu1 %v18085_v10 }
 0x3f1   :  { %16894 = vmatprep.subr.bf16.mxu1 %v18100_v16 }
 0x4b1   :  { %v15430_v4 = vpop.f32.mrb[2].mxu0 }
 0x4b2   :  { %v836_v6 = vpop.f32.mrb[3].mxu0 }
 0x4b3   :  { %v16861_v7 = vpack.c.bf16 %v15430_v4, %v836_v6  ;;  %v13904_v4 = vld [vmem:[%s18176_s7 + $0x20] sm:$0xff] }
 0x4b5   :  { %16862 = vmatprep.subr.bf16.mxu0 %v16861_v7 }
 0x4b6   :  { %16864 = vmatpush3.bf16.msra.mxu0 %v16861_v7  ;;  %v15437_v8 = vpop.f32.mrb[4].mxu1 }
 0x4b7   :  { %v923_v11 = vpop.f32.mrb[5].mxu1 }
 0x4b9   :  { %15443 = vmatmul.mubr.msk.f32.vlgmr.msra.gmra.mrb[4].mxu0 %vm850_vm4, %v846_v9  ;;  %v13905_v9 = vld [vmem:[%s18176_s7 + $0x28] sm:$0xff]  ;;  %s13819_s7 = sld [smem:[%s20441_s0 + %s18006_s4]]   ;;  %s18021_s4 = smov 42  }
 0x4ba   :  { %15460 = vmatprep.mubr.msk.f32.mxu0 %vm850_vm4, %v13890_v12  ;;  %v1640_v12 = vld [vmem:[%s13805_s11 + $0x8] sm:$0xff] }
 0x4be   :  { %v15455_v13 = vpop.f32.mrb[6].mxu1 }
 0x4bf   :  { %v1079_v14 = vpop.f32.mrb[7].mxu1 }
 0x4c0   :  { %v16873_v15 = vpack.c.bf16 %v15455_v13, %v1079_v14 }
 0x4c2   :  { %16874 = vmatprep.subr.bf16.mxu0 %v16873_v15 }
 0x4c3   :  { %16876 = vmatpush3.bf16.msra.mxu0 %v16873_v15 }
 0x4c6   :  { %15461 = vmatmul.mubr.msk.f32.vlgmr.msra.gmra.mrb[4].mxu0 %vm850_vm4, %v13891_v17 }
 0x4c7   :  { %15478 = vmatprep.mubr.msk.f32.mxu0 %vm850_vm4, %v13896_v39 }
 0x599   :  { %v15462_v18 = vpop.f32.mrb[4].mxu0 }
 0x59a   :  { %v17541_v19 = vadd.f32 %v15462_v18, %v15437_v8  ;;  %v1163_v21 = vpop.f32.mrb[5].mxu0  ;;  %v1748_v18 = vld [vmem:[%s13806_s15] sm:$0xff] }
 0x59b   :  { %v17542_v22 = vadd.f32 %v1163_v21, %v923_v11  ;;  %v1639_v11 = vld [vmem:[%s13805_s11] sm:$0xff]  ;;  %s18393_s11 = sld [smem:[%s20441_s0 + %s18007_s8]]   ;;  %s18022_s8 = smov 43  }
 0x59c   :  { %v1177_v23 = vsel %vm295_vm3, %v17541_v19, 0.0 }
 0x59d   :  { %1178 = vadd.xlane.f32.xlu0 %v1177_v23  ;;  %v1174_v24 = vsel %vm295_vm3, %v17542_v22, 0.0 }
 0x59e   :  { %1175 = vadd.xlane.f32.xlu1 %v1174_v24 }
 0x5af   :  { %1204 = vperm.xlu1 %17803, %v1200_v25  }
 0x5b3   :  { %1209 = vperm.xlu0 %17802, %v1201_v26   ;;  %1218 = vperm.xlu1 %17803, %v1214_v27  }
 0x62a   :  { %v1179_v28 = vpop.xlane.xlu0 %1178 }
 0x62b   :  { %v1181_v29 = vmul.f32 0.03125, %v1179_v28  ;;  %v1176_v30 = vpop.xlane.xlu1 %1175 }
 0x62c   :  { %v1180_v31 = vmul.f32 0.03125, %v1176_v30  ;;  %v1762_v30 = vld [vmem:[%s13807_s19] sm:$0xff] }
 0x62d   :  { %v1183_v32 = vsub.f32 %v17541_v19, %v1181_v29 }
 0x62e   :  { %v1182_v33 = vsub.f32 %v17542_v22, %v1180_v31  ;;  %v1763_v31 = vld [vmem:[%s13807_s19 + $0x8] sm:$0xff]  ;;  %s13821_s19 = sld [smem:[%s20441_s0 + %s18009_s16]]   ;;  %s18024_s16 = smov 45  }
 0x62f   :  { %v1185_v34 = vmul.f32 %v1183_v32, %v1183_v32  ;;  %v1205_v40 = vpop.permute.xlu1 %1204 }
 0x630   :  { %v1184_v36 = vmul.f32 %v1182_v33, %v1182_v33 }
 0x631   :  { %v1189_v35 = vsel %vm295_vm3, %v1185_v34, 0.0 }
 0x632   :  { %1190 = vadd.xlane.f32.xlu1 %v1189_v35  ;;  %v1186_v37 = vsel %vm295_vm3, %v1184_v36, 0.0  ;;  %v1210_v50 = vpop.permute.xlu0 %1209 }
 0x633   :  { %v1219_v41 = vpop.permute.xlu1 %1218 }
 0x636   :  { %1187 = vadd.xlane.f32.xlu1 %v1186_v37 }
 0x647   :  { %1223 = vperm.xlu1 %17803, %v1215_v38  }
 0x6bf   :  { %v1191_v42 = vpop.xlane.xlu1 %1190 }
 0x6c0   :  { %v1193_v43 = vmul.f32 0.03125, %v1191_v42 }
 0x6c2   :  { %v1195_v44 = vadd.f32 1e-05, %v1193_v43 }
 0x6c3   :  { %v1188_v45 = vpop.xlane.xlu1 %1187 }
 0x6c4   :  { %17808 = vrsqrt.f32 %v1195_v44  ;;  %v1192_v46 = vmul.f32 0.03125, %v1188_v45 }
 0x6c6   :  { %v1194_v47 = vadd.f32 1e-05, %v1192_v46 }
 0x6c7   :  { %v1224_v54 = vpop.permute.xlu1 %1223 }
 0x6c8   :  { %17810 = vrsqrt.f32 %v1194_v47 }
 0x6ce   :  { %v17809_v48 = vpop.eup %17808 }
 0x6cf   :  { %v1199_v49 = vmul.f32 %v17809_v48, %v1183_v32  ;;  %v13912_v32 = vld [vmem:[%s18230_s23 + $0x10] sm:$0xff] }
 0x6d1   :  { %v1213_v51 = vmul.f32 %v1210_v50, %v1199_v49 }
 0x6d2   :  { %v17811_v52 = vpop.eup %17810 }
 0x6d3   :  { %v1198_v53 = vmul.f32 %v17811_v52, %v1182_v33  ;;  %v1227_v55 = vadd.f32 %v1224_v54, %v1213_v51  ;;  %v13913_v54 = vld [vmem:[%s18230_s23 + $0x18] sm:$0xff] }
 0x6d5   :  { %v1212_v56 = vmul.f32 %v1205_v40, %v1198_v53  ;;  %v1229_v58 = vmax.f32 %v1227_v55, 0.0  ;;  %v1859_v55 = vld [vmem:[%s18230_s23] sm:$0xff] }
 0x6d7   :  { %v1226_v57 = vadd.f32 %v1219_v41, %v1212_v56 }
 0x6d9   :  { %v1228_v59 = vmax.f32 %v1226_v57, 0.0 }
 0x6db   :  { %15471 = vmatprep.mubr.msk.f32.mxu1 %vm295_vm3, %v1228_v59  ;;  %v16885_v60 = vpack.c.bf16 %v1229_v58, %v1228_v59 }
 0x6dc   :  { %15472 = vmatmul.mubr.msk.f32.vlgmr.msra.gmra.mrb[8].mxu1 %vm295_vm3, %v1229_v58 }
 0x6dd   :  { %16896 = vmatpush3.bf16.msra.mxu1 %v18100_v16  ;;  %16886 = vmatprep.subr.bf16.mxu0 %v16885_v60 }
 0x6de   :  { %15496 = vmatprep.mubr.msk.f32.mxu1 %vm295_vm3, %v1228_v59  ;;  %16888 = vmatpush3.bf16.msra.mxu0 %v16885_v60  ;;  %v1860_v59 = vld [vmem:[%s18230_s23 + $0x8] sm:$0xff]  ;;  %v13920_v60 = vld [vmem:[%s18230_s23 + $0x20] sm:$0xff] }
 0x6df   :  { %16898 = vmatprep.subr.bf16.mxu1 %v18108_v20 }
 0x6e1   :  { %16900 = vmatpush3.bf16.msra.mxu1 %v18108_v20  ;;  %15479 = vmatmul.mubr.msk.f32.vlgmr.msra.gmra.mrb[6].mxu0 %vm850_vm4, %v13897_v61 }
 0x6e2   :  { %16910 = vmatprep.subr.bf16.mxu1 %v18077_v5  ;;  %15485 = vmatprep.mubr.msk.f32.mxu0 %vm850_vm4, %v1311_v62 }
 0x6e4   :  { %15497 = vmatmul.mubr.msk.f32.vlgmr.msra.gmra.mrb[10].mxu1 %vm295_vm3, %v1229_v58 }
 0x6e5   :  { %16912 = vmatpush3.bf16.msra.mxu1 %v18077_v5 }
 0x6e6   :  { %16914 = vmatprep.subr.bf16.mxu1 %v18085_v10 }
 0x6e9   :  { %16916 = vmatpush3.bf16.msra.mxu1 %v18085_v10 }
 0x6ea   :  { %16926 = vmatprep.subr.bf16.mxu1 %v18100_v16 }
 0x7af   :  { %v15473_v63 = vpop.f32.mrb[8].mxu1 }
 0x7b0   :  { %v1302_v0 = vpop.f32.mrb[9].mxu1 }
 0x7b1   :  { %v16889_v2 = vpack.c.bf16 %v15473_v63, %v1302_v0  ;;  %v13921_v0 = vld [vmem:[%s18230_s23 + $0x28] sm:$0xff]  ;;  %s18462_s23 = sld [smem:[%s20441_s0 + %s18010_s20]]   ;;  %s18025_s20 = smov 46  }
 0x7b3   :  { %16890 = vmatprep.subr.bf16.mxu0 %v16889_v2 }
 0x7b4   :  { %16892 = vmatpush3.bf16.msra.mxu0 %v16889_v2 }
 0x7b7   :  { %v15498_v6 = vpop.f32.mrb[10].mxu1  ;;  %15486 = vmatmul.mubr.msk.f32.vlgmr.msra.gmra.mrb[6].mxu0 %vm850_vm4, %v1312_v3 }
 0x7b8   :  { %v1544_v7 = vpop.f32.mrb[11].mxu1  ;;  %15503 = vmatprep.mubr.msk.f32.mxu0 %vm850_vm4, %v13904_v4 }
 0x7b9   :  { %v16901_v8 = vpack.c.bf16 %v15498_v6, %v1544_v7  ;;  %v2214_v7 = vld [vmem:[%s13809_s27 + $0x8] sm:$0xff] }
 0x7bb   :  { %16902 = vmatprep.subr.bf16.mxu0 %v16901_v8 }
 0x7bc   :  { %16904 = vmatpush3.bf16.msra.mxu0 %v16901_v8  ;;  %v2213_v8 = vld [vmem:[%s13809_s27] sm:$0xff]  ;;  %s13792_s27 = sld [smem:[%s20441_s0 + %s18011_s24]]   ;;  %s18026_s24 = smov 47  }
 0x7bd   :  { %16906 = vmatprep.subr.bf16.mxu0 %v18137_v1 }
 0x7bf   :  { %15504 = vmatmul.mubr.msk.f32.vlgmr.msra.gmra.mrb[6].mxu0 %vm850_vm4, %v13905_v9 }
 0x7c0   :  { %16908 = vmatpush3.bf16.msra.mxu0 %v18137_v1  ;;  %15510 = vmatprep.mubr.msk.f32.mxu0 %vm850_vm4, %v1639_v11  ;;  %v1749_v1 = vld [vmem:[%s13806_s15 + $0x8] sm:$0xff]  ;;  %s18426_s15 = sld [smem:[%s20441_s0 + %s18008_s12]]   ;;  %s18023_s12 = smov 44  }
 0x7c7   :  { %15511 = vmatmul.mubr.msk.f32.vlgmr.msra.gmra.mrb[6].mxu0 %vm850_vm4, %v1640_v12 }
 0x7c8   :  { %15528 = vmatprep.mubr.msk.f32.mxu0 %vm850_vm4, %v13912_v32 }
 0x89a   :  { %v18209_v13 = vpop.f32.mrb[6].mxu0 }
 0x89b   :  { %v18211_v14 = vpop.f32.mrb[7].mxu0  ;;  %v1725_v15 = vsel %vm295_vm3, %v18209_v13, 0.0 }
 0x89c   :  { %1726 = vadd.xlane.f32.xlu0 %v1725_v15  ;;  %v1722_v17 = vsel %vm295_vm3, %v18211_v14, 0.0 }
 0x89d   :  { %1723 = vadd.xlane.f32.xlu1 %v1722_v17 }
 0x8ae   :  { %1757 = vperm.xlu1 %17803, %v1749_v1  }
 0x8b2   :  { %1752 = vperm.xlu0 %17802, %v1748_v18  }
 0x929   :  { %v1727_v19 = vpop.xlane.xlu0 %1726 }
 0x92a   :  { %v1729_v21 = vmul.f32 0.03125, %v1727_v19  ;;  %v1724_v22 = vpop.xlane.xlu1 %1723 }
 0x92b   :  { %v1728_v23 = vmul.f32 0.03125, %v1724_v22 }
 0x92c   :  { %v1731_v24 = vsub.f32 %v18209_v13, %v1729_v21 }
 0x92d   :  { %v1730_v25 = vsub.f32 %v18211_v14, %v1728_v23  ;;  %v2227_v23 = vld [vmem:[%s13810_s1] sm:$0xff] }
 0x92e   :  { %v1733_v26 = vmul.f32 %v1731_v24, %v1731_v24  ;;  %v1758_v33 = vpop.permute.xlu1 %1757 }
 0x92f   :  { %v1732_v27 = vmul.f32 %v1730_v25, %v1730_v25 }
 0x930   :  { %v1737_v28 = vsel %vm295_vm3, %v1733_v26, 0.0 }
 0x931   :  { %1738 = vadd.xlane.f32.xlu1 %v1737_v28  ;;  %v1734_v29 = vsel %vm295_vm3, %v1732_v27, 0.0  ;;  %v1753_v34 = vpop.permute.xlu0 %1752 }
 0x932   :  { %1735 = vadd.xlane.f32.xlu0 %v1734_v29 }
 0x942   :  { %1766 = vperm.xlu1 %17803, %v1762_v30  }
 0x948   :  { %1771 = vperm.xlu0 %17802, %v1763_v31  }
 0x9be   :  { %v1739_v35 = vpop.xlane.xlu1 %1738 }
 0x9bf   :  { %v1741_v36 = vmul.f32 0.03125, %v1739_v35  ;;  %v1736_v37 = vpop.xlane.xlu0 %1735 }
 0x9c0   :  { %v1740_v38 = vmul.f32 0.03125, %v1736_v37 }
 0x9c1   :  { %v1743_v39 = vadd.f32 1e-05, %v1741_v36 }
 0x9c2   :  { %v1742_v40 = vadd.f32 1e-05, %v1740_v38  ;;  %v1767_v48 = vpop.permute.xlu1 %1766 }
 0x9c3   :  { %17812 = vrsqrt.f32 %v1743_v39 }
 0x9c4   :  { %17814 = vrsqrt.f32 %v1742_v40 }
 0x9c7   :  { %v1772_v47 = vpop.permute.xlu0 %1771 }
 0x9cd   :  { %v17813_v41 = vpop.eup %17812 }
 0x9ce   :  { %v17815_v42 = vpop.eup %17814  ;;  %v1747_v43 = vmul.f32 %v17813_v41, %v1731_v24  ;;  %v2228_v24 = vld [vmem:[%s13810_s1 + $0x8] sm:$0xff]  ;;  %s18494_s1 = sld [smem:[%s20441_s0 + %s18012_s28]]   ;;  %s18027_s28 = smov 48  }
 0x9cf   :  { %v1746_v44 = vmul.f32 %v17815_v42, %v1730_v25  ;;  %v13926_v25 = vld [vmem:[%s18269_s5 + $0x10] sm:$0xff] }
 0x9d0   :  { %v1761_v45 = vmul.f32 %v1758_v33, %v1747_v43 }
 0x9d1   :  { %v1760_v46 = vmul.f32 %v1753_v34, %v1746_v44 }
 0x9d2   :  { %v1775_v49 = vadd.f32 %v1772_v47, %v1761_v45  ;;  %v13927_v47 = vld [vmem:[%s18269_s5 + $0x18] sm:$0xff] }
 0x9d3   :  { %v1774_v50 = vadd.f32 %v1767_v48, %v1760_v46  ;;  %v2324_v48 = vld [vmem:[%s18269_s5] sm:$0xff] }
 0x9d4   :  { %v1777_v51 = vmax.f32 %v1775_v49, 0.0 }
 0x9d5   :  { %v1776_v52 = vmax.f32 %v1774_v50, 0.0 }
 0x9d7   :  { %15521 = vmatprep.mubr.msk.f32.mxu1 %vm295_vm3, %v1776_v52  ;;  %v16917_v53 = vpack.c.bf16 %v1777_v51, %v1776_v52 }
 0x9d8   :  { %15522 = vmatmul.mubr.msk.f32.vlgmr.msra.gmra.mrb[12].mxu1 %vm295_vm3, %v1777_v51 }
 0x9d9   :  { %16928 = vmatpush3.bf16.msra.mxu1 %v18100_v16  ;;  %16918 = vmatprep.subr.bf16.mxu0 %v16917_v53 }
 0x9da   :  { %15546 = vmatprep.mubr.msk.f32.mxu1 %vm295_vm3, %v1776_v52  ;;  %16920 = vmatpush3.bf16.msra.mxu0 %v16917_v53  ;;  %v2325_v52 = vld [vmem:[%s18269_s5 + $0x8] sm:$0xff]  ;;  %v13934_v53 = vld [vmem:[%s18269_s5 + $0x20] sm:$0xff] }
 0x9db   :  { %16930 = vmatprep.subr.bf16.mxu1 %v18108_v20 }
 0x9dd   :  { %16932 = vmatpush3.bf16.msra.mxu1 %v18108_v20  ;;  %15529 = vmatmul.mubr.msk.f32.vlgmr.msra.gmra.mrb[8].mxu0 %vm850_vm4, %v13913_v54 }
 0x9de   :  { %15535 = vmatprep.mubr.msk.f32.mxu0 %vm850_vm4, %v1859_v55 }
 0x9e0   :  { %15547 = vmatmul.mubr.msk.f32.vlgmr.msra.gmra.mrb[14].mxu1 %vm295_vm3, %v1777_v51 }
 0x9e1   :  { %15571 = vmatprep.mubr.msk.f32.mxu1 %vm850_vm4, %v13926_v25 }
 0xaab   :  { %v15523_v56 = vpop.f32.mrb[12].mxu1 }
 0xaac   :  { %v1850_v57 = vpop.f32.mrb[13].mxu1 }
 0xaad   :  { %v16921_v58 = vpack.c.bf16 %v15523_v56, %v1850_v57  ;;  %v13935_v57 = vld [vmem:[%s18269_s5 + $0x28] sm:$0xff]  ;;  %s18529_s5 = sld [smem:[%s20441_s0 + %s18013_s2]]   ;;  %s18028_s2 = smov 49  }
 0xaaf   :  { %16922 = vmatprep.subr.bf16.mxu0 %v16921_v58 }
 0xab0   :  { %16924 = vmatpush3.bf16.msra.mxu0 %v16921_v58 }
 0xab3   :  { %v15548_v61 = vpop.f32.mrb[14].mxu1  ;;  %15536 = vmatmul.mubr.msk.f32.vlgmr.msra.gmra.mrb[8].mxu0 %vm850_vm4, %v1860_v59 }
 0xab4   :  { %v2092_v62 = vpop.f32.mrb[15].mxu1  ;;  %15553 = vmatprep.mubr.msk.f32.mxu0 %vm850_vm4, %v13920_v60 }
 0xab5   :  { %v16933_v63 = vpack.c.bf16 %v15548_v61, %v2092_v62 }
 0xab7   :  { %16934 = vmatprep.subr.bf16.mxu0 %v16933_v63 }
 0xab8   :  { %16936 = vmatpush3.bf16.msra.mxu0 %v16933_v63 }
 0xab9   :  { %16938 = vmatprep.subr.bf16.mxu0 %v18077_v5 }
 0xabb   :  { %15554 = vmatmul.mubr.msk.f32.vlgmr.msra.gmra.mrb[8].mxu0 %vm850_vm4, %v13921_v0  ;;  %v2681_v0 = vld [vmem:[%s13812_s9 + $0x8] sm:$0xff] }
 0xabc   :  { %16940 = vmatpush3.bf16.msra.mxu0 %v18077_v5 }
 0xabd   :  { %16942 = vmatprep.subr.bf16.mxu0 %v18085_v10 }
 0xac0   :  { %16944 = vmatpush3.bf16.msra.mxu0 %v18085_v10 }
 0xac1   :  { %16954 = vmatprep.subr.bf16.mxu0 %v18100_v16 }
 0xb8e   :  { %v15555_v2 = vpop.f32.mrb[8].mxu0 }
 0xb8f   :  { %v2176_v3 = vpop.f32.mrb[9].mxu0  ;;  %v2190_v4 = vsel %vm295_vm3, %v15555_v2, 0.0 }
 0xb90   :  { %2191 = vadd.xlane.f32.xlu0 %v2190_v4  ;;  %v2187_v6 = vsel %vm295_vm3, %v2176_v3, 0.0 }
 0xb91   :  { %2188 = vadd.xlane.f32.xlu1 %v2187_v6 }
 0xba2   :  { %2222 = vperm.xlu1 %17803, %v2214_v7  }
 0xba6   :  { %2217 = vperm.xlu0 %17802, %v2213_v8  }
 0xc1d   :  { %v2192_v9 = vpop.xlane.xlu0 %2191 }
 0xc1e   :  { %v2194_v11 = vmul.f32 0.03125, %v2192_v9  ;;  %v2189_v12 = vpop.xlane.xlu1 %2188 }
 0xc1f   :  { %v2193_v15 = vmul.f32 0.03125, %v2189_v12 }
 0xc20   :  { %v2196_v17 = vsub.f32 %v15555_v2, %v2194_v11 }
 0xc21   :  { %v2195_v1 = vsub.f32 %v2176_v3, %v2193_v15  ;;  %v2694_v15 = vld [vmem:[%s13813_s13] sm:$0xff] }
 0xc22   :  { %v2198_v18 = vmul.f32 %v2196_v17, %v2196_v17  ;;  %v2223_v26 = vpop.permute.xlu1 %2222 }
 0xc23   :  { %v2197_v19 = vmul.f32 %v2195_v1, %v2195_v1 }
 0xc24   :  { %v2202_v21 = vsel %vm295_vm3, %v2198_v18, 0.0 }
 0xc25   :  { %2203 = vadd.xlane.f32.xlu1 %v2202_v21  ;;  %v2199_v22 = vsel %vm295_vm3, %v2197_v19, 0.0  ;;  %v2218_v27 = vpop.permute.xlu0 %2217 }
 0xc26   :  { %2200 = vadd.xlane.f32.xlu0 %v2199_v22 }
 0xc36   :  { %2231 = vperm.xlu1 %17803, %v2227_v23  }
 0xc3c   :  { %2236 = vperm.xlu0 %17802, %v2228_v24  }
 0xcb2   :  { %v2204_v28 = vpop.xlane.xlu1 %2203 }
 0xcb3   :  { %v2206_v29 = vmul.f32 0.03125, %v2204_v28  ;;  %v2201_v30 = vpop.xlane.xlu0 %2200 }
 0xcb4   :  { %v2205_v31 = vmul.f32 0.03125, %v2201_v30 }
 0xcb5   :  { %v2208_v32 = vadd.f32 1e-05, %v2206_v29 }
 0xcb6   :  { %v2207_v33 = vadd.f32 1e-05, %v2205_v31  ;;  %v2232_v41 = vpop.permute.xlu1 %2231 }
 0xcb7   :  { %17816 = vrsqrt.f32 %v2208_v32 }
 0xcb8   :  { %17818 = vrsqrt.f32 %v2207_v33 }
 0xcbb   :  { %v2237_v40 = vpop.permute.xlu0 %2236 }
 0xcc1   :  { %v17817_v34 = vpop.eup %17816 }
 0xcc2   :  { %v17819_v35 = vpop.eup %17818  ;;  %v2212_v36 = vmul.f32 %v17817_v34, %v2196_v17  ;;  %v2695_v17 = vld [vmem:[%s13813_s13 + $0x8] sm:$0xff]  ;;  %s13825_s13 = sld [smem:[%s20441_s0 + %s18015_s10]]   ;;  %s18030_s10 = smov 52  }
 0xcc3   :  { %v2211_v37 = vmul.f32 %v17819_v35, %v2195_v1  ;;  %v13940_v1 = vld [vmem:[%s18318_s17 + $0x10] sm:$0xff] }
 0xcc4   :  { %v2226_v38 = vmul.f32 %v2223_v26, %v2212_v36 }
 0xcc5   :  { %v2225_v39 = vmul.f32 %v2218_v27, %v2211_v37 }
 0xcc6   :  { %v2240_v42 = vadd.f32 %v2237_v40, %v2226_v38  ;;  %v13941_v40 = vld [vmem:[%s18318_s17 + $0x18] sm:$0xff] }
 0xcc7   :  { %v2239_v43 = vadd.f32 %v2232_v41, %v2225_v39  ;;  %v2791_v41 = vld [vmem:[%s18318_s17] sm:$0xff] }
 0xcc8   :  { %v2242_v44 = vmax.f32 %v2240_v42, 0.0 }
 0xcc9   :  { %v2241_v45 = vmax.f32 %v2239_v43, 0.0 }
 0xccb   :  { %15564 = vmatprep.mubr.msk.f32.mxu0 %vm295_vm3, %v2241_v45  ;;  %v16945_v46 = vpack.c.bf16 %v2242_v44, %v2241_v45 }
 0xccc   :  { %15565 = vmatmul.mubr.msk.f32.vlgmr.msra.gmra.mrb[10].mxu0 %vm295_vm3, %v2242_v44 }
 0xccd   :  { %16956 = vmatpush3.bf16.msra.mxu0 %v18100_v16  ;;  %16946 = vmatprep.subr.bf16.mxu1 %v16945_v46 }
 0xcce   :  { %15589 = vmatprep.mubr.msk.f32.mxu0 %vm295_vm3, %v2241_v45  ;;  %16948 = vmatpush3.bf16.msra.mxu1 %v16945_v46  ;;  %v2792_v45 = vld [vmem:[%s18318_s17 + $0x8] sm:$0xff]  ;;  %v13948_v46 = vld [vmem:[%s18318_s17 + $0x20] sm:$0xff] }
 0xccf   :  { %16958 = vmatprep.subr.bf16.mxu0 %v18108_v20 }
 0xcd1   :  { %16960 = vmatpush3.bf16.msra.mxu0 %v18108_v20  ;;  %15572 = vmatmul.mubr.msk.f32.vlgmr.msra.gmra.mrb[16].mxu1 %vm850_vm4, %v13927_v47 }
 0xcd2   :  { %15578 = vmatprep.mubr.msk.f32.mxu1 %vm850_vm4, %v2324_v48 }
 0xcd4   :  { %15590 = vmatmul.mubr.msk.f32.vlgmr.msra.gmra.mrb[12].mxu0 %vm295_vm3, %v2242_v44 }
 0xcd5   :  { %15614 = vmatprep.mubr.msk.f32.mxu0 %vm850_vm4, %v13940_v1 }
 0xd9f   :  { %v15566_v49 = vpop.f32.mrb[10].mxu0 }
 0xda0   :  { %v2315_v50 = vpop.f32.mrb[11].mxu0 }
 0xda1   :  { %v16949_v51 = vpack.c.bf16 %v15566_v49, %v2315_v50  ;;  %v13949_v50 = vld [vmem:[%s18318_s17 + $0x28] sm:$0xff]  ;;  %s18587_s17 = sld [smem:[%s20441_s0 + %s18016_s14]]   ;;  %s18031_s14 = smov 4  }
 0xda3   :  { %16950 = vmatprep.subr.bf16.mxu1 %v16949_v51 }
 0xda4   :  { %16952 = vmatpush3.bf16.msra.mxu1 %v16949_v51 }
 0xda7   :  { %v15591_v54 = vpop.f32.mrb[12].mxu0  ;;  %15579 = vmatmul.mubr.msk.f32.vlgmr.msra.gmra.mrb[16].mxu1 %vm850_vm4, %v2325_v52 }
 0xda8   :  { %v2557_v55 = vpop.f32.mrb[13].mxu0  ;;  %15596 = vmatprep.mubr.msk.f32.mxu1 %vm850_vm4, %v13934_v53 }
 0xda9   :  { %v16961_v56 = vpack.c.bf16 %v15591_v54, %v2557_v55  ;;  %v3145_v55 = vld [vmem:[%s13815_s21] sm:$0xff] }
 0xdab   :  { %16962 = vmatprep.subr.bf16.mxu1 %v16961_v56 }
 0xdac   :  { %16964 = vmatpush3.bf16.msra.mxu1 %v16961_v56 }
 0xdad   :  { %16966 = vmatprep.subr.bf16.mxu1 %v18077_v5 }
 0xdaf   :  { %15597 = vmatmul.mubr.msk.f32.vlgmr.msra.gmra.mrb[16].mxu1 %vm850_vm4, %v13935_v57 }
 0xdb0   :  { %16968 = vmatpush3.bf16.msra.mxu1 %v18077_v5 }
 0xdb1   :  { %16970 = vmatprep.subr.bf16.mxu1 %v18085_v10 }
 0xdb4   :  { %16972 = vmatpush3.bf16.msra.mxu1 %v18085_v10 }
 0xdb5   :  { %16982 = vmatprep.subr.bf16.mxu1 %v18100_v16 }
 0xe82   :  { %v15598_v58 = vpop.f32.mrb[16].mxu1 }
 0xe83   :  { %v18296_v59 = vadd.f32 %v15598_v58, %v18209_v13  ;;  %v2641_v60 = vpop.f32.mrb[17].mxu1  ;;  %v2680_v13 = vld [vmem:[%s13812_s9] sm:$0xff]  ;;  %s13824_s9 = sld [smem:[%s20441_s0 + %s18014_s6]]   ;;  %s18029_s6 = smov 51  }
 0xe84   :  { %v18299_v61 = vadd.f32 %v2641_v60, %v18211_v14 }
 0xe85   :  { %v2657_v62 = vsel %vm295_vm3, %v18296_v59, 0.0 }
 0xe86   :  { %2658 = vadd.xlane.f32.xlu0 %v2657_v62  ;;  %v2654_v63 = vsel %vm295_vm3, %v18299_v61, 0.0 }
 0xe87   :  { %2655 = vadd.xlane.f32.xlu1 %v2654_v63 }
 0xe98   :  { %2689 = vperm.xlu1 %17803, %v2681_v0  }
 0xe9c   :  { %2684 = vperm.xlu0 %17802, %v2680_v13  }
 0xf13   :  { %v2659_v2 = vpop.xlane.xlu0 %2658 }
 0xf14   :  { %v2661_v14 = vmul.f32 0.03125, %v2659_v2  ;;  %v2656_v3 = vpop.xlane.xlu1 %2655 }
 0xf15   :  { %v2660_v4 = vmul.f32 0.03125, %v2656_v3  ;;  %v3160_v3 = vld [vmem:[%s13816_s25 + $0x8] sm:$0xff] }
 0xf16   :  { %v2663_v6 = vsub.f32 %v18296_v59, %v2661_v14  ;;  %v3159_v14 = vld [vmem:[%s13816_s25] sm:$0xff]  ;;  %s13828_s25 = sld [smem:[%s20441_s0 + %s18018_s22]]   ;;  %s18033_s22 = smov 55  }
 0xf17   :  { %v2662_v7 = vsub.f32 %v18299_v61, %v2660_v4  ;;  %v13954_v4 = vld [vmem:[%s18357_s29 + $0x10] sm:$0xff] }
 0xf18   :  { %v2665_v8 = vmul.f32 %v2663_v6, %v2663_v6  ;;  %v2690_v18 = vpop.permute.xlu1 %2689 }
 0xf19   :  { %v2664_v9 = vmul.f32 %v2662_v7, %v2662_v7 }
 0xf1a   :  { %v2669_v11 = vsel %vm295_vm3, %v2665_v8, 0.0 }
 0xf1b   :  { %2670 = vadd.xlane.f32.xlu1 %v2669_v11  ;;  %v2666_v12 = vsel %vm295_vm3, %v2664_v9, 0.0  ;;  %v2685_v19 = vpop.permute.xlu0 %2684 }
 0xf1c   :  { %2667 = vadd.xlane.f32.xlu0 %v2666_v12 }
 0xf2c   :  { %2698 = vperm.xlu1 %17803, %v2694_v15  }
 0xf32   :  { %2703 = vperm.xlu0 %17802, %v2695_v17  }
 0xfa8   :  { %v2671_v21 = vpop.xlane.xlu1 %2670 }
 0xfa9   :  { %v2673_v22 = vmul.f32 0.03125, %v2671_v21  ;;  %v2668_v23 = vpop.xlane.xlu0 %2667 }
 0xfaa   :  { %v2672_v24 = vmul.f32 0.03125, %v2668_v23 }
 0xfab   :  { %v2675_v25 = vadd.f32 1e-05, %v2673_v22 }
 0xfac   :  { %v2674_v26 = vadd.f32 1e-05, %v2672_v24  ;;  %v2699_v34 = vpop.permute.xlu1 %2698 }
 0xfad   :  { %17820 = vrsqrt.f32 %v2675_v25 }
 0xfae   :  { %17822 = vrsqrt.f32 %v2674_v26 }
 0xfb1   :  { %v2704_v33 = vpop.permute.xlu0 %2703 }
 0xfb7   :  { %v17821_v27 = vpop.eup %17820 }
 0xfb8   :  { %v17823_v28 = vpop.eup %17822  ;;  %v2679_v29 = vmul.f32 %v17821_v27, %v2663_v6 }
 0xfb9   :  { %v2678_v30 = vmul.f32 %v17823_v28, %v2662_v7 }
 0xfba   :  { %v2693_v31 = vmul.f32 %v2690_v18, %v2679_v29 }
 0xfbb   :  { %v2692_v32 = vmul.f32 %v2685_v19, %v2678_v30 }
 0xfbc   :  { %v2707_v35 = vadd.f32 %v2704_v33, %v2693_v31  ;;  %v13955_v31 = vld [vmem:[%s18357_s29 + $0x18] sm:$0xff] }
 0xfbd   :  { %v2706_v36 = vadd.f32 %v2699_v34, %v2692_v32  ;;  %v3256_v32 = vld [vmem:[%s18357_s29] sm:$0xff] }
 0xfbe   :  { %v2709_v37 = vmax.f32 %v2707_v35, 0.0  ;;  %v3257_v35 = vld [vmem:[%s18357_s29 + $0x8] sm:$0xff] }
 0xfbf   :  { %v2708_v38 = vmax.f32 %v2706_v36, 0.0  ;;  %v13962_v36 = vld [vmem:[%s18357_s29 + $0x20] sm:$0xff] }
 0xfc1   :  { %15607 = vmatprep.mubr.msk.f32.mxu1 %vm295_vm3, %v2708_v38  ;;  %v16973_v39 = vpack.c.bf16 %v2709_v37, %v2708_v38 }
 0xfc2   :  { %15608 = vmatmul.mubr.msk.f32.vlgmr.msra.gmra.mrb[18].mxu1 %vm295_vm3, %v2709_v37 }
 0xfc3   :  { %16984 = vmatpush3.bf16.msra.mxu1 %v18100_v16  ;;  %16974 = vmatprep.subr.bf16.mxu0 %v16973_v39 }
 0xfc4   :  { %15632 = vmatprep.mubr.msk.f32.mxu1 %vm295_vm3, %v2708_v38  ;;  %16976 = vmatpush3.bf16.msra.mxu0 %v16973_v39  ;;  %v13963_v39 = vld [vmem:[%s18357_s29 + $0x28] sm:$0xff]  ;;  %s18652_s29 = sld [smem:[%s20441_s0 + %s18019_s26]]   ;;  %s18034_s26 = smov 56  }
 0xfc5   :  { %16986 = vmatprep.subr.bf16.mxu1 %v18108_v20 }
 0xfc7   :  { %16988 = vmatpush3.bf16.msra.mxu1 %v18108_v20  ;;  %15615 = vmatmul.mubr.msk.f32.vlgmr.msra.gmra.mrb[14].mxu0 %vm850_vm4, %v13941_v40 }
 0xfc8   :  { %15621 = vmatprep.mubr.msk.f32.mxu0 %vm850_vm4, %v2791_v41 }
 0xfca   :  { %15633 = vmatmul.mubr.msk.f32.vlgmr.msra.gmra.mrb[20].mxu1 %vm295_vm3, %v2709_v37 }
 0xfcb   :  { %15657 = vmatprep.mubr.msk.f32.mxu1 %vm850_vm4, %v13954_v4 }
0x1095   :  { %v15609_v42 = vpop.f32.mrb[18].mxu1 }
0x1096   :  { %v2782_v43 = vpop.f32.mrb[19].mxu1 }
0x1097   :  { %v16977_v44 = vpack.c.bf16 %v15609_v42, %v2782_v43 }
0x1099   :  { %16978 = vmatprep.subr.bf16.mxu0 %v16977_v44 }
0x109a   :  { %16980 = vmatpush3.bf16.msra.mxu0 %v16977_v44 }
0x109d   :  { %v15634_v47 = vpop.f32.mrb[20].mxu1  ;;  %15622 = vmatmul.mubr.msk.f32.vlgmr.msra.gmra.mrb[14].mxu0 %vm850_vm4, %v2792_v45 }
0x109e   :  { %v3024_v48 = vpop.f32.mrb[21].mxu1  ;;  %15639 = vmatprep.mubr.msk.f32.mxu0 %vm850_vm4, %v13948_v46  ;;  %v3613_v46 = vld [vmem:[%s13818_s3 + $0x8] sm:$0xff] }
0x109f   :  { %v16989_v49 = vpack.c.bf16 %v15634_v47, %v3024_v48  ;;  %v3612_v47 = vld [vmem:[%s13818_s3] sm:$0xff]  ;;  %s18674_s3 = sld [smem:[%s20441_s0 + %s18020_s30]]   ;;  %s18035_s30 = smov 5  }
0x10a1   :  { %16990 = vmatprep.subr.bf16.mxu0 %v16989_v49 }
0x10a2   :  { %16992 = vmatpush3.bf16.msra.mxu0 %v16989_v49 }
0x10a3   :  { %16994 = vmatprep.subr.bf16.mxu0 %v18077_v5 }
0x10a5   :  { %15640 = vmatmul.mubr.msk.f32.vlgmr.msra.gmra.mrb[14].mxu0 %vm850_vm4, %v13949_v50 }
0x10a6   :  { %16996 = vmatpush3.bf16.msra.mxu0 %v18077_v5  ;;  %v3146_v5 = vld [vmem:[%s13815_s21 + $0x8] sm:$0xff]  ;;  %s18613_s21 = sld [smem:[%s20441_s0 + %s18017_s18]]   ;;  %s18032_s18 = smov 50  }
0x10a7   :  { %16998 = vmatprep.subr.bf16.mxu0 %v18085_v10 }
0x10aa   :  { %17000 = vmatpush3.bf16.msra.mxu0 %v18085_v10 }
0x10ab   :  { %17010 = vmatprep.subr.bf16.mxu0 %v18100_v16 }
0x1178   :  { %v15641_v51 = vpop.f32.mrb[14].mxu0 }
0x1179   :  { %v3108_v52 = vpop.f32.mrb[15].mxu0  ;;  %v3122_v53 = vsel %vm295_vm3, %v15641_v51, 0.0 }
0x117a   :  { %3123 = vadd.xlane.f32.xlu0 %v3122_v53  ;;  %v3119_v54 = vsel %vm295_vm3, %v3108_v52, 0.0 }
0x117b   :  { %3120 = vadd.xlane.f32.xlu1 %v3119_v54 }
0x118c   :  { %3154 = vperm.xlu1 %17803, %v3146_v5  }
0x1190   :  { %3149 = vperm.xlu0 %17802, %v3145_v55   ;;  %v3626_v55 = vld [vmem:[%s13819_s7] sm:$0xff] }
0x1207   :  { %v3124_v10 = vpop.xlane.xlu0 %3123 }
0x1208   :  { %v3126_v56 = vmul.f32 0.03125, %v3124_v10  ;;  %v3121_v57 = vpop.xlane.xlu1 %3120  ;;  %v3627_v10 = vld [vmem:[%s13819_s7 + $0x8] sm:$0xff]  ;;  %s13831_s7 = sld [smem:[%s20441_s0 + %s18021_s4]]   ;;  %s18036_s4 = smov 7  }
0x1209   :  { %v3125_v58 = vmul.f32 0.03125, %v3121_v57  ;;  %v13969_v57 = vld [vmem:[%s18393_s11 + $0x28] sm:$0xff] }
0x120a   :  { %v3128_v60 = vsub.f32 %v15641_v51, %v3126_v56  ;;  %v13968_v56 = vld [vmem:[%s18393_s11 + $0x20] sm:$0xff] }
0x120b   :  { %v3127_v62 = vsub.f32 %v3108_v52, %v3125_v58  ;;  %v17029_v58 = vpack.c.bf16 %v13969_v57, %v13968_v56 }
0x120c   :  { %v3130_v63 = vmul.f32 %v3128_v60, %v3128_v60  ;;  %v3155_v6 = vpop.permute.xlu1 %3154 }
0x120d   :  { %v3129_v0 = vmul.f32 %v3127_v62, %v3127_v62 }
0x120e   :  { %v3134_v13 = vsel %vm295_vm3, %v3130_v63, 0.0 }
0x120f   :  { %3135 = vadd.xlane.f32.xlu1 %v3134_v13  ;;  %v3131_v2 = vsel %vm295_vm3, %v3129_v0, 0.0  ;;  %v3150_v7 = vpop.permute.xlu0 %3149  ;;  %v13970_v0 = vld [vmem:[%s18393_s11 + $0x30] sm:$0xff]  ;;  %v13971_v13 = vld [vmem:[%s18393_s11 + $0x38] sm:$0xff] }
0x1210   :  { %3132 = vadd.xlane.f32.xlu0 %v3131_v2  ;;  %v17033_v2 = vpack.c.bf16 %v13971_v13, %v13970_v0  ;;  %v4251_v0 = vld [vmem:[%s13821_s19 + $0x10] sm:$0xff]  ;;  %v4278_v13 = vld [vmem:[%s18462_s23 + $0x8] sm:$0xff] }
0x1220   :  { %3163 = vperm.xlu1 %17803, %v3159_v14   ;;  %v3644_v14 = vld [vmem:[%s18393_s11 + $0x10] sm:$0xff] }
0x1226   :  { %3168 = vperm.xlu0 %17802, %v3160_v3   ;;  %v3645_v3 = vld [vmem:[%s18393_s11 + $0x18] sm:$0xff] }
0x1227   :  { %v17025_v4 = vpack.c.bf16 %v3645_v3, %v3644_v14 }
0x129c   :  { %v3136_v8 = vpop.xlane.xlu1 %3135 }
0x129d   :  { %v3138_v9 = vmul.f32 0.03125, %v3136_v8  ;;  %v3133_v11 = vpop.xlane.xlu0 %3132 }
0x129e   :  { %v3137_v12 = vmul.f32 0.03125, %v3133_v11 }
0x129f   :  { %v3140_v15 = vadd.f32 1e-05, %v3138_v9 }
0x12a0   :  { %v3139_v17 = vadd.f32 1e-05, %v3137_v12  ;;  %v3164_v25 = vpop.permute.xlu1 %3163 }
0x12a1   :  { %17824 = vrsqrt.f32 %v3140_v15 }
0x12a2   :  { %17826 = vrsqrt.f32 %v3139_v17 }
0x12a5   :  { %v3169_v24 = vpop.permute.xlu0 %3168 }
0x12ab   :  { %v17825_v1 = vpop.eup %17824 }
0x12ac   :  { %v17827_v18 = vpop.eup %17826  ;;  %v3144_v19 = vmul.f32 %v17825_v1, %v3128_v60  ;;  %v3642_v60 = vld [vmem:[%s18393_s11] sm:$0xff] }
0x12ad   :  { %v3143_v21 = vmul.f32 %v17827_v18, %v3127_v62  ;;  %v3643_v62 = vld [vmem:[%s18393_s11 + $0x8] sm:$0xff] }
0x12ae   :  { %v3158_v22 = vmul.f32 %v3155_v6, %v3144_v19  ;;  %v17021_v63 = vpack.c.bf16 %v3643_v62, %v3642_v60  ;;  %v13986_v6 = vld [vmem:[%s18393_s11 + $0x40] sm:$0xff]  ;;  %v4250_v60 = vld [vmem:[%s13821_s19 + $0x8] sm:$0xff] }
0x12af   :  { %v3157_v23 = vmul.f32 %v3150_v7, %v3143_v21  ;;  %v13987_v7 = vld [vmem:[%s18393_s11 + $0x48] sm:$0xff]  ;;  %v4277_v62 = vld [vmem:[%s18462_s23] sm:$0xff] }
0x12b0   :  { %v3172_v26 = vadd.f32 %v3169_v24, %v3158_v22  ;;  %v17045_v8 = vpack.c.bf16 %v13987_v7, %v13986_v6 }
0x12b1   :  { %v3171_v27 = vadd.f32 %v3164_v25, %v3157_v23 }
0x12b2   :  { %v3174_v28 = vmax.f32 %v3172_v26, 0.0 }
0x12b3   :  { %v3173_v29 = vmax.f32 %v3171_v27, 0.0 }
0x12b5   :  { %15650 = vmatprep.mubr.msk.f32.mxu0 %vm295_vm3, %v3173_v29  ;;  %v17001_v30 = vpack.c.bf16 %v3174_v28, %v3173_v29 }
0x12b6   :  { %15651 = vmatmul.mubr.msk.f32.vlgmr.msra.gmra.mrb[16].mxu0 %vm295_vm3, %v3174_v28 }
0x12b7   :  { %17012 = vmatpush3.bf16.msra.mxu0 %v18100_v16  ;;  %17002 = vmatprep.subr.bf16.mxu1 %v17001_v30 }
0x12b8   :  { %15675 = vmatprep.mubr.msk.f32.mxu0 %vm295_vm3, %v3173_v29  ;;  %17004 = vmatpush3.bf16.msra.mxu1 %v17001_v30 }
0x12b9   :  { %17014 = vmatprep.subr.bf16.mxu0 %v18108_v20 }
0x12bb   :  { %17016 = vmatpush3.bf16.msra.mxu0 %v18108_v20  ;;  %15658 = vmatmul.mubr.msk.f32.vlgmr.msra.gmra.mrb[22].mxu1 %vm850_vm4, %v13955_v31  ;;  %v13988_v31 = vld [vmem:[%s18393_s11 + $0x50] sm:$0xff] }
0x12bc   :  { %15664 = vmatprep.mubr.msk.f32.mxu1 %vm850_vm4, %v3256_v32  ;;  %17030 = vmatprep.subr.bf16.mxu0 %v17029_v58  ;;  %v13989_v32 = vld [vmem:[%s18393_s11 + $0x58] sm:$0xff]  ;;  %s18729_s11 = sld [smem:[%s20441_s0 + %s18022_s8]]   ;;  %s18037_s8 = smov 53  }
0x12be   :  { %15676 = vmatmul.mubr.msk.f32.vlgmr.msra.gmra.mrb[18].mxu0 %vm295_vm3, %v3174_v28 }
0x12bf   :  { %17032 = vmatpush3.bf16.msra.mxu0 %v17029_v58 }
0x12c0   :  { %17034 = vmatprep.subr.bf16.mxu0 %v17033_v2 }
0x12c3   :  { %17036 = vmatpush3.bf16.msra.mxu0 %v17033_v2  ;;  %v4252_v2 = vld [vmem:[%s13821_s19 + $0x18] sm:$0xff] }
0x12c4   :  { %17046 = vmatprep.subr.bf16.mxu0 %v17045_v8 }
0x1389   :  { %v15652_v16 = vpop.f32.mrb[16].mxu0 }
0x138a   :  { %v3247_v33 = vpop.f32.mrb[17].mxu0 }
0x138b   :  { %v17005_v34 = vpack.c.bf16 %v15652_v16, %v3247_v33 }
0x138d   :  { %17006 = vmatprep.subr.bf16.mxu1 %v17005_v34 }
0x138e   :  { %17008 = vmatpush3.bf16.msra.mxu1 %v17005_v34  ;;  %v17049_v34 = vpack.c.bf16 %v13989_v32, %v13988_v31  ;;  %v14016_v31 = vld [vmem:[%s13792_s27 + $0x20] sm:$0xff] }
0x1391   :  { %v15677_v37 = vpop.f32.mrb[18].mxu0  ;;  %15665 = vmatmul.mubr.msk.f32.vlgmr.msra.gmra.mrb[22].mxu1 %vm850_vm4, %v3257_v35  ;;  %v13974_v35 = vld [vmem:[%s18426_s15 + $0x20] sm:$0xff] }
0x1392   :  { %v3489_v20 = vpop.f32.mrb[19].mxu0  ;;  %15682 = vmatprep.mubr.msk.f32.mxu1 %vm850_vm4, %v13962_v36 }
0x1393   :  { %v17017_v38 = vpack.c.bf16 %v15677_v37, %v3489_v20 }
0x1395   :  { %17018 = vmatprep.subr.bf16.mxu1 %v17017_v38 }
0x1396   :  { %17020 = vmatpush3.bf16.msra.mxu1 %v17017_v38 }
0x1397   :  { %17022 = vmatprep.subr.bf16.mxu1 %v17021_v63 }
0x1399   :  { %15683 = vmatmul.mubr.msk.f32.vlgmr.msra.gmra.mrb[22].mxu1 %vm850_vm4, %v13963_v39 }
0x139a   :  { %17024 = vmatpush3.bf16.msra.mxu1 %v17021_v63  ;;  %v4249_v63 = vld [vmem:[%s13821_s19] sm:$0xff]  ;;  %s13834_s19 = sld [smem:[%s20441_s0 + %s18024_s16]]   ;;  %s18039_s16 = smov 58  }
0x139b   :  { %17026 = vmatprep.subr.bf16.mxu1 %v17025_v4 }
0x139e   :  { %17028 = vmatpush3.bf16.msra.mxu1 %v17025_v4 }
0x146c   :  { %v15684_v40 = vpop.f32.mrb[22].mxu1 }
0x146d   :  { %v3585_v41 = vadd.f32 %v15684_v40, %v18296_v59  ;;  %v3573_v42 = vpop.f32.mrb[23].mxu1 }
0x146e   :  { %v3584_v43 = vadd.f32 %v3573_v42, %v18299_v61  ;;  %v13976_v42 = vld [vmem:[%s18426_s15 + $0x30] sm:$0xff] }
0x146f   :  { %v3589_v44 = vsel %vm295_vm3, %v3585_v41, 0.0 }
0x1470   :  { %3590 = vadd.xlane.f32.xlu0 %v3589_v44  ;;  %v3586_v45 = vsel %vm295_vm3, %v3584_v43, 0.0 }
0x1471   :  { %3587 = vadd.xlane.f32.xlu1 %v3586_v45  ;;  %v13977_v45 = vld [vmem:[%s18426_s15 + $0x38] sm:$0xff] }
0x1482   :  { %3621 = vperm.xlu1 %17803, %v3613_v46  }
0x1486   :  { %3616 = vperm.xlu0 %17802, %v3612_v47   ;;  %v3727_v47 = vld [vmem:[%s18426_s15] sm:$0xff] }
0x14fd   :  { %v3591_v48 = vpop.xlane.xlu0 %3590 }
0x14fe   :  { %v3593_v59 = vmul.f32 0.03125, %v3591_v48  ;;  %v3588_v49 = vpop.xlane.xlu1 %3587  ;;  %v3728_v48 = vld [vmem:[%s18426_s15 + $0x8] sm:$0xff] }
0x14ff   :  { %v3592_v50 = vmul.f32 0.03125, %v3588_v49  ;;  %v3730_v49 = vld [vmem:[%s18426_s15 + $0x18] sm:$0xff] }
0x1500   :  { %v3595_v61 = vsub.f32 %v3585_v41, %v3593_v59  ;;  %v13975_v41 = vld [vmem:[%s18426_s15 + $0x28] sm:$0xff]  ;;  %v3729_v59 = vld [vmem:[%s18426_s15 + $0x10] sm:$0xff] }
0x1501   :  { %v3594_v51 = vsub.f32 %v3584_v43, %v3592_v50  ;;  %v13992_v50 = vld [vmem:[%s18426_s15 + $0x40] sm:$0xff] }
0x1502   :  { %v3597_v52 = vmul.f32 %v3595_v61, %v3595_v61  ;;  %v3622_v9 = vpop.permute.xlu1 %3621 }
0x1503   :  { %v3596_v53 = vmul.f32 %v3594_v51, %v3594_v51 }
0x1504   :  { %v3601_v54 = vsel %vm295_vm3, %v3597_v52, 0.0  ;;  %v13995_v52 = vld [vmem:[%s18426_s15 + $0x58] sm:$0xff] }
0x1505   :  { %3602 = vadd.xlane.f32.xlu1 %v3601_v54  ;;  %v3598_v5 = vsel %vm295_vm3, %v3596_v53, 0.0  ;;  %v3617_v11 = vpop.permute.xlu0 %3616 }
0x1506   :  { %3599 = vadd.xlane.f32.xlu0 %v3598_v5 }
0x1516   :  { %3630 = vperm.xlu1 %17803, %v3626_v55  }
0x151c   :  { %3635 = vperm.xlu0 %17802, %v3627_v10  }
0x1592   :  { %v3603_v12 = vpop.xlane.xlu1 %3602 }
0x1593   :  { %v3605_v15 = vmul.f32 0.03125, %v3603_v12  ;;  %v3600_v17 = vpop.xlane.xlu0 %3599 }
0x1594   :  { %v3604_v1 = vmul.f32 0.03125, %v3600_v17 }
0x1595   :  { %v3607_v18 = vadd.f32 1e-05, %v3605_v15 }
0x1596   :  { %v3606_v19 = vadd.f32 1e-05, %v3604_v1  ;;  %v3631_v28 = vpop.permute.xlu1 %3630 }
0x1597   :  { %17828 = vrsqrt.f32 %v3607_v18 }
0x1598   :  { %17830 = vrsqrt.f32 %v3606_v19 }
0x159b   :  { %v3636_v27 = vpop.permute.xlu0 %3635 }
0x15a1   :  { %v17829_v21 = vpop.eup %17828 }
0x15a2   :  { %v17831_v22 = vpop.eup %17830  ;;  %v3611_v23 = vmul.f32 %v17829_v21, %v3595_v61  ;;  %v13993_v61 = vld [vmem:[%s18426_s15 + $0x48] sm:$0xff] }
0x15a3   :  { %v3610_v24 = vmul.f32 %v17831_v22, %v3594_v51  ;;  %v13994_v51 = vld [vmem:[%s18426_s15 + $0x50] sm:$0xff]  ;;  %s18755_s15 = sld [smem:[%s20441_s0 + %s18023_s12]]   ;;  %s18038_s12 = smov 54  }
0x15a4   :  { %v3625_v25 = vmul.f32 %v3622_v9, %v3611_v23 }
0x15a5   :  { %v3624_v26 = vmul.f32 %v3617_v11, %v3610_v24 }
0x15a6   :  { %v3639_v29 = vadd.f32 %v3636_v27, %v3625_v25  ;;  %v4279_v27 = vld [vmem:[%s18462_s23 + $0x10] sm:$0xff] }
0x15a7   :  { %v3638_v30 = vadd.f32 %v3631_v28, %v3624_v26  ;;  %v4280_v28 = vld [vmem:[%s18462_s23 + $0x18] sm:$0xff]  ;;  %s18793_s23 = sld [smem:[%s20441_s0 + %s18025_s20]]   ;;  %s18040_s20 = smov 59  }
0x15a8   :  { %v18409_v33 = vmax.f32 %v3639_v29, 0.0  ;;  %v4309_v29 = vld [vmem:[%s13792_s27] sm:$0xff] }
0x15a9   :  { %v18407_v16 = vmax.f32 %v3638_v30, 0.0  ;;  %v4310_v30 = vld [vmem:[%s13792_s27 + $0x8] sm:$0xff] }
0x15aa   :  { %v18496_v32 = vpack.c.bf16 %v4310_v30, %v4309_v29 }
0x15ab   :  { %15693 = vmatprep.mubr.msk.f32.mxu1 %vm295_vm3, %v18407_v16  ;;  %15704 = vmatprep.mubr.msk.f32.mxu0 %vm295_vm3, %v18407_v16 }
0x15ac   :  { %15694 = vmatmul.mubr.msk.f32.vlgmr.msra.gmra.mrb[24].mxu1 %vm295_vm3, %v18409_v33  ;;  %15705 = vmatmul.mubr.msk.f32.vlgmr.msra.gmra.mrb[20].mxu0 %vm295_vm3, %v18409_v33 }
0x15ad   :  { %17048 = vmatpush3.bf16.msra.mxu0 %v17045_v8  ;;  %15735 = vmatprep.mubr.msk.f32.mxu0 %vm295_vm3, %v18407_v16 }
0x15ae   :  { %17050 = vmatprep.subr.bf16.mxu0 %v17049_v34  ;;  %15711 = vmatprep.mubr.msk.f32.mxu1 %vm850_vm4, %v13974_v35 }
0x15b1   :  { %17052 = vmatpush3.bf16.msra.mxu0 %v17049_v34  ;;  %v14017_v34 = vld [vmem:[%s13792_s27 + $0x28] sm:$0xff]  ;;  %s18814_s27 = sld [smem:[%s20441_s0 + %s18026_s24]]   ;;  %s18041_s24 = smov 57  }
0x15b2   :  { %v18498_v35 = vpack.c.bf16 %v14017_v34, %v14016_v31  ;;  %17058 = vmatprep.subr.bf16.mxu0 %v18496_v32 }
0x15b4   :  { %15736 = vmatmul.mubr.msk.f32.vlgmr.msra.gmra.mrb[22].mxu0 %vm295_vm3, %v18409_v33 }
0x15b5   :  { %17060 = vmatpush3.bf16.msra.mxu0 %v18496_v32 }
0x167f   :  { %v15695_v36 = vpop.f32.mrb[24].mxu1  ;;  %v15706_v37 = vpop.f32.mrb[20].mxu0 }
0x1680   :  { %v3718_v20 = vpop.f32.mrb[25].mxu1  ;;  %v3802_v38 = vpop.f32.mrb[21].mxu0 }
0x1681   :  { %v17041_v39 = vpack.c.bf16 %v15695_v36, %v3718_v20  ;;  %v17037_v40 = vpack.c.bf16 %v15706_v37, %v3802_v38  ;;  %v4809_v36 = vld [vmem:[%s18494_s1] sm:$0xff]  ;;  %v4810_v37 = vld [vmem:[%s18494_s1 + $0x8] sm:$0xff] }
0x1682   :  { %v17089_v20 = vpack.c.bf16 %v4810_v37, %v4809_v36 }
0x1683   :  { %17038 = vmatprep.subr.bf16.mxu1 %v17037_v40 }
0x1684   :  { %17040 = vmatpush3.bf16.msra.mxu1 %v17037_v40 }
0x1685   :  { %17042 = vmatprep.subr.bf16.mxu1 %v17041_v39 }
0x1687   :  { %v15737_v43 = vpop.f32.mrb[22].mxu0  ;;  %15712 = vmatmul.mubr.msk.f32.vlgmr.msra.gmra.mrb[26].mxu1 %vm850_vm4, %v13975_v41 }
0x1688   :  { %v4081_v44 = vpop.f32.mrb[23].mxu0  ;;  %17044 = vmatpush3.bf16.msra.mxu1 %v17041_v39  ;;  %15714 = vmatprep.mubr.msk.f32.mxu1 %vm850_vm4, %v13976_v42 }
0x1689   :  { %v17053_v46 = vpack.c.bf16 %v15737_v43, %v4081_v44 }
0x168b   :  { %17054 = vmatprep.subr.bf16.mxu1 %v17053_v46  ;;  %15715 = vmatmul.mubr.msk.f32.gmra.mrb[28].mxu1 %vm850_vm4, %v13977_v45 }
0x168c   :  { %15721 = vmatprep.mubr.msk.f32.mxu1 %vm850_vm4, %v3727_v47 }
0x168f   :  { %15722 = vmatmul.mubr.msk.f32.vlgmr.msra.gmra.mrb[26].mxu1 %vm850_vm4, %v3728_v48 }
0x1690   :  { %17056 = vmatpush3.bf16.msra.mxu1 %v17053_v46  ;;  %15724 = vmatprep.mubr.msk.f32.mxu1 %vm850_vm4, %v3729_v59 }
0x1691   :  { %17078 = vmatprep.subr.bf16.mxu1 %v18498_v35 }
0x1693   :  { %15725 = vmatmul.mubr.msk.f32.gmra.mrb[28].mxu1 %vm850_vm4, %v3730_v49 }
0x1694   :  { %15742 = vmatprep.mubr.msk.f32.mxu1 %vm850_vm4, %v13992_v50 }
0x1697   :  { %15743 = vmatmul.mubr.msk.f32.vlgmr.msra.gmra.mrb[26].mxu1 %vm850_vm4, %v13993_v61 }
0x1698   :  { %15745 = vmatprep.mubr.msk.f32.mxu1 %vm850_vm4, %v13994_v51  ;;  %17080 = vmatpush3.bf16.msra.mxu1 %v18498_v35 }
0x1699   :  { %17090 = vmatprep.subr.bf16.mxu1 %v17089_v20 }
0x169b   :  { %15746 = vmatmul.mubr.msk.f32.gmra.mrb[28].mxu1 %vm850_vm4, %v13995_v52 }
0x176a   :  { %v15744_v53 = vpop.f32.mrb[26].mxu1 }
0x176b   :  { %v4173_v54 = vpop.f32.mrb[27].mxu1  ;;  %v4199_v5 = vsel %vm850_vm4, %v15744_v53, 0.0 }
0x176c   :  { %4200 = vadd.xlane.f32.xlu0 %v4199_v5  ;;  %v4196_v55 = vsel %vm850_vm4, %v4173_v54, 0.0 }
0x176d   :  { %4197 = vadd.xlane.f32.xlu1 %v4196_v55 }
0x176e   :  { %v15747_v10 = vpop.f32.mrb[28].mxu1 }
0x176f   :  { %v4183_v56 = vpop.f32.mrb[29].mxu1  ;;  %v4205_v57 = vsel %vm850_vm4, %v15747_v10, 0.0 }
0x1770   :  { %v4202_v58 = vsel %vm850_vm4, %v4183_v56, 0.0 }
0x1771   :  { %4206 = vadd.xlane.f32.xlu1 %v4205_v57  ;;  %4203 = vadd.xlane.f32.xlu0 %v4202_v58 }
0x1782   :  { %4260 = vperm.xlu1 %17803, %v4250_v60  }
0x1786   :  { %4283 = vperm.xlu1 %17803, %v4277_v62  }
0x1787   :  { %4255 = vperm.xlu0 %17802, %v4249_v63  }
0x178a   :  { %4265 = vperm.xlu1 %17803, %v4251_v0  }
0x178b   :  { %4288 = vperm.xlu0 %17802, %v4278_v13   ;;  %v4811_v13 = vld [vmem:[%s18494_s1 + $0x10] sm:$0xff] }
0x178f   :  { %4270 = vperm.xlu0 %17802, %v4252_v2   ;;  %v4812_v2 = vld [vmem:[%s18494_s1 + $0x18] sm:$0xff]  ;;  %s13837_s1 = sld [smem:[%s20441_s0 + %s18027_s28]]   ;;  %s18042_s28 = smov 61  }
0x17f9   :  { %v4201_v14 = vpop.xlane.xlu0 %4200 }
0x17fa   :  { %v4210_v3 = vmul.f32 0.0625, %v4201_v14  ;;  %v4198_v4 = vpop.xlane.xlu1 %4197 }
0x17fb   :  { %v4209_v6 = vmul.f32 0.0625, %v4198_v4 }
0x17fc   :  { %v18466_v7 = vsub.f32 %v15744_v53, %v4210_v3 }
0x17fd   :  { %v18468_v8 = vsub.f32 %v4173_v54, %v4209_v6 }
0x17fe   :  { %v4207_v9 = vpop.xlane.xlu1 %4206  ;;  %v4204_v11 = vpop.xlane.xlu0 %4203  ;;  %v4218_v12 = vmul.f32 %v18466_v7, %v18466_v7 }
0x17ff   :  { %v4212_v15 = vmul.f32 0.0625, %v4207_v9  ;;  %v4211_v17 = vmul.f32 0.0625, %v4204_v11  ;;  %v4217_v1 = vmul.f32 %v18468_v8, %v18468_v8 }
0x1800   :  { %v4224_v18 = vsel %vm850_vm4, %v4218_v12, 0.0 }
0x1801   :  { %v18475_v19 = vsub.f32 %v15747_v10, %v4212_v15  ;;  %v18477_v21 = vsub.f32 %v4183_v56, %v4211_v17  ;;  %4225 = vadd.xlane.f32.xlu1 %v4224_v18  ;;  %v4221_v22 = vsel %vm850_vm4, %v4217_v1, 0.0 }
0x1802   :  { %4222 = vadd.xlane.f32.xlu0 %v4221_v22  ;;  %v4261_v38 = vpop.permute.xlu1 %4260  ;;  %v14007_v22 = vld [vmem:[%s18529_s5 + $0x38] sm:$0xff] }
0x1803   :  { %v4220_v23 = vmul.f32 %v18475_v19, %v18475_v19  ;;  %v4219_v24 = vmul.f32 %v18477_v21, %v18477_v21 }
0x1805   :  { %v4230_v25 = vsel %vm850_vm4, %v4220_v23, 0.0  ;;  %v4227_v26 = vsel %vm850_vm4, %v4219_v24, 0.0  ;;  %v4408_v23 = vld [vmem:[%s18529_s5] sm:$0xff] }
0x1806   :  { %4231 = vadd.xlane.f32.xlu1 %v4230_v25  ;;  %4228 = vadd.xlane.f32.xlu0 %v4227_v26  ;;  %v4256_v39 = vpop.permute.xlu0 %4255  ;;  %v4284_v40 = vpop.permute.xlu1 %4283 }
0x180a   :  { %v4289_v41 = vpop.permute.xlu0 %4288  ;;  %v4266_v42 = vpop.permute.xlu1 %4265 }
0x180e   :  { %v4271_v43 = vpop.permute.xlu0 %4270 }
0x1817   :  { %4293 = vperm.xlu1 %17803, %v4279_v27  }
0x181c   :  { %4298 = vperm.xlu0 %17802, %v4280_v28  }
0x188e   :  { %v4226_v44 = vpop.xlane.xlu1 %4225 }
0x188f   :  { %v4234_v45 = vmul.f32 0.0625, %v4226_v44  ;;  %v4223_v46 = vpop.xlane.xlu0 %4222  ;;  %v14022_v44 = vld [vmem:[%s18529_s5 + $0x40] sm:$0xff] }
0x1890   :  { %v4233_v47 = vmul.f32 0.0625, %v4223_v46  ;;  %v14024_v46 = vld [vmem:[%s18529_s5 + $0x50] sm:$0xff] }
0x1891   :  { %v4238_v48 = vadd.f32 1e-05, %v4234_v45  ;;  %v14023_v45 = vld [vmem:[%s18529_s5 + $0x48] sm:$0xff] }
0x1892   :  { %v4237_v59 = vadd.f32 1e-05, %v4233_v47  ;;  %v14025_v47 = vld [vmem:[%s18529_s5 + $0x58] sm:$0xff] }
0x1893   :  { %17832 = vrsqrt.f32 %v4238_v48  ;;  %v4232_v49 = vpop.xlane.xlu1 %4231  ;;  %v4229_v50 = vpop.xlane.xlu0 %4228  ;;  %v4805_v48 = vld [vmem:[%s13824_s9] sm:$0xff] }
0x1894   :  { %17834 = vrsqrt.f32 %v4237_v59  ;;  %v4236_v61 = vmul.f32 0.0625, %v4232_v49  ;;  %v4235_v51 = vmul.f32 0.0625, %v4229_v50  ;;  %v4806_v59 = vld [vmem:[%s13824_s9 + $0x8] sm:$0xff]  ;;  %v4807_v49 = vld [vmem:[%s13824_s9 + $0x10] sm:$0xff]  ;;  %v4808_v50 = vld [vmem:[%s13824_s9 + $0x18] sm:$0xff]  ;;  %s18881_s9 = sld [smem:[%s20441_s0 + %s18029_s6]]  }
0x1896   :  { %v4240_v52 = vadd.f32 1e-05, %v4236_v61  ;;  %v4239_v53 = vadd.f32 1e-05, %v4235_v51 }
0x1897   :  { %v4294_v12 = vpop.permute.xlu1 %4293 }
0x1898   :  { %17836 = vrsqrt.f32 %v4240_v52 }
0x1899   :  { %17838 = vrsqrt.f32 %v4239_v53 }
0x189b   :  { %v4299_v11 = vpop.permute.xlu0 %4298 }
0x189d   :  { %v17833_v54 = vpop.eup %17832 }
0x189e   :  { %v17835_v5 = vpop.eup %17834  ;;  %v4246_v55 = vmul.f32 %v17833_v54, %v18466_v7  ;;  %v17093_v7 = vpack.c.bf16 %v4812_v2, %v4811_v13 }
0x189f   :  { %v4245_v10 = vmul.f32 %v17835_v5, %v18468_v8 }
0x18a0   :  { %v4274_v56 = vmul.f32 %v4261_v38, %v4246_v55 }
0x18a1   :  { %v4273_v57 = vmul.f32 %v4256_v39, %v4245_v10 }
0x18a2   :  { %v17837_v58 = vpop.eup %17836  ;;  %v4302_v60 = vadd.f32 %v4289_v41, %v4274_v56  ;;  %v5038_v56 = vld [vmem:[%s13825_s13 + $0x8] sm:$0xff] }
0x18a3   :  { %v17839_v62 = vpop.eup %17838  ;;  %v4248_v63 = vmul.f32 %v17837_v58, %v18475_v19  ;;  %v4301_v0 = vadd.f32 %v4284_v40, %v4273_v57  ;;  %v4409_v40 = vld [vmem:[%s18529_s5 + $0x8] sm:$0xff]  ;;  %v5065_v57 = vld [vmem:[%s18587_s17] sm:$0xff] }
0x18a4   :  { %v4247_v14 = vmul.f32 %v17839_v62, %v18477_v21  ;;  %v4306_v3 = vmax.f32 %v4302_v60, 0.0  ;;  %v14005_v21 = vld [vmem:[%s18529_s5 + $0x28] sm:$0xff]  ;;  %v5037_v58 = vld [vmem:[%s13825_s13] sm:$0xff]  ;;  %v5039_v60 = vld [vmem:[%s13825_s13 + $0x10] sm:$0xff] }
0x18a5   :  { %v4276_v4 = vmul.f32 %v4271_v43, %v4248_v63  ;;  %v4305_v6 = vmax.f32 %v4301_v0, 0.0  ;;  %v4411_v43 = vld [vmem:[%s18529_s5 + $0x18] sm:$0xff]  ;;  %v5066_v62 = vld [vmem:[%s18587_s17 + $0x8] sm:$0xff] }
0x18a6   :  { %v4275_v9 = vmul.f32 %v4266_v42, %v4247_v14  ;;  %v4410_v42 = vld [vmem:[%s18529_s5 + $0x10] sm:$0xff]  ;;  %v5040_v63 = vld [vmem:[%s13825_s13 + $0x18] sm:$0xff]  ;;  %s18887_s13 = sld [smem:[%s20441_s0 + %s18030_s10]]  }
0x18a7   :  { %v4304_v8 = vadd.f32 %v4299_v11, %v4276_v4  ;;  %15752 = vmatprep.mubr.msk.f32.mxu0 %vm850_vm4, %v4305_v6  ;;  %15790 = vmatprep.mubr.msk.f32.mxu1 %vm850_vm4, %v4305_v6  ;;  %v17061_v15 = vpack.c.bf16 %v4306_v3, %v4305_v6 }
0x18a8   :  { %v4303_v17 = vadd.f32 %v4294_v12, %v4275_v9  ;;  %15753 = vmatmul.mubr.msk.f32.vlgmr.msra.gmra.mrb[24].mxu0 %vm850_vm4, %v4306_v3  ;;  %15791 = vmatmul.mubr.msk.f32.vlgmr.msra.gmra.mrb[30].mxu1 %vm850_vm4, %v4306_v3 }
0x18a9   :  { %v4308_v1 = vmax.f32 %v4304_v8, 0.0  ;;  %17062 = vmatprep.subr.bf16.mxu0 %v17061_v15  ;;  %17092 = vmatpush3.bf16.msra.mxu1 %v17089_v20 }
0x18aa   :  { %v4307_v18 = vmax.f32 %v4303_v17, 0.0  ;;  %17064 = vmatpush3.bf16.msra.mxu0 %v17061_v15  ;;  %17094 = vmatprep.subr.bf16.mxu1 %v17093_v7 }
0x18ac   :  { %15755 = vmatprep.mubr.msk.f32.mxu0 %vm850_vm4, %v4307_v18  ;;  %15793 = vmatprep.mubr.msk.f32.mxu1 %vm850_vm4, %v4307_v18  ;;  %v17065_v19 = vpack.c.bf16 %v4308_v1, %v4307_v18 }
0x18ad   :  { %15756 = vmatmul.mubr.msk.f32.gmra.mrb[26].mxu0 %vm850_vm4, %v4308_v1  ;;  %15794 = vmatmul.mubr.msk.f32.gmra.mrb[32].mxu1 %vm850_vm4, %v4308_v1 }
0x18ae   :  { %17066 = vmatprep.subr.bf16.mxu0 %v17065_v19  ;;  %17096 = vmatpush3.bf16.msra.mxu1 %v17093_v7 }
0x18af   :  { %15818 = vmatprep.mubr.msk.f32.mxu1 %vm295_vm3, %v18407_v16  ;;  %17068 = vmatpush3.bf16.msra.mxu0 %v17065_v19  ;;  %v14004_v16 = vld [vmem:[%s18529_s5 + $0x20] sm:$0xff] }
0x18b0   :  { %17102 = vmatprep.subr.bf16.mxu1 %v18496_v32  ;;  %15766 = vmatprep.mubr.msk.f32.mxu0 %vm295_vm3, %v14004_v16 }
0x18b1   :  { %15819 = vmatmul.mubr.msk.f32.vlgmr.msra.gmra.mrb[34].mxu1 %vm295_vm3, %v18409_v33  ;;  %v14006_v33 = vld [vmem:[%s18529_s5 + $0x30] sm:$0xff]  ;;  %s18854_s5 = sld [smem:[%s20441_s0 + %s18028_s2]]   ;;  %s18043_s2 = smov 62  }
0x18b2   :  { %17104 = vmatpush3.bf16.msra.mxu1 %v18496_v32  ;;  %15767 = vmatmul.mubr.msk.f32.vlgmr.msra.gmra.mrb[28].mxu0 %vm295_vm3, %v14005_v21  ;;  %s19559_s6 = sld [smem:[%s20441_s0 + %s18043_s2]]  }
0x18b3   :  { %15769 = vmatprep.mubr.msk.f32.mxu0 %vm295_vm3, %v14006_v33 }
0x18b6   :  { %15770 = vmatmul.mubr.msk.f32.gmra.mrb[30].mxu0 %vm295_vm3, %v14007_v22  ;;  %v5067_v22 = vld [vmem:[%s18587_s17 + $0x10] sm:$0xff] }
0x18b7   :  { %15780 = vmatprep.mubr.msk.f32.mxu0 %vm295_vm3, %v4408_v23  ;;  %v5068_v23 = vld [vmem:[%s18587_s17 + $0x18] sm:$0xff]  ;;  %s18895_s17 = sld [smem:[%s20441_s0 + %s18031_s14]]  }
0x197b   :  { %v15754_v24 = vpop.f32.mrb[24].mxu0  ;;  %v15792_v25 = vpop.f32.mrb[30].mxu1 }
0x197c   :  { %v4389_v26 = vpop.f32.mrb[25].mxu0  ;;  %v4680_v27 = vpop.f32.mrb[31].mxu1 }
0x197d   :  { %v17069_v28 = vpack.c.bf16 %v15754_v24, %v4389_v26  ;;  %v17081_v29 = vpack.c.bf16 %v15792_v25, %v4680_v27 }
0x197f   :  { %17070 = vmatprep.subr.bf16.mxu0 %v17069_v28 }
0x1980   :  { %v15757_v30 = vpop.f32.mrb[26].mxu0  ;;  %v15795_v31 = vpop.f32.mrb[32].mxu1  ;;  %17072 = vmatpush3.bf16.msra.mxu0 %v17069_v28 }
0x1981   :  { %v4399_v34 = vpop.f32.mrb[27].mxu0  ;;  %v4690_v36 = vpop.f32.mrb[33].mxu1 }
0x1982   :  { %v17073_v37 = vpack.c.bf16 %v15757_v30, %v4399_v34  ;;  %v17085_v20 = vpack.c.bf16 %v15795_v31, %v4690_v36 }
0x1984   :  { %17074 = vmatprep.subr.bf16.mxu0 %v17073_v37  ;;  %v15820_v38 = vpop.f32.mrb[34].mxu1 }
0x1985   :  { %17076 = vmatpush3.bf16.msra.mxu0 %v17073_v37  ;;  %v4879_v39 = vpop.f32.mrb[35].mxu1 }
0x1986   :  { %v17097_v41 = vpack.c.bf16 %v15820_v38, %v4879_v39  ;;  %17082 = vmatprep.subr.bf16.mxu0 %v17081_v29 }
0x1988   :  { %15781 = vmatmul.mubr.msk.f32.vlgmr.msra.gmra.mrb[28].mxu0 %vm295_vm3, %v4409_v40 }
0x1989   :  { %17084 = vmatpush3.bf16.msra.mxu0 %v17081_v29  ;;  %15783 = vmatprep.mubr.msk.f32.mxu0 %vm295_vm3, %v4410_v42 }
0x198a   :  { %17086 = vmatprep.subr.bf16.mxu0 %v17085_v20 }
0x198c   :  { %15784 = vmatmul.mubr.msk.f32.gmra.mrb[30].mxu0 %vm295_vm3, %v4411_v43 }
0x198d   :  { %17088 = vmatpush3.bf16.msra.mxu0 %v17085_v20  ;;  %15804 = vmatprep.mubr.msk.f32.mxu0 %vm295_vm3, %v14022_v44 }
0x198e   :  { %17098 = vmatprep.subr.bf16.mxu0 %v17097_v41 }
0x1990   :  { %15805 = vmatmul.mubr.msk.f32.vlgmr.msra.gmra.mrb[28].mxu0 %vm295_vm3, %v14023_v45 }
0x1991   :  { %17100 = vmatpush3.bf16.msra.mxu0 %v17097_v41  ;;  %15807 = vmatprep.mubr.msk.f32.mxu0 %vm295_vm3, %v14024_v46 }
0x1992   :  { %17122 = vmatprep.subr.bf16.mxu0 %v18498_v35 }
0x1994   :  { %15808 = vmatmul.mubr.msk.f32.gmra.mrb[30].mxu0 %vm295_vm3, %v14025_v47 }
0x1995   :  { %15825 = vmatprep.mubr.msk.f32.mxu0 %vm850_vm4, %v4805_v48 }
0x1998   :  { %15826 = vmatmul.mubr.msk.f32.vlgmr.msra.gmra.mrb[28].mxu0 %vm850_vm4, %v4806_v59 }
0x1999   :  { %15828 = vmatprep.mubr.msk.f32.mxu0 %vm850_vm4, %v4807_v49  ;;  %17124 = vmatpush3.bf16.msra.mxu0 %v18498_v35 }
0x199a   :  { %17134 = vmatprep.subr.bf16.mxu0 %v18496_v32 }
0x199c   :  { %15829 = vmatmul.mubr.msk.f32.gmra.mrb[30].mxu0 %vm850_vm4, %v4808_v50 }
0x1a6b   :  { %v18565_v61 = vpop.f32.mrb[28].mxu0 }
0x1a6c   :  { %v18567_v51 = vpop.f32.mrb[29].mxu0  ;;  %v4988_v52 = vsel %vm850_vm4, %v18565_v61, 0.0 }
0x1a6d   :  { %4989 = vadd.xlane.f32.xlu0 %v4988_v52  ;;  %v4985_v53 = vsel %vm850_vm4, %v18567_v51, 0.0 }
0x1a6e   :  { %4986 = vadd.xlane.f32.xlu1 %v4985_v53 }
0x1a6f   :  { %v18573_v54 = vpop.f32.mrb[30].mxu0 }
0x1a70   :  { %v18575_v5 = vpop.f32.mrb[31].mxu0  ;;  %v4994_v55 = vsel %vm850_vm4, %v18573_v54, 0.0 }
0x1a71   :  { %v4991_v10 = vsel %vm850_vm4, %v18575_v5, 0.0 }
0x1a72   :  { %4995 = vadd.xlane.f32.xlu1 %v4994_v55  ;;  %4992 = vadd.xlane.f32.xlu0 %v4991_v10 }
0x1a83   :  { %5048 = vperm.xlu1 %17803, %v5038_v56  }
0x1a87   :  { %5071 = vperm.xlu1 %17803, %v5065_v57  }
0x1a88   :  { %5043 = vperm.xlu0 %17802, %v5037_v58  }
0x1a8b   :  { %5053 = vperm.xlu1 %17803, %v5039_v60  }
0x1a8c   :  { %5076 = vperm.xlu0 %17802, %v5066_v62  }
0x1a90   :  { %5058 = vperm.xlu0 %17802, %v5040_v63  }
0x1afa   :  { %v4990_v0 = vpop.xlane.xlu0 %4989 }
0x1afb   :  { %v4998_v13 = vmul.f32 0.0625, %v4990_v0  ;;  %v4987_v2 = vpop.xlane.xlu1 %4986 }
0x1afc   :  { %v4997_v14 = vmul.f32 0.0625, %v4987_v2 }
0x1afd   :  { %v5002_v3 = vsub.f32 %v18565_v61, %v4998_v13 }
0x1afe   :  { %v5001_v4 = vsub.f32 %v18567_v51, %v4997_v14 }
0x1aff   :  { %v4996_v6 = vpop.xlane.xlu1 %4995  ;;  %v4993_v9 = vpop.xlane.xlu0 %4992  ;;  %v5006_v11 = vmul.f32 %v5002_v3, %v5002_v3 }
0x1b00   :  { %v5000_v7 = vmul.f32 0.0625, %v4996_v6  ;;  %v4999_v12 = vmul.f32 0.0625, %v4993_v9  ;;  %v5005_v8 = vmul.f32 %v5001_v4, %v5001_v4  ;;  %v14040_v6 = vld [vmem:[%s18613_s21 + $0x20] sm:$0xff]  ;;  %v14041_v9 = vld [vmem:[%s18613_s21 + $0x28] sm:$0xff] }
0x1b01   :  { %v5012_v15 = vsel %vm850_vm4, %v5006_v11, 0.0  ;;  %v14042_v11 = vld [vmem:[%s18613_s21 + $0x30] sm:$0xff] }
0x1b02   :  { %v5004_v17 = vsub.f32 %v18573_v54, %v5000_v7  ;;  %v5003_v1 = vsub.f32 %v18575_v5, %v4999_v12  ;;  %5013 = vadd.xlane.f32.xlu1 %v5012_v15  ;;  %v5009_v18 = vsel %vm850_vm4, %v5005_v8, 0.0  ;;  %v14043_v7 = vld [vmem:[%s18613_s21 + $0x38] sm:$0xff]  ;;  %v5194_v12 = vld [vmem:[%s18613_s21] sm:$0xff] }
0x1b03   :  { %5010 = vadd.xlane.f32.xlu0 %v5009_v18  ;;  %v5049_v24 = vpop.permute.xlu1 %5048 }
0x1b04   :  { %v5008_v19 = vmul.f32 %v5004_v17, %v5004_v17  ;;  %v5007_v16 = vmul.f32 %v5003_v1, %v5003_v1 }
0x1b06   :  { %v5018_v21 = vsel %vm850_vm4, %v5008_v19, 0.0  ;;  %v5015_v33 = vsel %vm850_vm4, %v5007_v16, 0.0 }
0x1b07   :  { %5019 = vadd.xlane.f32.xlu1 %v5018_v21  ;;  %5016 = vadd.xlane.f32.xlu0 %v5015_v33  ;;  %v5044_v25 = vpop.permute.xlu0 %5043  ;;  %v5072_v26 = vpop.permute.xlu1 %5071 }
0x1b0b   :  { %v5077_v27 = vpop.permute.xlu0 %5076  ;;  %v5054_v28 = vpop.permute.xlu1 %5053 }
0x1b0f   :  { %v5059_v29 = vpop.permute.xlu0 %5058 }
0x1b18   :  { %5081 = vperm.xlu1 %17803, %v5067_v22  }
0x1b1d   :  { %5086 = vperm.xlu0 %17802, %v5068_v23  }
0x1b8f   :  { %v5014_v30 = vpop.xlane.xlu1 %5013 }
0x1b90   :  { %v5022_v31 = vmul.f32 0.0625, %v5014_v30  ;;  %v5011_v34 = vpop.xlane.xlu0 %5010  ;;  %v14058_v30 = vld [vmem:[%s18613_s21 + $0x50] sm:$0xff] }
0x1b91   :  { %v5021_v36 = vmul.f32 0.0625, %v5011_v34 }
0x1b92   :  { %v5026_v37 = vadd.f32 1e-05, %v5022_v31  ;;  %v14059_v31 = vld [vmem:[%s18613_s21 + $0x58] sm:$0xff] }
0x1b93   :  { %v5025_v20 = vadd.f32 1e-05, %v5021_v36 }
0x1b94   :  { %17840 = vrsqrt.f32 %v5026_v37  ;;  %v5020_v38 = vpop.xlane.xlu1 %5019  ;;  %v5017_v39 = vpop.xlane.xlu0 %5016 }
0x1b95   :  { %17842 = vrsqrt.f32 %v5025_v20  ;;  %v5024_v40 = vmul.f32 0.0625, %v5020_v38  ;;  %v5023_v41 = vmul.f32 0.0625, %v5017_v39 }
0x1b97   :  { %v5028_v42 = vadd.f32 1e-05, %v5024_v40  ;;  %v5027_v43 = vadd.f32 1e-05, %v5023_v41 }
0x1b98   :  { %v5082_v63 = vpop.permute.xlu1 %5081 }
0x1b99   :  { %17844 = vrsqrt.f32 %v5028_v42  ;;  %v5641_v42 = vld [vmem:[%s13828_s25 + $0x8] sm:$0xff] }
0x1b9a   :  { %17846 = vrsqrt.f32 %v5027_v43  ;;  %v5668_v43 = vld [vmem:[%s18652_s29] sm:$0xff] }
0x1b9c   :  { %v5087_v62 = vpop.permute.xlu0 %5086 }
0x1b9e   :  { %v17841_v44 = vpop.eup %17840 }
0x1b9f   :  { %v17843_v45 = vpop.eup %17842  ;;  %v5034_v46 = vmul.f32 %v17841_v44, %v5002_v3  ;;  %v5640_v44 = vld [vmem:[%s13828_s25] sm:$0xff] }
0x1ba0   :  { %v5033_v47 = vmul.f32 %v17843_v45, %v5001_v4  ;;  %v5642_v45 = vld [vmem:[%s13828_s25 + $0x10] sm:$0xff] }
0x1ba1   :  { %v5062_v48 = vmul.f32 %v5049_v24, %v5034_v46  ;;  %v5669_v46 = vld [vmem:[%s18652_s29 + $0x8] sm:$0xff] }
0x1ba2   :  { %v5061_v59 = vmul.f32 %v5044_v25, %v5033_v47  ;;  %v5195_v25 = vld [vmem:[%s18613_s21 + $0x8] sm:$0xff]  ;;  %v5643_v47 = vld [vmem:[%s13828_s25 + $0x18] sm:$0xff]  ;;  %s19077_s25 = sld [smem:[%s20441_s0 + %s18033_s22]]  }
0x1ba3   :  { %v17845_v49 = vpop.eup %17844  ;;  %v5090_v50 = vadd.f32 %v5077_v27, %v5062_v48  ;;  %v5197_v27 = vld [vmem:[%s18613_s21 + $0x18] sm:$0xff] }
0x1ba4   :  { %v17847_v52 = vpop.eup %17846  ;;  %v5036_v53 = vmul.f32 %v17845_v49, %v5004_v17  ;;  %v5089_v55 = vadd.f32 %v5072_v26, %v5061_v59  ;;  %v5196_v26 = vld [vmem:[%s18613_s21 + $0x10] sm:$0xff] }
0x1ba5   :  { %v5035_v10 = vmul.f32 %v17847_v52, %v5003_v1  ;;  %v5094_v56 = vmax.f32 %v5090_v50, 0.0 }
0x1ba6   :  { %v5064_v57 = vmul.f32 %v5059_v29, %v5036_v53  ;;  %v5093_v58 = vmax.f32 %v5089_v55, 0.0  ;;  %v14057_v29 = vld [vmem:[%s18613_s21 + $0x48] sm:$0xff] }
0x1ba7   :  { %v5063_v60 = vmul.f32 %v5054_v28, %v5035_v10  ;;  %v14056_v28 = vld [vmem:[%s18613_s21 + $0x40] sm:$0xff]  ;;  %s18947_s21 = sld [smem:[%s20441_s0 + %s18032_s18]]  }
0x1ba8   :  { %v5092_v0 = vadd.f32 %v5087_v62, %v5064_v57  ;;  %15835 = vmatprep.mubr.msk.f32.mxu1 %vm850_vm4, %v5093_v58  ;;  %15873 = vmatprep.mubr.msk.f32.mxu0 %vm850_vm4, %v5093_v58  ;;  %v17105_v13 = vpack.c.bf16 %v5094_v56, %v5093_v58 }
0x1ba9   :  { %v5091_v2 = vadd.f32 %v5082_v63, %v5063_v60  ;;  %15836 = vmatmul.mubr.msk.f32.vlgmr.msra.gmra.mrb[36].mxu1 %vm850_vm4, %v5094_v56  ;;  %15874 = vmatmul.mubr.msk.f32.vlgmr.msra.gmra.mrb[32].mxu0 %vm850_vm4, %v5094_v56 }
0x1baa   :  { %v5096_v14 = vmax.f32 %v5092_v0, 0.0  ;;  %17106 = vmatprep.subr.bf16.mxu1 %v17105_v13  ;;  %17136 = vmatpush3.bf16.msra.mxu0 %v18496_v32 }
0x1bab   :  { %v5095_v3 = vmax.f32 %v5091_v2, 0.0  ;;  %17108 = vmatpush3.bf16.msra.mxu1 %v17105_v13 }
0x1bad   :  { %15838 = vmatprep.mubr.msk.f32.mxu1 %vm850_vm4, %v5095_v3  ;;  %15876 = vmatprep.mubr.msk.f32.mxu0 %vm850_vm4, %v5095_v3  ;;  %v17109_v4 = vpack.c.bf16 %v5096_v14, %v5095_v3 }
0x1bae   :  { %15839 = vmatmul.mubr.msk.f32.gmra.mrb[38].mxu1 %vm850_vm4, %v5096_v14  ;;  %15877 = vmatmul.mubr.msk.f32.gmra.mrb[34].mxu0 %vm850_vm4, %v5096_v14 }
0x1baf   :  { %17110 = vmatprep.subr.bf16.mxu1 %v17109_v4  ;;  %15849 = vmatprep.mubr.msk.f32.mxu1 %vm295_vm3, %v14040_v6  ;;  %v5670_v6 = vld [vmem:[%s18652_s29 + $0x10] sm:$0xff] }
0x1bb0   :  { %17112 = vmatpush3.bf16.msra.mxu1 %v17109_v4 }
0x1bb3   :  { %15850 = vmatmul.mubr.msk.f32.vlgmr.msra.gmra.mrb[40].mxu1 %vm295_vm3, %v14041_v9  ;;  %v5671_v9 = vld [vmem:[%s18652_s29 + $0x18] sm:$0xff]  ;;  %s19083_s29 = sld [smem:[%s20441_s0 + %s18034_s26]]   ;;  %s18049_s26 = smov 68  }
0x1bb4   :  { %15852 = vmatprep.mubr.msk.f32.mxu1 %vm295_vm3, %v14042_v11 }
0x1bb7   :  { %15853 = vmatmul.mubr.msk.f32.gmra.mrb[42].mxu1 %vm295_vm3, %v14043_v7 }
0x1bb8   :  { %15863 = vmatprep.mubr.msk.f32.mxu1 %vm295_vm3, %v5194_v12 }
0x1c7c   :  { %v15837_v8 = vpop.f32.mrb[36].mxu1  ;;  %v15875_v15 = vpop.f32.mrb[32].mxu0 }
0x1c7d   :  { %v5175_v17 = vpop.f32.mrb[37].mxu1  ;;  %v5463_v1 = vpop.f32.mrb[33].mxu0 }
0x1c7e   :  { %v17113_v18 = vpack.c.bf16 %v15837_v8, %v5175_v17  ;;  %v17125_v19 = vpack.c.bf16 %v15875_v15, %v5463_v1 }
0x1c80   :  { %17114 = vmatprep.subr.bf16.mxu1 %v17113_v18 }
0x1c81   :  { %v15840_v16 = vpop.f32.mrb[38].mxu1  ;;  %v15878_v21 = vpop.f32.mrb[34].mxu0  ;;  %17116 = vmatpush3.bf16.msra.mxu1 %v17113_v18 }
0x1c82   :  { %v5185_v33 = vpop.f32.mrb[39].mxu1  ;;  %v5473_v22 = vpop.f32.mrb[35].mxu0 }
0x1c83   :  { %v17117_v23 = vpack.c.bf16 %v15840_v16, %v5185_v33  ;;  %v17129_v24 = vpack.c.bf16 %v15878_v21, %v5473_v22 }
0x1c85   :  { %17118 = vmatprep.subr.bf16.mxu1 %v17117_v23 }
0x1c86   :  { %17120 = vmatpush3.bf16.msra.mxu1 %v17117_v23 }
0x1c87   :  { %17126 = vmatprep.subr.bf16.mxu1 %v17125_v19 }
0x1c89   :  { %15864 = vmatmul.mubr.msk.f32.vlgmr.msra.gmra.mrb[40].mxu1 %vm295_vm3, %v5195_v25 }
0x1c8a   :  { %17128 = vmatpush3.bf16.msra.mxu1 %v17125_v19  ;;  %15866 = vmatprep.mubr.msk.f32.mxu1 %vm295_vm3, %v5196_v26 }
0x1c8b   :  { %17130 = vmatprep.subr.bf16.mxu1 %v17129_v24 }
0x1c8d   :  { %15867 = vmatmul.mubr.msk.f32.gmra.mrb[42].mxu1 %vm295_vm3, %v5197_v27 }
0x1c8e   :  { %17132 = vmatpush3.bf16.msra.mxu1 %v17129_v24  ;;  %15887 = vmatprep.mubr.msk.f32.mxu1 %vm295_vm3, %v14056_v28 }
0x1c8f   :  { %17154 = vmatprep.subr.bf16.mxu1 %v18498_v35 }
0x1c91   :  { %15888 = vmatmul.mubr.msk.f32.vlgmr.msra.gmra.mrb[40].mxu1 %vm295_vm3, %v14057_v29 }
0x1c92   :  { %15890 = vmatprep.mubr.msk.f32.mxu1 %vm295_vm3, %v14058_v30  ;;  %17156 = vmatpush3.bf16.msra.mxu1 %v18498_v35 }
0x1c93   :  { %17166 = vmatprep.subr.bf16.mxu1 %v18496_v32 }
0x1c95   :  { %15891 = vmatmul.mubr.msk.f32.gmra.mrb[42].mxu1 %vm295_vm3, %v14059_v31 }
0x1d64   :  { %v15889_v34 = vpop.f32.mrb[40].mxu1 }
0x1d65   :  { %v5565_v36 = vpop.f32.mrb[41].mxu1  ;;  %v5591_v37 = vsel %vm850_vm4, %v15889_v34, 0.0 }
0x1d66   :  { %5592 = vadd.xlane.f32.xlu0 %v5591_v37  ;;  %v5588_v20 = vsel %vm850_vm4, %v5565_v36, 0.0 }
0x1d67   :  { %5589 = vadd.xlane.f32.xlu1 %v5588_v20 }
0x1d68   :  { %v15892_v38 = vpop.f32.mrb[42].mxu1 }
0x1d69   :  { %v5575_v39 = vpop.f32.mrb[43].mxu1  ;;  %v5597_v40 = vsel %vm850_vm4, %v15892_v38, 0.0 }
0x1d6a   :  { %v5594_v41 = vsel %vm850_vm4, %v5575_v39, 0.0 }
0x1d6b   :  { %5598 = vadd.xlane.f32.xlu1 %v5597_v40  ;;  %5595 = vadd.xlane.f32.xlu0 %v5594_v41 }
0x1d7c   :  { %5651 = vperm.xlu1 %17803, %v5641_v42  }
0x1d80   :  { %5674 = vperm.xlu1 %17803, %v5668_v43  }
0x1d81   :  { %5646 = vperm.xlu0 %17802, %v5640_v44  }
0x1d84   :  { %5656 = vperm.xlu1 %17803, %v5642_v45  }
0x1d85   :  { %5679 = vperm.xlu0 %17802, %v5669_v46  }
0x1d89   :  { %5661 = vperm.xlu0 %17802, %v5643_v47  }
0x1df3   :  { %v5593_v48 = vpop.xlane.xlu0 %5592 }
0x1df4   :  { %v5601_v59 = vmul.f32 0.0625, %v5593_v48  ;;  %v5590_v49 = vpop.xlane.xlu1 %5589 }
0x1df5   :  { %v5600_v50 = vmul.f32 0.0625, %v5590_v49 }
0x1df6   :  { %v5605_v52 = vsub.f32 %v15889_v34, %v5601_v59 }
0x1df7   :  { %v5604_v53 = vsub.f32 %v5565_v36, %v5600_v50 }
0x1df8   :  { %v5599_v55 = vpop.xlane.xlu1 %5598  ;;  %v5596_v10 = vpop.xlane.xlu0 %5595  ;;  %v5609_v56 = vmul.f32 %v5605_v52, %v5605_v52 }
0x1df9   :  { %v5603_v57 = vmul.f32 0.0625, %v5599_v55  ;;  %v5602_v58 = vmul.f32 0.0625, %v5596_v10  ;;  %v5608_v60 = vmul.f32 %v5604_v53, %v5604_v53  ;;  %v14068_v55 = vld [vmem:[%s18674_s3 + $0x20] sm:$0xff]  ;;  %v14069_v10 = vld [vmem:[%s18674_s3 + $0x28] sm:$0xff] }
0x1dfa   :  { %v5615_v62 = vsel %vm850_vm4, %v5609_v56, 0.0  ;;  %v14070_v56 = vld [vmem:[%s18674_s3 + $0x30] sm:$0xff] }
0x1dfb   :  { %v5607_v63 = vsub.f32 %v15892_v38, %v5603_v57  ;;  %v5606_v0 = vsub.f32 %v5575_v39, %v5602_v58  ;;  %5616 = vadd.xlane.f32.xlu1 %v5615_v62  ;;  %v5612_v13 = vsel %vm850_vm4, %v5608_v60, 0.0  ;;  %v14071_v57 = vld [vmem:[%s18674_s3 + $0x38] sm:$0xff]  ;;  %v5797_v58 = vld [vmem:[%s18674_s3] sm:$0xff] }
0x1dfc   :  { %5613 = vadd.xlane.f32.xlu0 %v5612_v13  ;;  %v5652_v11 = vpop.permute.xlu1 %5651 }
0x1dfd   :  { %v5611_v2 = vmul.f32 %v5607_v63, %v5607_v63  ;;  %v5610_v14 = vmul.f32 %v5606_v0, %v5606_v0 }
0x1dff   :  { %v5621_v3 = vsel %vm850_vm4, %v5611_v2, 0.0  ;;  %v5618_v4 = vsel %vm850_vm4, %v5610_v14, 0.0 }
0x1e00   :  { %5622 = vadd.xlane.f32.xlu1 %v5621_v3  ;;  %5619 = vadd.xlane.f32.xlu0 %v5618_v4  ;;  %v5647_v7 = vpop.permute.xlu0 %5646  ;;  %v5675_v12 = vpop.permute.xlu1 %5674 }
0x1e04   :  { %v5680_v8 = vpop.permute.xlu0 %5679  ;;  %v5657_v15 = vpop.permute.xlu1 %5656 }
0x1e08   :  { %v5662_v17 = vpop.permute.xlu0 %5661 }
0x1e11   :  { %5684 = vperm.xlu1 %17803, %v5670_v6  }
0x1e16   :  { %5689 = vperm.xlu0 %17802, %v5671_v9  }
0x1e88   :  { %v5617_v1 = vpop.xlane.xlu1 %5616 }
0x1e89   :  { %v5625_v18 = vmul.f32 0.0625, %v5617_v1  ;;  %v5614_v19 = vpop.xlane.xlu0 %5613  ;;  %v14086_v1 = vld [vmem:[%s18674_s3 + $0x50] sm:$0xff] }
0x1e8a   :  { %v5624_v16 = vmul.f32 0.0625, %v5614_v19 }
0x1e8b   :  { %v5629_v21 = vadd.f32 1e-05, %v5625_v18  ;;  %v14087_v18 = vld [vmem:[%s18674_s3 + $0x58] sm:$0xff] }
0x1e8c   :  { %v5628_v33 = vadd.f32 1e-05, %v5624_v16 }
0x1e8d   :  { %17848 = vrsqrt.f32 %v5629_v21  ;;  %v5623_v22 = vpop.xlane.xlu1 %5622  ;;  %v5620_v23 = vpop.xlane.xlu0 %5619 }
0x1e8e   :  { %17850 = vrsqrt.f32 %v5628_v33  ;;  %v5627_v24 = vmul.f32 0.0625, %v5623_v22  ;;  %v5626_v25 = vmul.f32 0.0625, %v5620_v23 }
0x1e90   :  { %v5631_v26 = vadd.f32 1e-05, %v5627_v24  ;;  %v5630_v27 = vadd.f32 1e-05, %v5626_v25 }
0x1e91   :  { %v5685_v47 = vpop.permute.xlu1 %5684 }
0x1e92   :  { %17852 = vrsqrt.f32 %v5631_v26 }
0x1e93   :  { %17854 = vrsqrt.f32 %v5630_v27 }
0x1e95   :  { %v5690_v46 = vpop.permute.xlu0 %5689 }
0x1e97   :  { %v17849_v28 = vpop.eup %17848 }
0x1e98   :  { %v17851_v29 = vpop.eup %17850  ;;  %v5637_v30 = vmul.f32 %v17849_v28, %v5605_v52  ;;  %v6247_v28 = vld [vmem:[%s13831_s7] sm:$0xff] }
0x1e99   :  { %v5636_v31 = vmul.f32 %v17851_v29, %v5604_v53  ;;  %v6249_v29 = vld [vmem:[%s13831_s7 + $0x10] sm:$0xff] }
0x1e9a   :  { %v5665_v34 = vmul.f32 %v5652_v11, %v5637_v30  ;;  %v6276_v30 = vld [vmem:[%s18729_s11 + $0x8] sm:$0xff] }
0x1e9b   :  { %v5664_v36 = vmul.f32 %v5647_v7, %v5636_v31  ;;  %v5798_v7 = vld [vmem:[%s18674_s3 + $0x8] sm:$0xff]  ;;  %v6250_v31 = vld [vmem:[%s13831_s7 + $0x18] sm:$0xff] }
0x1e9c   :  { %v17853_v37 = vpop.eup %17852  ;;  %v5693_v20 = vadd.f32 %v5680_v8, %v5665_v34  ;;  %v5800_v8 = vld [vmem:[%s18674_s3 + $0x18] sm:$0xff] }
0x1e9d   :  { %v17855_v38 = vpop.eup %17854  ;;  %v5639_v39 = vmul.f32 %v17853_v37, %v5607_v63  ;;  %v5692_v40 = vadd.f32 %v5675_v12, %v5664_v36  ;;  %v5799_v12 = vld [vmem:[%s18674_s3 + $0x10] sm:$0xff] }
0x1e9e   :  { %v5638_v41 = vmul.f32 %v17855_v38, %v5606_v0  ;;  %v5697_v42 = vmax.f32 %v5693_v20, 0.0 }
0x1e9f   :  { %v5667_v43 = vmul.f32 %v5662_v17, %v5639_v39  ;;  %v5696_v44 = vmax.f32 %v5692_v40, 0.0  ;;  %v14085_v17 = vld [vmem:[%s18674_s3 + $0x48] sm:$0xff] }
0x1ea0   :  { %v5666_v45 = vmul.f32 %v5657_v15, %v5638_v41  ;;  %v14084_v15 = vld [vmem:[%s18674_s3 + $0x40] sm:$0xff]  ;;  %s19089_s3 = sld [smem:[%s20441_s0 + %s18035_s30]]   ;;  %s18050_s30 = smov 66  }
0x1ea1   :  { %v5695_v48 = vadd.f32 %v5690_v46, %v5667_v43  ;;  %15897 = vmatprep.mubr.msk.f32.mxu0 %vm850_vm4, %v5696_v44  ;;  %15935 = vmatprep.mubr.msk.f32.mxu1 %vm850_vm4, %v5696_v44  ;;  %v17137_v59 = vpack.c.bf16 %v5697_v42, %v5696_v44 }
0x1ea2   :  { %v5694_v49 = vadd.f32 %v5685_v47, %v5666_v45  ;;  %15898 = vmatmul.mubr.msk.f32.vlgmr.msra.gmra.mrb[36].mxu0 %vm850_vm4, %v5697_v42  ;;  %15936 = vmatmul.mubr.msk.f32.vlgmr.msra.gmra.mrb[44].mxu1 %vm850_vm4, %v5697_v42 }
0x1ea3   :  { %v5699_v50 = vmax.f32 %v5695_v48, 0.0  ;;  %17138 = vmatprep.subr.bf16.mxu0 %v17137_v59  ;;  %17168 = vmatpush3.bf16.msra.mxu1 %v18496_v32 }
0x1ea4   :  { %v5698_v52 = vmax.f32 %v5694_v49, 0.0  ;;  %17140 = vmatpush3.bf16.msra.mxu0 %v17137_v59 }
0x1ea6   :  { %15900 = vmatprep.mubr.msk.f32.mxu0 %vm850_vm4, %v5698_v52  ;;  %15938 = vmatprep.mubr.msk.f32.mxu1 %vm850_vm4, %v5698_v52  ;;  %v17141_v53 = vpack.c.bf16 %v5699_v50, %v5698_v52 }
0x1ea7   :  { %15901 = vmatmul.mubr.msk.f32.gmra.mrb[38].mxu0 %vm850_vm4, %v5699_v50  ;;  %15939 = vmatmul.mubr.msk.f32.gmra.mrb[46].mxu1 %vm850_vm4, %v5699_v50 }
0x1ea8   :  { %17142 = vmatprep.subr.bf16.mxu0 %v17141_v53  ;;  %15911 = vmatprep.mubr.msk.f32.mxu0 %vm295_vm3, %v14068_v55  ;;  %v6277_v55 = vld [vmem:[%s18729_s11 + $0x10] sm:$0xff] }
0x1ea9   :  { %17144 = vmatpush3.bf16.msra.mxu0 %v17141_v53 }
0x1eac   :  { %15912 = vmatmul.mubr.msk.f32.vlgmr.msra.gmra.mrb[40].mxu0 %vm295_vm3, %v14069_v10  ;;  %v6278_v10 = vld [vmem:[%s18729_s11 + $0x18] sm:$0xff] }
0x1ead   :  { %15914 = vmatprep.mubr.msk.f32.mxu0 %vm295_vm3, %v14070_v56 }
0x1eb0   :  { %15915 = vmatmul.mubr.msk.f32.gmra.mrb[42].mxu0 %vm295_vm3, %v14071_v57 }
0x1eb1   :  { %15925 = vmatprep.mubr.msk.f32.mxu0 %vm295_vm3, %v5797_v58 }
0x1f75   :  { %v15899_v60 = vpop.f32.mrb[36].mxu0  ;;  %v15937_v62 = vpop.f32.mrb[44].mxu1 }
0x1f76   :  { %v5778_v63 = vpop.f32.mrb[37].mxu0  ;;  %v6066_v0 = vpop.f32.mrb[45].mxu1 }
0x1f77   :  { %v17145_v13 = vpack.c.bf16 %v15899_v60, %v5778_v63  ;;  %v17157_v2 = vpack.c.bf16 %v15937_v62, %v6066_v0 }
0x1f79   :  { %17146 = vmatprep.subr.bf16.mxu0 %v17145_v13 }
0x1f7a   :  { %v15902_v14 = vpop.f32.mrb[38].mxu0  ;;  %v15940_v3 = vpop.f32.mrb[46].mxu1  ;;  %17148 = vmatpush3.bf16.msra.mxu0 %v17145_v13 }
0x1f7b   :  { %v5788_v4 = vpop.f32.mrb[39].mxu0  ;;  %v6076_v6 = vpop.f32.mrb[47].mxu1 }
0x1f7c   :  { %v17149_v9 = vpack.c.bf16 %v15902_v14, %v5788_v4  ;;  %v17161_v11 = vpack.c.bf16 %v15940_v3, %v6076_v6 }
0x1f7e   :  { %17150 = vmatprep.subr.bf16.mxu0 %v17149_v9 }
0x1f7f   :  { %17152 = vmatpush3.bf16.msra.mxu0 %v17149_v9 }
0x1f80   :  { %17158 = vmatprep.subr.bf16.mxu0 %v17157_v2 }
0x1f82   :  { %15926 = vmatmul.mubr.msk.f32.vlgmr.msra.gmra.mrb[40].mxu0 %vm295_vm3, %v5798_v7 }
0x1f83   :  { %17160 = vmatpush3.bf16.msra.mxu0 %v17157_v2  ;;  %15928 = vmatprep.mubr.msk.f32.mxu0 %vm295_vm3, %v5799_v12 }
0x1f84   :  { %17162 = vmatprep.subr.bf16.mxu0 %v17161_v11 }
0x1f86   :  { %15929 = vmatmul.mubr.msk.f32.gmra.mrb[42].mxu0 %vm295_vm3, %v5800_v8 }
0x1f87   :  { %17164 = vmatpush3.bf16.msra.mxu0 %v17161_v11  ;;  %15949 = vmatprep.mubr.msk.f32.mxu0 %vm295_vm3, %v14084_v15 }
0x1f88   :  { %17186 = vmatprep.subr.bf16.mxu0 %v18498_v35 }
0x1f8a   :  { %15950 = vmatmul.mubr.msk.f32.vlgmr.msra.gmra.mrb[40].mxu0 %vm295_vm3, %v14085_v17 }
0x1f8b   :  { %15952 = vmatprep.mubr.msk.f32.mxu0 %vm295_vm3, %v14086_v1  ;;  %17188 = vmatpush3.bf16.msra.mxu0 %v18498_v35 }
0x1f8c   :  { %17198 = vmatprep.subr.bf16.mxu0 %v18496_v32 }
0x1f8e   :  { %15953 = vmatmul.mubr.msk.f32.gmra.mrb[42].mxu0 %vm295_vm3, %v14087_v18 }
0x205d   :  { %v15951_v19 = vpop.f32.mrb[40].mxu0 }
0x205e   :  { %v18704_v16 = vadd.f32 %v15951_v19, %v18565_v61  ;;  %v6168_v21 = vpop.f32.mrb[41].mxu0 }
0x205f   :  { %v18707_v33 = vadd.f32 %v6168_v21, %v18567_v51 }
0x2060   :  { %v6198_v22 = vsel %vm850_vm4, %v18704_v16, 0.0 }
0x2061   :  { %6199 = vadd.xlane.f32.xlu0 %v6198_v22  ;;  %v15954_v23 = vpop.f32.mrb[42].mxu0  ;;  %v6195_v24 = vsel %vm850_vm4, %v18707_v33, 0.0 }
0x2062   :  { %v18714_v25 = vadd.f32 %v15954_v23, %v18573_v54  ;;  %6196 = vadd.xlane.f32.xlu1 %v6195_v24  ;;  %v6178_v26 = vpop.f32.mrb[43].mxu0  ;;  %v6248_v54 = vld [vmem:[%s13831_s7 + $0x8] sm:$0xff]  ;;  %s13796_s7 = sld [smem:[%s20441_s0 + %s18036_s4]]  }
0x2063   :  { %v18717_v61 = vadd.f32 %v6178_v26, %v18575_v5  ;;  %v6275_v5 = vld [vmem:[%s18729_s11] sm:$0xff]  ;;  %s19177_s11 = sld [smem:[%s20441_s0 + %s18037_s8]]  }
0x2064   :  { %v6204_v51 = vsel %vm850_vm4, %v18714_v25, 0.0  ;;  %s20055_s4 = sld [smem:[%s20441_s0 + %s18050_s30]]  }
0x2065   :  { %v6201_v27 = vsel %vm850_vm4, %v18717_v61, 0.0 }
0x2066   :  { %6205 = vadd.xlane.f32.xlu1 %v6204_v51  ;;  %6202 = vadd.xlane.f32.xlu0 %v6201_v27 }
0x2077   :  { %6258 = vperm.xlu1 %17803, %v6248_v54  }
0x207b   :  { %6281 = vperm.xlu1 %17803, %v6275_v5  }
0x207c   :  { %6253 = vperm.xlu0 %17802, %v6247_v28  }
0x207f   :  { %6263 = vperm.xlu1 %17803, %v6249_v29  }
0x2080   :  { %6286 = vperm.xlu0 %17802, %v6276_v30  }
0x2084   :  { %6268 = vperm.xlu0 %17802, %v6250_v31  }
0x20ee   :  { %v6200_v34 = vpop.xlane.xlu0 %6199 }
0x20ef   :  { %v6208_v36 = vmul.f32 0.0625, %v6200_v34  ;;  %v6197_v37 = vpop.xlane.xlu1 %6196 }
0x20f0   :  { %v6207_v20 = vmul.f32 0.0625, %v6197_v37 }
0x20f1   :  { %v6212_v38 = vsub.f32 %v18704_v16, %v6208_v36 }
0x20f2   :  { %v6211_v39 = vsub.f32 %v18707_v33, %v6207_v20 }
0x20f3   :  { %v6206_v40 = vpop.xlane.xlu1 %6205  ;;  %v6203_v41 = vpop.xlane.xlu0 %6202  ;;  %v6216_v42 = vmul.f32 %v6212_v38, %v6212_v38 }
0x20f4   :  { %v6210_v43 = vmul.f32 0.0625, %v6206_v40  ;;  %v6209_v44 = vmul.f32 0.0625, %v6203_v41  ;;  %v6215_v45 = vmul.f32 %v6211_v39, %v6211_v39  ;;  %v14097_v40 = vld [vmem:[%s18755_s15 + $0x28] sm:$0xff]  ;;  %v14098_v41 = vld [vmem:[%s18755_s15 + $0x30] sm:$0xff] }
0x20f5   :  { %v6222_v46 = vsel %vm850_vm4, %v6216_v42, 0.0  ;;  %v14099_v42 = vld [vmem:[%s18755_s15 + $0x38] sm:$0xff] }
0x20f6   :  { %v6214_v47 = vsub.f32 %v18714_v25, %v6210_v43  ;;  %v6213_v48 = vsub.f32 %v18717_v61, %v6209_v44  ;;  %6223 = vadd.xlane.f32.xlu1 %v6222_v46  ;;  %v6219_v59 = vsel %vm850_vm4, %v6215_v45, 0.0  ;;  %v6404_v43 = vld [vmem:[%s18755_s15] sm:$0xff] }
0x20f7   :  { %6220 = vadd.xlane.f32.xlu0 %v6219_v59  ;;  %v6259_v56 = vpop.permute.xlu1 %6258 }
0x20f8   :  { %v6218_v49 = vmul.f32 %v6214_v47, %v6214_v47  ;;  %v6217_v50 = vmul.f32 %v6213_v48, %v6213_v48 }
0x20fa   :  { %v6228_v52 = vsel %vm850_vm4, %v6218_v49, 0.0  ;;  %v6225_v53 = vsel %vm850_vm4, %v6217_v50, 0.0 }
0x20fb   :  { %6229 = vadd.xlane.f32.xlu1 %v6228_v52  ;;  %6226 = vadd.xlane.f32.xlu0 %v6225_v53  ;;  %v6254_v57 = vpop.permute.xlu0 %6253  ;;  %v6282_v58 = vpop.permute.xlu1 %6281 }
0x20ff   :  { %v6287_v60 = vpop.permute.xlu0 %6286  ;;  %v6264_v62 = vpop.permute.xlu1 %6263 }
0x2103   :  { %v6269_v63 = vpop.permute.xlu0 %6268 }
0x210c   :  { %6291 = vperm.xlu1 %17803, %v6277_v55  }
0x2111   :  { %6296 = vperm.xlu0 %17802, %v6278_v10  }
0x2183   :  { %v6224_v0 = vpop.xlane.xlu1 %6223 }
0x2184   :  { %v6232_v13 = vmul.f32 0.0625, %v6224_v0  ;;  %v6221_v2 = vpop.xlane.xlu0 %6220  ;;  %v14115_v0 = vld [vmem:[%s18755_s15 + $0x58] sm:$0xff] }
0x2185   :  { %v6231_v14 = vmul.f32 0.0625, %v6221_v2 }
0x2186   :  { %v6236_v3 = vadd.f32 1e-05, %v6232_v13 }
0x2187   :  { %v6235_v4 = vadd.f32 1e-05, %v6231_v14 }
0x2188   :  { %17856 = vrsqrt.f32 %v6236_v3  ;;  %v6230_v6 = vpop.xlane.xlu1 %6229  ;;  %v6227_v9 = vpop.xlane.xlu0 %6226 }
0x2189   :  { %17858 = vrsqrt.f32 %v6235_v4  ;;  %v6234_v11 = vmul.f32 0.0625, %v6230_v6  ;;  %v6233_v7 = vmul.f32 0.0625, %v6227_v9 }
0x218b   :  { %v6238_v12 = vadd.f32 1e-05, %v6234_v11  ;;  %v6237_v8 = vadd.f32 1e-05, %v6233_v7  ;;  %v6878_v7 = vld [vmem:[%s18793_s23] sm:$0xff] }
0x218c   :  { %v6292_v31 = vpop.permute.xlu1 %6291 }
0x218d   :  { %17860 = vrsqrt.f32 %v6238_v12  ;;  %v6850_v12 = vld [vmem:[%s13834_s19] sm:$0xff] }
0x218e   :  { %17862 = vrsqrt.f32 %v6237_v8  ;;  %v6852_v8 = vld [vmem:[%s13834_s19 + $0x10] sm:$0xff] }
0x2190   :  { %v6297_v30 = vpop.permute.xlu0 %6296 }
0x2192   :  { %v17857_v15 = vpop.eup %17856 }
0x2193   :  { %v17859_v17 = vpop.eup %17858  ;;  %v6244_v1 = vmul.f32 %v17857_v15, %v6212_v38  ;;  %v6879_v15 = vld [vmem:[%s18793_s23 + $0x8] sm:$0xff] }
0x2194   :  { %v6243_v18 = vmul.f32 %v17859_v17, %v6211_v39  ;;  %v6853_v17 = vld [vmem:[%s13834_s19 + $0x18] sm:$0xff] }
0x2195   :  { %v6272_v19 = vmul.f32 %v6259_v56, %v6244_v1  ;;  %v6405_v56 = vld [vmem:[%s18755_s15 + $0x8] sm:$0xff] }
0x2196   :  { %v6271_v21 = vmul.f32 %v6254_v57, %v6243_v18  ;;  %v6406_v57 = vld [vmem:[%s18755_s15 + $0x10] sm:$0xff] }
0x2197   :  { %v17861_v22 = vpop.eup %17860  ;;  %v6300_v23 = vadd.f32 %v6287_v60, %v6272_v19  ;;  %v14112_v60 = vld [vmem:[%s18755_s15 + $0x40] sm:$0xff] }
0x2198   :  { %v17863_v24 = vpop.eup %17862  ;;  %v6246_v26 = vmul.f32 %v17861_v22, %v6214_v47  ;;  %v6299_v51 = vadd.f32 %v6282_v58, %v6271_v21  ;;  %v6407_v58 = vld [vmem:[%s18755_s15 + $0x18] sm:$0xff] }
0x2199   :  { %v6245_v27 = vmul.f32 %v17863_v24, %v6213_v48  ;;  %v6304_v54 = vmax.f32 %v6300_v23, 0.0 }
0x219a   :  { %v6274_v5 = vmul.f32 %v6269_v63, %v6246_v26  ;;  %v6303_v28 = vmax.f32 %v6299_v51, 0.0  ;;  %v14114_v63 = vld [vmem:[%s18755_s15 + $0x50] sm:$0xff] }
0x219b   :  { %v6273_v29 = vmul.f32 %v6264_v62, %v6245_v27  ;;  %v14113_v62 = vld [vmem:[%s18755_s15 + $0x48] sm:$0xff] }
0x219c   :  { %v6302_v34 = vadd.f32 %v6297_v30, %v6274_v5  ;;  %15959 = vmatprep.mubr.msk.f32.mxu1 %vm850_vm4, %v6303_v28  ;;  %15997 = vmatprep.mubr.msk.f32.mxu0 %vm850_vm4, %v6303_v28  ;;  %v17169_v36 = vpack.c.bf16 %v6304_v54, %v6303_v28 }
0x219d   :  { %v6301_v37 = vadd.f32 %v6292_v31, %v6273_v29  ;;  %15960 = vmatmul.mubr.msk.f32.vlgmr.msra.gmra.mrb[48].mxu1 %vm850_vm4, %v6304_v54  ;;  %15998 = vmatmul.mubr.msk.f32.vlgmr.msra.gmra.mrb[44].mxu0 %vm850_vm4, %v6304_v54 }
0x219e   :  { %v6306_v20 = vmax.f32 %v6302_v34, 0.0  ;;  %17170 = vmatprep.subr.bf16.mxu1 %v17169_v36  ;;  %17200 = vmatpush3.bf16.msra.mxu0 %v18496_v32  ;;  %v14096_v32 = vld [vmem:[%s18755_s15 + $0x20] sm:$0xff]  ;;  %s13843_s15 = sld [smem:[%s20441_s0 + %s18038_s12]]  }
0x219f   :  { %v6305_v38 = vmax.f32 %v6301_v37, 0.0  ;;  %17172 = vmatpush3.bf16.msra.mxu1 %v17169_v36 }
0x21a1   :  { %15962 = vmatprep.mubr.msk.f32.mxu1 %vm850_vm4, %v6305_v38  ;;  %16000 = vmatprep.mubr.msk.f32.mxu0 %vm850_vm4, %v6305_v38  ;;  %v17173_v39 = vpack.c.bf16 %v6306_v20, %v6305_v38  ;;  %v6880_v38 = vld [vmem:[%s18793_s23 + $0x10] sm:$0xff] }
0x21a2   :  { %15963 = vmatmul.mubr.msk.f32.gmra.mrb[50].mxu1 %vm850_vm4, %v6306_v20  ;;  %16001 = vmatmul.mubr.msk.f32.gmra.mrb[46].mxu0 %vm850_vm4, %v6306_v20 }
0x21a3   :  { %17174 = vmatprep.subr.bf16.mxu1 %v17173_v39  ;;  %15973 = vmatprep.mubr.msk.f32.mxu1 %vm295_vm3, %v14096_v32 }
0x21a4   :  { %17176 = vmatpush3.bf16.msra.mxu1 %v17173_v39  ;;  %v6881_v39 = vld [vmem:[%s18793_s23 + $0x18] sm:$0xff]  ;;  %s19351_s23 = sld [smem:[%s20441_s0 + %s18040_s20]]  }
0x21a7   :  { %15974 = vmatmul.mubr.msk.f32.vlgmr.msra.gmra.mrb[52].mxu1 %vm295_vm3, %v14097_v40 }
0x21a8   :  { %15976 = vmatprep.mubr.msk.f32.mxu1 %vm295_vm3, %v14098_v41 }
0x21ab   :  { %15977 = vmatmul.mubr.msk.f32.gmra.mrb[54].mxu1 %vm295_vm3, %v14099_v42 }
0x21ac   :  { %15987 = vmatprep.mubr.msk.f32.mxu1 %vm295_vm3, %v6404_v43 }
0x2270   :  { %v15961_v44 = vpop.f32.mrb[48].mxu1  ;;  %v15999_v45 = vpop.f32.mrb[44].mxu0 }
0x2271   :  { %v6385_v46 = vpop.f32.mrb[49].mxu1  ;;  %v6673_v47 = vpop.f32.mrb[45].mxu0 }
0x2272   :  { %v17177_v48 = vpack.c.bf16 %v15961_v44, %v6385_v46  ;;  %v17189_v59 = vpack.c.bf16 %v15999_v45, %v6673_v47 }
0x2274   :  { %17178 = vmatprep.subr.bf16.mxu1 %v17177_v48 }
0x2275   :  { %v15964_v49 = vpop.f32.mrb[50].mxu1  ;;  %v16002_v50 = vpop.f32.mrb[46].mxu0  ;;  %17180 = vmatpush3.bf16.msra.mxu1 %v17177_v48 }
0x2276   :  { %v6395_v52 = vpop.f32.mrb[51].mxu1  ;;  %v6683_v53 = vpop.f32.mrb[47].mxu0 }
0x2277   :  { %v17181_v55 = vpack.c.bf16 %v15964_v49, %v6395_v52  ;;  %v17193_v10 = vpack.c.bf16 %v16002_v50, %v6683_v53 }
0x2279   :  { %17182 = vmatprep.subr.bf16.mxu1 %v17181_v55 }
0x227a   :  { %17184 = vmatpush3.bf16.msra.mxu1 %v17181_v55 }
0x227b   :  { %17190 = vmatprep.subr.bf16.mxu1 %v17189_v59 }
0x227d   :  { %15988 = vmatmul.mubr.msk.f32.vlgmr.msra.gmra.mrb[52].mxu1 %vm295_vm3, %v6405_v56 }
0x227e   :  { %17192 = vmatpush3.bf16.msra.mxu1 %v17189_v59  ;;  %15990 = vmatprep.mubr.msk.f32.mxu1 %vm295_vm3, %v6406_v57 }
0x227f   :  { %17194 = vmatprep.subr.bf16.mxu1 %v17193_v10 }
0x2281   :  { %15991 = vmatmul.mubr.msk.f32.gmra.mrb[54].mxu1 %vm295_vm3, %v6407_v58 }
0x2282   :  { %17196 = vmatpush3.bf16.msra.mxu1 %v17193_v10  ;;  %16011 = vmatprep.mubr.msk.f32.mxu1 %vm295_vm3, %v14112_v60 }
0x2283   :  { %17218 = vmatprep.subr.bf16.mxu1 %v18498_v35 }
0x2285   :  { %16012 = vmatmul.mubr.msk.f32.vlgmr.msra.gmra.mrb[52].mxu1 %vm295_vm3, %v14113_v62 }
0x2286   :  { %16014 = vmatprep.mubr.msk.f32.mxu1 %vm295_vm3, %v14114_v63  ;;  %17220 = vmatpush3.bf16.msra.mxu1 %v18498_v35  ;;  %v6851_v35 = vld [vmem:[%s13834_s19 + $0x8] sm:$0xff]  ;;  %s19345_s19 = sld [smem:[%s20441_s0 + %s18039_s16]]  }
0x2289   :  { %16015 = vmatmul.mubr.msk.f32.gmra.mrb[54].mxu1 %vm295_vm3, %v14115_v0 }
0x2358   :  { %v16013_v13 = vpop.f32.mrb[52].mxu1 }
0x2359   :  { %v6775_v2 = vpop.f32.mrb[53].mxu1  ;;  %v6801_v14 = vsel %vm850_vm4, %v16013_v13, 0.0 }
0x235a   :  { %6802 = vadd.xlane.f32.xlu0 %v6801_v14  ;;  %v6798_v3 = vsel %vm850_vm4, %v6775_v2, 0.0 }
0x235b   :  { %6799 = vadd.xlane.f32.xlu1 %v6798_v3 }
0x235c   :  { %v16016_v4 = vpop.f32.mrb[54].mxu1 }
0x235d   :  { %v6785_v6 = vpop.f32.mrb[55].mxu1  ;;  %v6807_v9 = vsel %vm850_vm4, %v16016_v4, 0.0 }
0x235e   :  { %v6804_v11 = vsel %vm850_vm4, %v6785_v6, 0.0 }
0x235f   :  { %6808 = vadd.xlane.f32.xlu1 %v6807_v9  ;;  %6805 = vadd.xlane.f32.xlu0 %v6804_v11 }
0x2370   :  { %6861 = vperm.xlu1 %17803, %v6851_v35  }
0x2374   :  { %6884 = vperm.xlu1 %17803, %v6878_v7  }
0x2375   :  { %6856 = vperm.xlu0 %17802, %v6850_v12  }
0x2378   :  { %6866 = vperm.xlu1 %17803, %v6852_v8  }
0x2379   :  { %6889 = vperm.xlu0 %17802, %v6879_v15  }
0x237d   :  { %6871 = vperm.xlu0 %17802, %v6853_v17  }
0x23e7   :  { %v6803_v1 = vpop.xlane.xlu0 %6802 }
0x23e8   :  { %v6811_v18 = vmul.f32 0.0625, %v6803_v1  ;;  %v6800_v19 = vpop.xlane.xlu1 %6799 }
0x23e9   :  { %v6810_v21 = vmul.f32 0.0625, %v6800_v19 }
0x23ea   :  { %v6815_v22 = vsub.f32 %v16013_v13, %v6811_v18 }
0x23eb   :  { %v6814_v23 = vsub.f32 %v6775_v2, %v6810_v21 }
0x23ec   :  { %v6809_v24 = vpop.xlane.xlu1 %6808  ;;  %v6806_v26 = vpop.xlane.xlu0 %6805  ;;  %v6819_v51 = vmul.f32 %v6815_v22, %v6815_v22 }
0x23ed   :  { %v6813_v27 = vmul.f32 0.0625, %v6809_v24  ;;  %v6812_v54 = vmul.f32 0.0625, %v6806_v26  ;;  %v6818_v5 = vmul.f32 %v6814_v23, %v6814_v23  ;;  %v14126_v24 = vld [vmem:[%s18814_s27 + $0x30] sm:$0xff]  ;;  %v14127_v26 = vld [vmem:[%s18814_s27 + $0x38] sm:$0xff] }
0x23ee   :  { %v6825_v28 = vsel %vm850_vm4, %v6819_v51, 0.0  ;;  %v7007_v51 = vld [vmem:[%s18814_s27] sm:$0xff] }
0x23ef   :  { %v6817_v29 = vsub.f32 %v16016_v4, %v6813_v27  ;;  %v6816_v30 = vsub.f32 %v6785_v6, %v6812_v54  ;;  %6826 = vadd.xlane.f32.xlu1 %v6825_v28  ;;  %v6822_v31 = vsel %vm850_vm4, %v6818_v5, 0.0 }
0x23f0   :  { %6823 = vadd.xlane.f32.xlu0 %v6822_v31  ;;  %v6862_v32 = vpop.permute.xlu1 %6861 }
0x23f1   :  { %v6821_v34 = vmul.f32 %v6817_v29, %v6817_v29  ;;  %v6820_v36 = vmul.f32 %v6816_v30, %v6816_v30 }
0x23f3   :  { %v6831_v37 = vsel %vm850_vm4, %v6821_v34, 0.0  ;;  %v6828_v20 = vsel %vm850_vm4, %v6820_v36, 0.0 }
0x23f4   :  { %6832 = vadd.xlane.f32.xlu1 %v6831_v37  ;;  %6829 = vadd.xlane.f32.xlu0 %v6828_v20  ;;  %v6857_v40 = vpop.permute.xlu0 %6856  ;;  %v6885_v41 = vpop.permute.xlu1 %6884 }
0x23f8   :  { %v6890_v42 = vpop.permute.xlu0 %6889  ;;  %v6867_v43 = vpop.permute.xlu1 %6866 }
0x23fc   :  { %v6872_v44 = vpop.permute.xlu0 %6871 }
0x2405   :  { %6894 = vperm.xlu1 %17803, %v6880_v38  }
0x240a   :  { %6899 = vperm.xlu0 %17802, %v6881_v39   ;;  %v7008_v39 = vld [vmem:[%s18814_s27 + $0x8] sm:$0xff] }
0x247c   :  { %v6827_v45 = vpop.xlane.xlu1 %6826 }
0x247d   :  { %v6835_v46 = vmul.f32 0.0625, %v6827_v45  ;;  %v6824_v47 = vpop.xlane.xlu0 %6823 }
0x247e   :  { %v6834_v48 = vmul.f32 0.0625, %v6824_v47 }
0x247f   :  { %v6839_v59 = vadd.f32 1e-05, %v6835_v46 }
0x2480   :  { %v6838_v49 = vadd.f32 1e-05, %v6834_v48 }
0x2481   :  { %17864 = vrsqrt.f32 %v6839_v59  ;;  %v6833_v50 = vpop.xlane.xlu1 %6832  ;;  %v6830_v52 = vpop.xlane.xlu0 %6829 }
0x2482   :  { %17866 = vrsqrt.f32 %v6838_v49  ;;  %v6837_v53 = vmul.f32 0.0625, %v6833_v50  ;;  %v6836_v55 = vmul.f32 0.0625, %v6830_v52 }
0x2484   :  { %v6841_v10 = vadd.f32 1e-05, %v6837_v53  ;;  %v6840_v56 = vadd.f32 1e-05, %v6836_v55 }
0x2485   :  { %v6895_v8 = vpop.permute.xlu1 %6894 }
0x2486   :  { %17868 = vrsqrt.f32 %v6841_v10 }
0x2487   :  { %17870 = vrsqrt.f32 %v6840_v56 }
0x2489   :  { %v6900_v12 = vpop.permute.xlu0 %6899 }
0x248b   :  { %v17865_v57 = vpop.eup %17864 }
0x248c   :  { %v17867_v58 = vpop.eup %17866  ;;  %v6847_v60 = vmul.f32 %v17865_v57, %v6815_v22  ;;  %v14124_v22 = vld [vmem:[%s18814_s27 + $0x20] sm:$0xff]  ;;  %v7486_v57 = vld [vmem:[%s18854_s5 + $0x8] sm:$0xff] }
0x248d   :  { %v6846_v62 = vmul.f32 %v17867_v58, %v6814_v23  ;;  %v14125_v23 = vld [vmem:[%s18814_s27 + $0x28] sm:$0xff]  ;;  %v7460_v58 = vld [vmem:[%s13837_s1 + $0x18] sm:$0xff] }
0x248e   :  { %v6875_v63 = vmul.f32 %v6862_v32, %v6847_v60  ;;  %v7009_v32 = vld [vmem:[%s18814_s27 + $0x10] sm:$0xff] }
0x248f   :  { %v6874_v0 = vmul.f32 %v6857_v40, %v6846_v62  ;;  %v7010_v40 = vld [vmem:[%s18814_s27 + $0x18] sm:$0xff] }
0x2490   :  { %v17869_v13 = vpop.eup %17868  ;;  %v6903_v2 = vadd.f32 %v6890_v42, %v6875_v63  ;;  %v14141_v42 = vld [vmem:[%s18814_s27 + $0x48] sm:$0xff] }
0x2491   :  { %v17871_v14 = vpop.eup %17870  ;;  %v6849_v3 = vmul.f32 %v17869_v13, %v6817_v29  ;;  %v6902_v4 = vadd.f32 %v6885_v41, %v6874_v0  ;;  %v14140_v41 = vld [vmem:[%s18814_s27 + $0x40] sm:$0xff] }
0x2492   :  { %v6848_v6 = vmul.f32 %v17871_v14, %v6816_v30  ;;  %v6907_v9 = vmax.f32 %v6903_v2, 0.0 }
0x2493   :  { %v6877_v11 = vmul.f32 %v6872_v44, %v6849_v3  ;;  %v6906_v35 = vmax.f32 %v6902_v4, 0.0  ;;  %v14143_v44 = vld [vmem:[%s18814_s27 + $0x58] sm:$0xff] }
0x2494   :  { %v6876_v7 = vmul.f32 %v6867_v43, %v6848_v6  ;;  %v14142_v43 = vld [vmem:[%s18814_s27 + $0x50] sm:$0xff]  ;;  %s19414_s27 = sld [smem:[%s20441_s0 + %s18041_s24]]  }
0x2495   :  { %v6905_v15 = vadd.f32 %v6900_v12, %v6877_v11  ;;  %16021 = vmatprep.mubr.msk.f32.mxu0 %vm850_vm4, %v6906_v35  ;;  %16059 = vmatprep.mubr.msk.f32.mxu1 %vm850_vm4, %v6906_v35  ;;  %v17201_v17 = vpack.c.bf16 %v6907_v9, %v6906_v35 }
0x2496   :  { %v6904_v1 = vadd.f32 %v6895_v8, %v6876_v7  ;;  %16022 = vmatmul.mubr.msk.f32.vlgmr.msra.gmra.mrb[48].mxu0 %vm850_vm4, %v6907_v9  ;;  %16060 = vmatmul.mubr.msk.f32.vlgmr.msra.gmra.mrb[56].mxu1 %vm850_vm4, %v6907_v9 }
0x2497   :  { %v6909_v18 = vmax.f32 %v6905_v15, 0.0  ;;  %17202 = vmatprep.subr.bf16.mxu0 %v17201_v17 }
0x2498   :  { %v6908_v19 = vmax.f32 %v6904_v1, 0.0  ;;  %17204 = vmatpush3.bf16.msra.mxu0 %v17201_v17 }
0x249a   :  { %16024 = vmatprep.mubr.msk.f32.mxu0 %vm850_vm4, %v6908_v19  ;;  %16062 = vmatprep.mubr.msk.f32.mxu1 %vm850_vm4, %v6908_v19  ;;  %v17205_v21 = vpack.c.bf16 %v6909_v18, %v6908_v19  ;;  %v7487_v19 = vld [vmem:[%s18854_s5 + $0x10] sm:$0xff] }
0x249b   :  { %16025 = vmatmul.mubr.msk.f32.gmra.mrb[50].mxu0 %vm850_vm4, %v6909_v18  ;;  %16063 = vmatmul.mubr.msk.f32.gmra.mrb[58].mxu1 %vm850_vm4, %v6909_v18 }
0x249c   :  { %17206 = vmatprep.subr.bf16.mxu0 %v17205_v21  ;;  %16035 = vmatprep.mubr.msk.f32.mxu0 %vm295_vm3, %v14124_v22  ;;  %v7488_v22 = vld [vmem:[%s18854_s5 + $0x18] sm:$0xff] }
0x249d   :  { %17208 = vmatpush3.bf16.msra.mxu0 %v17205_v21  ;;  %v8320_v21 = vld [vmem:[%s18881_s9 + $0x8] sm:$0xff] }
0x24a0   :  { %16036 = vmatmul.mubr.msk.f32.vlgmr.msra.gmra.mrb[52].mxu0 %vm295_vm3, %v14125_v23  ;;  %v8375_v23 = vld [vmem:[%s18887_s13] sm:$0xff] }
0x24a1   :  { %16038 = vmatprep.mubr.msk.f32.mxu0 %vm295_vm3, %v14126_v24  ;;  %v8319_v24 = vld [vmem:[%s18881_s9] sm:$0xff] }
0x24a4   :  { %16039 = vmatmul.mubr.msk.f32.gmra.mrb[54].mxu0 %vm295_vm3, %v14127_v26  ;;  %v8321_v26 = vld [vmem:[%s18881_s9 + $0x10] sm:$0xff] }
0x24a5   :  { %16049 = vmatprep.mubr.msk.f32.mxu0 %vm295_vm3, %v7007_v51  ;;  %v8376_v51 = vld [vmem:[%s18887_s13 + $0x8] sm:$0xff] }
0x2569   :  { %v16023_v27 = vpop.f32.mrb[48].mxu0  ;;  %v16061_v54 = vpop.f32.mrb[56].mxu1 }
0x256a   :  { %v6988_v5 = vpop.f32.mrb[49].mxu0  ;;  %v7276_v28 = vpop.f32.mrb[57].mxu1 }
0x256b   :  { %v17209_v29 = vpack.c.bf16 %v16023_v27, %v6988_v5  ;;  %v17221_v30 = vpack.c.bf16 %v16061_v54, %v7276_v28  ;;  %v7517_v27 = vld [vmem:[%s18895_s17] sm:$0xff]  ;;  %v7518_v54 = vld [vmem:[%s18895_s17 + $0x8] sm:$0xff]  ;;  %v8377_v28 = vld [vmem:[%s18887_s13 + $0x10] sm:$0xff] }
0x256c   :  { %v17229_v5 = vpack.c.bf16 %v7518_v54, %v7517_v27 }
0x256d   :  { %17210 = vmatprep.subr.bf16.mxu0 %v17209_v29 }
0x256e   :  { %v16026_v31 = vpop.f32.mrb[50].mxu0  ;;  %v16064_v34 = vpop.f32.mrb[58].mxu1  ;;  %17212 = vmatpush3.bf16.msra.mxu0 %v17209_v29  ;;  %v8322_v29 = vld [vmem:[%s18881_s9 + $0x18] sm:$0xff]  ;;  %17230 = vmatprep.subr.bf16.mxu1 %v17229_v5 }
0x256f   :  { %v6998_v36 = vpop.f32.mrb[51].mxu0  ;;  %v7286_v37 = vpop.f32.mrb[59].mxu1  ;;  %17232 = vmatpush3.bf16.msra.mxu1 %v17229_v5  ;;  %v14159_v5 = vld [vmem:[%s18947_s21 + $0x48] sm:$0xff] }
0x2570   :  { %v17213_v20 = vpack.c.bf16 %v16026_v31, %v6998_v36  ;;  %v17225_v38 = vpack.c.bf16 %v16064_v34, %v7286_v37  ;;  %v14153_v31 = vld [vmem:[%s18895_s17 + $0x18] sm:$0xff] }
0x2572   :  { %17214 = vmatprep.subr.bf16.mxu0 %v17213_v20 }
0x2573   :  { %17216 = vmatpush3.bf16.msra.mxu0 %v17213_v20 }
0x2574   :  { %17222 = vmatprep.subr.bf16.mxu0 %v17221_v30 }
0x2576   :  { %16050 = vmatmul.mubr.msk.f32.vlgmr.msra.gmra.mrb[52].mxu0 %vm295_vm3, %v7008_v39 }
0x2577   :  { %17224 = vmatpush3.bf16.msra.mxu0 %v17221_v30  ;;  %16052 = vmatprep.mubr.msk.f32.mxu0 %vm295_vm3, %v7009_v32  ;;  %v14152_v30 = vld [vmem:[%s18895_s17 + $0x10] sm:$0xff] }
0x2578   :  { %17226 = vmatprep.subr.bf16.mxu0 %v17225_v38  ;;  %v17233_v34 = vpack.c.bf16 %v14153_v31, %v14152_v30 }
0x257a   :  { %16053 = vmatmul.mubr.msk.f32.gmra.mrb[54].mxu0 %vm295_vm3, %v7010_v40  ;;  %17234 = vmatprep.subr.bf16.mxu1 %v17233_v34 }
0x257b   :  { %17228 = vmatpush3.bf16.msra.mxu0 %v17225_v38  ;;  %16073 = vmatprep.mubr.msk.f32.mxu0 %vm295_vm3, %v14140_v41 }
0x257e   :  { %16074 = vmatmul.mubr.msk.f32.vlgmr.msra.gmra.mrb[52].mxu0 %vm295_vm3, %v14141_v42 }
0x257f   :  { %16076 = vmatprep.mubr.msk.f32.mxu0 %vm295_vm3, %v14142_v43 }
0x2582   :  { %16077 = vmatmul.mubr.msk.f32.gmra.mrb[54].mxu0 %vm295_vm3, %v14143_v44 }
0x2651   :  { %v16075_v45 = vpop.f32.mrb[52].mxu0 }
0x2652   :  { %v7402_v46 = vadd.f32 %v16075_v45, %v18704_v16  ;;  %v7378_v47 = vpop.f32.mrb[53].mxu0  ;;  %v7458_v16 = vld [vmem:[%s13837_s1 + $0x8] sm:$0xff] }
0x2653   :  { %v7401_v48 = vadd.f32 %v7378_v47, %v18707_v33  ;;  %v7485_v33 = vld [vmem:[%s18854_s5] sm:$0xff]  ;;  %s18051_s5 = smov 70  }
0x2654   :  { %v7408_v59 = vsel %vm850_vm4, %v7402_v46, 0.0  ;;  %s20193_s8 = sld [smem:[%s20441_s0 + %s18051_s5]]  }
0x2655   :  { %7409 = vadd.xlane.f32.xlu0 %v7408_v59  ;;  %v16078_v49 = vpop.f32.mrb[54].mxu0  ;;  %v7405_v50 = vsel %vm850_vm4, %v7401_v48, 0.0 }
0x2656   :  { %v7404_v52 = vadd.f32 %v16078_v49, %v18714_v25  ;;  %7406 = vadd.xlane.f32.xlu1 %v7405_v50  ;;  %v7388_v53 = vpop.f32.mrb[55].mxu0  ;;  %v7457_v25 = vld [vmem:[%s13837_s1] sm:$0xff] }
0x2657   :  { %v7403_v55 = vadd.f32 %v7388_v53, %v18717_v61  ;;  %v7459_v61 = vld [vmem:[%s13837_s1 + $0x10] sm:$0xff]  ;;  %s19553_s1 = sld [smem:[%s20441_s0 + %s18042_s28]]  }
0x2658   :  { %v7414_v10 = vsel %vm850_vm4, %v7404_v52, 0.0 }
0x2659   :  { %v7411_v56 = vsel %vm850_vm4, %v7403_v55, 0.0 }
0x265a   :  { %7415 = vadd.xlane.f32.xlu1 %v7414_v10  ;;  %7412 = vadd.xlane.f32.xlu0 %v7411_v56 }
0x266b   :  { %7468 = vperm.xlu1 %17803, %v7458_v16  }
0x266f   :  { %7491 = vperm.xlu1 %17803, %v7485_v33  }
0x2670   :  { %7463 = vperm.xlu0 %17802, %v7457_v25  }
0x2673   :  { %7473 = vperm.xlu1 %17803, %v7459_v61  }
0x2674   :  { %7496 = vperm.xlu0 %17802, %v7486_v57  }
0x2678   :  { %7478 = vperm.xlu0 %17802, %v7460_v58  }
0x26e2   :  { %v7410_v60 = vpop.xlane.xlu0 %7409 }
0x26e3   :  { %v7418_v62 = vmul.f32 0.0625, %v7410_v60  ;;  %v7407_v63 = vpop.xlane.xlu1 %7406  ;;  %v14182_v60 = vld [vmem:[%s18895_s17 + $0x20] sm:$0xff] }
0x26e4   :  { %v7417_v0 = vmul.f32 0.0625, %v7407_v63 }
0x26e5   :  { %v18858_v13 = vsub.f32 %v7402_v46, %v7418_v62  ;;  %v14183_v62 = vld [vmem:[%s18895_s17 + $0x28] sm:$0xff]  ;;  %s18054_s17 = smov 71  }
0x26e6   :  { %v18860_v2 = vsub.f32 %v7401_v48, %v7417_v0  ;;  %s20364_s20 = sld [smem:[%s20441_s0 + %s18054_s17]]  }
0x26e7   :  { %v7416_v14 = vpop.xlane.xlu1 %7415  ;;  %v7413_v3 = vpop.xlane.xlu0 %7412  ;;  %v7426_v4 = vmul.f32 %v18858_v13, %v18858_v13 }
0x26e8   :  { %v7420_v6 = vmul.f32 0.0625, %v7416_v14  ;;  %v7419_v9 = vmul.f32 0.0625, %v7413_v3  ;;  %v7425_v11 = vmul.f32 %v18860_v2, %v18860_v2 }
0x26e9   :  { %v7432_v35 = vsel %vm850_vm4, %v7426_v4, 0.0 }
0x26ea   :  { %v18867_v7 = vsub.f32 %v7404_v52, %v7420_v6  ;;  %v18869_v12 = vsub.f32 %v7403_v55, %v7419_v9  ;;  %7433 = vadd.xlane.f32.xlu1 %v7432_v35  ;;  %v7429_v8 = vsel %vm850_vm4, %v7425_v11, 0.0 }
0x26eb   :  { %7430 = vadd.xlane.f32.xlu0 %v7429_v8  ;;  %v7469_v36 = vpop.permute.xlu1 %7468 }
0x26ec   :  { %v7428_v15 = vmul.f32 %v18867_v7, %v18867_v7  ;;  %v7427_v17 = vmul.f32 %v18869_v12, %v18869_v12 }
0x26ee   :  { %v7438_v1 = vsel %vm850_vm4, %v7428_v15, 0.0  ;;  %v7435_v18 = vsel %vm850_vm4, %v7427_v17, 0.0 }
0x26ef   :  { %7439 = vadd.xlane.f32.xlu1 %v7438_v1  ;;  %7436 = vadd.xlane.f32.xlu0 %v7435_v18  ;;  %v7464_v37 = vpop.permute.xlu0 %7463  ;;  %v7492_v20 = vpop.permute.xlu1 %7491 }
0x26f3   :  { %v7497_v38 = vpop.permute.xlu0 %7496  ;;  %v7474_v39 = vpop.permute.xlu1 %7473 }
0x26f7   :  { %v7479_v32 = vpop.permute.xlu0 %7478 }
0x2700   :  { %7501 = vperm.xlu1 %17803, %v7487_v19  }
0x2704   :  { %8334 = vperm.xlu1 %17803, %v8320_v21  }
0x2705   :  { %7506 = vperm.xlu0 %17802, %v7488_v22  }
0x2708   :  { %8385 = vperm.xlu1 %17803, %v8375_v23  }
0x2709   :  { %8329 = vperm.xlu0 %17802, %v8319_v24  }
0x270c   :  { %8339 = vperm.xlu1 %17803, %v8321_v26  }
0x270d   :  { %8390 = vperm.xlu0 %17802, %v8376_v51  }
0x2710   :  { %8395 = vperm.xlu1 %17803, %v8377_v28  }
0x2711   :  { %8344 = vperm.xlu0 %17802, %v8322_v29   ;;  %v14160_v29 = vld [vmem:[%s18947_s21 + $0x50] sm:$0xff] }
0x2777   :  { %v7434_v40 = vpop.xlane.xlu1 %7433 }
0x2778   :  { %v7442_v41 = vmul.f32 0.0625, %v7434_v40  ;;  %v7431_v42 = vpop.xlane.xlu0 %7430  ;;  %v7617_v40 = vld [vmem:[%s18947_s21 + $0x8] sm:$0xff] }
0x2779   :  { %v7441_v43 = vmul.f32 0.0625, %v7431_v42  ;;  %v7619_v42 = vld [vmem:[%s18947_s21 + $0x18] sm:$0xff] }
0x277a   :  { %v7446_v44 = vadd.f32 1e-05, %v7442_v41  ;;  %v7618_v41 = vld [vmem:[%s18947_s21 + $0x10] sm:$0xff] }
0x277b   :  { %v7445_v45 = vadd.f32 1e-05, %v7441_v43  ;;  %v7620_v43 = vld [vmem:[%s18947_s21 + $0x20] sm:$0xff] }
0x277c   :  { %17872 = vrsqrt.f32 %v7446_v44  ;;  %v7440_v46 = vpop.xlane.xlu1 %7439  ;;  %v7437_v47 = vpop.xlane.xlu0 %7436  ;;  %v7621_v44 = vld [vmem:[%s18947_s21 + $0x28] sm:$0xff] }
0x277d   :  { %17874 = vrsqrt.f32 %v7445_v45  ;;  %v7444_v48 = vmul.f32 0.0625, %v7440_v46  ;;  %v7443_v59 = vmul.f32 0.0625, %v7437_v47  ;;  %v7622_v45 = vld [vmem:[%s18947_s21 + $0x30] sm:$0xff]  ;;  %v7623_v46 = vld [vmem:[%s18947_s21 + $0x38] sm:$0xff]  ;;  %v14188_v47 = vld [vmem:[%s18947_s21 + $0x80] sm:$0xff] }
0x277f   :  { %v7448_v49 = vadd.f32 1e-05, %v7444_v48  ;;  %v7447_v50 = vadd.f32 1e-05, %v7443_v59  ;;  %v14189_v48 = vld [vmem:[%s18947_s21 + $0x88] sm:$0xff]  ;;  %v14190_v59 = vld [vmem:[%s18947_s21 + $0x90] sm:$0xff] }
0x2780   :  { %v7502_v6 = vpop.permute.xlu1 %7501 }
0x2781   :  { %17876 = vrsqrt.f32 %v7448_v49  ;;  %v14191_v49 = vld [vmem:[%s18947_s21 + $0x98] sm:$0xff] }
0x2782   :  { %17878 = vrsqrt.f32 %v7447_v50  ;;  %v14192_v50 = vld [vmem:[%s18947_s21 + $0xa0] sm:$0xff] }
0x2784   :  { %v7507_v4 = vpop.permute.xlu0 %7506 }
0x2786   :  { %v17873_v52 = vpop.eup %17872 }
0x2787   :  { %v17875_v53 = vpop.eup %17874  ;;  %v7454_v55 = vmul.f32 %v17873_v52, %v18858_v13  ;;  %v14193_v52 = vld [vmem:[%s18947_s21 + $0xa8] sm:$0xff] }
0x2788   :  { %v7453_v10 = vmul.f32 %v17875_v53, %v18860_v2  ;;  %v17253_v2 = vpack.c.bf16 %v14183_v62, %v14182_v60  ;;  %v14194_v53 = vld [vmem:[%s18947_s21 + $0xb0] sm:$0xff] }
0x2789   :  { %v7482_v56 = vmul.f32 %v7469_v36, %v7454_v55  ;;  %v14195_v55 = vld [vmem:[%s18947_s21 + $0xb8] sm:$0xff] }
0x278a   :  { %v7481_v16 = vmul.f32 %v7464_v37, %v7453_v10  ;;  %v14162_v37 = vld [vmem:[%s18947_s21 + $0x60] sm:$0xff] }
0x278b   :  { %v17877_v33 = vpop.eup %17876  ;;  %v7510_v25 = vadd.f32 %v7497_v38, %v7482_v56  ;;  %v14164_v38 = vld [vmem:[%s18947_s21 + $0x70] sm:$0xff] }
0x278c   :  { %v17879_v61 = vpop.eup %17878  ;;  %v7456_v57 = vmul.f32 %v17877_v33, %v18867_v7  ;;  %v7509_v58 = vadd.f32 %v7492_v20, %v7481_v16  ;;  %v14163_v20 = vld [vmem:[%s18947_s21 + $0x68] sm:$0xff] }
0x278d   :  { %v7455_v63 = vmul.f32 %v17879_v61, %v18869_v12  ;;  %v18914_v13 = vmax.f32 %v7510_v25, 0.0  ;;  %v14158_v12 = vld [vmem:[%s18947_s21 + $0x40] sm:$0xff] }
0x278e   :  { %v7484_v0 = vmul.f32 %v7479_v32, %v7456_v57  ;;  %v18912_v14 = vmax.f32 %v7509_v58, 0.0  ;;  %16107 = vmatprep.mubr.msk.f32.mxu0 %vm295_vm3, %v14158_v12  ;;  %v7616_v32 = vld [vmem:[%s18947_s21] sm:$0xff]  ;;  %v8378_v12 = vld [vmem:[%s18887_s13 + $0x18] sm:$0xff] }
0x278f   :  { %v7483_v3 = vmul.f32 %v7474_v39, %v7455_v63  ;;  %v14165_v39 = vld [vmem:[%s18947_s21 + $0x78] sm:$0xff] }
0x2790   :  { %v7512_v9 = vadd.f32 %v7507_v4, %v7484_v0  ;;  %16083 = vmatprep.mubr.msk.f32.mxu1 %vm850_vm4, %v18912_v14 }
0x2791   :  { %v7511_v11 = vadd.f32 %v7502_v6, %v7483_v3  ;;  %16084 = vmatmul.mubr.msk.f32.vlgmr.msra.gmra.mrb[60].mxu1 %vm850_vm4, %v18914_v13 }
0x2792   :  { %v18920_v35 = vmax.f32 %v7512_v9, 0.0  ;;  %17236 = vmatpush3.bf16.msra.mxu1 %v17233_v34  ;;  %v14161_v34 = vld [vmem:[%s18947_s21 + $0x58] sm:$0xff]  ;;  %v8323_v9 = vld [vmem:[%s18881_s9 + $0x20] sm:$0xff] }
0x2793   :  { %v18922_v7 = vmax.f32 %v7511_v11, 0.0  ;;  %17254 = vmatprep.subr.bf16.mxu1 %v17253_v2  ;;  %v8379_v11 = vld [vmem:[%s18887_s13 + $0x20] sm:$0xff] }
0x2795   :  { %16086 = vmatprep.mubr.msk.f32.mxu1 %vm850_vm4, %v18922_v7 }
0x2796   :  { %16087 = vmatmul.mubr.msk.f32.gmra.mrb[62].mxu1 %vm850_vm4, %v18920_v35 }
0x2797   :  { %16093 = vmatprep.mubr.msk.f32.mxu1 %vm850_vm4, %v18912_v14 }
0x279a   :  { %16094 = vmatmul.mubr.msk.f32.vlgmr.msra.gmra.mrb[64].mxu1 %vm850_vm4, %v18914_v13 }
0x279b   :  { %16096 = vmatprep.mubr.msk.f32.mxu1 %vm850_vm4, %v18922_v7  ;;  %17256 = vmatpush3.bf16.msra.mxu1 %v17253_v2 }
0x279e   :  { %16097 = vmatmul.mubr.msk.f32.gmra.mrb[66].mxu1 %vm850_vm4, %v18920_v35 }
0x279f   :  { %16143 = vmatprep.mubr.msk.f32.mxu1 %vm850_vm4, %v18912_v14 }
0x27a2   :  { %16144 = vmatmul.mubr.msk.f32.vlgmr.msra.gmra.mrb[68].mxu1 %vm850_vm4, %v18914_v13 }
0x27a3   :  { %16146 = vmatprep.mubr.msk.f32.mxu1 %vm850_vm4, %v18922_v7 }
0x27a6   :  { %16147 = vmatmul.mubr.msk.f32.gmra.mrb[70].mxu1 %vm850_vm4, %v18920_v35 }
0x2864   :  { %v16085_v8 = vpop.f32.mrb[60].mxu1 }
0x2865   :  { %v7597_v15 = vpop.f32.mrb[61].mxu1 }
0x2866   :  { %v17245_v17 = vpack.c.bf16 %v16085_v8, %v7597_v15  ;;  %v8325_v8 = vld [vmem:[%s18881_s9 + $0x30] sm:$0xff]  ;;  %v8324_v15 = vld [vmem:[%s18881_s9 + $0x28] sm:$0xff] }
0x2869   :  { %v16088_v1 = vpop.f32.mrb[62].mxu1 }
0x286a   :  { %v7607_v18 = vpop.f32.mrb[63].mxu1 }
0x286b   :  { %v17249_v19 = vpack.c.bf16 %v16088_v1, %v7607_v18  ;;  %v8326_v1 = vld [vmem:[%s18881_s9 + $0x38] sm:$0xff]  ;;  %v19018_v18 = vpop.permute.xlu1 %8334  ;;  %s18052_s9 = smov 8  }
0x286c   :  { %s13797_s12 = sld [smem:[%s20441_s0 + %s18052_s9]]  }
0x286d   :  { %v16095_v21 = vpop.f32.mrb[64].mxu1 }
0x286e   :  { %v7693_v22 = vpop.f32.mrb[65].mxu1 }
0x286f   :  { %v17237_v23 = vpack.c.bf16 %v16095_v21, %v7693_v22  ;;  %v19022_v21 = vpop.permute.xlu1 %8385 }
0x2871   :  { %v16098_v24 = vpop.f32.mrb[66].mxu1  ;;  %17238 = vmatprep.subr.bf16.mxu0 %v17237_v23 }
0x2872   :  { %v7703_v26 = vpop.f32.mrb[67].mxu1  ;;  %17240 = vmatpush3.bf16.msra.mxu0 %v17237_v23 }
0x2873   :  { %v17241_v51 = vpack.c.bf16 %v16098_v24, %v7703_v26  ;;  %v19026_v23 = vpop.permute.xlu1 %8339 }
0x2875   :  { %17242 = vmatprep.subr.bf16.mxu0 %v17241_v51  ;;  %v16145_v27 = vpop.f32.mrb[68].mxu1 }
0x2876   :  { %17244 = vmatpush3.bf16.msra.mxu0 %v17241_v51  ;;  %v8048_v54 = vpop.f32.mrb[69].mxu1 }
0x2877   :  { %v17257_v28 = vpack.c.bf16 %v16145_v27, %v8048_v54  ;;  %17246 = vmatprep.subr.bf16.mxu0 %v17245_v17  ;;  %v19030_v26 = vpop.permute.xlu1 %8395 }
0x2879   :  { %16108 = vmatmul.mubr.msk.f32.vlgmr.msra.gmra.mrb[56].mxu0 %vm295_vm3, %v14159_v5  ;;  %v16148_v30 = vpop.f32.mrb[70].mxu1 }
0x287a   :  { %17248 = vmatpush3.bf16.msra.mxu0 %v17245_v17  ;;  %v8058_v31 = vpop.f32.mrb[71].mxu1  ;;  %16110 = vmatprep.mubr.msk.f32.mxu0 %vm295_vm3, %v14160_v29  ;;  %v8380_v17 = vld [vmem:[%s18887_s13 + $0x28] sm:$0xff] }
0x287b   :  { %v17261_v36 = vpack.c.bf16 %v16148_v30, %v8058_v31  ;;  %17250 = vmatprep.subr.bf16.mxu0 %v17249_v19 }
0x287d   :  { %16111 = vmatmul.mubr.msk.f32.gmra.mrb[58].mxu0 %vm295_vm3, %v14161_v34 }
0x287e   :  { %17252 = vmatpush3.bf16.msra.mxu0 %v17249_v19  ;;  %16113 = vmatprep.mubr.msk.f32.mxu0 %vm295_vm3, %v14162_v37  ;;  %v19020_v19 = vpop.permute.xlu0 %8329 }
0x287f   :  { %17258 = vmatprep.subr.bf16.mxu0 %v17257_v28 }
0x2881   :  { %16114 = vmatmul.mubr.msk.f32.gmra.mrb[60].mxu0 %vm295_vm3, %v14163_v20 }
0x2882   :  { %16116 = vmatprep.mubr.msk.f32.mxu0 %vm295_vm3, %v14164_v38  ;;  %v19024_v22 = vpop.permute.xlu0 %8390 }
0x2885   :  { %16117 = vmatmul.mubr.msk.f32.gmra.mrb[62].mxu0 %vm295_vm3, %v14165_v39 }
0x2886   :  { %16127 = vmatprep.mubr.msk.f32.mxu0 %vm295_vm3, %v7616_v32  ;;  %v19028_v24 = vpop.permute.xlu0 %8344 }
0x2889   :  { %16128 = vmatmul.mubr.msk.f32.vlgmr.msra.gmra.mrb[56].mxu0 %vm295_vm3, %v7617_v40 }
0x288a   :  { %17260 = vmatpush3.bf16.msra.mxu0 %v17257_v28  ;;  %16130 = vmatprep.mubr.msk.f32.mxu0 %vm295_vm3, %v7618_v41 }
0x288b   :  { %17262 = vmatprep.subr.bf16.mxu0 %v17261_v36 }
0x288d   :  { %16131 = vmatmul.mubr.msk.f32.gmra.mrb[58].mxu0 %vm295_vm3, %v7619_v42 }
0x288e   :  { %17264 = vmatpush3.bf16.msra.mxu0 %v17261_v36  ;;  %16133 = vmatprep.mubr.msk.f32.mxu0 %vm295_vm3, %v7620_v43 }
0x2891   :  { %16134 = vmatmul.mubr.msk.f32.gmra.mrb[60].mxu0 %vm295_vm3, %v7621_v44 }
0x2892   :  { %16136 = vmatprep.mubr.msk.f32.mxu0 %vm295_vm3, %v7622_v45 }
0x2895   :  { %16137 = vmatmul.mubr.msk.f32.gmra.mrb[62].mxu0 %vm295_vm3, %v7623_v46 }
0x2896   :  { %16157 = vmatprep.mubr.msk.f32.mxu0 %vm295_vm3, %v14188_v47 }
0x2899   :  { %16158 = vmatmul.mubr.msk.f32.vlgmr.msra.gmra.mrb[56].mxu0 %vm295_vm3, %v14189_v48 }
0x289a   :  { %16160 = vmatprep.mubr.msk.f32.mxu0 %vm295_vm3, %v14190_v59 }
0x289d   :  { %16161 = vmatmul.mubr.msk.f32.gmra.mrb[58].mxu0 %vm295_vm3, %v14191_v49 }
0x289e   :  { %16163 = vmatprep.mubr.msk.f32.mxu0 %vm295_vm3, %v14192_v50 }
0x28a1   :  { %16164 = vmatmul.mubr.msk.f32.gmra.mrb[60].mxu0 %vm295_vm3, %v14193_v52 }
0x28a2   :  { %16166 = vmatprep.mubr.msk.f32.mxu0 %vm295_vm3, %v14194_v53 }
0x28a5   :  { %16167 = vmatmul.mubr.msk.f32.gmra.mrb[62].mxu0 %vm295_vm3, %v14195_v55 }
0x296c   :  { %v16159_v10 = vpop.f32.mrb[56].mxu0 }
0x296d   :  { %v8166_v56 = vpop.f32.mrb[57].mxu0  ;;  %v8217_v16 = vsel %vm8213_vm5, %v16159_v10, 0.0 }
0x296e   :  { %8218 = vadd.xlane.f32.xlu0 %v8217_v16  ;;  %v8214_v33 = vsel %vm8213_vm5, %v8166_v56, 0.0 }
0x296f   :  { %8215 = vadd.xlane.f32.xlu1 %v8214_v33 }
0x2970   :  { %v16162_v25 = vpop.f32.mrb[58].mxu0 }
0x2971   :  { %v8176_v61 = vpop.f32.mrb[59].mxu0  ;;  %v8223_v57 = vsel %vm8213_vm5, %v16162_v25, 0.0 }
0x2972   :  { %v8220_v58 = vsel %vm8213_vm5, %v8176_v61, 0.0 }
0x2973   :  { %8224 = vadd.xlane.f32.xlu1 %v8223_v57  ;;  %8221 = vadd.xlane.f32.xlu0 %v8220_v58 }
0x2974   :  { %v16165_v60 = vpop.f32.mrb[60].mxu0 }
0x2975   :  { %v8186_v62 = vpop.f32.mrb[61].mxu0  ;;  %v8229_v63 = vsel %vm8213_vm5, %v16165_v60, 0.0 }
0x2976   :  { %v8226_v0 = vsel %vm8213_vm5, %v8186_v62, 0.0 }
0x2977   :  { %8230 = vadd.xlane.f32.xlu1 %v8229_v63  ;;  %8227 = vadd.xlane.f32.xlu0 %v8226_v0  ;;  %v8381_v63 = vld [vmem:[%s18887_s13 + $0x30] sm:$0xff]  ;;  %v9427_v0 = vld [vmem:[%s19077_s25 + $0x8] sm:$0xff] }
0x2978   :  { %v19003_v3 = vpop.f32.mrb[62].mxu0 }
0x2979   :  { %v19005_v4 = vpop.f32.mrb[63].mxu0  ;;  %v8235_v2 = vsel %vm8213_vm5, %v19003_v3, 0.0 }
0x297a   :  { %v8232_v6 = vsel %vm8213_vm5, %v19005_v4, 0.0 }
0x297b   :  { %8236 = vadd.xlane.f32.xlu1 %v8235_v2  ;;  %8233 = vadd.xlane.f32.xlu0 %v8232_v6  ;;  %v9426_v2 = vld [vmem:[%s19077_s25] sm:$0xff] }
0x297c   :  { %v19095_v6 = vld [vmem:[%s19089_s3] sm:$0xff] }
0x297d   :  { %16169 = vmatprep.subr.mxu1 %v19095_v6 }
0x297e   :  { %16170 = vmatpush3.msra.mxu1 %v19095_v6 }
0x298c   :  { %8349 = vperm.xlu1 %17803, %v8323_v9   ;;  %v19098_v9 = vld [vmem:[%s19089_s3 + $0x10] sm:$0xff] }
0x298d   :  { %16239 = vmatprep.subr.mxu0 %v19098_v9 }
0x298e   :  { %16240 = vmatpush3.msra.mxu0 %v19098_v9 }
0x2990   :  { %8405 = vperm.xlu1 %17803, %v8379_v11   ;;  %v9428_v11 = vld [vmem:[%s19077_s25 + $0x10] sm:$0xff] }
0x2991   :  { %8400 = vperm.xlu0 %17802, %v8378_v12   ;;  %v9483_v12 = vld [vmem:[%s19083_s29 + $0x8] sm:$0xff] }
0x2994   :  { %8359 = vperm.xlu1 %17803, %v8325_v8   ;;  %v9484_v8 = vld [vmem:[%s19083_s29 + $0x10] sm:$0xff] }
0x2995   :  { %8354 = vperm.xlu0 %17802, %v8324_v15   ;;  %v9429_v15 = vld [vmem:[%s19077_s25 + $0x18] sm:$0xff] }
0x2999   :  { %8410 = vperm.xlu0 %17802, %v8380_v17   ;;  %v9106_v17 = vld [vmem:[%s13796_s7] sm:$0xff] }
0x299d   :  { %8364 = vperm.xlu0 %17802, %v8326_v1   ;;  %v9107_v1 = vld [vmem:[%s13796_s7 + $0x8] sm:$0xff]  ;;  %s18044_s7 = smov 60  }
0x299e   :  { %s19622_s10 = sld [smem:[%s20441_s0 + %s18044_s7]]  }
0x29fb   :  { %v8219_v51 = vpop.xlane.xlu0 %8218 }
0x29fc   :  { %v8240_v27 = vmul.f32 0.125, %v8219_v51  ;;  %v8216_v54 = vpop.xlane.xlu1 %8215  ;;  %v19111_v51 = vpack.c.bf16 %v9107_v1, %v9106_v17 }
0x29fd   :  { %v8239_v5 = vmul.f32 0.125, %v8216_v54 }
0x29fe   :  { %v19032_v28 = vsub.f32 %v16159_v10, %v8240_v27  ;;  %17314 = vmatprep.subr.bf16.mxu0 %v19111_v51 }
0x29ff   :  { %v19034_v29 = vsub.f32 %v8166_v56, %v8239_v5 }
0x2a00   :  { %v8225_v30 = vpop.xlane.xlu1 %8224  ;;  %v8222_v31 = vpop.xlane.xlu0 %8221  ;;  %v8256_v34 = vmul.f32 %v19032_v28, %v19032_v28 }
0x2a01   :  { %v8242_v36 = vmul.f32 0.125, %v8225_v30  ;;  %v8241_v37 = vmul.f32 0.125, %v8222_v31  ;;  %v8255_v20 = vmul.f32 %v19034_v29, %v19034_v29 }
0x2a02   :  { %v8266_v38 = vsel %vm8213_vm5, %v8256_v34, 0.0 }
0x2a03   :  { %v19041_v39 = vsub.f32 %v16162_v25, %v8242_v36  ;;  %v19043_v32 = vsub.f32 %v8176_v61, %v8241_v37  ;;  %8267 = vadd.xlane.f32.xlu1 %v8266_v38  ;;  %v8263_v40 = vsel %vm8213_vm5, %v8255_v20, 0.0 }
0x2a04   :  { %v8231_v41 = vpop.xlane.xlu1 %8230  ;;  %8264 = vadd.xlane.f32.xlu0 %v8263_v40  ;;  %v8228_v42 = vpop.xlane.xlu0 %8227 }
0x2a05   :  { %v8244_v43 = vmul.f32 0.125, %v8231_v41  ;;  %v8243_v44 = vmul.f32 0.125, %v8228_v42  ;;  %v8258_v45 = vmul.f32 %v19041_v39, %v19041_v39  ;;  %v8257_v46 = vmul.f32 %v19043_v32, %v19043_v32 }
0x2a07   :  { %v19050_v47 = vsub.f32 %v16165_v60, %v8244_v43  ;;  %v19052_v48 = vsub.f32 %v8186_v62, %v8243_v44  ;;  %v8272_v59 = vsel %vm8213_vm5, %v8258_v45, 0.0  ;;  %v8269_v49 = vsel %vm8213_vm5, %v8257_v46, 0.0 }
0x2a08   :  { %v8237_v50 = vpop.xlane.xlu1 %8236  ;;  %8273 = vadd.xlane.f32.xlu1 %v8272_v59  ;;  %8270 = vadd.xlane.f32.xlu0 %v8269_v49  ;;  %v8234_v52 = vpop.xlane.xlu0 %8233 }
0x2a09   :  { %v8246_v53 = vmul.f32 0.125, %v8237_v50  ;;  %v8245_v55 = vmul.f32 0.125, %v8234_v52  ;;  %v8260_v10 = vmul.f32 %v19050_v47, %v19050_v47  ;;  %v8259_v56 = vmul.f32 %v19052_v48, %v19052_v48 }
0x2a0b   :  { %v19061_v16 = vsub.f32 %v19003_v3, %v8246_v53  ;;  %v19064_v33 = vsub.f32 %v19005_v4, %v8245_v55  ;;  %v8278_v25 = vsel %vm8213_vm5, %v8260_v10, 0.0  ;;  %v8275_v61 = vsel %vm8213_vm5, %v8259_v56, 0.0  ;;  %v8382_v3 = vld [vmem:[%s18887_s13 + $0x38] sm:$0xff]  ;;  %v9482_v4 = vld [vmem:[%s19083_s29] sm:$0xff]  ;;  %s18053_s13 = smov 69  }
0x2a0c   :  { %8279 = vadd.xlane.f32.xlu1 %v8278_v25  ;;  %8276 = vadd.xlane.f32.xlu0 %v8275_v61  ;;  %v19114_v54 = vpop.permute.xlu1 %8349  ;;  %s20273_s16 = sld [smem:[%s20441_s0 + %s18053_s13]]  }
0x2a0d   :  { %v8262_v57 = vmul.f32 %v19061_v16, %v19061_v16  ;;  %v8261_v58 = vmul.f32 %v19064_v33, %v19064_v33 }
0x2a0f   :  { %v8284_v60 = vsel %vm8213_vm5, %v8262_v57, 0.0  ;;  %v8281_v62 = vsel %vm8213_vm5, %v8261_v58, 0.0 }
0x2a10   :  { %8285 = vadd.xlane.f32.xlu1 %v8284_v60  ;;  %8282 = vadd.xlane.f32.xlu0 %v8281_v62  ;;  %v8401_v27 = vpop.permute.xlu0 %8400  ;;  %v19118_v30 = vpop.permute.xlu1 %8405 }
0x2a14   :  { %v19116_v5 = vpop.permute.xlu0 %8354  ;;  %v19122_v34 = vpop.permute.xlu1 %8359 }
0x2a18   :  { %v19120_v31 = vpop.permute.xlu0 %8410 }
0x2a1c   :  { %v19124_v36 = vpop.permute.xlu0 %8364 }
0x2a21   :  { %8415 = vperm.xlu1 %17803, %v8381_v63  }
0x2a25   :  { %9441 = vperm.xlu1 %17803, %v9427_v0  }
0x2a26   :  { %8420 = vperm.xlu0 %17802, %v8382_v3  }
0x2a29   :  { %9492 = vperm.xlu1 %17803, %v9482_v4  }
0x2a2a   :  { %9436 = vperm.xlu0 %17802, %v9426_v2  }
0x2a2d   :  { %9446 = vperm.xlu1 %17803, %v9428_v11  }
0x2a2e   :  { %9497 = vperm.xlu0 %17802, %v9483_v12  }
0x2a31   :  { %9502 = vperm.xlu1 %17803, %v9484_v8  }
0x2a32   :  { %9451 = vperm.xlu0 %17802, %v9429_v15  }
0x2a90   :  { %v8268_v37 = vpop.xlane.xlu1 %8267 }
0x2a91   :  { %v8288_v20 = vmul.f32 0.125, %v8268_v37  ;;  %v8265_v38 = vpop.xlane.xlu0 %8264 }
0x2a92   :  { %v8287_v40 = vmul.f32 0.125, %v8265_v38 }
0x2a93   :  { %v8296_v41 = vadd.f32 1e-05, %v8288_v20 }
0x2a94   :  { %v8295_v42 = vadd.f32 1e-05, %v8287_v40 }
0x2a95   :  { %17880 = vrsqrt.f32 %v8296_v41  ;;  %v8274_v43 = vpop.xlane.xlu1 %8273  ;;  %v8271_v44 = vpop.xlane.xlu0 %8270 }
0x2a96   :  { %17882 = vrsqrt.f32 %v8295_v42  ;;  %v8290_v45 = vmul.f32 0.125, %v8274_v43  ;;  %v8289_v46 = vmul.f32 0.125, %v8271_v44 }
0x2a98   :  { %v8298_v59 = vadd.f32 1e-05, %v8290_v45  ;;  %v8297_v49 = vadd.f32 1e-05, %v8289_v46 }
0x2a99   :  { %v8280_v50 = vpop.xlane.xlu1 %8279  ;;  %v8277_v52 = vpop.xlane.xlu0 %8276 }
0x2a9a   :  { %17884 = vrsqrt.f32 %v8298_v59  ;;  %v8292_v53 = vmul.f32 0.125, %v8280_v50  ;;  %v8291_v55 = vmul.f32 0.125, %v8277_v52  ;;  %v14216_v50 = vld [vmem:[%s19177_s11 + $0x60] sm:$0xff]  ;;  %v14217_v52 = vld [vmem:[%s19177_s11 + $0x68] sm:$0xff] }
0x2a9b   :  { %17886 = vrsqrt.f32 %v8297_v49 }
0x2a9c   :  { %v8300_v10 = vadd.f32 1e-05, %v8292_v53  ;;  %v8299_v56 = vadd.f32 1e-05, %v8291_v55  ;;  %v14218_v53 = vld [vmem:[%s19177_s11 + $0x70] sm:$0xff]  ;;  %v14219_v55 = vld [vmem:[%s19177_s11 + $0x78] sm:$0xff] }
0x2a9d   :  { %v8286_v25 = vpop.xlane.xlu1 %8285  ;;  %v8283_v61 = vpop.xlane.xlu0 %8282 }
0x2a9e   :  { %17888 = vrsqrt.f32 %v8300_v10  ;;  %v8294_v57 = vmul.f32 0.125, %v8286_v25  ;;  %v8293_v58 = vmul.f32 0.125, %v8283_v61  ;;  %v8569_v10 = vld [vmem:[%s19177_s11] sm:$0xff] }
0x2a9f   :  { %v17881_v60 = vpop.eup %17880  ;;  %17890 = vrsqrt.f32 %v8299_v56 }
0x2aa0   :  { %v17883_v62 = vpop.eup %17882  ;;  %v8312_v63 = vmul.f32 %v17881_v60, %v19032_v28  ;;  %v8302_v0 = vadd.f32 1e-05, %v8294_v57  ;;  %v8301_v3 = vadd.f32 1e-05, %v8293_v58 }
0x2aa1   :  { %v8311_v4 = vmul.f32 %v17883_v62, %v19034_v29 }
0x2aa2   :  { %v8368_v2 = vmul.f32 %v19018_v18, %v8312_v63  ;;  %17892 = vrsqrt.f32 %v8302_v0 }
0x2aa3   :  { %17894 = vrsqrt.f32 %v8301_v3  ;;  %v8367_v11 = vmul.f32 %v19020_v19, %v8311_v4 }
0x2aa4   :  { %v17885_v12 = vpop.eup %17884  ;;  %v8424_v8 = vadd.f32 %v19024_v22, %v8368_v2 }
0x2aa5   :  { %v17887_v15 = vpop.eup %17886  ;;  %v8423_v17 = vadd.f32 %v19022_v21, %v8367_v11  ;;  %v8314_v1 = vmul.f32 %v17885_v12, %v19041_v39  ;;  %v8421_v45 = vpop.permute.xlu0 %8420 }
0x2aa6   :  { %v8432_v37 = vmax.f32 %v8424_v8, 0.0  ;;  %v8313_v28 = vmul.f32 %v17887_v15, %v19043_v32 }
0x2aa7   :  { %v8431_v20 = vmax.f32 %v8423_v17, 0.0  ;;  %v8370_v29 = vmul.f32 %v19028_v24, %v8314_v1 }
0x2aa8   :  { %v17889_v38 = vpop.eup %17888  ;;  %v8369_v18 = vmul.f32 %v19026_v23, %v8313_v28 }
0x2aa9   :  { %v17891_v40 = vpop.eup %17890  ;;  %16171 = vmatprep.mubr.msk.f32.mxu1 %vm8213_vm5, %v8431_v20  ;;  %16241 = vmatprep.mubr.msk.f32.mxu0 %vm8213_vm5, %v8431_v20  ;;  %v17265_v19 = vpack.c.bf16 %v8432_v37, %v8431_v20  ;;  %v8426_v22 = vadd.f32 %v8401_v27, %v8370_v29  ;;  %v8316_v21 = vmul.f32 %v17889_v38, %v19050_v47 }
0x2aaa   :  { %16172 = vmatmul.mubr.msk.f32.vlgmr.msra.gmra.mrb[72].mxu1 %vm8213_vm5, %v8432_v37  ;;  %16242 = vmatmul.mubr.msk.f32.vlgmr.msra.gmra.mrb[64].mxu0 %vm8213_vm5, %v8432_v37  ;;  %v8425_v39 = vadd.f32 %v19030_v26, %v8369_v18  ;;  %v8315_v24 = vmul.f32 %v17891_v40, %v19052_v48 }
0x2aab   :  { %17266 = vmatprep.subr.bf16.mxu1 %v17265_v19  ;;  %v8434_v32 = vmax.f32 %v8426_v22, 0.0  ;;  %v8372_v23 = vmul.f32 %v19116_v5, %v8316_v21  ;;  %17316 = vmatpush3.bf16.msra.mxu0 %v19111_v51  ;;  %v8570_v22 = vld [vmem:[%s19177_s11 + $0x8] sm:$0xff] }
0x2aac   :  { %v17893_v41 = vpop.eup %17892  ;;  %17268 = vmatpush3.bf16.msra.mxu1 %v17265_v19  ;;  %v8433_v42 = vmax.f32 %v8425_v39, 0.0  ;;  %v8371_v27 = vmul.f32 %v19114_v54, %v8315_v24  ;;  %16311 = vmatprep.subr.mxu0 %v19095_v6  ;;  %v8571_v39 = vld [vmem:[%s19177_s11 + $0x10] sm:$0xff] }
0x2aad   :  { %v17895_v47 = vpop.eup %17894  ;;  %v8318_v43 = vmul.f32 %v17893_v41, %v19061_v16  ;;  %v8428_v26 = vadd.f32 %v19120_v31, %v8372_v23  ;;  %v8572_v23 = vld [vmem:[%s19177_s11 + $0x18] sm:$0xff] }
0x2aae   :  { %v8317_v48 = vmul.f32 %v17895_v47, %v19064_v33  ;;  %16174 = vmatprep.mubr.msk.f32.mxu1 %vm8213_vm5, %v8433_v42  ;;  %16244 = vmatprep.mubr.msk.f32.mxu0 %vm8213_vm5, %v8433_v42  ;;  %v17269_v5 = vpack.c.bf16 %v8434_v32, %v8433_v42  ;;  %v8427_v51 = vadd.f32 %v19118_v30, %v8371_v27  ;;  %v8416_v33 = vpop.permute.xlu1 %8415  ;;  %v8573_v42 = vld [vmem:[%s19177_s11 + $0x20] sm:$0xff]  ;;  %v8574_v27 = vld [vmem:[%s19177_s11 + $0x28] sm:$0xff]  ;;  %v8575_v47 = vld [vmem:[%s19177_s11 + $0x30] sm:$0xff] }
0x2aaf   :  { %v8374_v44 = vmul.f32 %v19124_v36, %v8318_v43  ;;  %16175 = vmatmul.mubr.msk.f32.gmra.mrb[74].mxu1 %vm8213_vm5, %v8434_v32  ;;  %16245 = vmatmul.mubr.msk.f32.gmra.mrb[66].mxu0 %vm8213_vm5, %v8434_v32  ;;  %v8436_v54 = vmax.f32 %v8428_v26, 0.0  ;;  %v8576_v43 = vld [vmem:[%s19177_s11 + $0x38] sm:$0xff]  ;;  %v14245_v26 = vld [vmem:[%s19177_s11 + $0x80] sm:$0xff] }
0x2ab0   :  { %v8373_v16 = vmul.f32 %v19122_v34, %v8317_v48  ;;  %17270 = vmatprep.subr.bf16.mxu1 %v17269_v5  ;;  %v8435_v31 = vmax.f32 %v8427_v51, 0.0  ;;  %v14246_v48 = vld [vmem:[%s19177_s11 + $0x88] sm:$0xff]  ;;  %v14248_v51 = vld [vmem:[%s19177_s11 + $0x98] sm:$0xff] }
0x2ab1   :  { %v8430_v46 = vadd.f32 %v8421_v45, %v8374_v44  ;;  %17272 = vmatpush3.bf16.msra.mxu1 %v17269_v5  ;;  %v14247_v5 = vld [vmem:[%s19177_s11 + $0x90] sm:$0xff]  ;;  %v14249_v44 = vld [vmem:[%s19177_s11 + $0xa0] sm:$0xff]  ;;  %v14252_v45 = vld [vmem:[%s19177_s11 + $0xb8] sm:$0xff] }
0x2ab2   :  { %v8429_v59 = vadd.f32 %v8416_v33, %v8373_v16  ;;  %16177 = vmatprep.mubr.msk.f32.mxu1 %vm8213_vm5, %v8435_v31  ;;  %16247 = vmatprep.mubr.msk.f32.mxu0 %vm8213_vm5, %v8435_v31  ;;  %v17273_v30 = vpack.c.bf16 %v8436_v54, %v8435_v31  ;;  %v14251_v16 = vld [vmem:[%s19177_s11 + $0xb0] sm:$0xff]  ;;  %v9098_v31 = vld [vmem:[%s13843_s15] sm:$0xff]  ;;  %v9099_v33 = vld [vmem:[%s13843_s15 + $0x8] sm:$0xff] }
0x2ab3   :  { %v8438_v36 = vmax.f32 %v8430_v46, 0.0  ;;  %16178 = vmatmul.mubr.msk.f32.gmra.mrb[76].mxu1 %vm8213_vm5, %v8436_v54  ;;  %16248 = vmatmul.mubr.msk.f32.gmra.mrb[68].mxu0 %vm8213_vm5, %v8436_v54  ;;  %v14250_v54 = vld [vmem:[%s19177_s11 + $0xa8] sm:$0xff]  ;;  %v9100_v46 = vld [vmem:[%s13843_s15 + $0x10] sm:$0xff] }
0x2ab4   :  { %v8437_v49 = vmax.f32 %v8429_v59, 0.0  ;;  %17274 = vmatprep.subr.bf16.mxu1 %v17273_v30  ;;  %v9101_v59 = vld [vmem:[%s13843_s15 + $0x18] sm:$0xff] }
0x2ab5   :  { %17276 = vmatpush3.bf16.msra.mxu1 %v17273_v30  ;;  %v9102_v30 = vld [vmem:[%s13843_s15 + $0x20] sm:$0xff] }
0x2ab6   :  { %16180 = vmatprep.mubr.msk.f32.mxu1 %vm8213_vm5, %v8437_v49  ;;  %16250 = vmatprep.mubr.msk.f32.mxu0 %vm8213_vm5, %v8437_v49  ;;  %v17277_v34 = vpack.c.bf16 %v8438_v36, %v8437_v49  ;;  %v9104_v49 = vld [vmem:[%s13843_s15 + $0x30] sm:$0xff] }
0x2ab7   :  { %16181 = vmatmul.mubr.msk.f32.gmra.mrb[78].mxu1 %vm8213_vm5, %v8438_v36  ;;  %16251 = vmatmul.mubr.msk.f32.gmra.mrb[70].mxu0 %vm8213_vm5, %v8438_v36  ;;  %v9103_v36 = vld [vmem:[%s13843_s15 + $0x28] sm:$0xff] }
0x2ab8   :  { %17278 = vmatprep.subr.bf16.mxu1 %v17277_v34  ;;  %16285 = vmatprep.mubr.msk.f32.mxu0 %vm850_vm4, %v18912_v14  ;;  %v14212_v14 = vld [vmem:[%s19177_s11 + $0x40] sm:$0xff] }
0x2ab9   :  { %17280 = vmatpush3.bf16.msra.mxu1 %v17277_v34  ;;  %16199 = vmatprep.mubr.msk.f32.mxu1 %vm8586_vm6, %v14212_v14  ;;  %v9105_v34 = vld [vmem:[%s13843_s15 + $0x38] sm:$0xff]  ;;  %s18046_s15 = smov 65  }
0x2aba   :  { %s19793_s18 = sld [smem:[%s20441_s0 + %s18046_s15]]  }
0x2abb   :  { %16286 = vmatmul.mubr.msk.f32.vlgmr.msra.gmra.mrb[72].mxu0 %vm850_vm4, %v18914_v13  ;;  %v14213_v13 = vld [vmem:[%s19177_s11 + $0x48] sm:$0xff] }
0x2abc   :  { %16288 = vmatprep.mubr.msk.f32.mxu0 %vm850_vm4, %v18922_v7  ;;  %16312 = vmatpush3.msra.mxu0 %v19095_v6  ;;  %v14215_v7 = vld [vmem:[%s19177_s11 + $0x58] sm:$0xff] }
0x2abd   :  { %16200 = vmatmul.mubr.msk.f32.vlgmr.msra.gmra.mrb[80].mxu1 %vm8586_vm6, %v14213_v13 }
0x2abf   :  { %16289 = vmatmul.mubr.msk.f32.gmra.mrb[74].mxu0 %vm850_vm4, %v18920_v35  ;;  %v14214_v35 = vld [vmem:[%s19177_s11 + $0x50] sm:$0xff]  ;;  %s18045_s11 = smov 64  }
0x2ac0   :  { %16202 = vmatprep.mubr.msk.f32.mxu1 %vm8586_vm6, %v14214_v35  ;;  %s19787_s14 = sld [smem:[%s20441_s0 + %s18045_s11]]  }
0x2ac1   :  { %16203 = vmatmul.mubr.msk.f32.gmra.mrb[82].mxu1 %vm8586_vm6, %v14215_v7 }
0x2ac2   :  { %16205 = vmatprep.mubr.msk.f32.mxu1 %vm8586_vm6, %v14216_v50 }
0x2ac5   :  { %16206 = vmatmul.mubr.msk.f32.gmra.mrb[84].mxu1 %vm8586_vm6, %v14217_v52 }
0x2ac6   :  { %16208 = vmatprep.mubr.msk.f32.mxu1 %vm8586_vm6, %v14218_v53 }
0x2ac9   :  { %16209 = vmatmul.mubr.msk.f32.gmra.mrb[86].mxu1 %vm8586_vm6, %v14219_v55 }
0x2aca   :  { %16227 = vmatprep.mubr.msk.f32.mxu1 %vm8586_vm6, %v8569_v10 }
0x2b7d   :  { %v16173_v56 = vpop.f32.mrb[72].mxu1  ;;  %v16243_v25 = vpop.f32.mrb[64].mxu0 }
0x2b7e   :  { %v8530_v61 = vpop.f32.mrb[73].mxu1  ;;  %v8913_v57 = vpop.f32.mrb[65].mxu0 }
0x2b7f   :  { %v17281_v58 = vpack.c.bf16 %v16173_v56, %v8530_v61  ;;  %v17297_v60 = vpack.c.bf16 %v16243_v25, %v8913_v57 }
0x2b81   :  { %17282 = vmatprep.subr.bf16.mxu1 %v17281_v58 }
0x2b82   :  { %v16176_v62 = vpop.f32.mrb[74].mxu1  ;;  %v16246_v63 = vpop.f32.mrb[66].mxu0  ;;  %17284 = vmatpush3.bf16.msra.mxu1 %v17281_v58 }
0x2b83   :  { %v8540_v0 = vpop.f32.mrb[75].mxu1  ;;  %v8923_v3 = vpop.f32.mrb[67].mxu0 }
0x2b84   :  { %v17285_v4 = vpack.c.bf16 %v16176_v62, %v8540_v0  ;;  %v17301_v2 = vpack.c.bf16 %v16246_v63, %v8923_v3  ;;  %v9430_v62 = vld [vmem:[%s19077_s25 + $0x20] sm:$0xff]  ;;  %v9485_v0 = vld [vmem:[%s19083_s29 + $0x18] sm:$0xff]  ;;  %v9432_v3 = vld [vmem:[%s19077_s25 + $0x30] sm:$0xff] }
0x2b85   :  { %v9486_v63 = vld [vmem:[%s19083_s29 + $0x20] sm:$0xff] }
0x2b86   :  { %v16179_v11 = vpop.f32.mrb[76].mxu1  ;;  %17286 = vmatprep.subr.bf16.mxu1 %v17285_v4  ;;  %v16249_v12 = vpop.f32.mrb[68].mxu0 }
0x2b87   :  { %v8550_v8 = vpop.f32.mrb[77].mxu1  ;;  %17288 = vmatpush3.bf16.msra.mxu1 %v17285_v4  ;;  %v8933_v15 = vpop.f32.mrb[69].mxu0  ;;  %v9431_v4 = vld [vmem:[%s19077_s25 + $0x28] sm:$0xff] }
0x2b88   :  { %v17289_v17 = vpack.c.bf16 %v16179_v11, %v8550_v8  ;;  %v17305_v1 = vpack.c.bf16 %v16249_v12, %v8933_v15  ;;  %v9433_v11 = vld [vmem:[%s19077_s25 + $0x38] sm:$0xff]  ;;  %v19280_v12 = vpop.permute.xlu1 %9441  ;;  %v19282_v8 = vpop.permute.xlu0 %9436 }
0x2b8a   :  { %v16182_v37 = vpop.f32.mrb[78].mxu1  ;;  %17290 = vmatprep.subr.bf16.mxu1 %v17289_v17  ;;  %v16252_v28 = vpop.f32.mrb[70].mxu0 }
0x2b8b   :  { %v8560_v20 = vpop.f32.mrb[79].mxu1  ;;  %17292 = vmatpush3.bf16.msra.mxu1 %v17289_v17  ;;  %v8943_v29 = vpop.f32.mrb[71].mxu0 }
0x2b8c   :  { %v17293_v38 = vpack.c.bf16 %v16182_v37, %v8560_v20  ;;  %v17309_v18 = vpack.c.bf16 %v16252_v28, %v8943_v29  ;;  %v19284_v15 = vpop.permute.xlu1 %9492  ;;  %v19286_v17 = vpop.permute.xlu0 %9497 }
0x2b8e   :  { %17294 = vmatprep.subr.bf16.mxu1 %v17293_v38  ;;  %v16287_v40 = vpop.f32.mrb[72].mxu0 }
0x2b8f   :  { %17296 = vmatpush3.bf16.msra.mxu1 %v17293_v38  ;;  %v9174_v19 = vpop.f32.mrb[73].mxu0 }
0x2b90   :  { %v17317_v21 = vpack.c.bf16 %v16287_v40, %v9174_v19  ;;  %17298 = vmatprep.subr.bf16.mxu1 %v17297_v60  ;;  %v19290_v37 = vpop.permute.xlu0 %9451 }
0x2b92   :  { %16228 = vmatmul.mubr.msk.f32.vlgmr.msra.gmra.mrb[80].mxu1 %vm8586_vm6, %v8570_v22  ;;  %v16290_v24 = vpop.f32.mrb[74].mxu0 }
0x2b93   :  { %17300 = vmatpush3.bf16.msra.mxu1 %v17297_v60  ;;  %v9184_v32 = vpop.f32.mrb[75].mxu0  ;;  %16230 = vmatprep.mubr.msk.f32.mxu1 %vm8586_vm6, %v8571_v39 }
0x2b94   :  { %v17321_v41 = vpack.c.bf16 %v16290_v24, %v9184_v32  ;;  %17302 = vmatprep.subr.bf16.mxu1 %v17301_v2 }
0x2b96   :  { %16231 = vmatmul.mubr.msk.f32.gmra.mrb[82].mxu1 %vm8586_vm6, %v8572_v23 }
0x2b97   :  { %17304 = vmatpush3.bf16.msra.mxu1 %v17301_v2  ;;  %16233 = vmatprep.mubr.msk.f32.mxu1 %vm8586_vm6, %v8573_v42  ;;  %v9487_v2 = vld [vmem:[%s19083_s29 + $0x28] sm:$0xff] }
0x2b98   :  { %17306 = vmatprep.subr.bf16.mxu1 %v17305_v1 }
0x2b9a   :  { %16234 = vmatmul.mubr.msk.f32.gmra.mrb[84].mxu1 %vm8586_vm6, %v8574_v27 }
0x2b9b   :  { %17308 = vmatpush3.bf16.msra.mxu1 %v17305_v1  ;;  %16236 = vmatprep.mubr.msk.f32.mxu1 %vm8586_vm6, %v8575_v47  ;;  %v19288_v1 = vpop.permute.xlu1 %9446 }
0x2b9c   :  { %17310 = vmatprep.subr.bf16.mxu1 %v17309_v18 }
0x2b9e   :  { %16237 = vmatmul.mubr.msk.f32.gmra.mrb[86].mxu1 %vm8586_vm6, %v8576_v43 }
0x2b9f   :  { %17312 = vmatpush3.bf16.msra.mxu1 %v17309_v18  ;;  %16269 = vmatprep.mubr.msk.f32.mxu1 %vm8586_vm6, %v14245_v26  ;;  %v19292_v28 = vpop.permute.xlu1 %9502 }
0x2ba0   :  { %17318 = vmatprep.subr.bf16.mxu1 %v17317_v21 }
0x2ba2   :  { %16270 = vmatmul.mubr.msk.f32.vlgmr.msra.gmra.mrb[80].mxu1 %vm8586_vm6, %v14246_v48 }
0x2ba3   :  { %17320 = vmatpush3.bf16.msra.mxu1 %v17317_v21  ;;  %16272 = vmatprep.mubr.msk.f32.mxu1 %vm8586_vm6, %v14247_v5 }
0x2ba4   :  { %17322 = vmatprep.subr.bf16.mxu1 %v17321_v41 }
0x2ba6   :  { %16273 = vmatmul.mubr.msk.f32.gmra.mrb[82].mxu1 %vm8586_vm6, %v14248_v51 }
0x2ba7   :  { %17324 = vmatpush3.bf16.msra.mxu1 %v17321_v41  ;;  %16275 = vmatprep.mubr.msk.f32.mxu1 %vm8586_vm6, %v14249_v44 }
0x2ba8   :  { %16381 = vmatprep.subr.mxu1 %v19098_v9 }
0x2baa   :  { %16276 = vmatmul.mubr.msk.f32.gmra.mrb[84].mxu1 %vm8586_vm6, %v14250_v54 }
0x2bab   :  { %16278 = vmatprep.mubr.msk.f32.mxu1 %vm8586_vm6, %v14251_v16 }
0x2bae   :  { %16279 = vmatmul.mubr.msk.f32.gmra.mrb[86].mxu1 %vm8586_vm6, %v14252_v45 }
0x2baf   :  { %16299 = vmatprep.mubr.msk.f32.mxu1 %vm295_vm3, %v9098_v31 }
0x2bb2   :  { %16300 = vmatmul.mubr.msk.f32.vlgmr.msra.gmra.mrb[80].mxu1 %vm295_vm3, %v9099_v33 }
0x2bb3   :  { %16302 = vmatprep.mubr.msk.f32.mxu1 %vm295_vm3, %v9100_v46  ;;  %16382 = vmatpush3.msra.mxu1 %v19098_v9 }
0x2bb4   :  { %16423 = vmatprep.subr.mxu1 %v19095_v6 }
0x2bb6   :  { %16303 = vmatmul.mubr.msk.f32.gmra.mrb[82].mxu1 %vm295_vm3, %v9101_v59 }
0x2bb7   :  { %16305 = vmatprep.mubr.msk.f32.mxu1 %vm295_vm3, %v9102_v30 }
0x2bba   :  { %16306 = vmatmul.mubr.msk.f32.gmra.mrb[84].mxu1 %vm295_vm3, %v9103_v36 }
0x2bbb   :  { %16308 = vmatprep.mubr.msk.f32.mxu1 %vm295_vm3, %v9104_v49 }
0x2bbe   :  { %16309 = vmatmul.mubr.msk.f32.gmra.mrb[86].mxu1 %vm295_vm3, %v9105_v34 }
0x2c85   :  { %v19241_v14 = vpop.f32.mrb[80].mxu1 }
0x2c86   :  { %v19243_v13 = vpop.f32.mrb[81].mxu1  ;;  %v9325_v9 = vsel %vm8213_vm5, %v19241_v14, 0.0 }
0x2c87   :  { %9326 = vadd.xlane.f32.xlu0 %v9325_v9  ;;  %v9322_v35 = vsel %vm8213_vm5, %v19243_v13, 0.0 }
0x2c88   :  { %9323 = vadd.xlane.f32.xlu1 %v9322_v35 }
0x2c89   :  { %v19249_v7 = vpop.f32.mrb[82].mxu1 }
0x2c8a   :  { %v19251_v50 = vpop.f32.mrb[83].mxu1  ;;  %v9331_v52 = vsel %vm8213_vm5, %v19249_v7, 0.0 }
0x2c8b   :  { %v9328_v53 = vsel %vm8213_vm5, %v19251_v50, 0.0 }
0x2c8c   :  { %9332 = vadd.xlane.f32.xlu1 %v9331_v52  ;;  %9329 = vadd.xlane.f32.xlu0 %v9328_v53 }
0x2c8d   :  { %v19257_v55 = vpop.f32.mrb[84].mxu1 }
0x2c8e   :  { %v19259_v10 = vpop.f32.mrb[85].mxu1  ;;  %v9337_v56 = vsel %vm8213_vm5, %v19257_v55, 0.0 }
0x2c8f   :  { %v9334_v25 = vsel %vm8213_vm5, %v19259_v10, 0.0 }
0x2c90   :  { %9338 = vadd.xlane.f32.xlu1 %v9337_v56  ;;  %9335 = vadd.xlane.f32.xlu0 %v9334_v25 }
0x2c91   :  { %v19265_v61 = vpop.f32.mrb[86].mxu1 }
0x2c92   :  { %v19267_v57 = vpop.f32.mrb[87].mxu1  ;;  %v9343_v58 = vsel %vm8213_vm5, %v19265_v61, 0.0 }
0x2c93   :  { %v9340_v60 = vsel %vm8213_vm5, %v19267_v57, 0.0 }
0x2c94   :  { %9344 = vadd.xlane.f32.xlu1 %v9343_v58  ;;  %9341 = vadd.xlane.f32.xlu0 %v9340_v60  ;;  %v9488_v60 = vld [vmem:[%s19083_s29 + $0x30] sm:$0xff] }
0x2ca5   :  { %9456 = vperm.xlu1 %17803, %v9430_v62   ;;  %v10306_v62 = vld [vmem:[%s19345_s19 + $0x8] sm:$0xff] }
0x2ca9   :  { %9512 = vperm.xlu1 %17803, %v9486_v63   ;;  %v9489_v63 = vld [vmem:[%s19083_s29 + $0x38] sm:$0xff]  ;;  %s19993_s29 = sld [smem:[%s20441_s0 + %s18049_s26]]  }
0x2caa   :  { %9507 = vperm.xlu0 %17802, %v9485_v0   ;;  %v10361_v0 = vld [vmem:[%s19351_s23] sm:$0xff] }
0x2cad   :  { %9466 = vperm.xlu1 %17803, %v9432_v3   ;;  %v10305_v3 = vld [vmem:[%s19345_s19] sm:$0xff] }
0x2cae   :  { %9461 = vperm.xlu0 %17802, %v9431_v4   ;;  %v10307_v4 = vld [vmem:[%s19345_s19 + $0x10] sm:$0xff] }
0x2cb2   :  { %9517 = vperm.xlu0 %17802, %v9487_v2   ;;  %v10362_v2 = vld [vmem:[%s19351_s23 + $0x8] sm:$0xff] }
0x2cb6   :  { %9471 = vperm.xlu0 %17802, %v9433_v11   ;;  %v10363_v11 = vld [vmem:[%s19351_s23 + $0x10] sm:$0xff] }
0x2d14   :  { %v9327_v20 = vpop.xlane.xlu0 %9326 }
0x2d15   :  { %v9347_v29 = vmul.f32 0.125, %v9327_v20  ;;  %v9324_v38 = vpop.xlane.xlu1 %9323  ;;  %v10308_v20 = vld [vmem:[%s19345_s19 + $0x18] sm:$0xff] }
0x2d16   :  { %v9346_v18 = vmul.f32 0.125, %v9324_v38 }
0x2d17   :  { %v19295_v40 = vsub.f32 %v19241_v14, %v9347_v29 }
0x2d18   :  { %v19298_v19 = vsub.f32 %v19243_v13, %v9346_v18 }
0x2d19   :  { %v9333_v22 = vpop.xlane.xlu1 %9332  ;;  %v9330_v21 = vpop.xlane.xlu0 %9329  ;;  %v9363_v39 = vmul.f32 %v19295_v40, %v19295_v40 }
0x2d1a   :  { %v9349_v24 = vmul.f32 0.125, %v9333_v22  ;;  %v9348_v32 = vmul.f32 0.125, %v9330_v21  ;;  %v9362_v23 = vmul.f32 %v19298_v19, %v19298_v19 }
0x2d1b   :  { %v9373_v41 = vsel %vm8213_vm5, %v9363_v39, 0.0 }
0x2d1c   :  { %v19306_v42 = vsub.f32 %v19249_v7, %v9349_v24  ;;  %v19309_v27 = vsub.f32 %v19251_v50, %v9348_v32  ;;  %9374 = vadd.xlane.f32.xlu1 %v9373_v41  ;;  %v9370_v47 = vsel %vm8213_vm5, %v9362_v23, 0.0 }
0x2d1d   :  { %v9339_v43 = vpop.xlane.xlu1 %9338  ;;  %9371 = vadd.xlane.f32.xlu0 %v9370_v47  ;;  %v9336_v26 = vpop.xlane.xlu0 %9335 }
0x2d1e   :  { %v9351_v48 = vmul.f32 0.125, %v9339_v43  ;;  %v9350_v5 = vmul.f32 0.125, %v9336_v26  ;;  %v9365_v51 = vmul.f32 %v19306_v42, %v19306_v42  ;;  %v9364_v44 = vmul.f32 %v19309_v27, %v19309_v27 }
0x2d20   :  { %v19317_v54 = vsub.f32 %v19257_v55, %v9351_v48  ;;  %v19320_v16 = vsub.f32 %v19259_v10, %v9350_v5  ;;  %v9379_v45 = vsel %vm8213_vm5, %v9365_v51, 0.0  ;;  %v9376_v31 = vsel %vm8213_vm5, %v9364_v44, 0.0 }
0x2d21   :  { %v9345_v33 = vpop.xlane.xlu1 %9344  ;;  %9380 = vadd.xlane.f32.xlu1 %v9379_v45  ;;  %9377 = vadd.xlane.f32.xlu0 %v9376_v31  ;;  %v9342_v46 = vpop.xlane.xlu0 %9341 }
0x2d22   :  { %v9353_v59 = vmul.f32 0.125, %v9345_v33  ;;  %v9352_v30 = vmul.f32 0.125, %v9342_v46  ;;  %v9367_v36 = vmul.f32 %v19317_v54, %v19317_v54  ;;  %v9366_v49 = vmul.f32 %v19320_v16, %v19320_v16 }
0x2d24   :  { %v19329_v34 = vsub.f32 %v19265_v61, %v9353_v59  ;;  %v19332_v9 = vsub.f32 %v19267_v57, %v9352_v30  ;;  %v9385_v35 = vsel %vm8213_vm5, %v9367_v36, 0.0  ;;  %v9382_v52 = vsel %vm8213_vm5, %v9366_v49, 0.0 }
0x2d25   :  { %9386 = vadd.xlane.f32.xlu1 %v9385_v35  ;;  %9383 = vadd.xlane.f32.xlu0 %v9382_v52  ;;  %v19361_v38 = vpop.permute.xlu1 %9456 }
0x2d26   :  { %v9369_v53 = vmul.f32 %v19329_v34, %v19329_v34  ;;  %v9368_v56 = vmul.f32 %v19332_v9, %v19332_v9 }
0x2d28   :  { %v9391_v25 = vsel %vm8213_vm5, %v9369_v53, 0.0  ;;  %v9388_v58 = vsel %vm8213_vm5, %v9368_v56, 0.0 }
0x2d29   :  { %9392 = vadd.xlane.f32.xlu1 %v9391_v25  ;;  %9389 = vadd.xlane.f32.xlu0 %v9388_v58  ;;  %v9508_v29 = vpop.permute.xlu0 %9507  ;;  %v19365_v22 = vpop.permute.xlu1 %9512 }
0x2d2d   :  { %v19363_v18 = vpop.permute.xlu0 %9461  ;;  %v19369_v39 = vpop.permute.xlu1 %9466 }
0x2d31   :  { %v19367_v21 = vpop.permute.xlu0 %9517 }
0x2d35   :  { %v19371_v24 = vpop.permute.xlu0 %9471 }
0x2d3a   :  { %9522 = vperm.xlu1 %17803, %v9488_v60  }
0x2d3e   :  { %10320 = vperm.xlu1 %17803, %v10306_v62  }
0x2d3f   :  { %9527 = vperm.xlu0 %17802, %v9489_v63  }
0x2d42   :  { %10371 = vperm.xlu1 %17803, %v10361_v0  }
0x2d43   :  { %10315 = vperm.xlu0 %17802, %v10305_v3  }
0x2d46   :  { %10325 = vperm.xlu1 %17803, %v10307_v4  }
0x2d47   :  { %10376 = vperm.xlu0 %17802, %v10362_v2  }
0x2d4a   :  { %10381 = vperm.xlu1 %17803, %v10363_v11  }
0x2d4b   :  { %10330 = vperm.xlu0 %17802, %v10308_v20  }
0x2da9   :  { %v9375_v32 = vpop.xlane.xlu1 %9374 }
0x2daa   :  { %v9395_v23 = vmul.f32 0.125, %v9375_v32  ;;  %v9372_v41 = vpop.xlane.xlu0 %9371 }
0x2dab   :  { %v9394_v47 = vmul.f32 0.125, %v9372_v41 }
0x2dac   :  { %v9403_v43 = vadd.f32 1e-05, %v9395_v23 }
0x2dad   :  { %v9402_v26 = vadd.f32 1e-05, %v9394_v47 }
0x2dae   :  { %17896 = vrsqrt.f32 %v9403_v43  ;;  %v9381_v48 = vpop.xlane.xlu1 %9380  ;;  %v9378_v5 = vpop.xlane.xlu0 %9377 }
0x2daf   :  { %17898 = vrsqrt.f32 %v9402_v26  ;;  %v9397_v51 = vmul.f32 0.125, %v9381_v48  ;;  %v9396_v44 = vmul.f32 0.125, %v9378_v5 }
0x2db1   :  { %v9405_v45 = vadd.f32 1e-05, %v9397_v51  ;;  %v9404_v31 = vadd.f32 1e-05, %v9396_v44 }
0x2db2   :  { %v9387_v33 = vpop.xlane.xlu1 %9386  ;;  %v9384_v46 = vpop.xlane.xlu0 %9383 }
0x2db3   :  { %17900 = vrsqrt.f32 %v9405_v45  ;;  %v9399_v59 = vmul.f32 0.125, %v9387_v33  ;;  %v9398_v30 = vmul.f32 0.125, %v9384_v46 }
0x2db4   :  { %17902 = vrsqrt.f32 %v9404_v31 }
0x2db5   :  { %v9407_v36 = vadd.f32 1e-05, %v9399_v59  ;;  %v9406_v49 = vadd.f32 1e-05, %v9398_v30  ;;  %v14281_v59 = vld [vmem:[%s19414_s27 + $0x40] sm:$0xff]  ;;  %v14282_v30 = vld [vmem:[%s19414_s27 + $0x48] sm:$0xff] }
0x2db6   :  { %v9393_v35 = vpop.xlane.xlu1 %9392  ;;  %v9390_v52 = vpop.xlane.xlu0 %9389 }
0x2db7   :  { %17904 = vrsqrt.f32 %v9407_v36  ;;  %v9401_v53 = vmul.f32 0.125, %v9393_v35  ;;  %v9400_v56 = vmul.f32 0.125, %v9390_v52  ;;  %v14283_v36 = vld [vmem:[%s19414_s27 + $0x50] sm:$0xff]  ;;  %v14285_v35 = vld [vmem:[%s19414_s27 + $0x60] sm:$0xff]  ;;  %v14286_v52 = vld [vmem:[%s19414_s27 + $0x68] sm:$0xff] }
0x2db8   :  { %v17897_v25 = vpop.eup %17896  ;;  %17906 = vrsqrt.f32 %v9406_v49  ;;  %v14284_v49 = vld [vmem:[%s19414_s27 + $0x58] sm:$0xff] }
0x2db9   :  { %v17899_v58 = vpop.eup %17898  ;;  %v9419_v60 = vmul.f32 %v17897_v25, %v19295_v40  ;;  %v9409_v62 = vadd.f32 1e-05, %v9401_v53  ;;  %v9408_v63 = vadd.f32 1e-05, %v9400_v56  ;;  %v14287_v53 = vld [vmem:[%s19414_s27 + $0x70] sm:$0xff]  ;;  %v14288_v56 = vld [vmem:[%s19414_s27 + $0x78] sm:$0xff] }
0x2dba   :  { %v9418_v0 = vmul.f32 %v17899_v58, %v19298_v19  ;;  %v9675_v25 = vld [vmem:[%s19414_s27] sm:$0xff] }
0x2dbb   :  { %v9475_v3 = vmul.f32 %v19280_v12, %v9419_v60  ;;  %17908 = vrsqrt.f32 %v9409_v62 }
0x2dbc   :  { %17910 = vrsqrt.f32 %v9408_v63  ;;  %v9474_v4 = vmul.f32 %v19282_v8, %v9418_v0 }
0x2dbd   :  { %v17901_v2 = vpop.eup %17900  ;;  %v9531_v11 = vadd.f32 %v19286_v17, %v9475_v3 }
0x2dbe   :  { %v17903_v20 = vpop.eup %17902  ;;  %v9530_v32 = vadd.f32 %v19284_v15, %v9474_v4  ;;  %v9421_v23 = vmul.f32 %v17901_v2, %v19306_v42  ;;  %v9528_v45 = vpop.permute.xlu0 %9527 }
0x2dbf   :  { %v9539_v41 = vmax.f32 %v9531_v11, 0.0  ;;  %v9420_v40 = vmul.f32 %v17903_v20, %v19309_v27 }
0x2dc0   :  { %v9538_v47 = vmax.f32 %v9530_v32, 0.0  ;;  %v9477_v19 = vmul.f32 %v19290_v37, %v9421_v23 }
0x2dc1   :  { %v17905_v43 = vpop.eup %17904  ;;  %v9476_v12 = vmul.f32 %v19288_v1, %v9420_v40 }
0x2dc2   :  { %v17907_v26 = vpop.eup %17906  ;;  %16313 = vmatprep.mubr.msk.f32.mxu0 %vm8213_vm5, %v9538_v47  ;;  %16383 = vmatprep.mubr.msk.f32.mxu1 %vm8213_vm5, %v9538_v47  ;;  %v17325_v8 = vpack.c.bf16 %v9539_v41, %v9538_v47  ;;  %v9533_v17 = vadd.f32 %v9508_v29, %v9477_v19  ;;  %v9423_v15 = vmul.f32 %v17905_v43, %v19317_v54 }
0x2dc3   :  { %16314 = vmatmul.mubr.msk.f32.vlgmr.msra.gmra.mrb[76].mxu0 %vm8213_vm5, %v9539_v41  ;;  %16384 = vmatmul.mubr.msk.f32.vlgmr.msra.gmra.mrb[88].mxu1 %vm8213_vm5, %v9539_v41  ;;  %v9532_v42 = vadd.f32 %v19292_v28, %v9476_v12  ;;  %v9422_v37 = vmul.f32 %v17907_v26, %v19320_v16 }
0x2dc4   :  { %17326 = vmatprep.subr.bf16.mxu0 %v17325_v8  ;;  %v9541_v27 = vmax.f32 %v9533_v17, 0.0  ;;  %v9479_v1 = vmul.f32 %v19363_v18, %v9423_v15  ;;  %16424 = vmatpush3.msra.mxu1 %v19095_v6 }
0x2dc5   :  { %v17909_v48 = vpop.eup %17908  ;;  %17328 = vmatpush3.bf16.msra.mxu0 %v17325_v8  ;;  %v9540_v5 = vmax.f32 %v9532_v42, 0.0  ;;  %v9478_v29 = vmul.f32 %v19361_v38, %v9422_v37 }
0x2dc6   :  { %v17911_v54 = vpop.eup %17910  ;;  %v9425_v51 = vmul.f32 %v17909_v48, %v19329_v34  ;;  %v9535_v44 = vadd.f32 %v19367_v21, %v9479_v1  ;;  %v9677_v1 = vld [vmem:[%s19414_s27 + $0x10] sm:$0xff]  ;;  %v9678_v48 = vld [vmem:[%s19414_s27 + $0x18] sm:$0xff] }
0x2dc7   :  { %v9424_v28 = vmul.f32 %v17911_v54, %v19332_v9  ;;  %16316 = vmatprep.mubr.msk.f32.mxu0 %vm8213_vm5, %v9540_v5  ;;  %16386 = vmatprep.mubr.msk.f32.mxu1 %vm8213_vm5, %v9540_v5  ;;  %v17329_v16 = vpack.c.bf16 %v9541_v27, %v9540_v5  ;;  %v9534_v18 = vadd.f32 %v19365_v22, %v9478_v29  ;;  %v9523_v9 = vpop.permute.xlu1 %9522  ;;  %v9679_v5 = vld [vmem:[%s19414_s27 + $0x20] sm:$0xff]  ;;  %v9680_v29 = vld [vmem:[%s19414_s27 + $0x28] sm:$0xff]  ;;  %v9681_v54 = vld [vmem:[%s19414_s27 + $0x30] sm:$0xff] }
0x2dc8   :  { %v9481_v6 = vmul.f32 %v19371_v24, %v9425_v51  ;;  %16317 = vmatmul.mubr.msk.f32.gmra.mrb[78].mxu0 %vm8213_vm5, %v9541_v27  ;;  %16387 = vmatmul.mubr.msk.f32.gmra.mrb[90].mxu1 %vm8213_vm5, %v9541_v27  ;;  %v9543_v38 = vmax.f32 %v9535_v44, 0.0  ;;  %v9676_v27 = vld [vmem:[%s19414_s27 + $0x8] sm:$0xff]  ;;  %v9682_v51 = vld [vmem:[%s19414_s27 + $0x38] sm:$0xff]  ;;  %v14313_v44 = vld [vmem:[%s19414_s27 + $0x80] sm:$0xff] }
0x2dc9   :  { %v9480_v34 = vmul.f32 %v19369_v39, %v9424_v28  ;;  %17330 = vmatprep.subr.bf16.mxu0 %v17329_v16  ;;  %v9542_v21 = vmax.f32 %v9534_v18, 0.0  ;;  %v14314_v28 = vld [vmem:[%s19414_s27 + $0x88] sm:$0xff]  ;;  %v19453_v18 = vld [vmem:[%s19089_s3 + $0x10] sm:$0xff] }
0x2dca   :  { %v9537_v31 = vadd.f32 %v9528_v45, %v9481_v6  ;;  %17332 = vmatpush3.bf16.msra.mxu0 %v17329_v16  ;;  %v14315_v16 = vld [vmem:[%s19414_s27 + $0x90] sm:$0xff]  ;;  %v14316_v6 = vld [vmem:[%s19414_s27 + $0x98] sm:$0xff]  ;;  %v14318_v45 = vld [vmem:[%s19414_s27 + $0xa8] sm:$0xff] }
0x2dcb   :  { %v9536_v33 = vadd.f32 %v9523_v9, %v9480_v34  ;;  %16319 = vmatprep.mubr.msk.f32.mxu0 %vm8213_vm5, %v9542_v21  ;;  %16389 = vmatprep.mubr.msk.f32.mxu1 %vm8213_vm5, %v9542_v21  ;;  %v17333_v22 = vpack.c.bf16 %v9543_v38, %v9542_v21  ;;  %v19462_v34 = vld [vmem:[%s19089_s3] sm:$0xff]  ;;  %v14319_v21 = vld [vmem:[%s19414_s27 + $0xb0] sm:$0xff]  ;;  %v14320_v9 = vld [vmem:[%s19414_s27 + $0xb8] sm:$0xff] }
0x2dcc   :  { %v9545_v24 = vmax.f32 %v9537_v31, 0.0  ;;  %16320 = vmatmul.mubr.msk.f32.gmra.mrb[80].mxu0 %vm8213_vm5, %v9543_v38  ;;  %16390 = vmatmul.mubr.msk.f32.gmra.mrb[92].mxu1 %vm8213_vm5, %v9543_v38  ;;  %v14317_v38 = vld [vmem:[%s19414_s27 + $0xa0] sm:$0xff] }
0x2dcd   :  { %v9544_v46 = vmax.f32 %v9536_v33, 0.0  ;;  %17334 = vmatprep.subr.bf16.mxu0 %v17333_v22 }
0x2dce   :  { %17336 = vmatpush3.bf16.msra.mxu0 %v17333_v22 }
0x2dcf   :  { %16322 = vmatprep.mubr.msk.f32.mxu0 %vm8213_vm5, %v9544_v46  ;;  %16392 = vmatprep.mubr.msk.f32.mxu1 %vm8213_vm5, %v9544_v46  ;;  %v17337_v39 = vpack.c.bf16 %v9545_v24, %v9544_v46 }
0x2dd0   :  { %16323 = vmatmul.mubr.msk.f32.gmra.mrb[82].mxu0 %vm8213_vm5, %v9545_v24  ;;  %16393 = vmatmul.mubr.msk.f32.gmra.mrb[94].mxu1 %vm8213_vm5, %v9545_v24 }
0x2dd1   :  { %17338 = vmatprep.subr.bf16.mxu0 %v17337_v39  ;;  %16341 = vmatprep.mubr.msk.f32.mxu0 %vm8586_vm6, %v14281_v59 }
0x2dd2   :  { %17340 = vmatpush3.bf16.msra.mxu0 %v17337_v39 }
0x2dd5   :  { %16342 = vmatmul.mubr.msk.f32.vlgmr.msra.gmra.mrb[84].mxu0 %vm8586_vm6, %v14282_v30 }
0x2dd6   :  { %16344 = vmatprep.mubr.msk.f32.mxu0 %vm8586_vm6, %v14283_v36 }
0x2dd9   :  { %16345 = vmatmul.mubr.msk.f32.gmra.mrb[86].mxu0 %vm8586_vm6, %v14284_v49 }
0x2dda   :  { %16347 = vmatprep.mubr.msk.f32.mxu0 %vm8586_vm6, %v14285_v35 }
0x2ddd   :  { %16348 = vmatmul.mubr.msk.f32.gmra.mrb[88].mxu0 %vm8586_vm6, %v14286_v52 }
0x2dde   :  { %16350 = vmatprep.mubr.msk.f32.mxu0 %vm8586_vm6, %v14287_v53 }
0x2de1   :  { %16351 = vmatmul.mubr.msk.f32.gmra.mrb[90].mxu0 %vm8586_vm6, %v14288_v56 }
0x2de2   :  { %16369 = vmatprep.mubr.msk.f32.mxu0 %vm8586_vm6, %v9675_v25 }
0x2e96   :  { %v16315_v58 = vpop.f32.mrb[76].mxu0  ;;  %v16385_v60 = vpop.f32.mrb[88].mxu1 }
0x2e97   :  { %v9636_v62 = vpop.f32.mrb[77].mxu0  ;;  %v10016_v63 = vpop.f32.mrb[89].mxu1 }
0x2e98   :  { %v17341_v0 = vpack.c.bf16 %v16315_v58, %v9636_v62  ;;  %v17357_v3 = vpack.c.bf16 %v16385_v60, %v10016_v63  ;;  %v10309_v60 = vld [vmem:[%s19345_s19 + $0x20] sm:$0xff]  ;;  %v10364_v63 = vld [vmem:[%s19351_s23 + $0x18] sm:$0xff] }
0x2e99   :  { %v10365_v62 = vld [vmem:[%s19351_s23 + $0x20] sm:$0xff] }
0x2e9a   :  { %17342 = vmatprep.subr.bf16.mxu0 %v17341_v0 }
0x2e9b   :  { %v16318_v4 = vpop.f32.mrb[78].mxu0  ;;  %v16388_v2 = vpop.f32.mrb[90].mxu1  ;;  %17344 = vmatpush3.bf16.msra.mxu0 %v17341_v0  ;;  %v10311_v0 = vld [vmem:[%s19345_s19 + $0x30] sm:$0xff] }
0x2e9c   :  { %v9646_v11 = vpop.f32.mrb[79].mxu0  ;;  %v10026_v20 = vpop.f32.mrb[91].mxu1 }
0x2e9d   :  { %v17345_v32 = vpack.c.bf16 %v16318_v4, %v9646_v11  ;;  %v17361_v23 = vpack.c.bf16 %v16388_v2, %v10026_v20  ;;  %v10366_v4 = vld [vmem:[%s19351_s23 + $0x28] sm:$0xff]  ;;  %v10312_v2 = vld [vmem:[%s19345_s19 + $0x38] sm:$0xff]  ;;  %v19494_v11 = vpop.permute.xlu1 %10320  ;;  %v19496_v20 = vpop.permute.xlu0 %10315 }
0x2e9f   :  { %v16321_v41 = vpop.f32.mrb[80].mxu0  ;;  %17346 = vmatprep.subr.bf16.mxu0 %v17345_v32  ;;  %v16391_v40 = vpop.f32.mrb[92].mxu1 }
0x2ea0   :  { %v9656_v47 = vpop.f32.mrb[81].mxu0  ;;  %17348 = vmatpush3.bf16.msra.mxu0 %v17345_v32  ;;  %v10036_v19 = vpop.f32.mrb[93].mxu1 }
0x2ea1   :  { %v17349_v43 = vpack.c.bf16 %v16321_v41, %v9656_v47  ;;  %v17365_v12 = vpack.c.bf16 %v16391_v40, %v10036_v19  ;;  %v19498_v32 = vpop.permute.xlu1 %10371 }
0x2ea3   :  { %v16324_v26 = vpop.f32.mrb[82].mxu0  ;;  %17350 = vmatprep.subr.bf16.mxu0 %v17349_v43  ;;  %v16394_v8 = vpop.f32.mrb[94].mxu1 }
0x2ea4   :  { %v9666_v17 = vpop.f32.mrb[83].mxu0  ;;  %17352 = vmatpush3.bf16.msra.mxu0 %v17349_v43  ;;  %v10046_v15 = vpop.f32.mrb[95].mxu1 }
0x2ea5   :  { %v17353_v42 = vpack.c.bf16 %v16324_v26, %v9666_v17  ;;  %v17369_v37 = vpack.c.bf16 %v16394_v8, %v10046_v15  ;;  %v19502_v41 = vpop.permute.xlu1 %10325 }
0x2ea7   :  { %17354 = vmatprep.subr.bf16.mxu0 %v17353_v42 }
0x2ea8   :  { %17356 = vmatpush3.bf16.msra.mxu0 %v17353_v42 }
0x2ea9   :  { %17358 = vmatprep.subr.bf16.mxu0 %v17357_v3  ;;  %v19506_v47 = vpop.permute.xlu1 %10381 }
0x2eab   :  { %16370 = vmatmul.mubr.msk.f32.vlgmr.msra.gmra.mrb[84].mxu0 %vm8586_vm6, %v9676_v27 }
0x2eac   :  { %17360 = vmatpush3.bf16.msra.mxu0 %v17357_v3  ;;  %16372 = vmatprep.mubr.msk.f32.mxu0 %vm8586_vm6, %v9677_v1  ;;  %v10310_v3 = vld [vmem:[%s19345_s19 + $0x28] sm:$0xff]  ;;  %s18047_s19 = smov 63  }
0x2ead   :  { %17362 = vmatprep.subr.bf16.mxu0 %v17361_v23  ;;  %s19856_s22 = sld [smem:[%s20441_s0 + %s18047_s19]]  }
0x2eaf   :  { %16373 = vmatmul.mubr.msk.f32.gmra.mrb[86].mxu0 %vm8586_vm6, %v9678_v48 }
0x2eb0   :  { %17364 = vmatpush3.bf16.msra.mxu0 %v17361_v23  ;;  %16375 = vmatprep.mubr.msk.f32.mxu0 %vm8586_vm6, %v9679_v5  ;;  %v19500_v23 = vpop.permute.xlu0 %10376 }
0x2eb1   :  { %17366 = vmatprep.subr.bf16.mxu0 %v17365_v12 }
0x2eb3   :  { %16376 = vmatmul.mubr.msk.f32.gmra.mrb[88].mxu0 %vm8586_vm6, %v9680_v29 }
0x2eb4   :  { %17368 = vmatpush3.bf16.msra.mxu0 %v17365_v12  ;;  %16378 = vmatprep.mubr.msk.f32.mxu0 %vm8586_vm6, %v9681_v54  ;;  %v19504_v40 = vpop.permute.xlu0 %10330 }
0x2eb5   :  { %17370 = vmatprep.subr.bf16.mxu0 %v17369_v37 }
0x2eb7   :  { %16379 = vmatmul.mubr.msk.f32.gmra.mrb[90].mxu0 %vm8586_vm6, %v9682_v51 }
0x2eb8   :  { %17372 = vmatpush3.bf16.msra.mxu0 %v17369_v37  ;;  %16411 = vmatprep.mubr.msk.f32.mxu0 %vm8586_vm6, %v14313_v44 }
0x2eb9   :  { %16493 = vmatprep.subr.mxu0 %v19453_v18 }
0x2ebb   :  { %16412 = vmatmul.mubr.msk.f32.vlgmr.msra.gmra.mrb[84].mxu0 %vm8586_vm6, %v14314_v28 }
0x2ebc   :  { %16414 = vmatprep.mubr.msk.f32.mxu0 %vm8586_vm6, %v14315_v16  ;;  %16494 = vmatpush3.msra.mxu0 %v19453_v18 }
0x2ebd   :  { %16535 = vmatprep.subr.mxu0 %v19462_v34 }
0x2ebf   :  { %16415 = vmatmul.mubr.msk.f32.gmra.mrb[86].mxu0 %vm8586_vm6, %v14316_v6 }
0x2ec0   :  { %16417 = vmatprep.mubr.msk.f32.mxu0 %vm8586_vm6, %v14317_v38 }
0x2ec3   :  { %16418 = vmatmul.mubr.msk.f32.gmra.mrb[88].mxu0 %vm8586_vm6, %v14318_v45 }
0x2ec4   :  { %16420 = vmatprep.mubr.msk.f32.mxu0 %vm8586_vm6, %v14319_v21 }
0x2ec7   :  { %16421 = vmatmul.mubr.msk.f32.gmra.mrb[90].mxu0 %vm8586_vm6, %v14320_v9 }
0x2f8e   :  { %v16413_v31 = vpop.f32.mrb[84].mxu0 }
0x2f8f   :  { %v10154_v33 = vpop.f32.mrb[85].mxu0  ;;  %v10204_v22 = vsel %vm8213_vm5, %v16413_v31, 0.0 }
0x2f90   :  { %10205 = vadd.xlane.f32.xlu0 %v10204_v22  ;;  %v10201_v24 = vsel %vm8213_vm5, %v10154_v33, 0.0 }
0x2f91   :  { %10202 = vadd.xlane.f32.xlu1 %v10201_v24 }
0x2f92   :  { %v16416_v46 = vpop.f32.mrb[86].mxu0 }
0x2f93   :  { %v10164_v39 = vpop.f32.mrb[87].mxu0  ;;  %v10210_v59 = vsel %vm8213_vm5, %v16416_v46, 0.0 }
0x2f94   :  { %v10207_v30 = vsel %vm8213_vm5, %v10164_v39, 0.0 }
0x2f95   :  { %10211 = vadd.xlane.f32.xlu1 %v10210_v59  ;;  %10208 = vadd.xlane.f32.xlu0 %v10207_v30 }
0x2f96   :  { %v16419_v36 = vpop.f32.mrb[88].mxu0 }
0x2f97   :  { %v10174_v49 = vpop.f32.mrb[89].mxu0  ;;  %v10216_v35 = vsel %vm8213_vm5, %v16419_v36, 0.0 }
0x2f98   :  { %v10213_v52 = vsel %vm8213_vm5, %v10174_v49, 0.0 }
0x2f99   :  { %10217 = vadd.xlane.f32.xlu1 %v10216_v35  ;;  %10214 = vadd.xlane.f32.xlu0 %v10213_v52 }
0x2f9a   :  { %v19479_v53 = vpop.f32.mrb[90].mxu0 }
0x2f9b   :  { %v19481_v56 = vpop.f32.mrb[91].mxu0  ;;  %v10222_v25 = vsel %vm8213_vm5, %v19479_v53, 0.0 }
0x2f9c   :  { %v10219_v58 = vsel %vm8213_vm5, %v19481_v56, 0.0 }
0x2f9d   :  { %10223 = vadd.xlane.f32.xlu1 %v10222_v25  ;;  %10220 = vadd.xlane.f32.xlu0 %v10219_v58 }
0x2fae   :  { %10335 = vperm.xlu1 %17803, %v10309_v60  }
0x2fb2   :  { %10391 = vperm.xlu1 %17803, %v10365_v62   ;;  %v11193_v62 = vld [vmem:[%s19553_s1 + $0x8] sm:$0xff] }
0x2fb3   :  { %10386 = vperm.xlu0 %17802, %v10364_v63   ;;  %v10368_v63 = vld [vmem:[%s19351_s23 + $0x38] sm:$0xff] }
0x2fb6   :  { %10345 = vperm.xlu1 %17803, %v10311_v0   ;;  %v11248_v0 = vld [vmem:[%s19559_s6] sm:$0xff] }
0x2fb7   :  { %10340 = vperm.xlu0 %17802, %v10310_v3   ;;  %v11192_v3 = vld [vmem:[%s19553_s1] sm:$0xff] }
0x2fbb   :  { %10396 = vperm.xlu0 %17802, %v10366_v4   ;;  %v11194_v4 = vld [vmem:[%s19553_s1 + $0x10] sm:$0xff] }
0x2fbf   :  { %10350 = vperm.xlu0 %17802, %v10312_v2   ;;  %v11249_v2 = vld [vmem:[%s19559_s6 + $0x8] sm:$0xff] }
0x301d   :  { %v10206_v19 = vpop.xlane.xlu0 %10205 }
0x301e   :  { %v10226_v43 = vmul.f32 0.125, %v10206_v19  ;;  %v10203_v12 = vpop.xlane.xlu1 %10202  ;;  %v11250_v19 = vld [vmem:[%s19559_s6 + $0x10] sm:$0xff] }
0x301f   :  { %v10225_v26 = vmul.f32 0.125, %v10203_v12 }
0x3020   :  { %v19508_v8 = vsub.f32 %v16413_v31, %v10226_v43  ;;  %v11195_v43 = vld [vmem:[%s19553_s1 + $0x18] sm:$0xff] }
0x3021   :  { %v19510_v17 = vsub.f32 %v10154_v33, %v10225_v26 }
0x3022   :  { %v10212_v15 = vpop.xlane.xlu1 %10211  ;;  %v10209_v42 = vpop.xlane.xlu0 %10208  ;;  %v10242_v37 = vmul.f32 %v19508_v8, %v19508_v8 }
0x3023   :  { %v10228_v27 = vmul.f32 0.125, %v10212_v15  ;;  %v10227_v1 = vmul.f32 0.125, %v10209_v42  ;;  %v10241_v48 = vmul.f32 %v19510_v17, %v19510_v17 }
0x3024   :  { %v10252_v5 = vsel %vm8213_vm5, %v10242_v37, 0.0 }
0x3025   :  { %v19517_v29 = vsub.f32 %v16416_v46, %v10228_v27  ;;  %v19519_v54 = vsub.f32 %v10164_v39, %v10227_v1  ;;  %10253 = vadd.xlane.f32.xlu1 %v10252_v5  ;;  %v10249_v51 = vsel %vm8213_vm5, %v10241_v48, 0.0 }
0x3026   :  { %v10218_v44 = vpop.xlane.xlu1 %10217  ;;  %10250 = vadd.xlane.f32.xlu0 %v10249_v51  ;;  %v10215_v28 = vpop.xlane.xlu0 %10214 }
0x3027   :  { %v10230_v16 = vmul.f32 0.125, %v10218_v44  ;;  %v10229_v6 = vmul.f32 0.125, %v10215_v28  ;;  %v10244_v38 = vmul.f32 %v19517_v29, %v19517_v29  ;;  %v10243_v45 = vmul.f32 %v19519_v54, %v19519_v54 }
0x3029   :  { %v19526_v21 = vsub.f32 %v16419_v36, %v10230_v16  ;;  %v19528_v9 = vsub.f32 %v10174_v49, %v10229_v6  ;;  %v10258_v31 = vsel %vm8213_vm5, %v10244_v38, 0.0  ;;  %v10255_v33 = vsel %vm8213_vm5, %v10243_v45, 0.0 }
0x302a   :  { %v10224_v22 = vpop.xlane.xlu1 %10223  ;;  %10259 = vadd.xlane.f32.xlu1 %v10258_v31  ;;  %10256 = vadd.xlane.f32.xlu0 %v10255_v33  ;;  %v10221_v24 = vpop.xlane.xlu0 %10220 }
0x302b   :  { %v10232_v46 = vmul.f32 0.125, %v10224_v22  ;;  %v10231_v39 = vmul.f32 0.125, %v10221_v24  ;;  %v10246_v59 = vmul.f32 %v19526_v21, %v19526_v21  ;;  %v10245_v30 = vmul.f32 %v19528_v9, %v19528_v9 }
0x302d   :  { %v19537_v36 = vsub.f32 %v19479_v53, %v10232_v46  ;;  %v19540_v49 = vsub.f32 %v19481_v56, %v10231_v39  ;;  %v10264_v35 = vsel %vm8213_vm5, %v10246_v59, 0.0  ;;  %v10261_v52 = vsel %vm8213_vm5, %v10245_v30, 0.0  ;;  %v10367_v56 = vld [vmem:[%s19351_s23 + $0x30] sm:$0xff] }
0x302e   :  { %10265 = vadd.xlane.f32.xlu1 %v10264_v35  ;;  %10262 = vadd.xlane.f32.xlu0 %v10261_v52  ;;  %v19569_v26 = vpop.permute.xlu1 %10335 }
0x302f   :  { %v10248_v25 = vmul.f32 %v19537_v36, %v19537_v36  ;;  %v10247_v58 = vmul.f32 %v19540_v49, %v19540_v49 }
0x3031   :  { %v10270_v60 = vsel %vm8213_vm5, %v10248_v25, 0.0  ;;  %v10267_v53 = vsel %vm8213_vm5, %v10247_v58, 0.0 }
0x3032   :  { %10271 = vadd.xlane.f32.xlu1 %v10270_v60  ;;  %10268 = vadd.xlane.f32.xlu0 %v10267_v53  ;;  %v10387_v12 = vpop.permute.xlu0 %10386  ;;  %v19573_v42 = vpop.permute.xlu1 %10391 }
0x3036   :  { %v19571_v15 = vpop.permute.xlu0 %10340  ;;  %v19577_v27 = vpop.permute.xlu1 %10345 }
0x303a   :  { %v19575_v37 = vpop.permute.xlu0 %10396 }
0x303e   :  { %v19579_v1 = vpop.permute.xlu0 %10350 }
0x3043   :  { %10401 = vperm.xlu1 %17803, %v10367_v56  }
0x3047   :  { %11207 = vperm.xlu1 %17803, %v11193_v62  }
0x3048   :  { %10406 = vperm.xlu0 %17802, %v10368_v63  }
0x304b   :  { %11258 = vperm.xlu1 %17803, %v11248_v0  }
0x304c   :  { %11202 = vperm.xlu0 %17802, %v11192_v3  }
0x304f   :  { %11212 = vperm.xlu1 %17803, %v11194_v4  }
0x3050   :  { %11263 = vperm.xlu0 %17802, %v11249_v2  }
0x3053   :  { %11268 = vperm.xlu1 %17803, %v11250_v19  }
0x3054   :  { %11217 = vperm.xlu0 %17802, %v11195_v43  }
0x30b2   :  { %v10254_v48 = vpop.xlane.xlu1 %10253 }
0x30b3   :  { %v10274_v5 = vmul.f32 0.125, %v10254_v48  ;;  %v10251_v51 = vpop.xlane.xlu0 %10250 }
0x30b4   :  { %v10273_v44 = vmul.f32 0.125, %v10251_v51 }
0x30b5   :  { %v10282_v28 = vadd.f32 1e-05, %v10274_v5 }
0x30b6   :  { %v10281_v16 = vadd.f32 1e-05, %v10273_v44 }
0x30b7   :  { %17912 = vrsqrt.f32 %v10282_v28  ;;  %v10260_v6 = vpop.xlane.xlu1 %10259  ;;  %v10257_v38 = vpop.xlane.xlu0 %10256 }
0x30b8   :  { %17914 = vrsqrt.f32 %v10281_v16  ;;  %v10276_v45 = vmul.f32 0.125, %v10260_v6  ;;  %v10275_v31 = vmul.f32 0.125, %v10257_v38 }
0x30ba   :  { %v10284_v33 = vadd.f32 1e-05, %v10276_v45  ;;  %v10283_v22 = vadd.f32 1e-05, %v10275_v31 }
0x30bb   :  { %v10266_v24 = vpop.xlane.xlu1 %10265  ;;  %v10263_v46 = vpop.xlane.xlu0 %10262 }
0x30bc   :  { %17916 = vrsqrt.f32 %v10284_v33  ;;  %v10278_v39 = vmul.f32 0.125, %v10266_v24  ;;  %v10277_v59 = vmul.f32 0.125, %v10263_v46 }
0x30bd   :  { %17918 = vrsqrt.f32 %v10283_v22 }
0x30be   :  { %v10286_v30 = vadd.f32 1e-05, %v10278_v39  ;;  %v10285_v35 = vadd.f32 1e-05, %v10277_v59 }
0x30bf   :  { %v10272_v52 = vpop.xlane.xlu1 %10271  ;;  %v10269_v25 = vpop.xlane.xlu0 %10268 }
0x30c0   :  { %17920 = vrsqrt.f32 %v10286_v30  ;;  %v10280_v58 = vmul.f32 0.125, %v10272_v52  ;;  %v10279_v60 = vmul.f32 0.125, %v10269_v25  ;;  %v14337_v30 = vld [vmem:[%s19622_s10 + $0x40] sm:$0xff]  ;;  %v14339_v52 = vld [vmem:[%s19622_s10 + $0x50] sm:$0xff]  ;;  %v14340_v25 = vld [vmem:[%s19622_s10 + $0x58] sm:$0xff] }
0x30c1   :  { %v17913_v53 = vpop.eup %17912  ;;  %17922 = vrsqrt.f32 %v10285_v35  ;;  %v14338_v35 = vld [vmem:[%s19622_s10 + $0x48] sm:$0xff] }
0x30c2   :  { %v17915_v56 = vpop.eup %17914  ;;  %v10298_v62 = vmul.f32 %v17913_v53, %v19508_v8  ;;  %v10288_v63 = vadd.f32 1e-05, %v10280_v58  ;;  %v10287_v0 = vadd.f32 1e-05, %v10279_v60  ;;  %v14341_v58 = vld [vmem:[%s19622_s10 + $0x60] sm:$0xff]  ;;  %v14342_v60 = vld [vmem:[%s19622_s10 + $0x68] sm:$0xff] }
0x30c3   :  { %v10297_v3 = vmul.f32 %v17915_v56, %v19510_v17  ;;  %v14343_v53 = vld [vmem:[%s19622_s10 + $0x70] sm:$0xff]  ;;  %v14344_v56 = vld [vmem:[%s19622_s10 + $0x78] sm:$0xff] }
0x30c4   :  { %v10354_v4 = vmul.f32 %v19494_v11, %v10298_v62  ;;  %17924 = vrsqrt.f32 %v10288_v63  ;;  %v10554_v62 = vld [vmem:[%s19622_s10] sm:$0xff] }
0x30c5   :  { %17926 = vrsqrt.f32 %v10287_v0  ;;  %v10353_v2 = vmul.f32 %v19496_v20, %v10297_v3 }
0x30c6   :  { %v17917_v19 = vpop.eup %17916  ;;  %v10410_v43 = vadd.f32 %v19500_v23, %v10354_v4 }
0x30c7   :  { %v17919_v48 = vpop.eup %17918  ;;  %v10409_v5 = vadd.f32 %v19498_v32, %v10353_v2  ;;  %v10300_v51 = vmul.f32 %v17917_v19, %v19517_v29  ;;  %v10407_v24 = vpop.permute.xlu0 %10406 }
0x30c8   :  { %v10418_v44 = vmax.f32 %v10410_v43, 0.0  ;;  %v10299_v8 = vmul.f32 %v17919_v48, %v19519_v54 }
0x30c9   :  { %v10417_v28 = vmax.f32 %v10409_v5, 0.0  ;;  %v10356_v17 = vmul.f32 %v19504_v40, %v10300_v51 }
0x30ca   :  { %v17921_v16 = vpop.eup %17920  ;;  %v10355_v11 = vmul.f32 %v19502_v41, %v10299_v8 }
0x30cb   :  { %v17923_v6 = vpop.eup %17922  ;;  %16425 = vmatprep.mubr.msk.f32.mxu1 %vm8213_vm5, %v10417_v28  ;;  %16495 = vmatprep.mubr.msk.f32.mxu0 %vm8213_vm5, %v10417_v28  ;;  %v17373_v20 = vpack.c.bf16 %v10418_v44, %v10417_v28  ;;  %v10412_v23 = vadd.f32 %v10387_v12, %v10356_v17  ;;  %v10302_v32 = vmul.f32 %v17921_v16, %v19526_v21 }
0x30cc   :  { %16426 = vmatmul.mubr.msk.f32.vlgmr.msra.gmra.mrb[96].mxu1 %vm8213_vm5, %v10418_v44  ;;  %16496 = vmatmul.mubr.msk.f32.vlgmr.msra.gmra.mrb[92].mxu0 %vm8213_vm5, %v10418_v44  ;;  %v10411_v29 = vadd.f32 %v19506_v47, %v10355_v11  ;;  %v10301_v40 = vmul.f32 %v17923_v6, %v19528_v9 }
0x30cd   :  { %17374 = vmatprep.subr.bf16.mxu1 %v17373_v20  ;;  %v10420_v54 = vmax.f32 %v10412_v23, 0.0  ;;  %v10358_v41 = vmul.f32 %v19571_v15, %v10302_v32  ;;  %16536 = vmatpush3.msra.mxu0 %v19462_v34 }
0x30ce   :  { %v17925_v38 = vpop.eup %17924  ;;  %17376 = vmatpush3.bf16.msra.mxu1 %v17373_v20  ;;  %v10419_v45 = vmax.f32 %v10411_v29, 0.0  ;;  %v10357_v12 = vmul.f32 %v19569_v26, %v10301_v40 }
0x30cf   :  { %v17927_v21 = vpop.eup %17926  ;;  %v10304_v31 = vmul.f32 %v17925_v38, %v19537_v36  ;;  %v10414_v33 = vadd.f32 %v19575_v37, %v10358_v41  ;;  %v10555_v38 = vld [vmem:[%s19622_s10 + $0x8] sm:$0xff] }
0x30d0   :  { %v10303_v47 = vmul.f32 %v17927_v21, %v19540_v49  ;;  %16428 = vmatprep.mubr.msk.f32.mxu1 %vm8213_vm5, %v10419_v45  ;;  %16498 = vmatprep.mubr.msk.f32.mxu0 %vm8213_vm5, %v10419_v45  ;;  %v17377_v9 = vpack.c.bf16 %v10420_v54, %v10419_v45  ;;  %v10413_v15 = vadd.f32 %v19573_v42, %v10357_v12  ;;  %v10402_v49 = vpop.permute.xlu1 %10401  ;;  %v10556_v45 = vld [vmem:[%s19622_s10 + $0x10] sm:$0xff]  ;;  %v10557_v12 = vld [vmem:[%s19622_s10 + $0x18] sm:$0xff]  ;;  %v10558_v21 = vld [vmem:[%s19622_s10 + $0x20] sm:$0xff] }
0x30d1   :  { %v10360_v22 = vmul.f32 %v19579_v1, %v10304_v31  ;;  %16429 = vmatmul.mubr.msk.f32.gmra.mrb[98].mxu1 %vm8213_vm5, %v10420_v54  ;;  %16499 = vmatmul.mubr.msk.f32.gmra.mrb[94].mxu0 %vm8213_vm5, %v10420_v54  ;;  %v10422_v26 = vmax.f32 %v10414_v33, 0.0  ;;  %v10559_v31 = vld [vmem:[%s19622_s10 + $0x28] sm:$0xff]  ;;  %v10560_v33 = vld [vmem:[%s19622_s10 + $0x30] sm:$0xff] }
0x30d2   :  { %v10359_v36 = vmul.f32 %v19577_v27, %v10303_v47  ;;  %17378 = vmatprep.subr.bf16.mxu1 %v17377_v9  ;;  %v10421_v37 = vmax.f32 %v10413_v15, 0.0  ;;  %v10561_v47 = vld [vmem:[%s19622_s10 + $0x38] sm:$0xff]  ;;  %v14370_v15 = vld [vmem:[%s19622_s10 + $0x88] sm:$0xff] }
0x30d3   :  { %v10416_v46 = vadd.f32 %v10407_v24, %v10360_v22  ;;  %17380 = vmatpush3.bf16.msra.mxu1 %v17377_v9  ;;  %v14369_v9 = vld [vmem:[%s19622_s10 + $0x80] sm:$0xff]  ;;  %v14371_v22 = vld [vmem:[%s19622_s10 + $0x90] sm:$0xff]  ;;  %v14374_v24 = vld [vmem:[%s19622_s10 + $0xa8] sm:$0xff] }
0x30d4   :  { %v10415_v39 = vadd.f32 %v10402_v49, %v10359_v36  ;;  %16431 = vmatprep.mubr.msk.f32.mxu1 %vm8213_vm5, %v10421_v37  ;;  %16501 = vmatprep.mubr.msk.f32.mxu0 %vm8213_vm5, %v10421_v37  ;;  %v17381_v42 = vpack.c.bf16 %v10422_v26, %v10421_v37  ;;  %v14373_v36 = vld [vmem:[%s19622_s10 + $0xa0] sm:$0xff]  ;;  %v14375_v37 = vld [vmem:[%s19622_s10 + $0xb0] sm:$0xff]  ;;  %v14376_v49 = vld [vmem:[%s19622_s10 + $0xb8] sm:$0xff] }
0x30d5   :  { %v10424_v1 = vmax.f32 %v10416_v46, 0.0  ;;  %16432 = vmatmul.mubr.msk.f32.gmra.mrb[100].mxu1 %vm8213_vm5, %v10422_v26  ;;  %16502 = vmatmul.mubr.msk.f32.gmra.mrb[96].mxu0 %vm8213_vm5, %v10422_v26  ;;  %v14372_v26 = vld [vmem:[%s19622_s10 + $0x98] sm:$0xff] }
0x30d6   :  { %v10423_v59 = vmax.f32 %v10415_v39, 0.0  ;;  %17382 = vmatprep.subr.bf16.mxu1 %v17381_v42 }
0x30d7   :  { %17384 = vmatpush3.bf16.msra.mxu1 %v17381_v42 }
0x30d8   :  { %16434 = vmatprep.mubr.msk.f32.mxu1 %vm8213_vm5, %v10423_v59  ;;  %16504 = vmatprep.mubr.msk.f32.mxu0 %vm8213_vm5, %v10423_v59  ;;  %v17385_v27 = vpack.c.bf16 %v10424_v1, %v10423_v59 }
0x30d9   :  { %16435 = vmatmul.mubr.msk.f32.gmra.mrb[102].mxu1 %vm8213_vm5, %v10424_v1  ;;  %16505 = vmatmul.mubr.msk.f32.gmra.mrb[98].mxu0 %vm8213_vm5, %v10424_v1 }
0x30da   :  { %17386 = vmatprep.subr.bf16.mxu1 %v17385_v27  ;;  %16453 = vmatprep.mubr.msk.f32.mxu1 %vm8586_vm6, %v14337_v30 }
0x30db   :  { %17388 = vmatpush3.bf16.msra.mxu1 %v17385_v27 }
0x30de   :  { %16454 = vmatmul.mubr.msk.f32.vlgmr.msra.gmra.mrb[104].mxu1 %vm8586_vm6, %v14338_v35 }
0x30df   :  { %16456 = vmatprep.mubr.msk.f32.mxu1 %vm8586_vm6, %v14339_v52 }
0x30e2   :  { %16457 = vmatmul.mubr.msk.f32.gmra.mrb[106].mxu1 %vm8586_vm6, %v14340_v25 }
0x30e3   :  { %16459 = vmatprep.mubr.msk.f32.mxu1 %vm8586_vm6, %v14341_v58 }
0x30e6   :  { %16460 = vmatmul.mubr.msk.f32.gmra.mrb[108].mxu1 %vm8586_vm6, %v14342_v60 }
0x30e7   :  { %16462 = vmatprep.mubr.msk.f32.mxu1 %vm8586_vm6, %v14343_v53 }
0x30ea   :  { %16463 = vmatmul.mubr.msk.f32.gmra.mrb[110].mxu1 %vm8586_vm6, %v14344_v56 }
0x30eb   :  { %16481 = vmatprep.mubr.msk.f32.mxu1 %vm8586_vm6, %v10554_v62 }
0x319f   :  { %v16427_v63 = vpop.f32.mrb[96].mxu1  ;;  %v16497_v0 = vpop.f32.mrb[92].mxu0 }
0x31a0   :  { %v10515_v3 = vpop.f32.mrb[97].mxu1  ;;  %v10895_v4 = vpop.f32.mrb[93].mxu0 }
0x31a1   :  { %v17389_v2 = vpack.c.bf16 %v16427_v63, %v10515_v3  ;;  %v17405_v19 = vpack.c.bf16 %v16497_v0, %v10895_v4  ;;  %v11196_v0 = vld [vmem:[%s19553_s1 + $0x20] sm:$0xff]  ;;  %v11251_v3 = vld [vmem:[%s19559_s6 + $0x18] sm:$0xff]  ;;  %v11198_v4 = vld [vmem:[%s19553_s1 + $0x30] sm:$0xff] }
0x31a3   :  { %17390 = vmatprep.subr.bf16.mxu1 %v17389_v2 }
0x31a4   :  { %v16430_v43 = vpop.f32.mrb[98].mxu1  ;;  %v16500_v48 = vpop.f32.mrb[94].mxu0  ;;  %17392 = vmatpush3.bf16.msra.mxu1 %v17389_v2  ;;  %v11197_v2 = vld [vmem:[%s19553_s1 + $0x28] sm:$0xff] }
0x31a5   :  { %v10525_v5 = vpop.f32.mrb[99].mxu1  ;;  %v10905_v51 = vpop.f32.mrb[95].mxu0 }
0x31a6   :  { %v17393_v44 = vpack.c.bf16 %v16430_v43, %v10525_v5  ;;  %v17409_v8 = vpack.c.bf16 %v16500_v48, %v10905_v51  ;;  %v19722_v43 = vpop.permute.xlu1 %11207  ;;  %v19724_v48 = vpop.permute.xlu0 %11202 }
0x31a8   :  { %v16433_v28 = vpop.f32.mrb[100].mxu1  ;;  %17394 = vmatprep.subr.bf16.mxu1 %v17393_v44  ;;  %v16503_v17 = vpop.f32.mrb[96].mxu0 }
0x31a9   :  { %v10535_v16 = vpop.f32.mrb[101].mxu1  ;;  %17396 = vmatpush3.bf16.msra.mxu1 %v17393_v44  ;;  %v10915_v11 = vpop.f32.mrb[97].mxu0 }
0x31aa   :  { %v17397_v6 = vpack.c.bf16 %v16433_v28, %v10535_v16  ;;  %v17413_v20 = vpack.c.bf16 %v16503_v17, %v10915_v11  ;;  %v19726_v5 = vpop.permute.xlu1 %11258  ;;  %v19728_v51 = vpop.permute.xlu0 %11263 }
0x31ac   :  { %v16436_v23 = vpop.f32.mrb[102].mxu1  ;;  %17398 = vmatprep.subr.bf16.mxu1 %v17397_v6  ;;  %v16506_v32 = vpop.f32.mrb[98].mxu0 }
0x31ad   :  { %v10545_v29 = vpop.f32.mrb[103].mxu1  ;;  %17400 = vmatpush3.bf16.msra.mxu1 %v17397_v6  ;;  %v10925_v40 = vpop.f32.mrb[99].mxu0 }
0x31ae   :  { %v17401_v54 = vpack.c.bf16 %v16436_v23, %v10545_v29  ;;  %v17417_v41 = vpack.c.bf16 %v16506_v32, %v10925_v40  ;;  %v19730_v44 = vpop.permute.xlu1 %11212 }
0x31b0   :  { %17402 = vmatprep.subr.bf16.mxu1 %v17401_v54 }
0x31b1   :  { %17404 = vmatpush3.bf16.msra.mxu1 %v17401_v54 }
0x31b2   :  { %17406 = vmatprep.subr.bf16.mxu1 %v17405_v19  ;;  %v19734_v28 = vpop.permute.xlu1 %11268 }
0x31b4   :  { %16482 = vmatmul.mubr.msk.f32.vlgmr.msra.gmra.mrb[104].mxu1 %vm8586_vm6, %v10555_v38 }
0x31b5   :  { %17408 = vmatpush3.bf16.msra.mxu1 %v17405_v19  ;;  %16484 = vmatprep.mubr.msk.f32.mxu1 %vm8586_vm6, %v10556_v45  ;;  %v11199_v19 = vld [vmem:[%s19553_s1 + $0x38] sm:$0xff] }
0x31b6   :  { %17410 = vmatprep.subr.bf16.mxu1 %v17409_v8 }
0x31b8   :  { %16485 = vmatmul.mubr.msk.f32.gmra.mrb[106].mxu1 %vm8586_vm6, %v10557_v12 }
0x31b9   :  { %17412 = vmatpush3.bf16.msra.mxu1 %v17409_v8  ;;  %16487 = vmatprep.mubr.msk.f32.mxu1 %vm8586_vm6, %v10558_v21  ;;  %v19732_v8 = vpop.permute.xlu0 %11217 }
0x31ba   :  { %17414 = vmatprep.subr.bf16.mxu1 %v17413_v20 }
0x31bc   :  { %16488 = vmatmul.mubr.msk.f32.gmra.mrb[108].mxu1 %vm8586_vm6, %v10559_v31 }
0x31bd   :  { %17416 = vmatpush3.bf16.msra.mxu1 %v17413_v20  ;;  %16490 = vmatprep.mubr.msk.f32.mxu1 %vm8586_vm6, %v10560_v33 }
0x31be   :  { %17418 = vmatprep.subr.bf16.mxu1 %v17417_v41 }
0x31c0   :  { %16491 = vmatmul.mubr.msk.f32.gmra.mrb[110].mxu1 %vm8586_vm6, %v10561_v47 }
0x31c1   :  { %17420 = vmatpush3.bf16.msra.mxu1 %v17417_v41  ;;  %16523 = vmatprep.mubr.msk.f32.mxu1 %vm8586_vm6, %v14369_v9 }
0x31c2   :  { %16605 = vmatprep.subr.mxu1 %v19453_v18 }
0x31c4   :  { %16524 = vmatmul.mubr.msk.f32.vlgmr.msra.gmra.mrb[104].mxu1 %vm8586_vm6, %v14370_v15 }
0x31c5   :  { %16526 = vmatprep.mubr.msk.f32.mxu1 %vm8586_vm6, %v14371_v22  ;;  %16606 = vmatpush3.msra.mxu1 %v19453_v18 }
0x31c6   :  { %16647 = vmatprep.subr.mxu1 %v19462_v34 }
0x31c8   :  { %16527 = vmatmul.mubr.msk.f32.gmra.mrb[106].mxu1 %vm8586_vm6, %v14372_v26 }
0x31c9   :  { %16529 = vmatprep.mubr.msk.f32.mxu1 %vm8586_vm6, %v14373_v36 }
0x31cc   :  { %16530 = vmatmul.mubr.msk.f32.gmra.mrb[108].mxu1 %vm8586_vm6, %v14374_v24 }
0x31cd   :  { %16532 = vmatprep.mubr.msk.f32.mxu1 %vm8586_vm6, %v14375_v37 }
0x31d0   :  { %16533 = vmatmul.mubr.msk.f32.gmra.mrb[110].mxu1 %vm8586_vm6, %v14376_v49 }
0x3297   :  { %v16525_v46 = vpop.f32.mrb[104].mxu1 }
0x3298   :  { %v19676_v39 = vadd.f32 %v16525_v46, %v19241_v14  ;;  %v11033_v18 = vpop.f32.mrb[105].mxu1 }
0x3299   :  { %v19679_v34 = vadd.f32 %v11033_v18, %v19243_v13 }
0x329a   :  { %v11091_v42 = vsel %vm8213_vm5, %v19676_v39, 0.0 }
0x329b   :  { %11092 = vadd.xlane.f32.xlu0 %v11091_v42  ;;  %v16528_v1 = vpop.f32.mrb[106].mxu1  ;;  %v11088_v59 = vsel %vm8213_vm5, %v19679_v34, 0.0 }
0x329c   :  { %v19686_v27 = vadd.f32 %v16528_v1, %v19249_v7  ;;  %11089 = vadd.xlane.f32.xlu1 %v11088_v59  ;;  %v11043_v30 = vpop.f32.mrb[107].mxu1 }
0x329d   :  { %v19689_v14 = vadd.f32 %v11043_v30, %v19251_v50 }
0x329e   :  { %v11097_v13 = vsel %vm8213_vm5, %v19686_v27, 0.0 }
0x329f   :  { %v16531_v35 = vpop.f32.mrb[108].mxu1  ;;  %v11094_v52 = vsel %vm8213_vm5, %v19689_v14, 0.0 }
0x32a0   :  { %v19696_v25 = vadd.f32 %v16531_v35, %v19257_v55  ;;  %11098 = vadd.xlane.f32.xlu1 %v11097_v13  ;;  %11095 = vadd.xlane.f32.xlu0 %v11094_v52  ;;  %v11053_v7 = vpop.f32.mrb[109].mxu1 }
0x32a1   :  { %v19699_v58 = vadd.f32 %v11053_v7, %v19259_v10 }
0x32a2   :  { %v11103_v50 = vsel %vm8213_vm5, %v19696_v25, 0.0 }
0x32a3   :  { %v16534_v60 = vpop.f32.mrb[110].mxu1  ;;  %v11100_v53 = vsel %vm8213_vm5, %v19699_v58, 0.0 }
0x32a4   :  { %v19706_v55 = vadd.f32 %v16534_v60, %v19265_v61  ;;  %11104 = vadd.xlane.f32.xlu1 %v11103_v50  ;;  %11101 = vadd.xlane.f32.xlu0 %v11100_v53  ;;  %v11063_v56 = vpop.f32.mrb[111].mxu1  ;;  %v11252_v61 = vld [vmem:[%s19559_s6 + $0x20] sm:$0xff] }
0x32a5   :  { %v19709_v10 = vadd.f32 %v11063_v56, %v19267_v57  ;;  %v11253_v57 = vld [vmem:[%s19559_s6 + $0x28] sm:$0xff] }
0x32a6   :  { %v11109_v62 = vsel %vm8213_vm5, %v19706_v55, 0.0 }
0x32a7   :  { %v11106_v63 = vsel %vm8213_vm5, %v19709_v10, 0.0 }
0x32a8   :  { %11110 = vadd.xlane.f32.xlu1 %v11109_v62  ;;  %11107 = vadd.xlane.f32.xlu0 %v11106_v63  ;;  %v11254_v62 = vld [vmem:[%s19559_s6 + $0x30] sm:$0xff]  ;;  %v12072_v63 = vld [vmem:[%s19787_s14 + $0x8] sm:$0xff] }
0x32b9   :  { %11222 = vperm.xlu1 %17803, %v11196_v0   ;;  %v11255_v0 = vld [vmem:[%s19559_s6 + $0x38] sm:$0xff] }
0x32bd   :  { %11278 = vperm.xlu1 %17803, %v11252_v61   ;;  %v12127_v61 = vld [vmem:[%s19793_s18] sm:$0xff] }
0x32be   :  { %11273 = vperm.xlu0 %17802, %v11251_v3   ;;  %v12071_v3 = vld [vmem:[%s19787_s14] sm:$0xff] }
0x32c1   :  { %11232 = vperm.xlu1 %17803, %v11198_v4   ;;  %v12073_v4 = vld [vmem:[%s19787_s14 + $0x10] sm:$0xff] }
0x32c2   :  { %11227 = vperm.xlu0 %17802, %v11197_v2   ;;  %v12128_v2 = vld [vmem:[%s19793_s18 + $0x8] sm:$0xff] }
0x32c6   :  { %11283 = vperm.xlu0 %17802, %v11253_v57   ;;  %v12129_v57 = vld [vmem:[%s19793_s18 + $0x10] sm:$0xff] }
0x32ca   :  { %11237 = vperm.xlu0 %17802, %v11199_v19   ;;  %v12074_v19 = vld [vmem:[%s19787_s14 + $0x18] sm:$0xff] }
0x3328   :  { %v11093_v17 = vpop.xlane.xlu0 %11092 }
0x3329   :  { %v11113_v16 = vmul.f32 0.125, %v11093_v17  ;;  %v11090_v11 = vpop.xlane.xlu1 %11089 }
0x332a   :  { %v11112_v6 = vmul.f32 0.125, %v11090_v11 }
0x332b   :  { %v19737_v20 = vsub.f32 %v19676_v39, %v11113_v16 }
0x332c   :  { %v19740_v23 = vsub.f32 %v19679_v34, %v11112_v6 }
0x332d   :  { %v11099_v32 = vpop.xlane.xlu1 %11098  ;;  %v11096_v29 = vpop.xlane.xlu0 %11095  ;;  %v11129_v40 = vmul.f32 %v19737_v20, %v19737_v20 }
0x332e   :  { %v11115_v54 = vmul.f32 0.125, %v11099_v32  ;;  %v11114_v41 = vmul.f32 0.125, %v11096_v29  ;;  %v11128_v38 = vmul.f32 %v19740_v23, %v19740_v23 }
0x332f   :  { %v11139_v45 = vsel %vm8213_vm5, %v11129_v40, 0.0 }
0x3330   :  { %v19748_v12 = vsub.f32 %v19686_v27, %v11115_v54  ;;  %v19751_v21 = vsub.f32 %v19689_v14, %v11114_v41  ;;  %11140 = vadd.xlane.f32.xlu1 %v11139_v45  ;;  %v11136_v31 = vsel %vm8213_vm5, %v11128_v38, 0.0 }
0x3331   :  { %v11105_v33 = vpop.xlane.xlu1 %11104  ;;  %11137 = vadd.xlane.f32.xlu0 %v11136_v31  ;;  %v11102_v47 = vpop.xlane.xlu0 %11101 }
0x3332   :  { %v11117_v9 = vmul.f32 0.125, %v11105_v33  ;;  %v11116_v15 = vmul.f32 0.125, %v11102_v47  ;;  %v11131_v22 = vmul.f32 %v19748_v12, %v19748_v12  ;;  %v11130_v26 = vmul.f32 %v19751_v21, %v19751_v21 }
0x3334   :  { %v19759_v36 = vsub.f32 %v19696_v25, %v11117_v9  ;;  %v19762_v24 = vsub.f32 %v19699_v58, %v11116_v15  ;;  %v11145_v37 = vsel %vm8213_vm5, %v11131_v22, 0.0  ;;  %v11142_v49 = vsel %vm8213_vm5, %v11130_v26, 0.0 }
0x3335   :  { %v11111_v46 = vpop.xlane.xlu1 %11110  ;;  %11146 = vadd.xlane.f32.xlu1 %v11145_v37  ;;  %11143 = vadd.xlane.f32.xlu0 %v11142_v49  ;;  %v11108_v18 = vpop.xlane.xlu0 %11107 }
0x3336   :  { %v11119_v42 = vmul.f32 0.125, %v11111_v46  ;;  %v11118_v1 = vmul.f32 0.125, %v11108_v18  ;;  %v11133_v59 = vmul.f32 %v19759_v36, %v19759_v36  ;;  %v11132_v30 = vmul.f32 %v19762_v24, %v19762_v24 }
0x3338   :  { %v19771_v13 = vsub.f32 %v19706_v55, %v11119_v42  ;;  %v19774_v35 = vsub.f32 %v19709_v10, %v11118_v1  ;;  %v11151_v52 = vsel %vm8213_vm5, %v11133_v59, 0.0  ;;  %v11148_v7 = vsel %vm8213_vm5, %v11132_v30, 0.0 }
0x3339   :  { %11152 = vadd.xlane.f32.xlu1 %v11151_v52  ;;  %11149 = vadd.xlane.f32.xlu0 %v11148_v7  ;;  %v19803_v16 = vpop.permute.xlu1 %11222 }
0x333a   :  { %v11135_v50 = vmul.f32 %v19771_v13, %v19771_v13  ;;  %v11134_v60 = vmul.f32 %v19774_v35, %v19774_v35 }
0x333c   :  { %v11157_v53 = vsel %vm8213_vm5, %v11135_v50, 0.0  ;;  %v11154_v56 = vsel %vm8213_vm5, %v11134_v60, 0.0 }
0x333d   :  { %11158 = vadd.xlane.f32.xlu1 %v11157_v53  ;;  %11155 = vadd.xlane.f32.xlu0 %v11154_v56  ;;  %v11274_v17 = vpop.permute.xlu0 %11273  ;;  %v19807_v6 = vpop.permute.xlu1 %11278 }
0x3341   :  { %v19805_v11 = vpop.permute.xlu0 %11227  ;;  %v19811_v29 = vpop.permute.xlu1 %11232 }
0x3345   :  { %v19809_v32 = vpop.permute.xlu0 %11283 }
0x3349   :  { %v19813_v40 = vpop.permute.xlu0 %11237 }
0x334e   :  { %11288 = vperm.xlu1 %17803, %v11254_v62  }
0x3352   :  { %12086 = vperm.xlu1 %17803, %v12072_v63  }
0x3353   :  { %11293 = vperm.xlu0 %17802, %v11255_v0  }
0x3356   :  { %12137 = vperm.xlu1 %17803, %v12127_v61  }
0x3357   :  { %12081 = vperm.xlu0 %17802, %v12071_v3  }
0x335a   :  { %12091 = vperm.xlu1 %17803, %v12073_v4  }
0x335b   :  { %12142 = vperm.xlu0 %17802, %v12128_v2  }
0x335e   :  { %12147 = vperm.xlu1 %17803, %v12129_v57  }
0x335f   :  { %12096 = vperm.xlu0 %17802, %v12074_v19  }
0x33bd   :  { %v11141_v54 = vpop.xlane.xlu1 %11140 }
0x33be   :  { %v11161_v41 = vmul.f32 0.125, %v11141_v54  ;;  %v11138_v38 = vpop.xlane.xlu0 %11137 }
0x33bf   :  { %v11160_v45 = vmul.f32 0.125, %v11138_v38 }
0x33c0   :  { %v11169_v31 = vadd.f32 1e-05, %v11161_v41 }
0x33c1   :  { %v11168_v33 = vadd.f32 1e-05, %v11160_v45 }
0x33c2   :  { %17928 = vrsqrt.f32 %v11169_v31  ;;  %v11147_v47 = vpop.xlane.xlu1 %11146  ;;  %v11144_v9 = vpop.xlane.xlu0 %11143 }
0x33c3   :  { %17930 = vrsqrt.f32 %v11168_v33  ;;  %v11163_v15 = vmul.f32 0.125, %v11147_v47  ;;  %v11162_v22 = vmul.f32 0.125, %v11144_v9  ;;  %v17978_v33 = vld [vmem:[%s19089_s3] sm:$0xff] }
0x33c5   :  { %v11171_v26 = vadd.f32 1e-05, %v11163_v15  ;;  %v11170_v37 = vadd.f32 1e-05, %v11162_v22 }
0x33c6   :  { %v11153_v49 = vpop.xlane.xlu1 %11152  ;;  %v11150_v46 = vpop.xlane.xlu0 %11149 }
0x33c7   :  { %17932 = vrsqrt.f32 %v11171_v26  ;;  %v11165_v18 = vmul.f32 0.125, %v11153_v49  ;;  %v11164_v42 = vmul.f32 0.125, %v11150_v46 }
0x33c8   :  { %17934 = vrsqrt.f32 %v11170_v37 }
0x33c9   :  { %v11173_v1 = vadd.f32 1e-05, %v11165_v18  ;;  %v11172_v59 = vadd.f32 1e-05, %v11164_v42  ;;  %v14393_v42 = vld [vmem:[%s19856_s22 + $0x40] sm:$0xff] }
0x33ca   :  { %v11159_v30 = vpop.xlane.xlu1 %11158  ;;  %v11156_v52 = vpop.xlane.xlu0 %11155 }
0x33cb   :  { %17936 = vrsqrt.f32 %v11173_v1  ;;  %v11167_v7 = vmul.f32 0.125, %v11159_v30  ;;  %v11166_v50 = vmul.f32 0.125, %v11156_v52  ;;  %v14394_v1 = vld [vmem:[%s19856_s22 + $0x48] sm:$0xff]  ;;  %v14396_v30 = vld [vmem:[%s19856_s22 + $0x58] sm:$0xff]  ;;  %v14397_v52 = vld [vmem:[%s19856_s22 + $0x60] sm:$0xff] }
0x33cc   :  { %v17929_v60 = vpop.eup %17928  ;;  %17938 = vrsqrt.f32 %v11172_v59  ;;  %v14395_v59 = vld [vmem:[%s19856_s22 + $0x50] sm:$0xff] }
0x33cd   :  { %v17931_v53 = vpop.eup %17930  ;;  %v11185_v56 = vmul.f32 %v17929_v60, %v19737_v20  ;;  %v11175_v62 = vadd.f32 1e-05, %v11167_v7  ;;  %v11174_v63 = vadd.f32 1e-05, %v11166_v50  ;;  %v14398_v7 = vld [vmem:[%s19856_s22 + $0x68] sm:$0xff]  ;;  %v14399_v50 = vld [vmem:[%s19856_s22 + $0x70] sm:$0xff] }
0x33ce   :  { %v11184_v0 = vmul.f32 %v17931_v53, %v19740_v23  ;;  %v14400_v60 = vld [vmem:[%s19856_s22 + $0x78] sm:$0xff]  ;;  %v11441_v53 = vld [vmem:[%s19856_s22] sm:$0xff] }
0x33cf   :  { %v11241_v61 = vmul.f32 %v19722_v43, %v11185_v56  ;;  %17940 = vrsqrt.f32 %v11175_v62 }
0x33d0   :  { %17942 = vrsqrt.f32 %v11174_v63  ;;  %v11240_v3 = vmul.f32 %v19724_v48, %v11184_v0 }
0x33d1   :  { %v17933_v4 = vpop.eup %17932  ;;  %v11297_v2 = vadd.f32 %v19728_v51, %v11241_v61 }
0x33d2   :  { %v17935_v57 = vpop.eup %17934  ;;  %v11296_v19 = vadd.f32 %v19726_v5, %v11240_v3  ;;  %v11187_v54 = vmul.f32 %v17933_v4, %v19748_v12  ;;  %v11294_v37 = vpop.permute.xlu0 %11293 }
0x33d3   :  { %v11305_v41 = vmax.f32 %v11297_v2, 0.0  ;;  %v11186_v20 = vmul.f32 %v17935_v57, %v19751_v21 }
0x33d4   :  { %v11304_v38 = vmax.f32 %v11296_v19, 0.0  ;;  %v11243_v23 = vmul.f32 %v19732_v8, %v11187_v54 }
0x33d5   :  { %v17937_v43 = vpop.eup %17936  ;;  %v11242_v45 = vmul.f32 %v19730_v44, %v11186_v20 }
0x33d6   :  { %v17939_v31 = vpop.eup %17938  ;;  %16537 = vmatprep.mubr.msk.f32.mxu0 %vm8213_vm5, %v11304_v38  ;;  %16607 = vmatprep.mubr.msk.f32.mxu1 %vm8213_vm5, %v11304_v38  ;;  %v17421_v48 = vpack.c.bf16 %v11305_v41, %v11304_v38  ;;  %v11299_v51 = vadd.f32 %v11274_v17, %v11243_v23  ;;  %v11189_v5 = vmul.f32 %v17937_v43, %v19759_v36 }
0x33d7   :  { %16538 = vmatmul.mubr.msk.f32.vlgmr.msra.gmra.mrb[100].mxu0 %vm8213_vm5, %v11305_v41  ;;  %16608 = vmatmul.mubr.msk.f32.vlgmr.msra.gmra.mrb[112].mxu1 %vm8213_vm5, %v11305_v41  ;;  %v11298_v12 = vadd.f32 %v19734_v28, %v11242_v45  ;;  %v11188_v8 = vmul.f32 %v17939_v31, %v19762_v24 }
0x33d8   :  { %17422 = vmatprep.subr.bf16.mxu0 %v17421_v48  ;;  %v11307_v21 = vmax.f32 %v11299_v51, 0.0  ;;  %v11245_v44 = vmul.f32 %v19805_v11, %v11189_v5  ;;  %16648 = vmatpush3.msra.mxu1 %v17978_v33  ;;  %v11443_v33 = vld [vmem:[%s19856_s22 + $0x10] sm:$0xff] }
0x33d9   :  { %v17941_v47 = vpop.eup %17940  ;;  %17424 = vmatpush3.bf16.msra.mxu0 %v17421_v48  ;;  %v11306_v9 = vmax.f32 %v11298_v12, 0.0  ;;  %v11244_v17 = vmul.f32 %v19803_v16, %v11188_v8 }
0x33da   :  { %v17943_v36 = vpop.eup %17942  ;;  %v11191_v15 = vmul.f32 %v17941_v47, %v19771_v13  ;;  %v11301_v22 = vadd.f32 %v19809_v32, %v11245_v44  ;;  %v11442_v44 = vld [vmem:[%s19856_s22 + $0x8] sm:$0xff]  ;;  %v11444_v47 = vld [vmem:[%s19856_s22 + $0x18] sm:$0xff] }
0x33db   :  { %v11190_v28 = vmul.f32 %v17943_v36, %v19774_v35  ;;  %16540 = vmatprep.mubr.msk.f32.mxu0 %vm8213_vm5, %v11306_v9  ;;  %16610 = vmatprep.mubr.msk.f32.mxu1 %vm8213_vm5, %v11306_v9  ;;  %v17425_v24 = vpack.c.bf16 %v11307_v21, %v11306_v9  ;;  %v11300_v11 = vadd.f32 %v19807_v6, %v11244_v17  ;;  %v11289_v35 = vpop.permute.xlu1 %11288  ;;  %v11445_v9 = vld [vmem:[%s19856_s22 + $0x20] sm:$0xff]  ;;  %v11446_v17 = vld [vmem:[%s19856_s22 + $0x28] sm:$0xff]  ;;  %v11447_v36 = vld [vmem:[%s19856_s22 + $0x30] sm:$0xff] }
0x33dc   :  { %v11247_v26 = vmul.f32 %v19813_v40, %v11191_v15  ;;  %16541 = vmatmul.mubr.msk.f32.gmra.mrb[102].mxu0 %vm8213_vm5, %v11307_v21  ;;  %16611 = vmatmul.mubr.msk.f32.gmra.mrb[114].mxu1 %vm8213_vm5, %v11307_v21  ;;  %v11309_v16 = vmax.f32 %v11301_v22, 0.0  ;;  %v11448_v15 = vld [vmem:[%s19856_s22 + $0x38] sm:$0xff]  ;;  %v14425_v22 = vld [vmem:[%s19856_s22 + $0x80] sm:$0xff] }
0x33dd   :  { %v11246_v13 = vmul.f32 %v19811_v29, %v11190_v28  ;;  %17426 = vmatprep.subr.bf16.mxu0 %v17425_v24  ;;  %v11308_v32 = vmax.f32 %v11300_v11, 0.0  ;;  %v14426_v28 = vld [vmem:[%s19856_s22 + $0x88] sm:$0xff]  ;;  %v17979_v11 = vld [vmem:[%s19089_s3 + $0x10] sm:$0xff]  ;;  %s18048_s3 = smov 67  }
0x33de   :  { %v11303_v49 = vadd.f32 %v11294_v37, %v11247_v26  ;;  %17428 = vmatpush3.bf16.msra.mxu0 %v17425_v24  ;;  %v14427_v24 = vld [vmem:[%s19856_s22 + $0x90] sm:$0xff]  ;;  %v14428_v26 = vld [vmem:[%s19856_s22 + $0x98] sm:$0xff]  ;;  %s19987_s25 = sld [smem:[%s20441_s0 + %s18048_s3]]  }
0x33df   :  { %v11302_v46 = vadd.f32 %v11289_v35, %v11246_v13  ;;  %16543 = vmatprep.mubr.msk.f32.mxu0 %vm8213_vm5, %v11308_v32  ;;  %16613 = vmatprep.mubr.msk.f32.mxu1 %vm8213_vm5, %v11308_v32  ;;  %v17429_v6 = vpack.c.bf16 %v11309_v16, %v11308_v32  ;;  %v14430_v13 = vld [vmem:[%s19856_s22 + $0xa8] sm:$0xff]  ;;  %v14431_v37 = vld [vmem:[%s19856_s22 + $0xb0] sm:$0xff]  ;;  %v14432_v32 = vld [vmem:[%s19856_s22 + $0xb8] sm:$0xff] }
0x33e0   :  { %v11311_v40 = vmax.f32 %v11303_v49, 0.0  ;;  %16544 = vmatmul.mubr.msk.f32.gmra.mrb[104].mxu0 %vm8213_vm5, %v11309_v16  ;;  %16614 = vmatmul.mubr.msk.f32.gmra.mrb[116].mxu1 %vm8213_vm5, %v11309_v16  ;;  %v14429_v16 = vld [vmem:[%s19856_s22 + $0xa0] sm:$0xff] }
0x33e1   :  { %v11310_v18 = vmax.f32 %v11302_v46, 0.0  ;;  %17430 = vmatprep.subr.bf16.mxu0 %v17429_v6 }
0x33e2   :  { %17432 = vmatpush3.bf16.msra.mxu0 %v17429_v6 }
0x33e3   :  { %16546 = vmatprep.mubr.msk.f32.mxu0 %vm8213_vm5, %v11310_v18  ;;  %16616 = vmatprep.mubr.msk.f32.mxu1 %vm8213_vm5, %v11310_v18  ;;  %v17433_v29 = vpack.c.bf16 %v11311_v40, %v11310_v18 }
0x33e4   :  { %16547 = vmatmul.mubr.msk.f32.gmra.mrb[106].mxu0 %vm8213_vm5, %v11311_v40  ;;  %16617 = vmatmul.mubr.msk.f32.gmra.mrb[118].mxu1 %vm8213_vm5, %v11311_v40 }
0x33e5   :  { %17434 = vmatprep.subr.bf16.mxu0 %v17433_v29  ;;  %16565 = vmatprep.mubr.msk.f32.mxu0 %vm8586_vm6, %v14393_v42 }
0x33e6   :  { %17436 = vmatpush3.bf16.msra.mxu0 %v17433_v29 }
0x33e9   :  { %16566 = vmatmul.mubr.msk.f32.vlgmr.msra.gmra.mrb[108].mxu0 %vm8586_vm6, %v14394_v1 }
0x33ea   :  { %16568 = vmatprep.mubr.msk.f32.mxu0 %vm8586_vm6, %v14395_v59 }
0x33ed   :  { %16569 = vmatmul.mubr.msk.f32.gmra.mrb[110].mxu0 %vm8586_vm6, %v14396_v30 }
0x33ee   :  { %16571 = vmatprep.mubr.msk.f32.mxu0 %vm8586_vm6, %v14397_v52 }
0x33f1   :  { %16572 = vmatmul.mubr.msk.f32.gmra.mrb[112].mxu0 %vm8586_vm6, %v14398_v7 }
0x33f2   :  { %16574 = vmatprep.mubr.msk.f32.mxu0 %vm8586_vm6, %v14399_v50 }
0x33f5   :  { %16575 = vmatmul.mubr.msk.f32.gmra.mrb[114].mxu0 %vm8586_vm6, %v14400_v60 }
0x33f6   :  { %16593 = vmatprep.mubr.msk.f32.mxu0 %vm8586_vm6, %v11441_v53 }
0x34aa   :  { %v16539_v56 = vpop.f32.mrb[100].mxu0  ;;  %v16609_v62 = vpop.f32.mrb[112].mxu1 }
0x34ab   :  { %v11402_v63 = vpop.f32.mrb[101].mxu0  ;;  %v11782_v0 = vpop.f32.mrb[113].mxu1 }
0x34ac   :  { %v17437_v61 = vpack.c.bf16 %v16539_v56, %v11402_v63  ;;  %v17453_v3 = vpack.c.bf16 %v16609_v62, %v11782_v0  ;;  %v12075_v56 = vld [vmem:[%s19787_s14 + $0x20] sm:$0xff]  ;;  %v12130_v63 = vld [vmem:[%s19793_s18 + $0x18] sm:$0xff]  ;;  %v12077_v0 = vld [vmem:[%s19787_s14 + $0x30] sm:$0xff] }
0x34ad   :  { %v12131_v62 = vld [vmem:[%s19793_s18 + $0x20] sm:$0xff] }
0x34ae   :  { %17438 = vmatprep.subr.bf16.mxu0 %v17437_v61 }
0x34af   :  { %v16542_v4 = vpop.f32.mrb[102].mxu0  ;;  %v16612_v2 = vpop.f32.mrb[114].mxu1  ;;  %17440 = vmatpush3.bf16.msra.mxu0 %v17437_v61  ;;  %v12076_v61 = vld [vmem:[%s19787_s14 + $0x28] sm:$0xff] }
0x34b0   :  { %v11412_v57 = vpop.f32.mrb[103].mxu0  ;;  %v11792_v19 = vpop.f32.mrb[115].mxu1 }
0x34b1   :  { %v17441_v54 = vpack.c.bf16 %v16542_v4, %v11412_v57  ;;  %v17457_v41 = vpack.c.bf16 %v16612_v2, %v11792_v19  ;;  %v12078_v4 = vld [vmem:[%s19787_s14 + $0x38] sm:$0xff]  ;;  %v19928_v2 = vpop.permute.xlu1 %12086  ;;  %v19930_v57 = vpop.permute.xlu0 %12081 }
0x34b3   :  { %v16545_v20 = vpop.f32.mrb[104].mxu0  ;;  %17442 = vmatprep.subr.bf16.mxu0 %v17441_v54  ;;  %v16615_v38 = vpop.f32.mrb[116].mxu1 }
0x34b4   :  { %v11422_v23 = vpop.f32.mrb[105].mxu0  ;;  %17444 = vmatpush3.bf16.msra.mxu0 %v17441_v54  ;;  %v11802_v43 = vpop.f32.mrb[117].mxu1 }
0x34b5   :  { %v17445_v45 = vpack.c.bf16 %v16545_v20, %v11422_v23  ;;  %v17461_v31 = vpack.c.bf16 %v16615_v38, %v11802_v43  ;;  %v19932_v19 = vpop.permute.xlu1 %12137  ;;  %v19934_v54 = vpop.permute.xlu0 %12142 }
0x34b7   :  { %v16548_v48 = vpop.f32.mrb[106].mxu0  ;;  %17446 = vmatprep.subr.bf16.mxu0 %v17445_v45  ;;  %v16618_v51 = vpop.f32.mrb[118].mxu1 }
0x34b8   :  { %v11432_v5 = vpop.f32.mrb[107].mxu0  ;;  %17448 = vmatpush3.bf16.msra.mxu0 %v17445_v45  ;;  %v11812_v12 = vpop.f32.mrb[119].mxu1 }
0x34b9   :  { %v17449_v8 = vpack.c.bf16 %v16548_v48, %v11432_v5  ;;  %v17465_v21 = vpack.c.bf16 %v16618_v51, %v11812_v12  ;;  %v19938_v20 = vpop.permute.xlu0 %12096 }
0x34bb   :  { %17450 = vmatprep.subr.bf16.mxu0 %v17449_v8 }
0x34bc   :  { %17452 = vmatpush3.bf16.msra.mxu0 %v17449_v8 }
0x34bd   :  { %17454 = vmatprep.subr.bf16.mxu0 %v17453_v3 }
0x34bf   :  { %16594 = vmatmul.mubr.msk.f32.vlgmr.msra.gmra.mrb[108].mxu0 %vm8586_vm6, %v11442_v44 }
0x34c0   :  { %17456 = vmatpush3.bf16.msra.mxu0 %v17453_v3  ;;  %16596 = vmatprep.mubr.msk.f32.mxu0 %vm8586_vm6, %v11443_v33  ;;  %v12132_v3 = vld [vmem:[%s19793_s18 + $0x28] sm:$0xff] }
0x34c1   :  { %17458 = vmatprep.subr.bf16.mxu0 %v17457_v41 }
0x34c3   :  { %16597 = vmatmul.mubr.msk.f32.gmra.mrb[110].mxu0 %vm8586_vm6, %v11444_v47 }
0x34c4   :  { %17460 = vmatpush3.bf16.msra.mxu0 %v17457_v41  ;;  %16599 = vmatprep.mubr.msk.f32.mxu0 %vm8586_vm6, %v11445_v9  ;;  %v19936_v41 = vpop.permute.xlu1 %12091 }
0x34c5   :  { %17462 = vmatprep.subr.bf16.mxu0 %v17461_v31 }
0x34c7   :  { %16600 = vmatmul.mubr.msk.f32.gmra.mrb[112].mxu0 %vm8586_vm6, %v11446_v17 }
0x34c8   :  { %17464 = vmatpush3.bf16.msra.mxu0 %v17461_v31  ;;  %16602 = vmatprep.mubr.msk.f32.mxu0 %vm8586_vm6, %v11447_v36  ;;  %v19940_v38 = vpop.permute.xlu1 %12147 }
0x34c9   :  { %17466 = vmatprep.subr.bf16.mxu0 %v17465_v21 }
0x34cb   :  { %16603 = vmatmul.mubr.msk.f32.gmra.mrb[114].mxu0 %vm8586_vm6, %v11448_v15 }
0x34cc   :  { %17468 = vmatpush3.bf16.msra.mxu0 %v17465_v21  ;;  %16635 = vmatprep.mubr.msk.f32.mxu0 %vm8586_vm6, %v14425_v22 }
0x34cd   :  { %16717 = vmatprep.subr.mxu0 %v17979_v11 }
0x34cf   :  { %16636 = vmatmul.mubr.msk.f32.vlgmr.msra.gmra.mrb[108].mxu0 %vm8586_vm6, %v14426_v28 }
0x34d0   :  { %16638 = vmatprep.mubr.msk.f32.mxu0 %vm8586_vm6, %v14427_v24  ;;  %16718 = vmatpush3.msra.mxu0 %v17979_v11 }
0x34d3   :  { %16639 = vmatmul.mubr.msk.f32.gmra.mrb[110].mxu0 %vm8586_vm6, %v14428_v26 }
0x34d4   :  { %16641 = vmatprep.mubr.msk.f32.mxu0 %vm8586_vm6, %v14429_v16 }
0x34d7   :  { %16642 = vmatmul.mubr.msk.f32.gmra.mrb[112].mxu0 %vm8586_vm6, %v14430_v13 }
0x34d8   :  { %16644 = vmatprep.mubr.msk.f32.mxu0 %vm8586_vm6, %v14431_v37 }
0x34db   :  { %16645 = vmatmul.mubr.msk.f32.gmra.mrb[114].mxu0 %vm8586_vm6, %v14432_v32 }
0x35a2   :  { %v16637_v35 = vpop.f32.mrb[108].mxu0 }
0x35a3   :  { %v11920_v49 = vpop.f32.mrb[109].mxu0  ;;  %v11970_v46 = vsel %vm8213_vm5, %v16637_v35, 0.0 }
0x35a4   :  { %11971 = vadd.xlane.f32.xlu0 %v11970_v46  ;;  %v11967_v6 = vsel %vm8213_vm5, %v11920_v49, 0.0 }
0x35a5   :  { %11968 = vadd.xlane.f32.xlu1 %v11967_v6 }
0x35a6   :  { %v16640_v40 = vpop.f32.mrb[110].mxu0 }
0x35a7   :  { %v11930_v18 = vpop.f32.mrb[111].mxu0  ;;  %v11976_v29 = vsel %vm8213_vm5, %v16640_v40, 0.0 }
0x35a8   :  { %v11973_v42 = vsel %vm8213_vm5, %v11930_v18, 0.0 }
0x35a9   :  { %11977 = vadd.xlane.f32.xlu1 %v11976_v29  ;;  %11974 = vadd.xlane.f32.xlu0 %v11973_v42 }
0x35aa   :  { %v16643_v1 = vpop.f32.mrb[112].mxu0 }
0x35ab   :  { %v11940_v59 = vpop.f32.mrb[113].mxu0  ;;  %v11982_v30 = vsel %vm8213_vm5, %v16643_v1, 0.0 }
0x35ac   :  { %v11979_v52 = vsel %vm8213_vm5, %v11940_v59, 0.0 }
0x35ad   :  { %11983 = vadd.xlane.f32.xlu1 %v11982_v30  ;;  %11980 = vadd.xlane.f32.xlu0 %v11979_v52 }
0x35ae   :  { %v19913_v7 = vpop.f32.mrb[114].mxu0 }
0x35af   :  { %v19915_v50 = vpop.f32.mrb[115].mxu0  ;;  %v11988_v60 = vsel %vm8213_vm5, %v19913_v7, 0.0 }
0x35b0   :  { %v11985_v53 = vsel %vm8213_vm5, %v19915_v50, 0.0 }
0x35b1   :  { %11989 = vadd.xlane.f32.xlu1 %v11988_v60  ;;  %11986 = vadd.xlane.f32.xlu0 %v11985_v53  ;;  %v12959_v53 = vld [vmem:[%s19987_s25 + $0x8] sm:$0xff] }
0x35c2   :  { %12101 = vperm.xlu1 %17803, %v12075_v56   ;;  %v12134_v56 = vld [vmem:[%s19793_s18 + $0x38] sm:$0xff] }
0x35c6   :  { %12157 = vperm.xlu1 %17803, %v12131_v62   ;;  %v13014_v62 = vld [vmem:[%s19993_s29] sm:$0xff] }
0x35c7   :  { %12152 = vperm.xlu0 %17802, %v12130_v63   ;;  %v12958_v63 = vld [vmem:[%s19987_s25] sm:$0xff] }
0x35ca   :  { %12111 = vperm.xlu1 %17803, %v12077_v0   ;;  %v12960_v0 = vld [vmem:[%s19987_s25 + $0x10] sm:$0xff] }
0x35cb   :  { %12106 = vperm.xlu0 %17802, %v12076_v61   ;;  %v13015_v61 = vld [vmem:[%s19993_s29 + $0x8] sm:$0xff] }
0x35cf   :  { %12162 = vperm.xlu0 %17802, %v12132_v3   ;;  %v13016_v3 = vld [vmem:[%s19993_s29 + $0x10] sm:$0xff] }
0x35d3   :  { %12116 = vperm.xlu0 %17802, %v12078_v4   ;;  %v12961_v4 = vld [vmem:[%s19987_s25 + $0x18] sm:$0xff] }
0x3631   :  { %v11972_v23 = vpop.xlane.xlu0 %11971 }
0x3632   :  { %v11992_v43 = vmul.f32 0.125, %v11972_v23  ;;  %v11969_v45 = vpop.xlane.xlu1 %11968 }
0x3633   :  { %v11991_v31 = vmul.f32 0.125, %v11969_v45 }
0x3634   :  { %v19942_v48 = vsub.f32 %v16637_v35, %v11992_v43 }
0x3635   :  { %v19944_v51 = vsub.f32 %v11920_v49, %v11991_v31 }
0x3636   :  { %v11978_v5 = vpop.xlane.xlu1 %11977  ;;  %v11975_v12 = vpop.xlane.xlu0 %11974  ;;  %v12008_v8 = vmul.f32 %v19942_v48, %v19942_v48 }
0x3637   :  { %v11994_v21 = vmul.f32 0.125, %v11978_v5  ;;  %v11993_v44 = vmul.f32 0.125, %v11975_v12  ;;  %v12007_v33 = vmul.f32 %v19944_v51, %v19944_v51 }
0x3638   :  { %v12018_v47 = vsel %vm8213_vm5, %v12008_v8, 0.0 }
0x3639   :  { %v19951_v9 = vsub.f32 %v16640_v40, %v11994_v21  ;;  %v19953_v17 = vsub.f32 %v11930_v18, %v11993_v44  ;;  %12019 = vadd.xlane.f32.xlu1 %v12018_v47  ;;  %v12015_v36 = vsel %vm8213_vm5, %v12007_v33, 0.0 }
0x363a   :  { %v11984_v15 = vpop.xlane.xlu1 %11983  ;;  %12016 = vadd.xlane.f32.xlu0 %v12015_v36  ;;  %v11981_v22 = vpop.xlane.xlu0 %11980 }
0x363b   :  { %v11996_v28 = vmul.f32 0.125, %v11984_v15  ;;  %v11995_v24 = vmul.f32 0.125, %v11981_v22  ;;  %v12010_v11 = vmul.f32 %v19951_v9, %v19951_v9  ;;  %v12009_v26 = vmul.f32 %v19953_v17, %v19953_v17 }
0x363d   :  { %v19960_v16 = vsub.f32 %v16643_v1, %v11996_v28  ;;  %v19962_v13 = vsub.f32 %v11940_v59, %v11995_v24  ;;  %v12024_v37 = vsel %vm8213_vm5, %v12010_v11, 0.0  ;;  %v12021_v32 = vsel %vm8213_vm5, %v12009_v26, 0.0 }
0x363e   :  { %v11990_v35 = vpop.xlane.xlu1 %11989  ;;  %12025 = vadd.xlane.f32.xlu1 %v12024_v37  ;;  %12022 = vadd.xlane.f32.xlu0 %v12021_v32  ;;  %v11987_v49 = vpop.xlane.xlu0 %11986 }
0x363f   :  { %v11998_v46 = vmul.f32 0.125, %v11990_v35  ;;  %v11997_v6 = vmul.f32 0.125, %v11987_v49  ;;  %v12012_v40 = vmul.f32 %v19960_v16, %v19960_v16  ;;  %v12011_v18 = vmul.f32 %v19962_v13, %v19962_v13 }
0x3641   :  { %v19971_v29 = vsub.f32 %v19913_v7, %v11998_v46  ;;  %v19974_v42 = vsub.f32 %v19915_v50, %v11997_v6  ;;  %v12030_v1 = vsel %vm8213_vm5, %v12012_v40, 0.0  ;;  %v12027_v59 = vsel %vm8213_vm5, %v12011_v18, 0.0  ;;  %v12133_v50 = vld [vmem:[%s19793_s18 + $0x30] sm:$0xff] }
0x3642   :  { %12031 = vadd.xlane.f32.xlu1 %v12030_v1  ;;  %12028 = vadd.xlane.f32.xlu0 %v12027_v59  ;;  %v20003_v43 = vpop.permute.xlu1 %12101 }
0x3643   :  { %v12014_v30 = vmul.f32 %v19971_v29, %v19971_v29  ;;  %v12013_v52 = vmul.f32 %v19974_v42, %v19974_v42 }
0x3645   :  { %v12036_v60 = vsel %vm8213_vm5, %v12014_v30, 0.0  ;;  %v12033_v7 = vsel %vm8213_vm5, %v12013_v52, 0.0 }
0x3646   :  { %12037 = vadd.xlane.f32.xlu1 %v12036_v60  ;;  %12034 = vadd.xlane.f32.xlu0 %v12033_v7  ;;  %v12153_v23 = vpop.permute.xlu0 %12152  ;;  %v20007_v31 = vpop.permute.xlu1 %12157 }
0x364a   :  { %v20005_v45 = vpop.permute.xlu0 %12106  ;;  %v20011_v12 = vpop.permute.xlu1 %12111 }
0x364e   :  { %v20009_v5 = vpop.permute.xlu0 %12162 }
0x3652   :  { %v20013_v8 = vpop.permute.xlu0 %12116 }
0x3657   :  { %12167 = vperm.xlu1 %17803, %v12133_v50  }
0x365b   :  { %12973 = vperm.xlu1 %17803, %v12959_v53  }
0x365c   :  { %12172 = vperm.xlu0 %17802, %v12134_v56  }
0x365f   :  { %13024 = vperm.xlu1 %17803, %v13014_v62  }
0x3660   :  { %12968 = vperm.xlu0 %17802, %v12958_v63  }
0x3663   :  { %12978 = vperm.xlu1 %17803, %v12960_v0  }
0x3664   :  { %13029 = vperm.xlu0 %17802, %v13015_v61  }
0x3667   :  { %13034 = vperm.xlu1 %17803, %v13016_v3  }
0x3668   :  { %12983 = vperm.xlu0 %17802, %v12961_v4  }
0x36c6   :  { %v12020_v21 = vpop.xlane.xlu1 %12019 }
0x36c7   :  { %v12040_v44 = vmul.f32 0.125, %v12020_v21  ;;  %v12017_v33 = vpop.xlane.xlu0 %12016 }
0x36c8   :  { %v12039_v47 = vmul.f32 0.125, %v12017_v33 }
0x36c9   :  { %v12048_v36 = vadd.f32 1e-05, %v12040_v44 }
0x36ca   :  { %v12047_v15 = vadd.f32 1e-05, %v12039_v47 }
0x36cb   :  { %17944 = vrsqrt.f32 %v12048_v36  ;;  %v12026_v22 = vpop.xlane.xlu1 %12025  ;;  %v12023_v28 = vpop.xlane.xlu0 %12022 }
0x36cc   :  { %17946 = vrsqrt.f32 %v12047_v15  ;;  %v12042_v24 = vmul.f32 0.125, %v12026_v22  ;;  %v12041_v11 = vmul.f32 0.125, %v12023_v28 }
0x36ce   :  { %v12050_v26 = vadd.f32 1e-05, %v12042_v24  ;;  %v12049_v37 = vadd.f32 1e-05, %v12041_v11 }
0x36cf   :  { %v12032_v32 = vpop.xlane.xlu1 %12031  ;;  %v12029_v35 = vpop.xlane.xlu0 %12028 }
0x36d0   :  { %17948 = vrsqrt.f32 %v12050_v26  ;;  %v12044_v49 = vmul.f32 0.125, %v12032_v32  ;;  %v12043_v46 = vmul.f32 0.125, %v12029_v35 }
0x36d1   :  { %17950 = vrsqrt.f32 %v12049_v37 }
0x36d2   :  { %v12052_v6 = vadd.f32 1e-05, %v12044_v49  ;;  %v12051_v40 = vadd.f32 1e-05, %v12043_v46  ;;  %v14449_v49 = vld [vmem:[%s20055_s4 + $0x40] sm:$0xff]  ;;  %v14450_v46 = vld [vmem:[%s20055_s4 + $0x48] sm:$0xff] }
0x36d3   :  { %v12038_v18 = vpop.xlane.xlu1 %12037  ;;  %v12035_v1 = vpop.xlane.xlu0 %12034 }
0x36d4   :  { %17952 = vrsqrt.f32 %v12052_v6  ;;  %v12046_v59 = vmul.f32 0.125, %v12038_v18  ;;  %v12045_v30 = vmul.f32 0.125, %v12035_v1  ;;  %v14451_v6 = vld [vmem:[%s20055_s4 + $0x50] sm:$0xff]  ;;  %v14453_v18 = vld [vmem:[%s20055_s4 + $0x60] sm:$0xff]  ;;  %v14454_v1 = vld [vmem:[%s20055_s4 + $0x68] sm:$0xff] }
0x36d5   :  { %v17945_v52 = vpop.eup %17944  ;;  %17954 = vrsqrt.f32 %v12051_v40  ;;  %v14452_v40 = vld [vmem:[%s20055_s4 + $0x58] sm:$0xff] }
0x36d6   :  { %v17947_v60 = vpop.eup %17946  ;;  %v12064_v7 = vmul.f32 %v17945_v52, %v19942_v48  ;;  %v12054_v50 = vadd.f32 1e-05, %v12046_v59  ;;  %v12053_v53 = vadd.f32 1e-05, %v12045_v30  ;;  %v14455_v59 = vld [vmem:[%s20055_s4 + $0x70] sm:$0xff]  ;;  %v14456_v30 = vld [vmem:[%s20055_s4 + $0x78] sm:$0xff] }
0x36d7   :  { %v12063_v56 = vmul.f32 %v17947_v60, %v19944_v51  ;;  %v12320_v52 = vld [vmem:[%s20055_s4] sm:$0xff] }
0x36d8   :  { %v12120_v62 = vmul.f32 %v19928_v2, %v12064_v7  ;;  %17956 = vrsqrt.f32 %v12054_v50 }
0x36d9   :  { %17958 = vrsqrt.f32 %v12053_v53  ;;  %v12119_v63 = vmul.f32 %v19930_v57, %v12063_v56 }
0x36da   :  { %v17949_v0 = vpop.eup %17948  ;;  %v12176_v61 = vadd.f32 %v19934_v54, %v12120_v62 }
0x36db   :  { %v17951_v3 = vpop.eup %17950  ;;  %v12175_v4 = vadd.f32 %v19932_v19, %v12119_v63  ;;  %v12066_v21 = vmul.f32 %v17949_v0, %v19951_v9  ;;  %v12173_v26 = vpop.permute.xlu0 %12172 }
0x36dc   :  { %v12184_v44 = vmax.f32 %v12176_v61, 0.0  ;;  %v12065_v48 = vmul.f32 %v17951_v3, %v19953_v17 }
0x36dd   :  { %v12183_v33 = vmax.f32 %v12175_v4, 0.0  ;;  %v12122_v51 = vmul.f32 %v19938_v20, %v12066_v21 }
0x36de   :  { %v17953_v47 = vpop.eup %17952  ;;  %v12121_v2 = vmul.f32 %v19936_v41, %v12065_v48 }
0x36df   :  { %v17955_v36 = vpop.eup %17954  ;;  %16649 = vmatprep.mubr.msk.f32.mxu1 %vm8213_vm5, %v12183_v33  ;;  %16719 = vmatprep.mubr.msk.f32.mxu0 %vm8213_vm5, %v12183_v33  ;;  %v17469_v57 = vpack.c.bf16 %v12184_v44, %v12183_v33  ;;  %v12178_v54 = vadd.f32 %v12153_v23, %v12122_v51  ;;  %v12068_v19 = vmul.f32 %v17953_v47, %v19960_v16 }
0x36e0   :  { %16650 = vmatmul.mubr.msk.f32.vlgmr.msra.gmra.mrb[120].mxu1 %vm8213_vm5, %v12184_v44  ;;  %16720 = vmatmul.mubr.msk.f32.vlgmr.msra.gmra.mrb[116].mxu0 %vm8213_vm5, %v12184_v44  ;;  %v12177_v9 = vadd.f32 %v19940_v38, %v12121_v2  ;;  %v12067_v20 = vmul.f32 %v17955_v36, %v19962_v13 }
0x36e1   :  { %17470 = vmatprep.subr.bf16.mxu1 %v17469_v57  ;;  %v12186_v17 = vmax.f32 %v12178_v54, 0.0  ;;  %v12124_v41 = vmul.f32 %v20005_v45, %v12068_v19 }
0x36e2   :  { %v17957_v15 = vpop.eup %17956  ;;  %17472 = vmatpush3.bf16.msra.mxu1 %v17469_v57  ;;  %v12185_v22 = vmax.f32 %v12177_v9, 0.0  ;;  %v12123_v28 = vmul.f32 %v20003_v43, %v12067_v20 }
0x36e3   :  { %v17959_v23 = vpop.eup %17958  ;;  %v12070_v16 = vmul.f32 %v17957_v15, %v19971_v29  ;;  %v12180_v24 = vadd.f32 %v20009_v5, %v12124_v41  ;;  %v12322_v41 = vld [vmem:[%s20055_s4 + $0x10] sm:$0xff]  ;;  %v12323_v15 = vld [vmem:[%s20055_s4 + $0x18] sm:$0xff] }
0x36e4   :  { %v12069_v11 = vmul.f32 %v17959_v23, %v19974_v42  ;;  %16652 = vmatprep.mubr.msk.f32.mxu1 %vm8213_vm5, %v12185_v22  ;;  %16722 = vmatprep.mubr.msk.f32.mxu0 %vm8213_vm5, %v12185_v22  ;;  %v17473_v38 = vpack.c.bf16 %v12186_v17, %v12185_v22  ;;  %v12179_v13 = vadd.f32 %v20007_v31, %v12123_v28  ;;  %v12168_v42 = vpop.permute.xlu1 %12167  ;;  %v12324_v22 = vld [vmem:[%s20055_s4 + $0x20] sm:$0xff]  ;;  %v12325_v28 = vld [vmem:[%s20055_s4 + $0x28] sm:$0xff]  ;;  %v12326_v23 = vld [vmem:[%s20055_s4 + $0x30] sm:$0xff] }
0x36e5   :  { %v12126_v45 = vmul.f32 %v20013_v8, %v12070_v16  ;;  %16653 = vmatmul.mubr.msk.f32.gmra.mrb[122].mxu1 %vm8213_vm5, %v12186_v17  ;;  %16723 = vmatmul.mubr.msk.f32.gmra.mrb[118].mxu0 %vm8213_vm5, %v12186_v17  ;;  %v12188_v43 = vmax.f32 %v12180_v24, 0.0  ;;  %v12321_v17 = vld [vmem:[%s20055_s4 + $0x8] sm:$0xff]  ;;  %v12327_v16 = vld [vmem:[%s20055_s4 + $0x38] sm:$0xff]  ;;  %v14481_v24 = vld [vmem:[%s20055_s4 + $0x80] sm:$0xff] }
0x36e6   :  { %v12125_v29 = vmul.f32 %v20011_v12, %v12069_v11  ;;  %17474 = vmatprep.subr.bf16.mxu1 %v17473_v38  ;;  %v12187_v5 = vmax.f32 %v12179_v13, 0.0  ;;  %v14482_v11 = vld [vmem:[%s20055_s4 + $0x88] sm:$0xff]  ;;  %v14484_v13 = vld [vmem:[%s20055_s4 + $0x98] sm:$0xff] }
0x36e7   :  { %v12182_v37 = vadd.f32 %v12173_v26, %v12126_v45  ;;  %17476 = vmatpush3.bf16.msra.mxu1 %v17473_v38  ;;  %v14483_v38 = vld [vmem:[%s20055_s4 + $0x90] sm:$0xff]  ;;  %v14485_v45 = vld [vmem:[%s20055_s4 + $0xa0] sm:$0xff]  ;;  %v14488_v26 = vld [vmem:[%s20055_s4 + $0xb8] sm:$0xff] }
0x36e8   :  { %v12181_v32 = vadd.f32 %v12168_v42, %v12125_v29  ;;  %16655 = vmatprep.mubr.msk.f32.mxu1 %vm8213_vm5, %v12187_v5  ;;  %16725 = vmatprep.mubr.msk.f32.mxu0 %vm8213_vm5, %v12187_v5  ;;  %v17477_v31 = vpack.c.bf16 %v12188_v43, %v12187_v5  ;;  %v14487_v29 = vld [vmem:[%s20055_s4 + $0xb0] sm:$0xff] }
0x36e9   :  { %v12190_v8 = vmax.f32 %v12182_v37, 0.0  ;;  %16656 = vmatmul.mubr.msk.f32.gmra.mrb[124].mxu1 %vm8213_vm5, %v12188_v43  ;;  %16726 = vmatmul.mubr.msk.f32.gmra.mrb[120].mxu0 %vm8213_vm5, %v12188_v43  ;;  %v14486_v43 = vld [vmem:[%s20055_s4 + $0xa8] sm:$0xff] }
0x36ea   :  { %v12189_v35 = vmax.f32 %v12181_v32, 0.0  ;;  %17478 = vmatprep.subr.bf16.mxu1 %v17477_v31 }
0x36eb   :  { %17480 = vmatpush3.bf16.msra.mxu1 %v17477_v31 }
0x36ec   :  { %16658 = vmatprep.mubr.msk.f32.mxu1 %vm8213_vm5, %v12189_v35  ;;  %16728 = vmatprep.mubr.msk.f32.mxu0 %vm8213_vm5, %v12189_v35  ;;  %v17481_v12 = vpack.c.bf16 %v12190_v8, %v12189_v35 }
0x36ed   :  { %16659 = vmatmul.mubr.msk.f32.gmra.mrb[126].mxu1 %vm8213_vm5, %v12190_v8  ;;  %16729 = vmatmul.mubr.msk.f32.gmra.mrb[122].mxu0 %vm8213_vm5, %v12190_v8 }
0x36ee   :  { %17482 = vmatprep.subr.bf16.mxu1 %v17481_v12  ;;  %16677 = vmatprep.mubr.msk.f32.mxu1 %vm8586_vm6, %v14449_v49 }
0x36ef   :  { %17484 = vmatpush3.bf16.msra.mxu1 %v17481_v12 }
0x36f2   :  { %16678 = vmatmul.mubr.msk.f32.vlgmr.msra.gmra.mrb[128].mxu1 %vm8586_vm6, %v14450_v46 }
0x36f3   :  { %16680 = vmatprep.mubr.msk.f32.mxu1 %vm8586_vm6, %v14451_v6 }
0x36f6   :  { %16681 = vmatmul.mubr.msk.f32.gmra.mrb[130].mxu1 %vm8586_vm6, %v14452_v40 }
0x36f7   :  { %16683 = vmatprep.mubr.msk.f32.mxu1 %vm8586_vm6, %v14453_v18 }
0x36fa   :  { %16684 = vmatmul.mubr.msk.f32.gmra.mrb[132].mxu1 %vm8586_vm6, %v14454_v1 }
0x36fb   :  { %16686 = vmatprep.mubr.msk.f32.mxu1 %vm8586_vm6, %v14455_v59 }
0x36fe   :  { %16687 = vmatmul.mubr.msk.f32.gmra.mrb[134].mxu1 %vm8586_vm6, %v14456_v30 }
0x36ff   :  { %16705 = vmatprep.mubr.msk.f32.mxu1 %vm8586_vm6, %v12320_v52 }
0x37b3   :  { %v16651_v60 = vpop.f32.mrb[120].mxu1  ;;  %v16721_v7 = vpop.f32.mrb[116].mxu0 }
0x37b4   :  { %v12281_v50 = vpop.f32.mrb[121].mxu1  ;;  %v12661_v53 = vpop.f32.mrb[117].mxu0 }
0x37b5   :  { %v17485_v56 = vpack.c.bf16 %v16651_v60, %v12281_v50  ;;  %v17501_v62 = vpack.c.bf16 %v16721_v7, %v12661_v53  ;;  %v12962_v7 = vld [vmem:[%s19987_s25 + $0x20] sm:$0xff]  ;;  %v13017_v50 = vld [vmem:[%s19993_s29 + $0x18] sm:$0xff]  ;;  %v12964_v53 = vld [vmem:[%s19987_s25 + $0x30] sm:$0xff] }
0x37b7   :  { %17486 = vmatprep.subr.bf16.mxu1 %v17485_v56 }
0x37b8   :  { %v16654_v63 = vpop.f32.mrb[122].mxu1  ;;  %v16724_v0 = vpop.f32.mrb[118].mxu0  ;;  %17488 = vmatpush3.bf16.msra.mxu1 %v17485_v56  ;;  %v12963_v56 = vld [vmem:[%s19987_s25 + $0x28] sm:$0xff] }
0x37b9   :  { %v12291_v61 = vpop.f32.mrb[123].mxu1  ;;  %v12671_v3 = vpop.f32.mrb[119].mxu0 }
0x37ba   :  { %v17489_v4 = vpack.c.bf16 %v16654_v63, %v12291_v61  ;;  %v17505_v21 = vpack.c.bf16 %v16724_v0, %v12671_v3  ;;  %v20134_v63 = vpop.permute.xlu1 %12973  ;;  %v20136_v0 = vpop.permute.xlu0 %12968 }
0x37bc   :  { %v16657_v44 = vpop.f32.mrb[124].mxu1  ;;  %17490 = vmatprep.subr.bf16.mxu1 %v17489_v4  ;;  %v16727_v48 = vpop.f32.mrb[120].mxu0 }
0x37bd   :  { %v12301_v33 = vpop.f32.mrb[125].mxu1  ;;  %17492 = vmatpush3.bf16.msra.mxu1 %v17489_v4  ;;  %v12681_v51 = vpop.f32.mrb[121].mxu0 }
0x37be   :  { %v17493_v47 = vpack.c.bf16 %v16657_v44, %v12301_v33  ;;  %v17509_v2 = vpack.c.bf16 %v16727_v48, %v12681_v51  ;;  %v20138_v61 = vpop.permute.xlu1 %13024  ;;  %v20140_v3 = vpop.permute.xlu0 %13029 }
0x37c0   :  { %v16660_v36 = vpop.f32.mrb[126].mxu1  ;;  %17494 = vmatprep.subr.bf16.mxu1 %v17493_v47  ;;  %v16730_v57 = vpop.f32.mrb[122].mxu0 }
0x37c1   :  { %v12311_v54 = vpop.f32.mrb[127].mxu1  ;;  %17496 = vmatpush3.bf16.msra.mxu1 %v17493_v47  ;;  %v12691_v19 = vpop.f32.mrb[123].mxu0 }
0x37c2   :  { %v17497_v9 = vpack.c.bf16 %v16660_v36, %v12311_v54  ;;  %v17513_v20 = vpack.c.bf16 %v16730_v57, %v12691_v19  ;;  %v20142_v4 = vpop.permute.xlu1 %12978 }
0x37c4   :  { %17498 = vmatprep.subr.bf16.mxu1 %v17497_v9 }
0x37c5   :  { %17500 = vmatpush3.bf16.msra.mxu1 %v17497_v9 }
0x37c6   :  { %17502 = vmatprep.subr.bf16.mxu1 %v17501_v62  ;;  %v20146_v44 = vpop.permute.xlu1 %13034 }
0x37c8   :  { %16706 = vmatmul.mubr.msk.f32.vlgmr.msra.gmra.mrb[128].mxu1 %vm8586_vm6, %v12321_v17 }
0x37c9   :  { %17504 = vmatpush3.bf16.msra.mxu1 %v17501_v62  ;;  %16708 = vmatprep.mubr.msk.f32.mxu1 %vm8586_vm6, %v12322_v41  ;;  %v12965_v62 = vld [vmem:[%s19987_s25 + $0x38] sm:$0xff] }
0x37ca   :  { %17506 = vmatprep.subr.bf16.mxu1 %v17505_v21 }
0x37cc   :  { %16709 = vmatmul.mubr.msk.f32.gmra.mrb[130].mxu1 %vm8586_vm6, %v12323_v15 }
0x37cd   :  { %17508 = vmatpush3.bf16.msra.mxu1 %v17505_v21  ;;  %16711 = vmatprep.mubr.msk.f32.mxu1 %vm8586_vm6, %v12324_v22  ;;  %v20144_v21 = vpop.permute.xlu0 %12983 }
0x37ce   :  { %17510 = vmatprep.subr.bf16.mxu1 %v17509_v2 }
0x37d0   :  { %16712 = vmatmul.mubr.msk.f32.gmra.mrb[132].mxu1 %vm8586_vm6, %v12325_v28 }
0x37d1   :  { %17512 = vmatpush3.bf16.msra.mxu1 %v17509_v2  ;;  %16714 = vmatprep.mubr.msk.f32.mxu1 %vm8586_vm6, %v12326_v23 }
0x37d2   :  { %17514 = vmatprep.subr.bf16.mxu1 %v17513_v20 }
0x37d4   :  { %16715 = vmatmul.mubr.msk.f32.gmra.mrb[134].mxu1 %vm8586_vm6, %v12327_v16 }
0x37d5   :  { %17516 = vmatpush3.bf16.msra.mxu1 %v17513_v20  ;;  %16747 = vmatprep.mubr.msk.f32.mxu1 %vm8586_vm6, %v14481_v24 }
0x37d8   :  { %16748 = vmatmul.mubr.msk.f32.vlgmr.msra.gmra.mrb[128].mxu1 %vm8586_vm6, %v14482_v11 }
0x37d9   :  { %16750 = vmatprep.mubr.msk.f32.mxu1 %vm8586_vm6, %v14483_v38 }
0x37dc   :  { %16751 = vmatmul.mubr.msk.f32.gmra.mrb[130].mxu1 %vm8586_vm6, %v14484_v13 }
0x37dd   :  { %16753 = vmatprep.mubr.msk.f32.mxu1 %vm8586_vm6, %v14485_v45 }
0x37e0   :  { %16754 = vmatmul.mubr.msk.f32.gmra.mrb[132].mxu1 %vm8586_vm6, %v14486_v43 }
0x37e1   :  { %16756 = vmatprep.mubr.msk.f32.mxu1 %vm8586_vm6, %v14487_v29 }
0x37e4   :  { %16757 = vmatmul.mubr.msk.f32.gmra.mrb[134].mxu1 %vm8586_vm6, %v14488_v26 }
0x38ab   :  { %v16749_v5 = vpop.f32.mrb[128].mxu1 }
0x38ac   :  { %v12847_v42 = vadd.f32 %v16749_v5, %v19676_v39  ;;  %v12799_v37 = vpop.f32.mrb[129].mxu1 }
0x38ad   :  { %v12846_v32 = vadd.f32 %v12799_v37, %v19679_v34 }
0x38ae   :  { %v12857_v31 = vsel %vm8213_vm5, %v12847_v42, 0.0 }
0x38af   :  { %12858 = vadd.xlane.f32.xlu0 %v12857_v31  ;;  %v16752_v8 = vpop.f32.mrb[130].mxu1  ;;  %v12854_v35 = vsel %vm8213_vm5, %v12846_v32, 0.0 }
0x38b0   :  { %v12849_v12 = vadd.f32 %v16752_v8, %v19686_v27  ;;  %12855 = vadd.xlane.f32.xlu1 %v12854_v35  ;;  %v12809_v49 = vpop.f32.mrb[131].mxu1 }
0x38b1   :  { %v12848_v46 = vadd.f32 %v12809_v49, %v19689_v14 }
0x38b2   :  { %v12863_v6 = vsel %vm8213_vm5, %v12849_v12, 0.0 }
0x38b3   :  { %v16755_v40 = vpop.f32.mrb[132].mxu1  ;;  %v12860_v39 = vsel %vm8213_vm5, %v12848_v46, 0.0 }
0x38b4   :  { %v12851_v18 = vadd.f32 %v16755_v40, %v19696_v25  ;;  %12864 = vadd.xlane.f32.xlu1 %v12863_v6  ;;  %12861 = vadd.xlane.f32.xlu0 %v12860_v39  ;;  %v12819_v34 = vpop.f32.mrb[133].mxu1 }
0x38b5   :  { %v12850_v1 = vadd.f32 %v12819_v34, %v19699_v58  ;;  %v13020_v34 = vld [vmem:[%s19993_s29 + $0x30] sm:$0xff] }
0x38b6   :  { %v12869_v27 = vsel %vm8213_vm5, %v12851_v18, 0.0 }
0x38b7   :  { %v16758_v59 = vpop.f32.mrb[134].mxu1  ;;  %v12866_v14 = vsel %vm8213_vm5, %v12850_v1, 0.0 }
0x38b8   :  { %v20118_v30 = vadd.f32 %v16758_v59, %v19706_v55  ;;  %12870 = vadd.xlane.f32.xlu1 %v12869_v27  ;;  %12867 = vadd.xlane.f32.xlu0 %v12866_v14  ;;  %v12829_v25 = vpop.f32.mrb[135].mxu1  ;;  %v13018_v55 = vld [vmem:[%s19993_s29 + $0x20] sm:$0xff]  ;;  %v13021_v27 = vld [vmem:[%s19993_s29 + $0x38] sm:$0xff]  ;;  %v13242_v59 = vld [vmem:[%s20193_s8 + $0x10] sm:$0xff] }
0x38b9   :  { %v20121_v52 = vadd.f32 %v12829_v25, %v19709_v10  ;;  %v13019_v10 = vld [vmem:[%s19993_s29 + $0x28] sm:$0xff]  ;;  %v13244_v25 = vld [vmem:[%s20193_s8 + $0x20] sm:$0xff] }
0x38ba   :  { %v12875_v58 = vsel %vm8213_vm5, %v20118_v30, 0.0  ;;  %v13241_v14 = vld [vmem:[%s20193_s8 + $0x8] sm:$0xff] }
0x38bb   :  { %v12872_v60 = vsel %vm8213_vm5, %v20121_v52, 0.0 }
0x38bc   :  { %12876 = vadd.xlane.f32.xlu1 %v12875_v58  ;;  %12873 = vadd.xlane.f32.xlu0 %v12872_v60  ;;  %v13246_v58 = vld [vmem:[%s20193_s8 + $0x30] sm:$0xff]  ;;  %v13245_v60 = vld [vmem:[%s20193_s8 + $0x28] sm:$0xff] }
0x38cd   :  { %12988 = vperm.xlu1 %17803, %v12962_v7   ;;  %v13248_v7 = vld [vmem:[%s20193_s8 + $0x40] sm:$0xff] }
0x38d1   :  { %13044 = vperm.xlu1 %17803, %v13018_v55   ;;  %v13247_v55 = vld [vmem:[%s20193_s8 + $0x38] sm:$0xff] }
0x38d2   :  { %13039 = vperm.xlu0 %17802, %v13017_v50   ;;  %v13250_v50 = vld [vmem:[%s20193_s8 + $0x50] sm:$0xff] }
0x38d5   :  { %12998 = vperm.xlu1 %17803, %v12964_v53   ;;  %v13249_v53 = vld [vmem:[%s20193_s8 + $0x48] sm:$0xff] }
0x38d6   :  { %12993 = vperm.xlu0 %17802, %v12963_v56   ;;  %v13252_v56 = vld [vmem:[%s20193_s8 + $0x60] sm:$0xff] }
0x38da   :  { %13049 = vperm.xlu0 %17802, %v13019_v10   ;;  %v13251_v10 = vld [vmem:[%s20193_s8 + $0x58] sm:$0xff] }
0x38de   :  { %13003 = vperm.xlu0 %17802, %v12965_v62   ;;  %v13254_v62 = vld [vmem:[%s20193_s8 + $0x70] sm:$0xff] }
0x393c   :  { %v12859_v48 = vpop.xlane.xlu0 %12858 }
0x393d   :  { %v12879_v33 = vmul.f32 0.125, %v12859_v48  ;;  %v12856_v51 = vpop.xlane.xlu1 %12855  ;;  %v13253_v48 = vld [vmem:[%s20193_s8 + $0x68] sm:$0xff] }
0x393e   :  { %v12878_v47 = vmul.f32 0.125, %v12856_v51  ;;  %v13255_v51 = vld [vmem:[%s20193_s8 + $0x78] sm:$0xff] }
0x393f   :  { %v20148_v2 = vsub.f32 %v12847_v42, %v12879_v33  ;;  %v13256_v33 = vld [vmem:[%s20193_s8 + $0x80] sm:$0xff] }
0x3940   :  { %v20150_v36 = vsub.f32 %v12846_v32, %v12878_v47  ;;  %v13258_v47 = vld [vmem:[%s20193_s8 + $0x90] sm:$0xff] }
0x3941   :  { %v12865_v57 = vpop.xlane.xlu1 %12864  ;;  %v12862_v54 = vpop.xlane.xlu0 %12861  ;;  %v12895_v19 = vmul.f32 %v20148_v2, %v20148_v2 }
0x3942   :  { %v12881_v9 = vmul.f32 0.125, %v12865_v57  ;;  %v12880_v20 = vmul.f32 0.125, %v12862_v54  ;;  %v12894_v17 = vmul.f32 %v20150_v36, %v20150_v36  ;;  %v13257_v57 = vld [vmem:[%s20193_s8 + $0x88] sm:$0xff]  ;;  %v13260_v54 = vld [vmem:[%s20193_s8 + $0xa0] sm:$0xff] }
0x3943   :  { %v12905_v41 = vsel %vm8213_vm5, %v12895_v19, 0.0  ;;  %v13259_v19 = vld [vmem:[%s20193_s8 + $0x98] sm:$0xff] }
0x3944   :  { %v20157_v15 = vsub.f32 %v12849_v12, %v12881_v9  ;;  %v20159_v22 = vsub.f32 %v12848_v46, %v12880_v20  ;;  %12906 = vadd.xlane.f32.xlu1 %v12905_v41  ;;  %v12902_v28 = vsel %vm8213_vm5, %v12894_v17, 0.0  ;;  %v13262_v9 = vld [vmem:[%s20193_s8 + $0xb0] sm:$0xff]  ;;  %v13261_v20 = vld [vmem:[%s20193_s8 + $0xa8] sm:$0xff]  ;;  %v13264_v17 = vld [vmem:[%s20193_s8 + $0xc0] sm:$0xff] }
0x3945   :  { %v12871_v23 = vpop.xlane.xlu1 %12870  ;;  %12903 = vadd.xlane.f32.xlu0 %v12902_v28  ;;  %v12868_v16 = vpop.xlane.xlu0 %12867  ;;  %v13263_v41 = vld [vmem:[%s20193_s8 + $0xb8] sm:$0xff]  ;;  %v13266_v28 = vld [vmem:[%s20193_s8 + $0xd0] sm:$0xff] }
0x3946   :  { %v12883_v24 = vmul.f32 0.125, %v12871_v23  ;;  %v12882_v11 = vmul.f32 0.125, %v12868_v16  ;;  %v12897_v38 = vmul.f32 %v20157_v15, %v20157_v15  ;;  %v12896_v13 = vmul.f32 %v20159_v22, %v20159_v22  ;;  %v13265_v23 = vld [vmem:[%s20193_s8 + $0xc8] sm:$0xff]  ;;  %v13268_v16 = vld [vmem:[%s20193_s8 + $0xe0] sm:$0xff] }
0x3948   :  { %v20166_v45 = vsub.f32 %v12851_v18, %v12883_v24  ;;  %v20168_v43 = vsub.f32 %v12850_v1, %v12882_v11  ;;  %v12911_v29 = vsel %vm8213_vm5, %v12897_v38, 0.0  ;;  %v12908_v26 = vsel %vm8213_vm5, %v12896_v13, 0.0  ;;  %v13240_v1 = vld [vmem:[%s20193_s8] sm:$0xff]  ;;  %v13267_v24 = vld [vmem:[%s20193_s8 + $0xd8] sm:$0xff]  ;;  %v13270_v11 = vld [vmem:[%s20193_s8 + $0xf0] sm:$0xff] }
0x3949   :  { %v12877_v5 = vpop.xlane.xlu1 %12876  ;;  %12912 = vadd.xlane.f32.xlu1 %v12911_v29  ;;  %12909 = vadd.xlane.f32.xlu0 %v12908_v26  ;;  %v12874_v42 = vpop.xlane.xlu0 %12873  ;;  %v13269_v38 = vld [vmem:[%s20193_s8 + $0xe8] sm:$0xff]  ;;  %v13271_v13 = vld [vmem:[%s20193_s8 + $0xf8] sm:$0xff] }
0x394a   :  { %v12885_v37 = vmul.f32 0.125, %v12877_v5  ;;  %v12884_v32 = vmul.f32 0.125, %v12874_v42  ;;  %v12899_v31 = vmul.f32 %v20166_v45, %v20166_v45  ;;  %v12898_v8 = vmul.f32 %v20168_v43, %v20168_v43 }
0x394c   :  { %v20177_v35 = vsub.f32 %v20118_v30, %v12885_v37  ;;  %v20180_v12 = vsub.f32 %v20121_v52, %v12884_v32  ;;  %v12917_v49 = vsel %vm8213_vm5, %v12899_v31, 0.0  ;;  %v12914_v46 = vsel %vm8213_vm5, %v12898_v8, 0.0  ;;  %v13078_v30 = vld [vmem:[%s13797_s12] sm:$0xff]  ;;  %v13243_v52 = vld [vmem:[%s20193_s8 + $0x18] sm:$0xff] }
0x394d   :  { %12918 = vadd.xlane.f32.xlu1 %v12917_v49  ;;  %12915 = vadd.xlane.f32.xlu0 %v12914_v46  ;;  %v20232_v26 = vpop.permute.xlu1 %12988 }
0x394e   :  { %v12901_v6 = vmul.f32 %v20177_v35, %v20177_v35  ;;  %v12900_v40 = vmul.f32 %v20180_v12, %v20180_v12  ;;  %16759 = vmatprep.subr.mxu0 %v13078_v30 }
0x394f   :  { %16760 = vmatpush3.msra.mxu0 %v13078_v30 }
0x3950   :  { %v12923_v39 = vsel %vm8213_vm5, %v12901_v6, 0.0  ;;  %v12920_v18 = vsel %vm8213_vm5, %v12900_v40, 0.0 }
0x3951   :  { %12924 = vadd.xlane.f32.xlu1 %v12923_v39  ;;  %12921 = vadd.xlane.f32.xlu0 %v12920_v18  ;;  %v13040_v29 = vpop.permute.xlu0 %13039  ;;  %v20234_v42 = vpop.permute.xlu1 %13044 }
0x3955   :  { %v12994_v5 = vpop.permute.xlu0 %12993  ;;  %v20238_v32 = vpop.permute.xlu1 %12998 }
0x3959   :  { %v20236_v37 = vpop.permute.xlu0 %13049 }
0x395d   :  { %v20240_v31 = vpop.permute.xlu0 %13003 }
0x3962   :  { %13054 = vperm.xlu1 %17803, %v13020_v34  }
0x3966   :  { %13274 = vperm.xlu1 %17803, %v13240_v1  }
0x3967   :  { %13059 = vperm.xlu0 %17802, %v13021_v27  }
0x396a   :  { %13284 = vperm.xlu1 %17803, %v13242_v59  }
0x396b   :  { %13279 = vperm.xlu0 %17802, %v13241_v14  }
0x396e   :  { %13294 = vperm.xlu1 %17803, %v13244_v25  }
0x396f   :  { %13289 = vperm.xlu0 %17802, %v13243_v52  }
0x3972   :  { %13304 = vperm.xlu1 %17803, %v13246_v58  }
0x3973   :  { %13299 = vperm.xlu0 %17802, %v13245_v60  }
0x3976   :  { %13314 = vperm.xlu1 %17803, %v13248_v7  }
0x3977   :  { %13309 = vperm.xlu0 %17802, %v13247_v55  }
0x397a   :  { %13324 = vperm.xlu1 %17803, %v13250_v50  }
0x397b   :  { %13319 = vperm.xlu0 %17802, %v13249_v53  }
0x397e   :  { %13334 = vperm.xlu1 %17803, %v13252_v56  }
0x397f   :  { %13329 = vperm.xlu0 %17802, %v13251_v10  }
0x3982   :  { %13344 = vperm.xlu1 %17803, %v13254_v62  }
0x3983   :  { %13339 = vperm.xlu0 %17802, %v13253_v48  }
0x3986   :  { %13354 = vperm.xlu1 %17803, %v13256_v33  }
0x3987   :  { %13349 = vperm.xlu0 %17802, %v13255_v51  }
0x398a   :  { %13364 = vperm.xlu1 %17803, %v13258_v47  }
0x398b   :  { %13359 = vperm.xlu0 %17802, %v13257_v57  }
0x398e   :  { %13374 = vperm.xlu1 %17803, %v13260_v54  }
0x398f   :  { %13369 = vperm.xlu0 %17802, %v13259_v19  }
0x3992   :  { %13384 = vperm.xlu1 %17803, %v13262_v9  }
0x3993   :  { %13379 = vperm.xlu0 %17802, %v13261_v20  }
0x3996   :  { %13394 = vperm.xlu1 %17803, %v13264_v17  }
0x3997   :  { %13389 = vperm.xlu0 %17802, %v13263_v41  }
0x399a   :  { %13404 = vperm.xlu1 %17803, %v13266_v28  }
0x399b   :  { %13399 = vperm.xlu0 %17802, %v13265_v23  }
0x399e   :  { %13414 = vperm.xlu1 %17803, %v13268_v16  }
0x399f   :  { %13409 = vperm.xlu0 %17802, %v13267_v24  }
0x39a2   :  { %13424 = vperm.xlu1 %17803, %v13270_v11  }
0x39a3   :  { %13419 = vperm.xlu0 %17802, %v13269_v38  }
0x39a7   :  { %13429 = vperm.xlu0 %17802, %v13271_v13  }
0x39d1   :  { %v12907_v8 = vpop.xlane.xlu1 %12906 }
0x39d2   :  { %v12927_v49 = vmul.f32 0.125, %v12907_v8  ;;  %v12904_v46 = vpop.xlane.xlu0 %12903 }
0x39d3   :  { %v12926_v6 = vmul.f32 0.125, %v12904_v46 }
0x39d4   :  { %v12935_v40 = vadd.f32 1e-05, %v12927_v49 }
0x39d5   :  { %v12934_v39 = vadd.f32 1e-05, %v12926_v6 }
0x39d6   :  { %17960 = vrsqrt.f32 %v12935_v40  ;;  %v12913_v18 = vpop.xlane.xlu1 %12912  ;;  %v12910_v34 = vpop.xlane.xlu0 %12909 }
0x39d7   :  { %17962 = vrsqrt.f32 %v12934_v39  ;;  %v12929_v1 = vmul.f32 0.125, %v12913_v18  ;;  %v12928_v27 = vmul.f32 0.125, %v12910_v34 }
0x39d9   :  { %v12937_v59 = vadd.f32 1e-05, %v12929_v1  ;;  %v12936_v14 = vadd.f32 1e-05, %v12928_v27 }
0x39da   :  { %v12919_v30 = vpop.xlane.xlu1 %12918  ;;  %v12916_v25 = vpop.xlane.xlu0 %12915 }
0x39db   :  { %17964 = vrsqrt.f32 %v12937_v59  ;;  %v12931_v52 = vmul.f32 0.125, %v12919_v30  ;;  %v12930_v58 = vmul.f32 0.125, %v12916_v25 }
0x39dc   :  { %17966 = vrsqrt.f32 %v12936_v14 }
0x39dd   :  { %v12939_v60 = vadd.f32 1e-05, %v12931_v52  ;;  %v12938_v7 = vadd.f32 1e-05, %v12930_v58 }
0x39de   :  { %v12925_v55 = vpop.xlane.xlu1 %12924  ;;  %v12922_v50 = vpop.xlane.xlu0 %12921 }
0x39df   :  { %17968 = vrsqrt.f32 %v12939_v60  ;;  %v12933_v53 = vmul.f32 0.125, %v12925_v55  ;;  %v12932_v56 = vmul.f32 0.125, %v12922_v50  ;;  %v13209_v60 = vld [vmem:[%s20273_s16 + $0x8] sm:$0xff]  ;;  %v13210_v55 = vld [vmem:[%s20273_s16 + $0x10] sm:$0xff]  ;;  %v13228_v50 = vld [vmem:[%s20273_s16 + $0xa0] sm:$0xff] }
0x39e0   :  { %v17961_v10 = vpop.eup %17960  ;;  %17970 = vrsqrt.f32 %v12938_v7  ;;  %v13227_v7 = vld [vmem:[%s20273_s16 + $0x98] sm:$0xff] }
0x39e1   :  { %v17963_v62 = vpop.eup %17962  ;;  %v12951_v48 = vmul.f32 %v17961_v10, %v20148_v2  ;;  %v12941_v33 = vadd.f32 1e-05, %v12933_v53  ;;  %v12940_v51 = vadd.f32 1e-05, %v12932_v56  ;;  %v13211_v53 = vld [vmem:[%s20273_s16 + $0x18] sm:$0xff]  ;;  %v13229_v56 = vld [vmem:[%s20273_s16 + $0xa8] sm:$0xff] }
0x39e2   :  { %v12950_v47 = vmul.f32 %v17963_v62, %v20150_v36  ;;  %v13055_v6 = vpop.permute.xlu1 %13054  ;;  %v13212_v10 = vld [vmem:[%s20273_s16 + $0x20] sm:$0xff]  ;;  %v13230_v62 = vld [vmem:[%s20273_s16 + $0xb0] sm:$0xff] }
0x39e3   :  { %v13007_v57 = vmul.f32 %v20134_v63, %v12951_v48  ;;  %17972 = vrsqrt.f32 %v12941_v33  ;;  %v13213_v48 = vld [vmem:[%s20273_s16 + $0x28] sm:$0xff]  ;;  %v13231_v33 = vld [vmem:[%s20273_s16 + $0xb8] sm:$0xff] }
0x39e4   :  { %17974 = vrsqrt.f32 %v12940_v51  ;;  %v13006_v54 = vmul.f32 %v20136_v0, %v12950_v47  ;;  %v13214_v51 = vld [vmem:[%s20273_s16 + $0x30] sm:$0xff]  ;;  %v13232_v47 = vld [vmem:[%s20273_s16 + $0xc0] sm:$0xff] }
0x39e5   :  { %v17965_v19 = vpop.eup %17964  ;;  %v13063_v9 = vadd.f32 %v20140_v3, %v13007_v57  ;;  %v13215_v57 = vld [vmem:[%s20273_s16 + $0x38] sm:$0xff] }
0x39e6   :  { %v17967_v20 = vpop.eup %17966  ;;  %v13062_v17 = vadd.f32 %v20138_v61, %v13006_v54  ;;  %v12953_v41 = vmul.f32 %v17965_v19, %v20157_v15  ;;  %v13060_v46 = vpop.permute.xlu0 %13059  ;;  %v13233_v54 = vld [vmem:[%s20273_s16 + $0xc8] sm:$0xff]  ;;  %v13216_v19 = vld [vmem:[%s20273_s16 + $0x40] sm:$0xff] }
0x39e7   :  { %v12952_v2 = vmul.f32 %v17967_v20, %v20159_v22  ;;  %v13071_v16 = vmax.f32 %v13063_v9, 0.0  ;;  %v13234_v9 = vld [vmem:[%s20273_s16 + $0xd0] sm:$0xff]  ;;  %v13217_v20 = vld [vmem:[%s20273_s16 + $0x48] sm:$0xff] }
0x39e8   :  { %v13070_v28 = vmax.f32 %v13062_v17, 0.0  ;;  %v13009_v23 = vmul.f32 %v20144_v21, %v12953_v41  ;;  %v13235_v17 = vld [vmem:[%s20273_s16 + $0xd8] sm:$0xff]  ;;  %v13218_v41 = vld [vmem:[%s20273_s16 + $0x50] sm:$0xff] }
0x39e9   :  { %v17969_v36 = vpop.eup %17968  ;;  %v13008_v63 = vmul.f32 %v20142_v4, %v12952_v2  ;;  %v13236_v2 = vld [vmem:[%s20273_s16 + $0xe0] sm:$0xff] }
0x39ea   :  { %v17971_v24 = vpop.eup %17970  ;;  %16761 = vmatprep.mubr.msk.f32.mxu0 %vm8213_vm5, %v13070_v28  ;;  %v13065_v0 = vadd.f32 %v13040_v29, %v13009_v23  ;;  %v12955_v3 = vmul.f32 %v17969_v36, %v20166_v45  ;;  %v13219_v28 = vld [vmem:[%s20273_s16 + $0x58] sm:$0xff]  ;;  %v13237_v23 = vld [vmem:[%s20273_s16 + $0xe8] sm:$0xff]  ;;  %v13220_v36 = vld [vmem:[%s20273_s16 + $0x60] sm:$0xff] }
0x39eb   :  { %16762 = vmatmul.mubr.msk.f32.vlgmr.msra.gmra.mrb[124].mxu0 %vm8213_vm5, %v13071_v16  ;;  %v13064_v61 = vadd.f32 %v20146_v44, %v13008_v63  ;;  %v12954_v15 = vmul.f32 %v17971_v24, %v20168_v43  ;;  %v13238_v16 = vld [vmem:[%s20273_s16 + $0xf0] sm:$0xff]  ;;  %v13221_v63 = vld [vmem:[%s20273_s16 + $0x68] sm:$0xff]  ;;  %v13239_v24 = vld [vmem:[%s20273_s16 + $0xf8] sm:$0xff] }
0x39ec   :  { %v13073_v22 = vmax.f32 %v13065_v0, 0.0  ;;  %v13011_v11 = vmul.f32 %v12994_v5, %v12955_v3  ;;  %v13222_v0 = vld [vmem:[%s20273_s16 + $0x70] sm:$0xff]  ;;  %v13223_v3 = vld [vmem:[%s20273_s16 + $0x78] sm:$0xff] }
0x39ed   :  { %v17973_v38 = vpop.eup %17972  ;;  %v13072_v21 = vmax.f32 %v13064_v61, 0.0  ;;  %v13010_v13 = vmul.f32 %v20232_v26, %v12954_v15  ;;  %v13224_v61 = vld [vmem:[%s20273_s16 + $0x80] sm:$0xff]  ;;  %v13225_v15 = vld [vmem:[%s20273_s16 + $0x88] sm:$0xff] }
0x39ee   :  { %v17975_v8 = vpop.eup %17974  ;;  %v12957_v4 = vmul.f32 %v17973_v38, %v20177_v35  ;;  %v13067_v49 = vadd.f32 %v20236_v37, %v13011_v11  ;;  %v13280_v11 = vpop.permute.xlu0 %13279 }
0x39ef   :  { %v12956_v29 = vmul.f32 %v17975_v8, %v20180_v12  ;;  %16764 = vmatprep.mubr.msk.f32.mxu0 %vm8213_vm5, %v13072_v21  ;;  %v13066_v45 = vadd.f32 %v20234_v42, %v13010_v13  ;;  %v13208_v42 = vld [vmem:[%s20273_s16] sm:$0xff] }
0x39f0   :  { %v13013_v44 = vmul.f32 %v20240_v31, %v12957_v4  ;;  %16765 = vmatmul.mubr.msk.f32.gmra.mrb[126].mxu0 %vm8213_vm5, %v13073_v22  ;;  %v13075_v43 = vmax.f32 %v13067_v49, 0.0  ;;  %v13275_v22 = vpop.permute.xlu1 %13274 }
0x39f1   :  { %v13012_v5 = vmul.f32 %v20238_v32, %v12956_v29  ;;  %v13074_v26 = vmax.f32 %v13066_v45, 0.0  ;;  %v13226_v32 = vld [vmem:[%s20273_s16 + $0x90] sm:$0xff] }
0x39f2   :  { %v13069_v40 = vadd.f32 %v13060_v46, %v13013_v44  ;;  %16816 = vmatprep.mubr.msk.f32.mxu1 %vm8586_vm6, %v13226_v32  ;;  %v13290_v21 = vpop.permute.xlu0 %13289 }
0x39f3   :  { %v13068_v35 = vadd.f32 %v13055_v6, %v13012_v5  ;;  %16767 = vmatprep.mubr.msk.f32.mxu0 %vm8213_vm5, %v13074_v26 }
0x39f4   :  { %v13077_v37 = vmax.f32 %v13069_v40, 0.0  ;;  %16768 = vmatmul.mubr.msk.f32.gmra.mrb[128].mxu0 %vm8213_vm5, %v13075_v43  ;;  %v13285_v38 = vpop.permute.xlu1 %13284 }
0x39f5   :  { %v13076_v12 = vmax.f32 %v13068_v35, 0.0 }
0x39f6   :  { %v13300_v8 = vpop.permute.xlu0 %13299 }
0x39f7   :  { %16770 = vmatprep.mubr.msk.f32.mxu0 %vm8213_vm5, %v13076_v12 }
0x39f8   :  { %16771 = vmatmul.mubr.msk.f32.gmra.mrb[130].mxu0 %vm8213_vm5, %v13077_v37  ;;  %v13295_v13 = vpop.permute.xlu1 %13294 }
0x39f9   :  { %16789 = vmatprep.mubr.msk.f32.mxu0 %vm8586_vm6, %v13208_v42 }
0x39fa   :  { %v13310_v49 = vpop.permute.xlu0 %13309 }
0x39fc   :  { %v20339_v4 = vpop.permute.xlu1 %13304 }
0x39fe   :  { %v20343_v45 = vpop.permute.xlu0 %13319 }
0x3a00   :  { %v20341_v29 = vpop.permute.xlu1 %13314 }
0x3a02   :  { %v20347_v43 = vpop.permute.xlu0 %13329 }
0x3a04   :  { %v20345_v44 = vpop.permute.xlu1 %13324 }
0x3a06   :  { %v20351_v46 = vpop.permute.xlu0 %13339 }
0x3a08   :  { %v20349_v5 = vpop.permute.xlu1 %13334 }
0x3a0a   :  { %v20355_v6 = vpop.permute.xlu0 %13349 }
0x3a0c   :  { %v20353_v26 = vpop.permute.xlu1 %13344 }
0x3a0e   :  { %v20359_v35 = vpop.permute.xlu0 %13359 }
0x3a10   :  { %v20357_v40 = vpop.permute.xlu1 %13354 }
0x3a12   :  { %v13370_v12 = vpop.permute.xlu0 %13369 }
0x3a14   :  { %v13365_v37 = vpop.permute.xlu1 %13364 }
0x3a16   :  { %v13380_v32 = vpop.permute.xlu0 %13379 }
0x3a18   :  { %v13375_v42 = vpop.permute.xlu1 %13374 }
0x3abe   :  { %v16763_v31 = vpop.f32.mrb[124].mxu0 }
0x3abf   :  { %v13169_v39 = vpop.f32.mrb[125].mxu0 }
0x3ac0   :  { %v17517_v18 = vpack.c.bf16 %v16763_v31, %v13169_v39  ;;  %v13385_v31 = vpop.permute.xlu1 %13384  ;;  %v13390_v39 = vpop.permute.xlu0 %13389 }
0x3ac2   :  { %17518 = vmatprep.subr.bf16.mxu0 %v17517_v18  ;;  %17533 = vmatprep.subr.bf16.mxu1 %v17517_v18 }
0x3ac3   :  { %v16766_v34 = vpop.f32.mrb[126].mxu0  ;;  %17520 = vmatpush3.bf16.msra.mxu0 %v17517_v18  ;;  %17537 = vmatpush3.bf16.msra.mxu1 %v17517_v18 }
0x3ac4   :  { %v13179_v1 = vpop.f32.mrb[127].mxu0  ;;  %v13395_v18 = vpop.permute.xlu1 %13394 }
0x3ac5   :  { %v17521_v27 = vpack.c.bf16 %v16766_v34, %v13179_v1  ;;  %v13400_v34 = vpop.permute.xlu0 %13399 }
0x3ac7   :  { %v16769_v59 = vpop.f32.mrb[128].mxu0  ;;  %17522 = vmatprep.subr.bf16.mxu0 %v17521_v27  ;;  %17534 = vmatprep.subr.bf16.mxu1 %v17521_v27 }
0x3ac8   :  { %v13189_v14 = vpop.f32.mrb[129].mxu0  ;;  %17524 = vmatpush3.bf16.msra.mxu0 %v17521_v27  ;;  %17538 = vmatpush3.bf16.msra.mxu1 %v17521_v27 }
0x3ac9   :  { %v17525_v30 = vpack.c.bf16 %v16769_v59, %v13189_v14 }
0x3acb   :  { %v16772_v25 = vpop.f32.mrb[130].mxu0  ;;  %17526 = vmatprep.subr.bf16.mxu0 %v17525_v30  ;;  %17535 = vmatprep.subr.bf16.mxu1 %v17525_v30 }
0x3acc   :  { %v13199_v52 = vpop.f32.mrb[131].mxu0  ;;  %17528 = vmatpush3.bf16.msra.mxu0 %v17525_v30  ;;  %17539 = vmatpush3.bf16.msra.mxu1 %v17525_v30 }
0x3acd   :  { %v17529_v58 = vpack.c.bf16 %v16772_v25, %v13199_v52 }
0x3acf   :  { %17530 = vmatprep.subr.bf16.mxu0 %v17529_v58  ;;  %17536 = vmatprep.subr.bf16.mxu1 %v17529_v58 }
0x3ad0   :  { %17532 = vmatpush3.bf16.msra.mxu0 %v17529_v58  ;;  %17540 = vmatpush3.bf16.msra.mxu1 %v17529_v58 }
0x3ad3   :  { %16790 = vmatmul.mubr.msk.f32.vlgmr.msra.gmra.mrb[132].mxu0 %vm8586_vm6, %v13209_v60  ;;  %16817 = vmatmul.mubr.msk.f32.vlgmr.msra.gmra.mrb[136].mxu1 %vm8586_vm6, %v13227_v7 }
0x3ad4   :  { %16792 = vmatprep.mubr.msk.f32.mxu0 %vm8586_vm6, %v13210_v55  ;;  %16819 = vmatprep.mubr.msk.f32.mxu1 %vm8586_vm6, %v13228_v50 }
0x3ad7   :  { %16793 = vmatmul.mubr.msk.f32.gmra.mrb[134].mxu0 %vm8586_vm6, %v13211_v53  ;;  %16820 = vmatmul.mubr.msk.f32.gmra.mrb[138].mxu1 %vm8586_vm6, %v13229_v56 }
0x3ad8   :  { %16795 = vmatprep.mubr.msk.f32.mxu0 %vm8586_vm6, %v13212_v10  ;;  %16822 = vmatprep.mubr.msk.f32.mxu1 %vm8586_vm6, %v13230_v62 }
0x3adb   :  { %16796 = vmatmul.mubr.msk.f32.gmra.mrb[136].mxu0 %vm8586_vm6, %v13213_v48  ;;  %16823 = vmatmul.mubr.msk.f32.gmra.mrb[140].mxu1 %vm8586_vm6, %v13231_v33  ;;  %v13405_v48 = vpop.permute.xlu1 %13404  ;;  %v13410_v33 = vpop.permute.xlu0 %13409 }
0x3adc   :  { %16798 = vmatprep.mubr.msk.f32.mxu0 %vm8586_vm6, %v13214_v51  ;;  %16825 = vmatprep.mubr.msk.f32.mxu1 %vm8586_vm6, %v13232_v47 }
0x3adf   :  { %16799 = vmatmul.mubr.msk.f32.gmra.mrb[138].mxu0 %vm8586_vm6, %v13215_v57  ;;  %16826 = vmatmul.mubr.msk.f32.gmra.mrb[142].mxu1 %vm8586_vm6, %v13233_v54 }
0x3ae0   :  { %16801 = vmatprep.mubr.msk.f32.mxu0 %vm8586_vm6, %v13216_v19  ;;  %16828 = vmatprep.mubr.msk.f32.mxu1 %vm8586_vm6, %v13234_v9 }
0x3ae3   :  { %16802 = vmatmul.mubr.msk.f32.gmra.mrb[140].mxu0 %vm8586_vm6, %v13217_v20  ;;  %16829 = vmatmul.mubr.msk.f32.gmra.mrb[144].mxu1 %vm8586_vm6, %v13235_v17 }
0x3ae4   :  { %16804 = vmatprep.mubr.msk.f32.mxu0 %vm8586_vm6, %v13218_v41  ;;  %16831 = vmatprep.mubr.msk.f32.mxu1 %vm8586_vm6, %v13236_v2 }
0x3ae7   :  { %16805 = vmatmul.mubr.msk.f32.gmra.mrb[142].mxu0 %vm8586_vm6, %v13219_v28  ;;  %16832 = vmatmul.mubr.msk.f32.gmra.mrb[146].mxu1 %vm8586_vm6, %v13237_v23 }
0x3ae8   :  { %16807 = vmatprep.mubr.msk.f32.mxu0 %vm8586_vm6, %v13220_v36  ;;  %16834 = vmatprep.mubr.msk.f32.mxu1 %vm8586_vm6, %v13238_v16 }
0x3aeb   :  { %16808 = vmatmul.mubr.msk.f32.gmra.mrb[144].mxu0 %vm8586_vm6, %v13221_v63  ;;  %16835 = vmatmul.mubr.msk.f32.gmra.mrb[148].mxu1 %vm8586_vm6, %v13239_v24 }
0x3aec   :  { %16810 = vmatprep.mubr.msk.f32.mxu0 %vm8586_vm6, %v13222_v0  ;;  %v13415_v0 = vpop.permute.xlu1 %13414 }
0x3aef   :  { %16811 = vmatmul.mubr.msk.f32.gmra.mrb[146].mxu0 %vm8586_vm6, %v13223_v3  ;;  %v13420_v3 = vpop.permute.xlu0 %13419 }
0x3af0   :  { %16813 = vmatprep.mubr.msk.f32.mxu0 %vm8586_vm6, %v13224_v61 }
0x3af3   :  { %16814 = vmatmul.mubr.msk.f32.gmra.mrb[148].mxu0 %vm8586_vm6, %v13225_v15 }
0x3ba6   :  { %v16791_v1 = vpop.f32.mrb[132].mxu0  ;;  %v16818_v27 = vpop.f32.mrb[136].mxu1 }
0x3ba7   :  { %v13600_v59 = vadd.f32 %v16791_v1, %v13280_v11  ;;  %v13690_v14 = vadd.f32 %v16818_v27, %v13370_v12  ;;  %v13594_v30 = vpop.f32.mrb[133].mxu0  ;;  %v13684_v25 = vpop.f32.mrb[137].mxu1 }
0x3ba8   :  { %v13595_v52 = vadd.f32 %v13594_v30, %v13275_v22  ;;  %v13685_v58 = vadd.f32 %v13684_v25, %v13365_v37 }
0x3ba9   :  { %13755 = vst.msk [vmem:[%s20364_s20 + $0x8] sm:$0xff] %vm13753_vm7, %v13600_v59  ;;  %13773 = vst.msk [vmem:[%s20364_s20 + $0x98] sm:$0xff] %vm13753_vm7, %v13690_v14 }
0x3baa   :  { %13754 = vst.msk [vmem:[%s20364_s20] sm:$0xff] %vm13753_vm7, %v13595_v52  ;;  %13772 = vst.msk [vmem:[%s20364_s20 + $0x90] sm:$0xff] %vm13753_vm7, %v13685_v58  ;;  %v16794_v60 = vpop.f32.mrb[134].mxu0  ;;  %v16821_v7 = vpop.f32.mrb[138].mxu1 }
0x3bab   :  { %v13610_v55 = vadd.f32 %v16794_v60, %v13290_v21  ;;  %v13700_v50 = vadd.f32 %v16821_v7, %v13380_v32  ;;  %v13604_v53 = vpop.f32.mrb[135].mxu0  ;;  %v13694_v56 = vpop.f32.mrb[139].mxu1 }
0x3bac   :  { %v13605_v10 = vadd.f32 %v13604_v53, %v13285_v38  ;;  %v13695_v62 = vadd.f32 %v13694_v56, %v13375_v42 }
0x3bad   :  { %13757 = vst.msk [vmem:[%s20364_s20 + $0x18] sm:$0xff] %vm13753_vm7, %v13610_v55  ;;  %13775 = vst.msk [vmem:[%s20364_s20 + $0xa8] sm:$0xff] %vm13753_vm7, %v13700_v50 }
0x3bae   :  { %13756 = vst.msk [vmem:[%s20364_s20 + $0x10] sm:$0xff] %vm13753_vm7, %v13605_v10  ;;  %13774 = vst.msk [vmem:[%s20364_s20 + $0xa0] sm:$0xff] %vm13753_vm7, %v13695_v62  ;;  %v16797_v51 = vpop.f32.mrb[136].mxu0  ;;  %v16824_v47 = vpop.f32.mrb[140].mxu1 }
0x3baf   :  { %v13620_v57 = vadd.f32 %v16797_v51, %v13300_v8  ;;  %v13710_v54 = vadd.f32 %v16824_v47, %v13390_v39  ;;  %v13614_v19 = vpop.f32.mrb[137].mxu0  ;;  %v13704_v9 = vpop.f32.mrb[141].mxu1 }
0x3bb0   :  { %v13615_v20 = vadd.f32 %v13614_v19, %v13295_v13  ;;  %v13705_v17 = vadd.f32 %v13704_v9, %v13385_v31  ;;  %v13425_v31 = vpop.permute.xlu1 %13424  ;;  %v13430_v39 = vpop.permute.xlu0 %13429 }
0x3bb1   :  { %13759 = vst.msk [vmem:[%s20364_s20 + $0x28] sm:$0xff] %vm13753_vm7, %v13620_v57  ;;  %13777 = vst.msk [vmem:[%s20364_s20 + $0xb8] sm:$0xff] %vm13753_vm7, %v13710_v54 }
0x3bb2   :  { %13758 = vst.msk [vmem:[%s20364_s20 + $0x20] sm:$0xff] %vm13753_vm7, %v13615_v20  ;;  %13776 = vst.msk [vmem:[%s20364_s20 + $0xb0] sm:$0xff] %vm13753_vm7, %v13705_v17  ;;  %v16800_v41 = vpop.f32.mrb[138].mxu0  ;;  %v16827_v2 = vpop.f32.mrb[142].mxu1 }
0x3bb3   :  { %v13630_v28 = vadd.f32 %v16800_v41, %v13310_v49  ;;  %v13720_v23 = vadd.f32 %v16827_v2, %v13400_v34  ;;  %v13624_v36 = vpop.f32.mrb[139].mxu0  ;;  %v13714_v16 = vpop.f32.mrb[143].mxu1 }
0x3bb4   :  { %v13625_v63 = vadd.f32 %v13624_v36, %v20339_v4  ;;  %v13715_v24 = vadd.f32 %v13714_v16, %v13395_v18 }
0x3bb5   :  { %13761 = vst.msk [vmem:[%s20364_s20 + $0x38] sm:$0xff] %vm13753_vm7, %v13630_v28  ;;  %13779 = vst.msk [vmem:[%s20364_s20 + $0xc8] sm:$0xff] %vm13753_vm7, %v13720_v23 }
0x3bb6   :  { %13760 = vst.msk [vmem:[%s20364_s20 + $0x30] sm:$0xff] %vm13753_vm7, %v13625_v63  ;;  %13778 = vst.msk [vmem:[%s20364_s20 + $0xc0] sm:$0xff] %vm13753_vm7, %v13715_v24  ;;  %v16803_v61 = vpop.f32.mrb[140].mxu0  ;;  %v16830_v15 = vpop.f32.mrb[144].mxu1 }
0x3bb7   :  { %v13640_v22 = vadd.f32 %v16803_v61, %v20343_v45  ;;  %v13730_v11 = vadd.f32 %v16830_v15, %v13410_v33  ;;  %v13634_v38 = vpop.f32.mrb[141].mxu0  ;;  %v13724_v21 = vpop.f32.mrb[145].mxu1 }
0x3bb8   :  { %v13635_v13 = vadd.f32 %v13634_v38, %v20341_v29  ;;  %v13725_v8 = vadd.f32 %v13724_v21, %v13405_v48 }
0x3bb9   :  { %13763 = vst.msk [vmem:[%s20364_s20 + $0x48] sm:$0xff] %vm13753_vm7, %v13640_v22  ;;  %13781 = vst.msk [vmem:[%s20364_s20 + $0xd8] sm:$0xff] %vm13753_vm7, %v13730_v11 }
0x3bba   :  { %13762 = vst.msk [vmem:[%s20364_s20 + $0x40] sm:$0xff] %vm13753_vm7, %v13635_v13  ;;  %13780 = vst.msk [vmem:[%s20364_s20 + $0xd0] sm:$0xff] %vm13753_vm7, %v13725_v8  ;;  %v16806_v4 = vpop.f32.mrb[142].mxu0  ;;  %v16833_v49 = vpop.f32.mrb[146].mxu1 }
0x3bbb   :  { %v13650_v45 = vadd.f32 %v16806_v4, %v20347_v43  ;;  %v13740_v37 = vadd.f32 %v16833_v49, %v13420_v3  ;;  %v13644_v12 = vpop.f32.mrb[143].mxu0  ;;  %v13734_v29 = vpop.f32.mrb[147].mxu1 }
0x3bbc   :  { %v13645_v42 = vadd.f32 %v13644_v12, %v20345_v44  ;;  %v13735_v32 = vadd.f32 %v13734_v29, %v13415_v0 }
0x3bbd   :  { %13765 = vst.msk [vmem:[%s20364_s20 + $0x58] sm:$0xff] %vm13753_vm7, %v13650_v45  ;;  %13783 = vst.msk [vmem:[%s20364_s20 + $0xe8] sm:$0xff] %vm13753_vm7, %v13740_v37 }
0x3bbe   :  { %13764 = vst.msk [vmem:[%s20364_s20 + $0x50] sm:$0xff] %vm13753_vm7, %v13645_v42  ;;  %13782 = vst.msk [vmem:[%s20364_s20 + $0xe0] sm:$0xff] %vm13753_vm7, %v13735_v32  ;;  %v16809_v43 = vpop.f32.mrb[144].mxu0  ;;  %v16836_v18 = vpop.f32.mrb[148].mxu1 }
0x3bbf   :  { %v13660_v44 = vadd.f32 %v16809_v43, %v20351_v46  ;;  %v13750_v34 = vadd.f32 %v16836_v18, %v13430_v39  ;;  %v13654_v1 = vpop.f32.mrb[145].mxu0  ;;  %v13744_v27 = vpop.f32.mrb[149].mxu1 }
0x3bc0   :  { %v13655_v59 = vadd.f32 %v13654_v1, %v20349_v5  ;;  %v13745_v14 = vadd.f32 %v13744_v27, %v13425_v31 }
0x3bc1   :  { %13767 = vst.msk [vmem:[%s20364_s20 + $0x68] sm:$0xff] %vm13753_vm7, %v13660_v44  ;;  %13785 = vst.msk [vmem:[%s20364_s20 + $0xf8] sm:$0xff] %vm13753_vm7, %v13750_v34 }
0x3bc2   :  { %13766 = vst.msk [vmem:[%s20364_s20 + $0x60] sm:$0xff] %vm13753_vm7, %v13655_v59  ;;  %13784 = vst.msk [vmem:[%s20364_s20 + $0xf0] sm:$0xff] %vm13753_vm7, %v13745_v14  ;;  %v16812_v30 = vpop.f32.mrb[146].mxu0 }
0x3bc3   :  { %v13670_v25 = vadd.f32 %v16812_v30, %v20355_v6  ;;  %v13664_v46 = vpop.f32.mrb[147].mxu0 }
0x3bc4   :  { %v13665_v52 = vadd.f32 %v13664_v46, %v20353_v26 }
0x3bc5   :  { %13769 = vst.msk [vmem:[%s20364_s20 + $0x78] sm:$0xff] %vm13753_vm7, %v13670_v25 }
0x3bc6   :  { %13768 = vst.msk [vmem:[%s20364_s20 + $0x70] sm:$0xff] %vm13753_vm7, %v13665_v52  ;;  %v16815_v5 = vpop.f32.mrb[148].mxu0 }
0x3bc7   :  { %v13680_v58 = vadd.f32 %v16815_v5, %v20359_v35  ;;  %v13674_v60 = vpop.f32.mrb[149].mxu0 }
0x3bc8   :  { %v13675_v7 = vadd.f32 %v13674_v60, %v20357_v40 }
0x3bc9   :  { %13771 = vst.msk [vmem:[%s20364_s20 + $0x88] sm:$0xff] %vm13753_vm7, %v13680_v58 }
0x3bca   :  { %13770 = vst.msk [vmem:[%s20364_s20 + $0x80] sm:$0xff] %vm13753_vm7, %v13675_v7 }

</bundles_post_ra>
